<compile_context>
chip_gen: v5e
topology: v5e:2x2
jax: 0.10.0
libtpu: 0.0.40
codegen_flags: <defaults>
</compile_context>

<pallas_src>
import functools

import jax
import jax.numpy as jnp
from jax import lax
from jax.experimental import pallas as pl
from jax.experimental.pallas import tpu as pltpu

NEG_SLOPE = 0.01  # torch.nn.LeakyReLU default negative_slope


def _round_up(x, m):
    return ((x + m - 1) // m) * m


def _convblock_kernel(xw_ref, w0_ref, wr_ref, b_ref, o_ref, act_ref, *,
                      K, num_layers, t_tile, t_true, f_true, f_w, lpad, pad,
                      c0p, cp):
    """Fused num_layers x (KxK 'same' conv + bias + LeakyReLU) on one tile.

    xw_ref : (1, 1, t_tile + 2*L*pad, Fa, c0p)    bf16  haloed input tile
    w0_ref : (K*K*c0p, cp)                        bf16  layer-0 im2col weights
    wr_ref : (max(L-1,1), K*K, cp, cp)            bf16  inner-layer per-tap weights
    b_ref  : (L, cp)                              f32   biases
    o_ref  : (1, 1, t_tile, f_w, cp)              bf16  output tile
    act_ref: (nbuf, t_tile + 2*(L-1)*pad, Fa, cp) bf16  ping-pong activations
    """
    L = num_layers
    t_idx = pl.program_id(1)
    n_t = pl.num_programs(1)

    # Zero the feature-halo columns of every activation buffer written this
    # step ('same' zero padding along features for the inner layers).  The
    # LPAD / RPAD blocks are 8-column aligned -> cheap unmasked stores.
    used_bufs = sorted({i % 2 for i in range(L - 1)})
    for bidx in used_bufs:
        rows = act_ref.shape[1]
        rpad = act_ref.shape[2] - (lpad + f_w)
        act_ref[bidx, :, 0:lpad, :] = jnp.zeros((rows, lpad, cp), act_ref.dtype)
        act_ref[bidx, :, lpad + f_w:, :] = jnp.zeros((rows, rpad, cp), act_ref.dtype)

    for l in range(L):                        # static unroll over layers
        h = (L - 1 - l) * pad                 # time halo still carried after layer l
        r_out = t_tile + 2 * h                # rows produced by layer l
        m = r_out * f_w

        if l == 0:
            # Tiny input-channel count: concatenate the K*K taps along channels
            # -> one matmul with contraction K*K*c0p.
            cols = []
            for dy in range(K):
                for dx in range(K):
                    c0 = lpad - pad + dx
                    p = xw_ref[0, 0, dy:dy + r_out, c0:c0 + f_w, :]
                    cols.append(p.reshape(m, c0p))
            lhs = jnp.concatenate(cols, axis=-1)                  # (m, K*K*c0p)
            acc = jnp.dot(lhs, w0_ref[...],
                          preferred_element_type=jnp.float32)     # (m, cp) f32
        else:
            # Per-tap accumulating matmuls: contraction = cp (>=128) keeps the
            # MXU fed without materialising a huge im2col LHS in VMEM.
            src = (l - 1) % 2
            acc = None
            for dy in range(K):
                for dx in range(K):
                    c0 = lpad - pad + dx
                    p = act_ref[src, dy:dy + r_out, c0:c0 + f_w, :]
                    part = jnp.dot(p.reshape(m, cp),
                                   wr_ref[l - 1, dy * K + dx],
                                   preferred_element_type=jnp.float32)
                    acc = part if acc is None else acc + part

        acc = acc + b_ref[l:l + 1, :]                             # lane-dense bias
        y = jnp.where(acc >= 0, acc, NEG_SLOPE * acc)             # LeakyReLU(0.01)
        y = y.reshape(r_out, f_w, cp)
        # TODO(synk): training-mode dropout mask (module runs Dropout; identity in eval).

        if l == L - 1:
            # Padded rows (>= T), padded feature columns (>= F) and padded
            # channels are sliced off by the wrapper; no masking needed here.
            o_ref[0, 0] = y.astype(o_ref.dtype)
        else:
            dst = l % 2
            if f_w > f_true:
                # Garbage columns beyond the true feature width must be zero
                # before the next layer reads them as 'same' padding.
                col = lax.broadcasted_iota(jnp.int32, (1, f_w, 1), 1)
                y = jnp.where(col < f_true, y, 0.0)

            is_boundary = jnp.logical_or(t_idx == 0, t_idx == n_t - 1)

            @pl.when(is_boundary)
            def _():
                # Halo rows outside the real sequence must be zero ('same'
                # zero padding along time for the next layer).
                g = (lax.broadcasted_iota(jnp.int32, (r_out, 1, 1), 0)
                     + t_idx * t_tile - h)
                ym = jnp.where((g >= 0) & (g < t_true), y, 0.0)
                act_ref[dst, 0:r_out, lpad:lpad + f_w, :] = ym.astype(act_ref.dtype)

            @pl.when(jnp.logical_not(is_boundary))
            def _():
                act_ref[dst, 0:r_out, lpad:lpad + f_w, :] = y.astype(act_ref.dtype)


def _vmem_capacity_bytes():
    try:
        return int(pltpu.get_tpu_info().vmem_capacity_bytes)
    except Exception:
        return 128 * 1024 * 1024   # v5e / v6e default; v7x reports 64 MiB


def conv_block_forward(x, params, *, K=3, t_tile=None):
    """ConvBlock.forward (defaults: no norm, no residual, eval-mode dropout)."""
    assert K % 2 == 1, "only odd kernel sizes ('same' symmetric padding) supported"
    if x.ndim == 3:                 # SpeechBrain Conv2d: (B, T, F) -> (B, T, F, 1)
        x = x[..., None]
    B, T, F, Cin = x.shape
    L = len(params)
    Cout = params[0][0].shape[-1]
    pad = (K - 1) // 2

    c0p = max(8, _round_up(Cin, 8))          # layer-0 input-channel pad (sublane)
    cp = _round_up(Cout, 128)                # lane-dense output-channel pad
    f_w = _round_up(F, 8)                    # per-layer compute width (sublane aligned)
    lpad = max(8, _round_up(pad, 8))         # aligned left feature-halo block
    rpad = max(8, _round_up(pad, 8))         # aligned right feature-halo block
    Fa = lpad + f_w + rpad                   # stored feature width
    nbuf = min(2, L - 1)                     # ping-pong activation buffers needed

    # ---- VMEM budgeting: derive time tile + limit from device VMEM ----------
    vmem_cap = _vmem_capacity_bytes()
    vmem_limit = min(int(vmem_cap * 3 // 4), 100 * 1024 * 1024)

    def vmem_estimate(tt):
        r_in = tt + 2 * L * pad
        r_mx = tt + 2 * (L - 1) * pad
        in_blk = 2 * r_in * Fa * c0p * 2                       # double-buffered bf16
        out_blk = 2 * tt * f_w * cp * 2                        # double-buffered bf16
        w_bytes = ((K * K * c0p * cp + max(L - 1, 1) * K * K * cp * cp) * 2
                   + L * cp * 4)                               # single-buffered
        act = max(nbuf, 0) * r_mx * Fa * cp * 2
        trans = r_mx * f_w * cp * (4 + 2 + 2)                  # f32 acc + patch copies
        return in_blk + out_blk + w_bytes + act + trans

    if t_tile is None:
        budget = max(vmem_limit - (6 << 20), 8 << 20)          # compiler-scratch headroom
        t_tile = 8
        for cand in (512, 384, 256, 192, 128, 96, 64, 48, 32, 16, 8):
            if vmem_estimate(cand) <= budget:
                t_tile = cand
                break
    t_tile = max(1, min(int(t_tile), T))

    nT = -(-T // t_tile)
    Tp = nT * t_tile
    HT = L * pad                             # time halo needed by the fused stack
    r_in0 = t_tile + 2 * HT
    r_max = t_tile + 2 * (L - 1) * pad

    # ---- host-side prep (all per-layer padding happens in-kernel) -----------
    xpad = jnp.pad(x, ((0, 0), (HT, HT + Tp - T), (lpad, Fa - lpad - F),
                       (0, c0p - Cin))).astype(jnp.bfloat16)
    # Overlapping haloed time windows: tile i covers padded rows
    # [i*t_tile, i*t_tile + r_in0).  (For very large inputs this extra HBM pass
    # could be replaced by a manual windowed DMA from a pl.ANY input; the input
    # is the smallest operand here so the simple form is kept.)
    xw = jnp.stack([xpad[:, i * t_tile:i * t_tile + r_in0] for i in range(nT)],
                   axis=1)                                     # (B, nT, r_in0, Fa, c0p)

    w0 = jnp.pad(params[0][0], ((0, 0), (0, 0), (0, c0p - Cin), (0, cp - Cout)))
    w0 = w0.reshape(K * K * c0p, cp).astype(jnp.bfloat16)      # (K*K*c0p, cp)
    if L > 1:
        wr = jnp.stack([
            jnp.pad(w, ((0, 0), (0, 0), (0, cp - Cout), (0, cp - Cout)))
               .reshape(K * K, cp, cp)
            for (w, _) in params[1:]]).astype(jnp.bfloat16)    # (L-1, K*K, cp, cp)
    else:
        wr = jnp.zeros((1, K * K, cp, cp), jnp.bfloat16)       # unused dummy
    bias = jnp.stack([jnp.pad(b, (0, cp - b.shape[0])) for (_, b) in params])
    bias = bias.astype(jnp.float32)                            # (L, cp)

    kern = functools.partial(
        _convblock_kernel, K=K, num_layers=L, t_tile=t_tile, t_true=T,
        f_true=F, f_w=f_w, lpad=lpad, pad=pad, c0p=c0p, cp=cp)

    act_shape = (1, 8, 8, 128) if nbuf == 0 else (nbuf, r_max, Fa, cp)

    def build_call(single_buffer_consts):
        const_kw = ({"pipeline_mode": pl.Buffered(1)} if single_buffer_consts
                    else {})
        return pl.pallas_call(
            kern,
            out_shape=jax.ShapeDtypeStruct((B, nT, t_tile, f_w, cp), jnp.bfloat16),
            grid_spec=pltpu.PrefetchScalarGridSpec(
                num_scalar_prefetch=0,
                grid=(B, nT),
                in_specs=[
                    pl.BlockSpec((1, 1, r_in0, Fa, c0p),
                                 lambda b, t: (b, t, 0, 0, 0)),
                    pl.BlockSpec((K * K * c0p, cp),
                                 lambda b, t: (0, 0), **const_kw),
                    pl.BlockSpec((max(L - 1, 1), K * K, cp, cp),
                                 lambda b, t: (0, 0, 0, 0), **const_kw),
                    pl.BlockSpec((L, cp), lambda b, t: (0, 0), **const_kw),
                ],
                out_specs=pl.BlockSpec((1, 1, t_tile, f_w, cp),
                                       lambda b, t: (b, t, 0, 0, 0)),
                scratch_shapes=[pltpu.VMEM(act_shape, jnp.bfloat16)],
            ),
            compiler_params=pltpu.CompilerParams(
                dimension_semantics=("parallel", "parallel"),
                vmem_limit_bytes=vmem_limit,
            ),
        )

    try:
        out = build_call(True)(xw, w0, wr, bias)
    except Exception:
        # Fallback: default (double-buffered) specs for the constant operands.
        out = build_call(False)(xw, w0, wr, bias)

    # Lane-dense padded output slab -> user layout.
    out = out.reshape(B, nT * t_tile, f_w, cp)[:, :T, :F, :Cout]
    # TODO(synk): residual branch (reduce_conv + norm + dropout) not implemented
    #             (module defaults residual=False, norm=None).
    # TODO(synk): last-layer stride > 1 and dilation > 1 not implemented (defaults 1).
    return out.astype(jnp.float32)


def init_params(key, num_layers, in_channels, out_channels, K):
    """Deterministic PyTorch-style uniform(-1/sqrt(fan_in), +) init. HWIO weights."""
    params = []
    cin = in_channels
    for _ in range(num_layers):
        key, kw, kb = jax.random.split(key, 3)
        fan_in = cin * K * K
        bound = 1.0 / (fan_in ** 0.5)
        w = jax.random.uniform(kw, (K, K, cin, out_channels), jnp.float32, -bound, bound)
        b = jax.random.uniform(kb, (out_channels,), jnp.float32, -bound, bound)
        params.append((w, b))
        cin = out_channels
    return params


def _reference_forward(x, params):
    """Pure-JAX reference mirroring the kernel's bf16 rounding points."""
    if x.ndim == 3:
        x = x[..., None]
    a = x.astype(jnp.bfloat16)
    for (w, b) in params:
        y = lax.conv_general_dilated(
            a.astype(jnp.float32),
            w.astype(jnp.bfloat16).astype(jnp.float32),
            window_strides=(1, 1), padding="SAME",
            dimension_numbers=("NHWC", "HWIO", "NHWC"))
        y = y + b
        y = jnp.where(y >= 0, y, NEG_SLOPE * y)
        a = y.astype(jnp.bfloat16)
    return a.astype(jnp.float32)


if __name__ == "__main__":
    key = jax.random.PRNGKey(0)
    kx, kp = jax.random.split(key)

    # Small shapes consistent with the module (SpeechBrain example is (8, 30, 10)).
    B, T, F = 2, 16, 8
    num_layers, out_channels, K = 2, 16, 3

    x = jax.random.uniform(kx, (B, T, F), dtype=jnp.float32)
    params = init_params(kp, num_layers, in_channels=1,
                         out_channels=out_channels, K=K)

    out = conv_block_forward(x, params, K=K)
    out = jax.block_until_ready(out)
    assert out.shape == (B, T, F, out_channels), out.shape

    ref = _reference_forward(x, params)
    err = float(jnp.max(jnp.abs(out - ref)))
    assert jnp.allclose(out, ref, rtol=1e-2, atol=1e-2), err

    print("KERNEL_OK")
</pallas_src>

<mosaic_0001>
module attributes {stable_mosaic.version = 11 : i64} {
  func.func @_convblock_kernel(%arg0: i32, %arg1: i32, %arg2: memref<1x1x20x24x8xbf16, #tpu.memory_space<vmem>>, %arg3: memref<72x128xbf16, #tpu.memory_space<vmem>>, %arg4: memref<1x9x128x128xbf16, #tpu.memory_space<vmem>>, %arg5: memref<2x128xf32, #tpu.memory_space<vmem>>, %arg6: memref<1x1x16x8x128xbf16, #tpu.memory_space<vmem>>, %arg7: memref<1x18x24x128xbf16, #tpu.memory_space<vmem>>) attributes {dimension_semantics = [#tpu.dimension_semantics<parallel>, #tpu.dimension_semantics<parallel>], iteration_bounds = array<i64: 2, 1>, scalar_prefetch = 0 : i64, scratch_operands = 1 : i64, tpu.core_type = #tpu.core_type<tc>, window_params = [{transform_indices = @transform_0, window_bounds = array<i64: 1, 1, 20, 24, 8>}, {pipeline_mode = #tpu.pipeline_mode<synchronous>, transform_indices = @transform_1, window_bounds = array<i64: 72, 128>}, {pipeline_mode = #tpu.pipeline_mode<synchronous>, transform_indices = @transform_2, window_bounds = array<i64: 1, 9, 128, 128>}, {pipeline_mode = #tpu.pipeline_mode<synchronous>, transform_indices = @transform_3, window_bounds = array<i64: 2, 128>}, {transform_indices = @transform_4, window_bounds = array<i64: 1, 1, 16, 8, 128>}]} {
    %cst = arith.constant 0.000000e+00 : bf16
    %0 = vector.broadcast %cst : bf16 to vector<18x8x128xbf16>
    %c0 = arith.constant 0 : index
    %c0_0 = arith.constant 0 : index
    %c0_1 = arith.constant 0 : index
    %c0_2 = arith.constant 0 : index
    %1 = vector.load %arg7[%c0, %c0_0, %c0_1, %c0_2] : memref<1x18x24x128xbf16, #tpu.memory_space<vmem>>, vector<1x18x8x128xbf16>
    %2 = vector.shape_cast %1 : vector<1x18x8x128xbf16> to vector<18x8x128xbf16>
    %3 = vector.shape_cast %0 : vector<18x8x128xbf16> to vector<1x18x8x128xbf16>
    tpu.vector_store %arg7[%c0, %c0_0, %c0_1, %c0_2], %3 {strides = array<i32>} : memref<1x18x24x128xbf16, #tpu.memory_space<vmem>>, vector<1x18x8x128xbf16>,
    %cst_3 = arith.constant 0.000000e+00 : bf16
    %4 = vector.broadcast %cst_3 : bf16 to vector<18x8x128xbf16>
    %c0_4 = arith.constant 0 : index
    %c0_5 = arith.constant 0 : index
    %c16 = arith.constant 16 : index
    %c0_6 = arith.constant 0 : index
    %5 = vector.load %arg7[%c0_4, %c0_5, %c16, %c0_6] : memref<1x18x24x128xbf16, #tpu.memory_space<vmem>>, vector<1x18x8x128xbf16>
    %6 = vector.shape_cast %5 : vector<1x18x8x128xbf16> to vector<18x8x128xbf16>
    %7 = vector.shape_cast %4 : vector<18x8x128xbf16> to vector<1x18x8x128xbf16>
    tpu.vector_store %arg7[%c0_4, %c0_5, %c16, %c0_6], %7 {strides = array<i32>} : memref<1x18x24x128xbf16, #tpu.memory_space<vmem>>, vector<1x18x8x128xbf16>,
    %c0_7 = arith.constant 0 : index
    %c0_8 = arith.constant 0 : index
    %c0_9 = arith.constant 0 : index
    %c7 = arith.constant 7 : index
    %c0_10 = arith.constant 0 : index
    %8 = vector.load %arg2[%c0_7, %c0_8, %c0_9, %c7, %c0_10] : memref<1x1x20x24x8xbf16, #tpu.memory_space<vmem>>, vector<1x1x18x8x8xbf16>
    %9 = vector.shape_cast %8 : vector<1x1x18x8x8xbf16> to vector<18x8x8xbf16>
    %10 = vector.shape_cast %9 : vector<18x8x8xbf16> to vector<144x8xbf16>
    %c0_11 = arith.constant 0 : index
    %c0_12 = arith.constant 0 : index
    %c0_13 = arith.constant 0 : index
    %c8 = arith.constant 8 : index
    %c0_14 = arith.constant 0 : index
    %11 = vector.load %arg2[%c0_11, %c0_12, %c0_13, %c8, %c0_14] : memref<1x1x20x24x8xbf16, #tpu.memory_space<vmem>>, vector<1x1x18x8x8xbf16>
    %12 = vector.shape_cast %11 : vector<1x1x18x8x8xbf16> to vector<18x8x8xbf16>
    %13 = vector.shape_cast %12 : vector<18x8x8xbf16> to vector<144x8xbf16>
    %c0_15 = arith.constant 0 : index
    %c0_16 = arith.constant 0 : index
    %c0_17 = arith.constant 0 : index
    %c9 = arith.constant 9 : index
    %c0_18 = arith.constant 0 : index
    %14 = vector.load %arg2[%c0_15, %c0_16, %c0_17, %c9, %c0_18] : memref<1x1x20x24x8xbf16, #tpu.memory_space<vmem>>, vector<1x1x18x8x8xbf16>
    %15 = vector.shape_cast %14 : vector<1x1x18x8x8xbf16> to vector<18x8x8xbf16>
    %16 = vector.shape_cast %15 : vector<18x8x8xbf16> to vector<144x8xbf16>
    %c0_19 = arith.constant 0 : index
    %c0_20 = arith.constant 0 : index
    %c1 = arith.constant 1 : index
    %c7_21 = arith.constant 7 : index
    %c0_22 = arith.constant 0 : index
    %17 = vector.load %arg2[%c0_19, %c0_20, %c1, %c7_21, %c0_22] : memref<1x1x20x24x8xbf16, #tpu.memory_space<vmem>>, vector<1x1x18x8x8xbf16>
    %18 = vector.shape_cast %17 : vector<1x1x18x8x8xbf16> to vector<18x8x8xbf16>
    %19 = vector.shape_cast %18 : vector<18x8x8xbf16> to vector<144x8xbf16>
    %c0_23 = arith.constant 0 : index
    %c0_24 = arith.constant 0 : index
    %c1_25 = arith.constant 1 : index
    %c8_26 = arith.constant 8 : index
    %c0_27 = arith.constant 0 : index
    %20 = vector.load %arg2[%c0_23, %c0_24, %c1_25, %c8_26, %c0_27] : memref<1x1x20x24x8xbf16, #tpu.memory_space<vmem>>, vector<1x1x18x8x8xbf16>
    %21 = vector.shape_cast %20 : vector<1x1x18x8x8xbf16> to vector<18x8x8xbf16>
    %22 = vector.shape_cast %21 : vector<18x8x8xbf16> to vector<144x8xbf16>
    %c0_28 = arith.constant 0 : index
    %c0_29 = arith.constant 0 : index
    %c1_30 = arith.constant 1 : index
    %c9_31 = arith.constant 9 : index
    %c0_32 = arith.constant 0 : index
    %23 = vector.load %arg2[%c0_28, %c0_29, %c1_30, %c9_31, %c0_32] : memref<1x1x20x24x8xbf16, #tpu.memory_space<vmem>>, vector<1x1x18x8x8xbf16>
    %24 = vector.shape_cast %23 : vector<1x1x18x8x8xbf16> to vector<18x8x8xbf16>
    %25 = vector.shape_cast %24 : vector<18x8x8xbf16> to vector<144x8xbf16>
    %c0_33 = arith.constant 0 : index
    %c0_34 = arith.constant 0 : index
    %c2 = arith.constant 2 : index
    %c7_35 = arith.constant 7 : index
    %c0_36 = arith.constant 0 : index
    %26 = vector.load %arg2[%c0_33, %c0_34, %c2, %c7_35, %c0_36] : memref<1x1x20x24x8xbf16, #tpu.memory_space<vmem>>, vector<1x1x18x8x8xbf16>
    %27 = vector.shape_cast %26 : vector<1x1x18x8x8xbf16> to vector<18x8x8xbf16>
    %28 = vector.shape_cast %27 : vector<18x8x8xbf16> to vector<144x8xbf16>
    %c0_37 = arith.constant 0 : index
    %c0_38 = arith.constant 0 : index
    %c2_39 = arith.constant 2 : index
    %c8_40 = arith.constant 8 : index
    %c0_41 = arith.constant 0 : index
    %29 = vector.load %arg2[%c0_37, %c0_38, %c2_39, %c8_40, %c0_41] : memref<1x1x20x24x8xbf16, #tpu.memory_space<vmem>>, vector<1x1x18x8x8xbf16>
    %30 = vector.shape_cast %29 : vector<1x1x18x8x8xbf16> to vector<18x8x8xbf16>
    %31 = vector.shape_cast %30 : vector<18x8x8xbf16> to vector<144x8xbf16>
    %c0_42 = arith.constant 0 : index
    %c0_43 = arith.constant 0 : index
    %c2_44 = arith.constant 2 : index
    %c9_45 = arith.constant 9 : index
    %c0_46 = arith.constant 0 : index
    %32 = vector.load %arg2[%c0_42, %c0_43, %c2_44, %c9_45, %c0_46] : memref<1x1x20x24x8xbf16, #tpu.memory_space<vmem>>, vector<1x1x18x8x8xbf16>
    %33 = vector.shape_cast %32 : vector<1x1x18x8x8xbf16> to vector<18x8x8xbf16>
    %34 = vector.shape_cast %33 : vector<18x8x8xbf16> to vector<144x8xbf16>
    %35 = tpu.concatenate %10, %13, %16, %19, %22, %25, %28, %31, %34 in 1 : vector<144x8xbf16>, vector<144x8xbf16>, vector<144x8xbf16>, vector<144x8xbf16>, vector<144x8xbf16>, vector<144x8xbf16>, vector<144x8xbf16>, vector<144x8xbf16>, vector<144x8xbf16> -> vector<144x72xbf16>
    %c0_47 = arith.constant 0 : index
    %c0_48 = arith.constant 0 : index
    %36 = vector.load %arg3[%c0_47, %c0_48] : memref<72x128xbf16, #tpu.memory_space<vmem>>, vector<72x128xbf16>
    %cst_49 = arith.constant dense<0.000000e+00> : vector<144x128xf32>
    %37 = tpu.matmul %35, %36, %cst_49 {dimension_numbers = #tpu.dot_dimension_numbers<[1], [0], [0], [1], [0, 0, 1, 1], [], []>} : vector<144x72xbf16>, vector<72x128xbf16>, vector<144x128xf32> -> vector<144x128xf32>
    %c0_50 = arith.constant 0 : index
    %c0_51 = arith.constant 0 : index
    %38 = vector.load %arg5[%c0_50, %c0_51] : memref<2x128xf32, #tpu.memory_space<vmem>>, vector<1x128xf32>
    %39 = vector.broadcast %38 : vector<1x128xf32> to vector<144x128xf32>
    %40 = arith.addf %37, %39 : vector<144x128xf32>
    %cst_52 = arith.constant 0.000000e+00 : f32
    %41 = vector.broadcast %cst_52 : f32 to vector<144x128xf32>
    %42 = arith.cmpf oge, %40, %41 : vector<144x128xf32>
    %cst_53 = arith.constant 0.00999999977 : f32
    %43 = vector.broadcast %cst_53 : f32 to vector<144x128xf32>
    %44 = arith.mulf %43, %40 : vector<144x128xf32>
    %45 = arith.select %42, %40, %44 : vector<144x128xi1>, vector<144x128xf32>
    %46 = vector.shape_cast %45 : vector<144x128xf32> to vector<18x8x128xf32>
    %c0_i32 = arith.constant 0 : i32
    %47 = arith.cmpi eq, %arg1, %c0_i32 : i32
    %c0_i32_54 = arith.constant 0 : i32
    %48 = arith.cmpi eq, %arg1, %c0_i32_54 : i32
    %49 = arith.ori %47, %48 : i1
    %50 = arith.extui %49 : i1 to i32
    %c0_i32_55 = arith.constant 0 : i32
    %51 = arith.cmpi ne, %50, %c0_i32_55 : i32
    scf.if %51 {
      %130 = tpu.iota {dimensions = array<i32: 0>} : vector<18x1x1xi32>
      %c16_i32 = arith.constant 16 : i32
      %131 = arith.muli %arg1, %c16_i32 : i32
      %132 = vector.broadcast %131 : i32 to vector<18x1x1xi32>
      %133 = arith.addi %130, %132 : vector<18x1x1xi32>
      %c1_i32 = arith.constant 1 : i32
      %134 = vector.broadcast %c1_i32 : i32 to vector<18x1x1xi32>
      %135 = arith.subi %133, %134 : vector<18x1x1xi32>
      %c0_i32_143 = arith.constant 0 : i32
      %136 = vector.broadcast %c0_i32_143 : i32 to vector<18x1x1xi32>
      %137 = arith.cmpi sge, %135, %136 : vector<18x1x1xi32>
      %c16_i32_144 = arith.constant 16 : i32
      %138 = vector.broadcast %c16_i32_144 : i32 to vector<18x1x1xi32>
      %139 = arith.cmpi slt, %135, %138 : vector<18x1x1xi32>
      %140 = arith.andi %137, %139 : vector<18x1x1xi1>
      %cst_145 = arith.constant 0.000000e+00 : f32
      %141 = vector.shape_cast %140 : vector<18x1x1xi1> to vector<18x1x1xi1>
      %142 = vector.broadcast %141 : vector<18x1x1xi1> to vector<18x8x128xi1>
      %143 = vector.broadcast %cst_145 : f32 to vector<18x8x128xf32>
      %144 = arith.select %142, %46, %143 : vector<18x8x128xi1>, vector<18x8x128xf32>
      %145 = arith.truncf %144 : vector<18x8x128xf32> to vector<18x8x128xbf16>
      %c0_146 = arith.constant 0 : index
      %c0_147 = arith.constant 0 : index
      %c8_148 = arith.constant 8 : index
      %c0_149 = arith.constant 0 : index
      %146 = vector.load %arg7[%c0_146, %c0_147, %c8_148, %c0_149] : memref<1x18x24x128xbf16, #tpu.memory_space<vmem>>, vector<1x18x8x128xbf16>
      %147 = vector.shape_cast %146 : vector<1x18x8x128xbf16> to vector<18x8x128xbf16>
      %148 = vector.shape_cast %145 : vector<18x8x128xbf16> to vector<1x18x8x128xbf16>
      tpu.vector_store %arg7[%c0_146, %c0_147, %c8_148, %c0_149], %148 {strides = array<i32>} : memref<1x18x24x128xbf16, #tpu.memory_space<vmem>>, vector<1x18x8x128xbf16>,
    } else {
    }
    %true = arith.constant true
    %52 = arith.xori %49, %true : i1
    %53 = arith.extui %52 : i1 to i32
    %c0_i32_56 = arith.constant 0 : i32
    %54 = arith.cmpi ne, %53, %c0_i32_56 : i32
    scf.if %54 {
      %130 = arith.truncf %46 : vector<18x8x128xf32> to vector<18x8x128xbf16>
      %c0_143 = arith.constant 0 : index
      %c0_144 = arith.constant 0 : index
      %c8_145 = arith.constant 8 : index
      %c0_146 = arith.constant 0 : index
      %131 = vector.load %arg7[%c0_143, %c0_144, %c8_145, %c0_146] : memref<1x18x24x128xbf16, #tpu.memory_space<vmem>>, vector<1x18x8x128xbf16>
      %132 = vector.shape_cast %131 : vector<1x18x8x128xbf16> to vector<18x8x128xbf16>
      %133 = vector.shape_cast %130 : vector<18x8x128xbf16> to vector<1x18x8x128xbf16>
      tpu.vector_store %arg7[%c0_143, %c0_144, %c8_145, %c0_146], %133 {strides = array<i32>} : memref<1x18x24x128xbf16, #tpu.memory_space<vmem>>, vector<1x18x8x128xbf16>,
    } else {
    }
    %c0_57 = arith.constant 0 : index
    %c0_58 = arith.constant 0 : index
    %c7_59 = arith.constant 7 : index
    %c0_60 = arith.constant 0 : index
    %55 = vector.load %arg7[%c0_57, %c0_58, %c7_59, %c0_60] : memref<1x18x24x128xbf16, #tpu.memory_space<vmem>>, vector<1x16x8x128xbf16>
    %56 = vector.shape_cast %55 : vector<1x16x8x128xbf16> to vector<16x8x128xbf16>
    %57 = vector.shape_cast %56 : vector<16x8x128xbf16> to vector<128x128xbf16>
    %c0_61 = arith.constant 0 : index
    %c0_62 = arith.constant 0 : index
    %c0_63 = arith.constant 0 : index
    %c0_64 = arith.constant 0 : index
    %58 = vector.load %arg4[%c0_61, %c0_62, %c0_63, %c0_64] : memref<1x9x128x128xbf16, #tpu.memory_space<vmem>>, vector<1x1x128x128xbf16>
    %59 = vector.shape_cast %58 : vector<1x1x128x128xbf16> to vector<128x128xbf16>
    %cst_65 = arith.constant dense<0.000000e+00> : vector<128x128xf32>
    %60 = tpu.matmul %57, %59, %cst_65 {dimension_numbers = #tpu.dot_dimension_numbers<[1], [0], [0], [1], [0, 0, 1, 1], [], []>} : vector<128x128xbf16>, vector<128x128xbf16>, vector<128x128xf32> -> vector<128x128xf32>
    %c0_66 = arith.constant 0 : index
    %c0_67 = arith.constant 0 : index
    %c8_68 = arith.constant 8 : index
    %c0_69 = arith.constant 0 : index
    %61 = vector.load %arg7[%c0_66, %c0_67, %c8_68, %c0_69] : memref<1x18x24x128xbf16, #tpu.memory_space<vmem>>, vector<1x16x8x128xbf16>
    %62 = vector.shape_cast %61 : vector<1x16x8x128xbf16> to vector<16x8x128xbf16>
    %63 = vector.shape_cast %62 : vector<16x8x128xbf16> to vector<128x128xbf16>
    %c0_70 = arith.constant 0 : index
    %c1_71 = arith.constant 1 : index
    %c0_72 = arith.constant 0 : index
    %c0_73 = arith.constant 0 : index
    %64 = vector.load %arg4[%c0_70, %c1_71, %c0_72, %c0_73] : memref<1x9x128x128xbf16, #tpu.memory_space<vmem>>, vector<1x1x128x128xbf16>
    %65 = vector.shape_cast %64 : vector<1x1x128x128xbf16> to vector<128x128xbf16>
    %cst_74 = arith.constant dense<0.000000e+00> : vector<128x128xf32>
    %66 = tpu.matmul %63, %65, %cst_74 {dimension_numbers = #tpu.dot_dimension_numbers<[1], [0], [0], [1], [0, 0, 1, 1], [], []>} : vector<128x128xbf16>, vector<128x128xbf16>, vector<128x128xf32> -> vector<128x128xf32>
    %67 = arith.addf %60, %66 : vector<128x128xf32>
    %c0_75 = arith.constant 0 : index
    %c0_76 = arith.constant 0 : index
    %c9_77 = arith.constant 9 : index
    %c0_78 = arith.constant 0 : index
    %68 = vector.load %arg7[%c0_75, %c0_76, %c9_77, %c0_78] : memref<1x18x24x128xbf16, #tpu.memory_space<vmem>>, vector<1x16x8x128xbf16>
    %69 = vector.shape_cast %68 : vector<1x16x8x128xbf16> to vector<16x8x128xbf16>
    %70 = vector.shape_cast %69 : vector<16x8x128xbf16> to vector<128x128xbf16>
    %c0_79 = arith.constant 0 : index
    %c2_80 = arith.constant 2 : index
    %c0_81 = arith.constant 0 : index
    %c0_82 = arith.constant 0 : index
    %71 = vector.load %arg4[%c0_79, %c2_80, %c0_81, %c0_82] : memref<1x9x128x128xbf16, #tpu.memory_space<vmem>>, vector<1x1x128x128xbf16>
    %72 = vector.shape_cast %71 : vector<1x1x128x128xbf16> to vector<128x128xbf16>
    %cst_83 = arith.constant dense<0.000000e+00> : vector<128x128xf32>
    %73 = tpu.matmul %70, %72, %cst_83 {dimension_numbers = #tpu.dot_dimension_numbers<[1], [0], [0], [1], [0, 0, 1, 1], [], []>} : vector<128x128xbf16>, vector<128x128xbf16>, vector<128x128xf32> -> vector<128x128xf32>
    %74 = arith.addf %67, %73 : vector<128x128xf32>
    %c0_84 = arith.constant 0 : index
    %c1_85 = arith.constant 1 : index
    %c7_86 = arith.constant 7 : index
    %c0_87 = arith.constant 0 : index
    %75 = vector.load %arg7[%c0_84, %c1_85, %c7_86, %c0_87] : memref<1x18x24x128xbf16, #tpu.memory_space<vmem>>, vector<1x16x8x128xbf16>
    %76 = vector.shape_cast %75 : vector<1x16x8x128xbf16> to vector<16x8x128xbf16>
    %77 = vector.shape_cast %76 : vector<16x8x128xbf16> to vector<128x128xbf16>
    %c0_88 = arith.constant 0 : index
    %c3 = arith.constant 3 : index
    %c0_89 = arith.constant 0 : index
    %c0_90 = arith.constant 0 : index
    %78 = vector.load %arg4[%c0_88, %c3, %c0_89, %c0_90] : memref<1x9x128x128xbf16, #tpu.memory_space<vmem>>, vector<1x1x128x128xbf16>
    %79 = vector.shape_cast %78 : vector<1x1x128x128xbf16> to vector<128x128xbf16>
    %cst_91 = arith.constant dense<0.000000e+00> : vector<128x128xf32>
    %80 = tpu.matmul %77, %79, %cst_91 {dimension_numbers = #tpu.dot_dimension_numbers<[1], [0], [0], [1], [0, 0, 1, 1], [], []>} : vector<128x128xbf16>, vector<128x128xbf16>, vector<128x128xf32> -> vector<128x128xf32>
    %81 = arith.addf %74, %80 : vector<128x128xf32>
    %c0_92 = arith.constant 0 : index
    %c1_93 = arith.constant 1 : index
    %c8_94 = arith.constant 8 : index
    %c0_95 = arith.constant 0 : index
    %82 = vector.load %arg7[%c0_92, %c1_93, %c8_94, %c0_95] : memref<1x18x24x128xbf16, #tpu.memory_space<vmem>>, vector<1x16x8x128xbf16>
    %83 = vector.shape_cast %82 : vector<1x16x8x128xbf16> to vector<16x8x128xbf16>
    %84 = vector.shape_cast %83 : vector<16x8x128xbf16> to vector<128x128xbf16>
    %c0_96 = arith.constant 0 : index
    %c4 = arith.constant 4 : index
    %c0_97 = arith.constant 0 : index
    %c0_98 = arith.constant 0 : index
    %85 = vector.load %arg4[%c0_96, %c4, %c0_97, %c0_98] : memref<1x9x128x128xbf16, #tpu.memory_space<vmem>>, vector<1x1x128x128xbf16>
    %86 = vector.shape_cast %85 : vector<1x1x128x128xbf16> to vector<128x128xbf16>
    %cst_99 = arith.constant dense<0.000000e+00> : vector<128x128xf32>
    %87 = tpu.matmul %84, %86, %cst_99 {dimension_numbers = #tpu.dot_dimension_numbers<[1], [0], [0], [1], [0, 0, 1, 1], [], []>} : vector<128x128xbf16>, vector<128x128xbf16>, vector<128x128xf32> -> vector<128x128xf32>
    %88 = arith.addf %81, %87 : vector<128x128xf32>
    %c0_100 = arith.constant 0 : index
    %c1_101 = arith.constant 1 : index
    %c9_102 = arith.constant 9 : index
    %c0_103 = arith.constant 0 : index
    %89 = vector.load %arg7[%c0_100, %c1_101, %c9_102, %c0_103] : memref<1x18x24x128xbf16, #tpu.memory_space<vmem>>, vector<1x16x8x128xbf16>
    %90 = vector.shape_cast %89 : vector<1x16x8x128xbf16> to vector<16x8x128xbf16>
    %91 = vector.shape_cast %90 : vector<16x8x128xbf16> to vector<128x128xbf16>
    %c0_104 = arith.constant 0 : index
    %c5 = arith.constant 5 : index
    %c0_105 = arith.constant 0 : index
    %c0_106 = arith.constant 0 : index
    %92 = vector.load %arg4[%c0_104, %c5, %c0_105, %c0_106] : memref<1x9x128x128xbf16, #tpu.memory_space<vmem>>, vector<1x1x128x128xbf16>
    %93 = vector.shape_cast %92 : vector<1x1x128x128xbf16> to vector<128x128xbf16>
    %cst_107 = arith.constant dense<0.000000e+00> : vector<128x128xf32>
    %94 = tpu.matmul %91, %93, %cst_107 {dimension_numbers = #tpu.dot_dimension_numbers<[1], [0], [0], [1], [0, 0, 1, 1], [], []>} : vector<128x128xbf16>, vector<128x128xbf16>, vector<128x128xf32> -> vector<128x128xf32>
    %95 = arith.addf %88, %94 : vector<128x128xf32>
    %c0_108 = arith.constant 0 : index
    %c2_109 = arith.constant 2 : index
    %c7_110 = arith.constant 7 : index
    %c0_111 = arith.constant 0 : index
    %96 = vector.load %arg7[%c0_108, %c2_109, %c7_110, %c0_111] : memref<1x18x24x128xbf16, #tpu.memory_space<vmem>>, vector<1x16x8x128xbf16>
    %97 = vector.shape_cast %96 : vector<1x16x8x128xbf16> to vector<16x8x128xbf16>
    %98 = vector.shape_cast %97 : vector<16x8x128xbf16> to vector<128x128xbf16>
    %c0_112 = arith.constant 0 : index
    %c6 = arith.constant 6 : index
    %c0_113 = arith.constant 0 : index
    %c0_114 = arith.constant 0 : index
    %99 = vector.load %arg4[%c0_112, %c6, %c0_113, %c0_114] : memref<1x9x128x128xbf16, #tpu.memory_space<vmem>>, vector<1x1x128x128xbf16>
    %100 = vector.shape_cast %99 : vector<1x1x128x128xbf16> to vector<128x128xbf16>
    %cst_115 = arith.constant dense<0.000000e+00> : vector<128x128xf32>
    %101 = tpu.matmul %98, %100, %cst_115 {dimension_numbers = #tpu.dot_dimension_numbers<[1], [0], [0], [1], [0, 0, 1, 1], [], []>} : vector<128x128xbf16>, vector<128x128xbf16>, vector<128x128xf32> -> vector<128x128xf32>
    %102 = arith.addf %95, %101 : vector<128x128xf32>
    %c0_116 = arith.constant 0 : index
    %c2_117 = arith.constant 2 : index
    %c8_118 = arith.constant 8 : index
    %c0_119 = arith.constant 0 : index
    %103 = vector.load %arg7[%c0_116, %c2_117, %c8_118, %c0_119] : memref<1x18x24x128xbf16, #tpu.memory_space<vmem>>, vector<1x16x8x128xbf16>
    %104 = vector.shape_cast %103 : vector<1x16x8x128xbf16> to vector<16x8x128xbf16>
    %105 = vector.shape_cast %104 : vector<16x8x128xbf16> to vector<128x128xbf16>
    %c0_120 = arith.constant 0 : index
    %c7_121 = arith.constant 7 : index
    %c0_122 = arith.constant 0 : index
    %c0_123 = arith.constant 0 : index
    %106 = vector.load %arg4[%c0_120, %c7_121, %c0_122, %c0_123] : memref<1x9x128x128xbf16, #tpu.memory_space<vmem>>, vector<1x1x128x128xbf16>
    %107 = vector.shape_cast %106 : vector<1x1x128x128xbf16> to vector<128x128xbf16>
    %cst_124 = arith.constant dense<0.000000e+00> : vector<128x128xf32>
    %108 = tpu.matmul %105, %107, %cst_124 {dimension_numbers = #tpu.dot_dimension_numbers<[1], [0], [0], [1], [0, 0, 1, 1], [], []>} : vector<128x128xbf16>, vector<128x128xbf16>, vector<128x128xf32> -> vector<128x128xf32>
    %109 = arith.addf %102, %108 : vector<128x128xf32>
    %c0_125 = arith.constant 0 : index
    %c2_126 = arith.constant 2 : index
    %c9_127 = arith.constant 9 : index
    %c0_128 = arith.constant 0 : index
    %110 = vector.load %arg7[%c0_125, %c2_126, %c9_127, %c0_128] : memref<1x18x24x128xbf16, #tpu.memory_space<vmem>>, vector<1x16x8x128xbf16>
    %111 = vector.shape_cast %110 : vector<1x16x8x128xbf16> to vector<16x8x128xbf16>
    %112 = vector.shape_cast %111 : vector<16x8x128xbf16> to vector<128x128xbf16>
    %c0_129 = arith.constant 0 : index
    %c8_130 = arith.constant 8 : index
    %c0_131 = arith.constant 0 : index
    %c0_132 = arith.constant 0 : index
    %113 = vector.load %arg4[%c0_129, %c8_130, %c0_131, %c0_132] : memref<1x9x128x128xbf16, #tpu.memory_space<vmem>>, vector<1x1x128x128xbf16>
    %114 = vector.shape_cast %113 : vector<1x1x128x128xbf16> to vector<128x128xbf16>
    %cst_133 = arith.constant dense<0.000000e+00> : vector<128x128xf32>
    %115 = tpu.matmul %112, %114, %cst_133 {dimension_numbers = #tpu.dot_dimension_numbers<[1], [0], [0], [1], [0, 0, 1, 1], [], []>} : vector<128x128xbf16>, vector<128x128xbf16>, vector<128x128xf32> -> vector<128x128xf32>
    %116 = arith.addf %109, %115 : vector<128x128xf32>
    %c1_134 = arith.constant 1 : index
    %c0_135 = arith.constant 0 : index
    %117 = vector.load %arg5[%c1_134, %c0_135] : memref<2x128xf32, #tpu.memory_space<vmem>>, vector<1x128xf32>
    %118 = vector.broadcast %117 : vector<1x128xf32> to vector<128x128xf32>
    %119 = arith.addf %116, %118 : vector<128x128xf32>
    %cst_136 = arith.constant 0.000000e+00 : f32
    %120 = vector.broadcast %cst_136 : f32 to vector<128x128xf32>
    %121 = arith.cmpf oge, %119, %120 : vector<128x128xf32>
    %cst_137 = arith.constant 0.00999999977 : f32
    %122 = vector.broadcast %cst_137 : f32 to vector<128x128xf32>
    %123 = arith.mulf %122, %119 : vector<128x128xf32>
    %124 = arith.select %121, %119, %123 : vector<128x128xi1>, vector<128x128xf32>
    %125 = vector.shape_cast %124 : vector<128x128xf32> to vector<16x8x128xf32>
    %126 = arith.truncf %125 : vector<16x8x128xf32> to vector<16x8x128xbf16>
    %c0_138 = arith.constant 0 : index
    %c0_139 = arith.constant 0 : index
    %c0_140 = arith.constant 0 : index
    %c0_141 = arith.constant 0 : index
    %c0_142 = arith.constant 0 : index
    %127 = vector.load %arg6[%c0_138, %c0_139, %c0_140, %c0_141, %c0_142] : memref<1x1x16x8x128xbf16, #tpu.memory_space<vmem>>, vector<1x1x16x8x128xbf16>
    %128 = vector.shape_cast %127 : vector<1x1x16x8x128xbf16> to vector<16x8x128xbf16>
    %129 = vector.shape_cast %126 : vector<16x8x128xbf16> to vector<1x1x16x8x128xbf16>
    tpu.vector_store %arg6[%c0_138, %c0_139, %c0_140, %c0_141, %c0_142], %129 {strides = array<i32>} : memref<1x1x16x8x128xbf16, #tpu.memory_space<vmem>>, vector<1x1x16x8x128xbf16>,
    return
  }
  func.func @transform_0(%arg0: i32, %arg1: i32) -> (i32, i32, i32, i32, i32) {
    %c0_i32 = arith.constant 0 : i32
    %c0_i32_0 = arith.constant 0 : i32
    %c0_i32_1 = arith.constant 0 : i32
    %c0_i32_2 = arith.constant 0 : i32
    return %arg0, %arg1, %c0_i32, %c0_i32_0, %c0_i32_1 : i32, i32, i32, i32, i32
  }
  func.func @transform_1(%arg0: i32, %arg1: i32) -> (i32, i32) {
    %c0_i32 = arith.constant 0 : i32
    %c0_i32_0 = arith.constant 0 : i32
    %c0_i32_1 = arith.constant 0 : i32
    return %c0_i32, %c0_i32_0 : i32, i32
  }
  func.func @transform_2(%arg0: i32, %arg1: i32) -> (i32, i32, i32, i32) {
    %c0_i32 = arith.constant 0 : i32
    %c0_i32_0 = arith.constant 0 : i32
    %c0_i32_1 = arith.constant 0 : i32
    %c0_i32_2 = arith.constant 0 : i32
    %c0_i32_3 = arith.constant 0 : i32
    return %c0_i32, %c0_i32_0, %c0_i32_1, %c0_i32_2 : i32, i32, i32, i32
  }
  func.func @transform_3(%arg0: i32, %arg1: i32) -> (i32, i32) {
    %c0_i32 = arith.constant 0 : i32
    %c0_i32_0 = arith.constant 0 : i32
    %c0_i32_1 = arith.constant 0 : i32
    return %c0_i32, %c0_i32_0 : i32, i32
  }
  func.func @transform_4(%arg0: i32, %arg1: i32) -> (i32, i32, i32, i32, i32) {
    %c0_i32 = arith.constant 0 : i32
    %c0_i32_0 = arith.constant 0 : i32
    %c0_i32_1 = arith.constant 0 : i32
    %c0_i32_2 = arith.constant 0 : i32
    return %arg0, %arg1, %c0_i32, %c0_i32_0, %c0_i32_1 : i32, i32, i32, i32, i32
  }
}

module attributes {stable_mosaic.version = 11 : i64} {
  func.func @_convblock_kernel(%arg0: i32, %arg1: i32, %arg2: memref<1x1x20x24x8xbf16, #tpu.memory_space<vmem>>, %arg3: memref<72x128xbf16, #tpu.memory_space<vmem>>, %arg4: memref<1x9x128x128xbf16, #tpu.memory_space<vmem>>, %arg5: memref<2x128xf32, #tpu.memory_space<vmem>>, %arg6: memref<1x1x16x8x128xbf16, #tpu.memory_space<vmem>>, %arg7: memref<1x18x24x128xbf16, #tpu.memory_space<vmem>>) attributes {dimension_semantics = [#tpu.dimension_semantics<parallel>, #tpu.dimension_semantics<parallel>], iteration_bounds = array<i64: 2, 1>, scalar_prefetch = 0 : i64, scratch_operands = 1 : i64, tpu.core_type = #tpu.core_type<tc>, window_params = [{transform_indices = @transform_0, window_bounds = array<i64: 1, 1, 20, 24, 8>}, {pipeline_mode = #tpu.pipeline_mode<synchronous>, transform_indices = @transform_1, window_bounds = array<i64: 72, 128>}, {pipeline_mode = #tpu.pipeline_mode<synchronous>, transform_indices = @transform_2, window_bounds = array<i64: 1, 9, 128, 128>}, {pipeline_mode = #tpu.pipeline_mode<synchronous>, transform_indices = @transform_3, window_bounds = array<i64: 2, 128>}, {transform_indices = @transform_4, window_bounds = array<i64: 1, 1, 16, 8, 128>}]} {
    %cst = arith.constant 0.000000e+00 : bf16
    %0 = vector.broadcast %cst : bf16 to vector<18x8x128xbf16>
    %c0 = arith.constant 0 : index
    %c0_0 = arith.constant 0 : index
    %c0_1 = arith.constant 0 : index
    %c0_2 = arith.constant 0 : index
    %1 = vector.load %arg7[%c0, %c0_0, %c0_1, %c0_2] : memref<1x18x24x128xbf16, #tpu.memory_space<vmem>>, vector<1x18x8x128xbf16>
    %2 = vector.shape_cast %1 : vector<1x18x8x128xbf16> to vector<18x8x128xbf16>
    %3 = vector.shape_cast %0 : vector<18x8x128xbf16> to vector<1x18x8x128xbf16>
    tpu.vector_store %arg7[%c0, %c0_0, %c0_1, %c0_2], %3 {strides = array<i32>} : memref<1x18x24x128xbf16, #tpu.memory_space<vmem>>, vector<1x18x8x128xbf16>,
    %cst_3 = arith.constant 0.000000e+00 : bf16
    %4 = vector.broadcast %cst_3 : bf16 to vector<18x8x128xbf16>
    %c0_4 = arith.constant 0 : index
    %c0_5 = arith.constant 0 : index
    %c16 = arith.constant 16 : index
    %c0_6 = arith.constant 0 : index
    %5 = vector.load %arg7[%c0_4, %c0_5, %c16, %c0_6] : memref<1x18x24x128xbf16, #tpu.memory_space<vmem>>, vector<1x18x8x128xbf16>
    %6 = vector.shape_cast %5 : vector<1x18x8x128xbf16> to vector<18x8x128xbf16>
    %7 = vector.shape_cast %4 : vector<18x8x128xbf16> to vector<1x18x8x128xbf16>
    tpu.vector_store %arg7[%c0_4, %c0_5, %c16, %c0_6], %7 {strides = array<i32>} : memref<1x18x24x128xbf16, #tpu.memory_space<vmem>>, vector<1x18x8x128xbf16>,
    %c0_7 = arith.constant 0 : index
    %c0_8 = arith.constant 0 : index
    %c0_9 = arith.constant 0 : index
    %c7 = arith.constant 7 : index
    %c0_10 = arith.constant 0 : index
    %8 = vector.load %arg2[%c0_7, %c0_8, %c0_9, %c7, %c0_10] : memref<1x1x20x24x8xbf16, #tpu.memory_space<vmem>>, vector<1x1x18x8x8xbf16>
    %9 = vector.shape_cast %8 : vector<1x1x18x8x8xbf16> to vector<18x8x8xbf16>
    %10 = vector.shape_cast %9 : vector<18x8x8xbf16> to vector<144x8xbf16>
    %c0_11 = arith.constant 0 : index
    %c0_12 = arith.constant 0 : index
    %c0_13 = arith.constant 0 : index
    %c8 = arith.constant 8 : index
    %c0_14 = arith.constant 0 : index
    %11 = vector.load %arg2[%c0_11, %c0_12, %c0_13, %c8, %c0_14] : memref<1x1x20x24x8xbf16, #tpu.memory_space<vmem>>, vector<1x1x18x8x8xbf16>
    %12 = vector.shape_cast %11 : vector<1x1x18x8x8xbf16> to vector<18x8x8xbf16>
    %13 = vector.shape_cast %12 : vector<18x8x8xbf16> to vector<144x8xbf16>
    %c0_15 = arith.constant 0 : index
    %c0_16 = arith.constant 0 : index
    %c0_17 = arith.constant 0 : index
    %c9 = arith.constant 9 : index
    %c0_18 = arith.constant 0 : index
    %14 = vector.load %arg2[%c0_15, %c0_16, %c0_17, %c9, %c0_18] : memref<1x1x20x24x8xbf16, #tpu.memory_space<vmem>>, vector<1x1x18x8x8xbf16>
    %15 = vector.shape_cast %14 : vector<1x1x18x8x8xbf16> to vector<18x8x8xbf16>
    %16 = vector.shape_cast %15 : vector<18x8x8xbf16> to vector<144x8xbf16>
    %c0_19 = arith.constant 0 : index
    %c0_20 = arith.constant 0 : index
    %c1 = arith.constant 1 : index
    %c7_21 = arith.constant 7 : index
    %c0_22 = arith.constant 0 : index
    %17 = vector.load %arg2[%c0_19, %c0_20, %c1, %c7_21, %c0_22] : memref<1x1x20x24x8xbf16, #tpu.memory_space<vmem>>, vector<1x1x18x8x8xbf16>
    %18 = vector.shape_cast %17 : vector<1x1x18x8x8xbf16> to vector<18x8x8xbf16>
    %19 = vector.shape_cast %18 : vector<18x8x8xbf16> to vector<144x8xbf16>
    %c0_23 = arith.constant 0 : index
    %c0_24 = arith.constant 0 : index
    %c1_25 = arith.constant 1 : index
    %c8_26 = arith.constant 8 : index
    %c0_27 = arith.constant 0 : index
    %20 = vector.load %arg2[%c0_23, %c0_24, %c1_25, %c8_26, %c0_27] : memref<1x1x20x24x8xbf16, #tpu.memory_space<vmem>>, vector<1x1x18x8x8xbf16>
    %21 = vector.shape_cast %20 : vector<1x1x18x8x8xbf16> to vector<18x8x8xbf16>
    %22 = vector.shape_cast %21 : vector<18x8x8xbf16> to vector<144x8xbf16>
    %c0_28 = arith.constant 0 : index
    %c0_29 = arith.constant 0 : index
    %c1_30 = arith.constant 1 : index
    %c9_31 = arith.constant 9 : index
    %c0_32 = arith.constant 0 : index
    %23 = vector.load %arg2[%c0_28, %c0_29, %c1_30, %c9_31, %c0_32] : memref<1x1x20x24x8xbf16, #tpu.memory_space<vmem>>, vector<1x1x18x8x8xbf16>
    %24 = vector.shape_cast %23 : vector<1x1x18x8x8xbf16> to vector<18x8x8xbf16>
    %25 = vector.shape_cast %24 : vector<18x8x8xbf16> to vector<144x8xbf16>
    %c0_33 = arith.constant 0 : index
    %c0_34 = arith.constant 0 : index
    %c2 = arith.constant 2 : index
    %c7_35 = arith.constant 7 : index
    %c0_36 = arith.constant 0 : index
    %26 = vector.load %arg2[%c0_33, %c0_34, %c2, %c7_35, %c0_36] : memref<1x1x20x24x8xbf16, #tpu.memory_space<vmem>>, vector<1x1x18x8x8xbf16>
    %27 = vector.shape_cast %26 : vector<1x1x18x8x8xbf16> to vector<18x8x8xbf16>
    %28 = vector.shape_cast %27 : vector<18x8x8xbf16> to vector<144x8xbf16>
    %c0_37 = arith.constant 0 : index
    %c0_38 = arith.constant 0 : index
    %c2_39 = arith.constant 2 : index
    %c8_40 = arith.constant 8 : index
    %c0_41 = arith.constant 0 : index
    %29 = vector.load %arg2[%c0_37, %c0_38, %c2_39, %c8_40, %c0_41] : memref<1x1x20x24x8xbf16, #tpu.memory_space<vmem>>, vector<1x1x18x8x8xbf16>
    %30 = vector.shape_cast %29 : vector<1x1x18x8x8xbf16> to vector<18x8x8xbf16>
    %31 = vector.shape_cast %30 : vector<18x8x8xbf16> to vector<144x8xbf16>
    %c0_42 = arith.constant 0 : index
    %c0_43 = arith.constant 0 : index
    %c2_44 = arith.constant 2 : index
    %c9_45 = arith.constant 9 : index
    %c0_46 = arith.constant 0 : index
    %32 = vector.load %arg2[%c0_42, %c0_43, %c2_44, %c9_45, %c0_46] : memref<1x1x20x24x8xbf16, #tpu.memory_space<vmem>>, vector<1x1x18x8x8xbf16>
    %33 = vector.shape_cast %32 : vector<1x1x18x8x8xbf16> to vector<18x8x8xbf16>
    %34 = vector.shape_cast %33 : vector<18x8x8xbf16> to vector<144x8xbf16>
    %35 = tpu.concatenate %10, %13, %16, %19, %22, %25, %28, %31, %34 in 1 : vector<144x8xbf16>, vector<144x8xbf16>, vector<144x8xbf16>, vector<144x8xbf16>, vector<144x8xbf16>, vector<144x8xbf16>, vector<144x8xbf16>, vector<144x8xbf16>, vector<144x8xbf16> -> vector<144x72xbf16>
    %c0_47 = arith.constant 0 : index
    %c0_48 = arith.constant 0 : index
    %36 = vector.load %arg3[%c0_47, %c0_48] : memref<72x128xbf16, #tpu.memory_space<vmem>>, vector<72x128xbf16>
    %cst_49 = arith.constant dense<0.000000e+00> : vector<144x128xf32>
    %37 = tpu.matmul %35, %36, %cst_49 {dimension_numbers = #tpu.dot_dimension_numbers<[1], [0], [0], [1], [0, 0, 1, 1], [], []>} : vector<144x72xbf16>, vector<72x128xbf16>, vector<144x128xf32> -> vector<144x128xf32>
    %c0_50 = arith.constant 0 : index
    %c0_51 = arith.constant 0 : index
    %38 = vector.load %arg5[%c0_50, %c0_51] : memref<2x128xf32, #tpu.memory_space<vmem>>, vector<1x128xf32>
    %39 = vector.broadcast %38 : vector<1x128xf32> to vector<144x128xf32>
    %40 = arith.addf %37, %39 : vector<144x128xf32>
    %cst_52 = arith.constant 0.000000e+00 : f32
    %41 = vector.broadcast %cst_52 : f32 to vector<144x128xf32>
    %42 = arith.cmpf oge, %40, %41 : vector<144x128xf32>
    %cst_53 = arith.constant 0.00999999977 : f32
    %43 = vector.broadcast %cst_53 : f32 to vector<144x128xf32>
    %44 = arith.mulf %43, %40 : vector<144x128xf32>
    %45 = arith.select %42, %40, %44 : vector<144x128xi1>, vector<144x128xf32>
    %46 = vector.shape_cast %45 : vector<144x128xf32> to vector<18x8x128xf32>
    %c0_i32 = arith.constant 0 : i32
    %47 = arith.cmpi eq, %arg1, %c0_i32 : i32
    %c0_i32_54 = arith.constant 0 : i32
    %48 = arith.cmpi eq, %arg1, %c0_i32_54 : i32
    %49 = arith.ori %47, %48 : i1
    %50 = arith.extui %49 : i1 to i32
    %c0_i32_55 = arith.constant 0 : i32
    %51 = arith.cmpi ne, %50, %c0_i32_55 : i32
    scf.if %51 {
      %130 = tpu.iota {dimensions = array<i32: 0>} : vector<18x1x1xi32>
      %c16_i32 = arith.constant 16 : i32
      %131 = arith.muli %arg1, %c16_i32 : i32
      %132 = vector.broadcast %131 : i32 to vector<18x1x1xi32>
      %133 = arith.addi %130, %132 : vector<18x1x1xi32>
      %c1_i32 = arith.constant 1 : i32
      %134 = vector.broadcast %c1_i32 : i32 to vector<18x1x1xi32>
      %135 = arith.subi %133, %134 : vector<18x1x1xi32>
      %c0_i32_143 = arith.constant 0 : i32
      %136 = vector.broadcast %c0_i32_143 : i32 to vector<18x1x1xi32>
      %137 = arith.cmpi sge, %135, %136 : vector<18x1x1xi32>
      %c16_i32_144 = arith.constant 16 : i32
      %138 = vector.broadcast %c16_i32_144 : i32 to vector<18x1x1xi32>
      %139 = arith.cmpi slt, %135, %138 : vector<18x1x1xi32>
      %140 = arith.andi %137, %139 : vector<18x1x1xi1>
      %cst_145 = arith.constant 0.000000e+00 : f32
      %141 = vector.shape_cast %140 : vector<18x1x1xi1> to vector<18x1x1xi1>
      %142 = vector.broadcast %141 : vector<18x1x1xi1> to vector<18x8x128xi1>
      %143 = vector.broadcast %cst_145 : f32 to vector<18x8x128xf32>
      %144 = arith.select %142, %46, %143 : vector<18x8x128xi1>, vector<18x8x128xf32>
      %145 = arith.truncf %144 : vector<18x8x128xf32> to vector<18x8x128xbf16>
      %c0_146 = arith.constant 0 : index
      %c0_147 = arith.constant 0 : index
      %c8_148 = arith.constant 8 : index
      %c0_149 = arith.constant 0 : index
      %146 = vector.load %arg7[%c0_146, %c0_147, %c8_148, %c0_149] : memref<1x18x24x128xbf16, #tpu.memory_space<vmem>>, vector<1x18x8x128xbf16>
      %147 = vector.shape_cast %146 : vector<1x18x8x128xbf16> to vector<18x8x128xbf16>
      %148 = vector.shape_cast %145 : vector<18x8x128xbf16> to vector<1x18x8x128xbf16>
      tpu.vector_store %arg7[%c0_146, %c0_147, %c8_148, %c0_149], %148 {strides = array<i32>} : memref<1x18x24x128xbf16, #tpu.memory_space<vmem>>, vector<1x18x8x128xbf16>,
    } else {
    }
    %true = arith.constant true
    %52 = arith.xori %49, %true : i1
    %53 = arith.extui %52 : i1 to i32
    %c0_i32_56 = arith.constant 0 : i32
    %54 = arith.cmpi ne, %53, %c0_i32_56 : i32
    scf.if %54 {
      %130 = arith.truncf %46 : vector<18x8x128xf32> to vector<18x8x128xbf16>
      %c0_143 = arith.constant 0 : index
      %c0_144 = arith.constant 0 : index
      %c8_145 = arith.constant 8 : index
      %c0_146 = arith.constant 0 : index
      %131 = vector.load %arg7[%c0_143, %c0_144, %c8_145, %c0_146] : memref<1x18x24x128xbf16, #tpu.memory_space<vmem>>, vector<1x18x8x128xbf16>
      %132 = vector.shape_cast %131 : vector<1x18x8x128xbf16> to vector<18x8x128xbf16>
      %133 = vector.shape_cast %130 : vector<18x8x128xbf16> to vector<1x18x8x128xbf16>
      tpu.vector_store %arg7[%c0_143, %c0_144, %c8_145, %c0_146], %133 {strides = array<i32>} : memref<1x18x24x128xbf16, #tpu.memory_space<vmem>>, vector<1x18x8x128xbf16>,
    } else {
    }
    %c0_57 = arith.constant 0 : index
    %c0_58 = arith.constant 0 : index
    %c7_59 = arith.constant 7 : index
    %c0_60 = arith.constant 0 : index
    %55 = vector.load %arg7[%c0_57, %c0_58, %c7_59, %c0_60] : memref<1x18x24x128xbf16, #tpu.memory_space<vmem>>, vector<1x16x8x128xbf16>
    %56 = vector.shape_cast %55 : vector<1x16x8x128xbf16> to vector<16x8x128xbf16>
    %57 = vector.shape_cast %56 : vector<16x8x128xbf16> to vector<128x128xbf16>
    %c0_61 = arith.constant 0 : index
    %c0_62 = arith.constant 0 : index
    %c0_63 = arith.constant 0 : index
    %c0_64 = arith.constant 0 : index
    %58 = vector.load %arg4[%c0_61, %c0_62, %c0_63, %c0_64] : memref<1x9x128x128xbf16, #tpu.memory_space<vmem>>, vector<1x1x128x128xbf16>
    %59 = vector.shape_cast %58 : vector<1x1x128x128xbf16> to vector<128x128xbf16>
    %cst_65 = arith.constant dense<0.000000e+00> : vector<128x128xf32>
    %60 = tpu.matmul %57, %59, %cst_65 {dimension_numbers = #tpu.dot_dimension_numbers<[1], [0], [0], [1], [0, 0, 1, 1], [], []>} : vector<128x128xbf16>, vector<128x128xbf16>, vector<128x128xf32> -> vector<128x128xf32>
    %c0_66 = arith.constant 0 : index
    %c0_67 = arith.constant 0 : index
    %c8_68 = arith.constant 8 : index
    %c0_69 = arith.constant 0 : index
    %61 = vector.load %arg7[%c0_66, %c0_67, %c8_68, %c0_69] : memref<1x18x24x128xbf16, #tpu.memory_space<vmem>>, vector<1x16x8x128xbf16>
    %62 = vector.shape_cast %61 : vector<1x16x8x128xbf16> to vector<16x8x128xbf16>
    %63 = vector.shape_cast %62 : vector<16x8x128xbf16> to vector<128x128xbf16>
    %c0_70 = arith.constant 0 : index
    %c1_71 = arith.constant 1 : index
    %c0_72 = arith.constant 0 : index
    %c0_73 = arith.constant 0 : index
    %64 = vector.load %arg4[%c0_70, %c1_71, %c0_72, %c0_73] : memref<1x9x128x128xbf16, #tpu.memory_space<vmem>>, vector<1x1x128x128xbf16>
    %65 = vector.shape_cast %64 : vector<1x1x128x128xbf16> to vector<128x128xbf16>
    %cst_74 = arith.constant dense<0.000000e+00> : vector<128x128xf32>
    %66 = tpu.matmul %63, %65, %cst_74 {dimension_numbers = #tpu.dot_dimension_numbers<[1], [0], [0], [1], [0, 0, 1, 1], [], []>} : vector<128x128xbf16>, vector<128x128xbf16>, vector<128x128xf32> -> vector<128x128xf32>
    %67 = arith.addf %60, %66 : vector<128x128xf32>
    %c0_75 = arith.constant 0 : index
    %c0_76 = arith.constant 0 : index
    %c9_77 = arith.constant 9 : index
    %c0_78 = arith.constant 0 : index
    %68 = vector.load %arg7[%c0_75, %c0_76, %c9_77, %c0_78] : memref<1x18x24x128xbf16, #tpu.memory_space<vmem>>, vector<1x16x8x128xbf16>
    %69 = vector.shape_cast %68 : vector<1x16x8x128xbf16> to vector<16x8x128xbf16>
    %70 = vector.shape_cast %69 : vector<16x8x128xbf16> to vector<128x128xbf16>
    %c0_79 = arith.constant 0 : index
    %c2_80 = arith.constant 2 : index
    %c0_81 = arith.constant 0 : index
    %c0_82 = arith.constant 0 : index
    %71 = vector.load %arg4[%c0_79, %c2_80, %c0_81, %c0_82] : memref<1x9x128x128xbf16, #tpu.memory_space<vmem>>, vector<1x1x128x128xbf16>
    %72 = vector.shape_cast %71 : vector<1x1x128x128xbf16> to vector<128x128xbf16>
    %cst_83 = arith.constant dense<0.000000e+00> : vector<128x128xf32>
    %73 = tpu.matmul %70, %72, %cst_83 {dimension_numbers = #tpu.dot_dimension_numbers<[1], [0], [0], [1], [0, 0, 1, 1], [], []>} : vector<128x128xbf16>, vector<128x128xbf16>, vector<128x128xf32> -> vector<128x128xf32>
    %74 = arith.addf %67, %73 : vector<128x128xf32>
    %c0_84 = arith.constant 0 : index
    %c1_85 = arith.constant 1 : index
    %c7_86 = arith.constant 7 : index
    %c0_87 = arith.constant 0 : index
    %75 = vector.load %arg7[%c0_84, %c1_85, %c7_86, %c0_87] : memref<1x18x24x128xbf16, #tpu.memory_space<vmem>>, vector<1x16x8x128xbf16>
    %76 = vector.shape_cast %75 : vector<1x16x8x128xbf16> to vector<16x8x128xbf16>
    %77 = vector.shape_cast %76 : vector<16x8x128xbf16> to vector<128x128xbf16>
    %c0_88 = arith.constant 0 : index
    %c3 = arith.constant 3 : index
    %c0_89 = arith.constant 0 : index
    %c0_90 = arith.constant 0 : index
    %78 = vector.load %arg4[%c0_88, %c3, %c0_89, %c0_90] : memref<1x9x128x128xbf16, #tpu.memory_space<vmem>>, vector<1x1x128x128xbf16>
    %79 = vector.shape_cast %78 : vector<1x1x128x128xbf16> to vector<128x128xbf16>
    %cst_91 = arith.constant dense<0.000000e+00> : vector<128x128xf32>
    %80 = tpu.matmul %77, %79, %cst_91 {dimension_numbers = #tpu.dot_dimension_numbers<[1], [0], [0], [1], [0, 0, 1, 1], [], []>} : vector<128x128xbf16>, vector<128x128xbf16>, vector<128x128xf32> -> vector<128x128xf32>
    %81 = arith.addf %74, %80 : vector<128x128xf32>
    %c0_92 = arith.constant 0 : index
    %c1_93 = arith.constant 1 : index
    %c8_94 = arith.constant 8 : index
    %c0_95 = arith.constant 0 : index
    %82 = vector.load %arg7[%c0_92, %c1_93, %c8_94, %c0_95] : memref<1x18x24x128xbf16, #tpu.memory_space<vmem>>, vector<1x16x8x128xbf16>
    %83 = vector.shape_cast %82 : vector<1x16x8x128xbf16> to vector<16x8x128xbf16>
    %84 = vector.shape_cast %83 : vector<16x8x128xbf16> to vector<128x128xbf16>
    %c0_96 = arith.constant 0 : index
    %c4 = arith.constant 4 : index
    %c0_97 = arith.constant 0 : index
    %c0_98 = arith.constant 0 : index
    %85 = vector.load %arg4[%c0_96, %c4, %c0_97, %c0_98] : memref<1x9x128x128xbf16, #tpu.memory_space<vmem>>, vector<1x1x128x128xbf16>
    %86 = vector.shape_cast %85 : vector<1x1x128x128xbf16> to vector<128x128xbf16>
    %cst_99 = arith.constant dense<0.000000e+00> : vector<128x128xf32>
    %87 = tpu.matmul %84, %86, %cst_99 {dimension_numbers = #tpu.dot_dimension_numbers<[1], [0], [0], [1], [0, 0, 1, 1], [], []>} : vector<128x128xbf16>, vector<128x128xbf16>, vector<128x128xf32> -> vector<128x128xf32>
    %88 = arith.addf %81, %87 : vector<128x128xf32>
    %c0_100 = arith.constant 0 : index
    %c1_101 = arith.constant 1 : index
    %c9_102 = arith.constant 9 : index
    %c0_103 = arith.constant 0 : index
    %89 = vector.load %arg7[%c0_100, %c1_101, %c9_102, %c0_103] : memref<1x18x24x128xbf16, #tpu.memory_space<vmem>>, vector<1x16x8x128xbf16>
    %90 = vector.shape_cast %89 : vector<1x16x8x128xbf16> to vector<16x8x128xbf16>
    %91 = vector.shape_cast %90 : vector<16x8x128xbf16> to vector<128x128xbf16>
    %c0_104 = arith.constant 0 : index
    %c5 = arith.constant 5 : index
    %c0_105 = arith.constant 0 : index
    %c0_106 = arith.constant 0 : index
    %92 = vector.load %arg4[%c0_104, %c5, %c0_105, %c0_106] : memref<1x9x128x128xbf16, #tpu.memory_space<vmem>>, vector<1x1x128x128xbf16>
    %93 = vector.shape_cast %92 : vector<1x1x128x128xbf16> to vector<128x128xbf16>
    %cst_107 = arith.constant dense<0.000000e+00> : vector<128x128xf32>
    %94 = tpu.matmul %91, %93, %cst_107 {dimension_numbers = #tpu.dot_dimension_numbers<[1], [0], [0], [1], [0, 0, 1, 1], [], []>} : vector<128x128xbf16>, vector<128x128xbf16>, vector<128x128xf32> -> vector<128x128xf32>
    %95 = arith.addf %88, %94 : vector<128x128xf32>
    %c0_108 = arith.constant 0 : index
    %c2_109 = arith.constant 2 : index
    %c7_110 = arith.constant 7 : index
    %c0_111 = arith.constant 0 : index
    %96 = vector.load %arg7[%c0_108, %c2_109, %c7_110, %c0_111] : memref<1x18x24x128xbf16, #tpu.memory_space<vmem>>, vector<1x16x8x128xbf16>
    %97 = vector.shape_cast %96 : vector<1x16x8x128xbf16> to vector<16x8x128xbf16>
    %98 = vector.shape_cast %97 : vector<16x8x128xbf16> to vector<128x128xbf16>
    %c0_112 = arith.constant 0 : index
    %c6 = arith.constant 6 : index
    %c0_113 = arith.constant 0 : index
    %c0_114 = arith.constant 0 : index
    %99 = vector.load %arg4[%c0_112, %c6, %c0_113, %c0_114] : memref<1x9x128x128xbf16, #tpu.memory_space<vmem>>, vector<1x1x128x128xbf16>
    %100 = vector.shape_cast %99 : vector<1x1x128x128xbf16> to vector<128x128xbf16>
    %cst_115 = arith.constant dense<0.000000e+00> : vector<128x128xf32>
    %101 = tpu.matmul %98, %100, %cst_115 {dimension_numbers = #tpu.dot_dimension_numbers<[1], [0], [0], [1], [0, 0, 1, 1], [], []>} : vector<128x128xbf16>, vector<128x128xbf16>, vector<128x128xf32> -> vector<128x128xf32>
    %102 = arith.addf %95, %101 : vector<128x128xf32>
    %c0_116 = arith.constant 0 : index
    %c2_117 = arith.constant 2 : index
    %c8_118 = arith.constant 8 : index
    %c0_119 = arith.constant 0 : index
    %103 = vector.load %arg7[%c0_116, %c2_117, %c8_118, %c0_119] : memref<1x18x24x128xbf16, #tpu.memory_space<vmem>>, vector<1x16x8x128xbf16>
    %104 = vector.shape_cast %103 : vector<1x16x8x128xbf16> to vector<16x8x128xbf16>
    %105 = vector.shape_cast %104 : vector<16x8x128xbf16> to vector<128x128xbf16>
    %c0_120 = arith.constant 0 : index
    %c7_121 = arith.constant 7 : index
    %c0_122 = arith.constant 0 : index
    %c0_123 = arith.constant 0 : index
    %106 = vector.load %arg4[%c0_120, %c7_121, %c0_122, %c0_123] : memref<1x9x128x128xbf16, #tpu.memory_space<vmem>>, vector<1x1x128x128xbf16>
    %107 = vector.shape_cast %106 : vector<1x1x128x128xbf16> to vector<128x128xbf16>
    %cst_124 = arith.constant dense<0.000000e+00> : vector<128x128xf32>
    %108 = tpu.matmul %105, %107, %cst_124 {dimension_numbers = #tpu.dot_dimension_numbers<[1], [0], [0], [1], [0, 0, 1, 1], [], []>} : vector<128x128xbf16>, vector<128x128xbf16>, vector<128x128xf32> -> vector<128x128xf32>
    %109 = arith.addf %102, %108 : vector<128x128xf32>
    %c0_125 = arith.constant 0 : index
    %c2_126 = arith.constant 2 : index
    %c9_127 = arith.constant 9 : index
    %c0_128 = arith.constant 0 : index
    %110 = vector.load %arg7[%c0_125, %c2_126, %c9_127, %c0_128] : memref<1x18x24x128xbf16, #tpu.memory_space<vmem>>, vector<1x16x8x128xbf16>
    %111 = vector.shape_cast %110 : vector<1x16x8x128xbf16> to vector<16x8x128xbf16>
    %112 = vector.shape_cast %111 : vector<16x8x128xbf16> to vector<128x128xbf16>
    %c0_129 = arith.constant 0 : index
    %c8_130 = arith.constant 8 : index
    %c0_131 = arith.constant 0 : index
    %c0_132 = arith.constant 0 : index
    %113 = vector.load %arg4[%c0_129, %c8_130, %c0_131, %c0_132] : memref<1x9x128x128xbf16, #tpu.memory_space<vmem>>, vector<1x1x128x128xbf16>
    %114 = vector.shape_cast %113 : vector<1x1x128x128xbf16> to vector<128x128xbf16>
    %cst_133 = arith.constant dense<0.000000e+00> : vector<128x128xf32>
    %115 = tpu.matmul %112, %114, %cst_133 {dimension_numbers = #tpu.dot_dimension_numbers<[1], [0], [0], [1], [0, 0, 1, 1], [], []>} : vector<128x128xbf16>, vector<128x128xbf16>, vector<128x128xf32> -> vector<128x128xf32>
    %116 = arith.addf %109, %115 : vector<128x128xf32>
    %c1_134 = arith.constant 1 : index
    %c0_135 = arith.constant 0 : index
    %117 = vector.load %arg5[%c1_134, %c0_135] : memref<2x128xf32, #tpu.memory_space<vmem>>, vector<1x128xf32>
    %118 = vector.broadcast %117 : vector<1x128xf32> to vector<128x128xf32>
    %119 = arith.addf %116, %118 : vector<128x128xf32>
    %cst_136 = arith.constant 0.000000e+00 : f32
    %120 = vector.broadcast %cst_136 : f32 to vector<128x128xf32>
    %121 = arith.cmpf oge, %119, %120 : vector<128x128xf32>
    %cst_137 = arith.constant 0.00999999977 : f32
    %122 = vector.broadcast %cst_137 : f32 to vector<128x128xf32>
    %123 = arith.mulf %122, %119 : vector<128x128xf32>
    %124 = arith.select %121, %119, %123 : vector<128x128xi1>, vector<128x128xf32>
    %125 = vector.shape_cast %124 : vector<128x128xf32> to vector<16x8x128xf32>
    %126 = arith.truncf %125 : vector<16x8x128xf32> to vector<16x8x128xbf16>
    %c0_138 = arith.constant 0 : index
    %c0_139 = arith.constant 0 : index
    %c0_140 = arith.constant 0 : index
    %c0_141 = arith.constant 0 : index
    %c0_142 = arith.constant 0 : index
    %127 = vector.load %arg6[%c0_138, %c0_139, %c0_140, %c0_141, %c0_142] : memref<1x1x16x8x128xbf16, #tpu.memory_space<vmem>>, vector<1x1x16x8x128xbf16>
    %128 = vector.shape_cast %127 : vector<1x1x16x8x128xbf16> to vector<16x8x128xbf16>
    %129 = vector.shape_cast %126 : vector<16x8x128xbf16> to vector<1x1x16x8x128xbf16>
    tpu.vector_store %arg6[%c0_138, %c0_139, %c0_140, %c0_141, %c0_142], %129 {strides = array<i32>} : memref<1x1x16x8x128xbf16, #tpu.memory_space<vmem>>, vector<1x1x16x8x128xbf16>,
    return
  }
  func.func @transform_0(%arg0: i32, %arg1: i32) -> (i32, i32, i32, i32, i32) {
    %c0_i32 = arith.constant 0 : i32
    %c0_i32_0 = arith.constant 0 : i32
    %c0_i32_1 = arith.constant 0 : i32
    %c0_i32_2 = arith.constant 0 : i32
    return %arg0, %arg1, %c0_i32, %c0_i32_0, %c0_i32_1 : i32, i32, i32, i32, i32
  }
  func.func @transform_1(%arg0: i32, %arg1: i32) -> (i32, i32) {
    %c0_i32 = arith.constant 0 : i32
    %c0_i32_0 = arith.constant 0 : i32
    %c0_i32_1 = arith.constant 0 : i32
    return %c0_i32, %c0_i32_0 : i32, i32
  }
  func.func @transform_2(%arg0: i32, %arg1: i32) -> (i32, i32, i32, i32) {
    %c0_i32 = arith.constant 0 : i32
    %c0_i32_0 = arith.constant 0 : i32
    %c0_i32_1 = arith.constant 0 : i32
    %c0_i32_2 = arith.constant 0 : i32
    %c0_i32_3 = arith.constant 0 : i32
    return %c0_i32, %c0_i32_0, %c0_i32_1, %c0_i32_2 : i32, i32, i32, i32
  }
  func.func @transform_3(%arg0: i32, %arg1: i32) -> (i32, i32) {
    %c0_i32 = arith.constant 0 : i32
    %c0_i32_0 = arith.constant 0 : i32
    %c0_i32_1 = arith.constant 0 : i32
    return %c0_i32, %c0_i32_0 : i32, i32
  }
  func.func @transform_4(%arg0: i32, %arg1: i32) -> (i32, i32, i32, i32, i32) {
    %c0_i32 = arith.constant 0 : i32
    %c0_i32_0 = arith.constant 0 : i32
    %c0_i32_1 = arith.constant 0 : i32
    %c0_i32_2 = arith.constant 0 : i32
    return %arg0, %arg1, %c0_i32, %c0_i32_0, %c0_i32_1 : i32, i32, i32, i32, i32
  }
}

</mosaic_0001>

<bundles_post_ra>
// kernel: tpu_custom_call.1
= control target key start
LH: loop header
LB: loop body
LE: loop exit
PB: predicated region body
PF: predicated region fallthrough
CT: control target
= control target key end

     0   :  { %9 = vsyncpa [#allocation4], 0  ;;  %s9236_s0 = inlined_call_operand.vmem [shape: bf16[2,1,20,24,8], index: 0, kind: input, shape index: {}]   ;;  %s9237_s1 = inlined_call_operand.vmem [shape: bf16[72,128], index: 1, kind: input, shape index: {}]   ;;  %s9238_s2 = inlined_call_operand.vmem [shape: bf16[1,9,128,128], index: 2, kind: input, shape index: {}]   ;;  %s9239_s3 = inlined_call_operand.vmem [shape: f32[2,128], index: 3, kind: input, shape index: {}]   ;;  %s9240_s4 = inlined_call_operand.hbm [shape: bf16[2,1,16,8,128], index: 4, kind: output, shape index: {}]  }
   0x1   :  { %11 = vsyncpa [#allocation4 + $0x1], 0  ;;  %s7018_s15 = smov 0   ;;  %s7020_s16 = smov 0  }
   0x2   :  { %s7022_s17 = smov 0   ;;  %s7024_s18 = smov 0  }
   0x3   :  { %s7026_s19 = smov 0   ;;  %s7028_s20 = smov 0  }
   0x4 LB: > { %s5774_s21 = sadd.s32 4294967295, %s6980_s20   ;;  %s5775_s22 = sadd.s32 4294967294, %s6980_s20   ;;  %s6980_s20 = sphi %s7028_s20, %s17_s20   ;;  %s6976_s19 = sphi %s7026_s19, %s9299_s19   ;;  %s6972_s18 = sphi %s7024_s18, %s9298_s18   ;;  %s6968_s17 = sphi %s7022_s17, %s9297_s17   ;;  %s6964_s16 = sphi %s7020_s16, %s9296_s16   ;;  %s6960_s15 = sphi %s7018_s15, %s9295_s15  }
   0x5   : > { %s29_s23 = sadd.s32 1, %s6976_s19  ;;  %s129_s24 = sadd.s32 1, %s6968_s17 }
   0x6   : > { %p31_p0 = scmp.ge.s32.totalorder %s29_s23, 2  ;;  %p139_p1 = scmp.ne.s32.totalorder %s6968_s17, %s6964_s16 }
   0x7   : > { %p140_p2 = scmp.eq.s32.totalorder %s5774_s21, 1  ;;  %p145_p3 = scmp.ne.s32.totalorder %s6964_s16, %s6960_s15 }
   0x8   : > { %s9301_s23 = smov (%p31_p0, %s29_s23), 0  ;;  %p146_p5 = scmp.eq.s32.totalorder %s5775_s22, 1 }
   0x9   : > { %p7058_p4 = por %p140_p2, %p139_p1  ;;  %s124_s26 = ssub.s32 %s6976_s19, %s9301_s23 }
   0xa   : > { %p5778_p6 = scmp.ge.s32.totalorder %s6980_s20, 1  ;;  %p127_p7 = scmp.eq.s32.totalorder %s124_s26, 0 }
   0xb   : > { %p7065_p8 = por %p146_p5, %p145_p3  ;;  %p185_p9 = scmp.lt.s32.totalorder %s6980_s20, 3 }
   0xc   : > { %s7071_s28 = scalar_select %p127_p7, %s6968_s17, %s129_s24  }
   0xd   : > { %p186_p10 = pnand %p5778_p6, %p185_p9 }
   0xe   : > { %p215_p11 = scmp.lt.s32.totalorder (!%p186_p10), %s6972_s18, 1  ;;  %s6982_s8 = smov (!%p186_p10), 8  }
   0xf   : > { %189 = sbr.rel (%p186_p10) target bundleno = 921 (0x399), region = 36  ;;  %s6983_s9 = smov (!%p186_p10), 32  }
  0x10   : > { %s6984_s10 = smov (!%p186_p10), 56   ;;  %s6985_s11 = smov (!%p186_p10), 24  }
  0x11   : > { %s6986_s12 = smov (!%p186_p10), 16   ;;  %s6987_s13 = smov (!%p186_p10), 64  }
  0x12   : > { %s6988_s14 = smov (!%p186_p10), 40   ;;  %s6989_s21 = smov (!%p186_p10), 48  }
  0x13   : > { %s6922_s26 = scalar_lea.hbm (!%p186_p10), %s9240_s4, 128 }
  0x14   : > { %s216_s29 = scalar_select %p215_p11, %s6972_s18, 1  ;;  %vm297_vm0 = vsmask.f32 256  ;;  %vm298_vm1 = vsmask.f32 4368  ;;  %vm2060_vm6 = vcmask 64512  }
  0x15   : > { %vm552_vm2 = vsmask.f32 3328  ;;  %vm553_vm3 = vsmask.f32 7440  ;;  %vm7112_vm4 = vmor %vm297_vm0, %vm298_vm1  ;;  %vm2278_vm7 = vcmask 1043456   ;;  %vm2088_vm8 = vcmask 130048  }
  0x16   : > { %s6832_s30 = smul.u32 240, %s216_s29  ;;  %vm7149_vm5 = vmor %vm552_vm2, %vm553_vm3  ;;  %vm2107_vm9 = vcmask 195584   ;;  %vm2126_vm10 = vcmask 261120   ;;  %vm2145_vm11 = vcmask 326656   ;;  %vm2164_vm12 = vcmask 392192  }
  0x17   : > { %vm2183_vm13 = vcmask 457728   ;;  %vm2202_vm14 = vcmask 523264   ;;  %vm2259_vm15 = vcmask 588800  }
  0x18   : > { %s7078_s7 = scalar_lea.vmem %s9236_s0, %s6832_s30 }
  0x19   : > { %v5945_v0 = vld [vmem:[%s7078_s7 + $0x4] sm:$0xf]  ;;  %v6641_v1 = vld [vmem:[%s7078_s7 + $0xc] sm:$0xf0]  ;;  %v6650_v4 = vld [vmem:[%s7078_s7 + $0x18] sm:$0xf0] }
  0x1a   : > { %v5981_v2 = vld [vmem:[%s7078_s7 + $0x10] sm:$0xf]  ;;  %v5946_v3 = vor.u32 %v6641_v1, %v5945_v0  ;;  %v6017_v5 = vld [vmem:[%s7078_s7 + $0x1c] sm:$0xf]  ;;  %v6659_v6 = vld [vmem:[%s7078_s7 + $0x24] sm:$0xf0] }
  0x1b   : > { %v5982_v7 = vor.u32 %v6650_v4, %v5981_v2  ;;  %v5799_v8 = vld [vmem:[%s7078_s7 + $0xc] sm:$0x8]  ;;  %v7088_v9 = vld [vmem:[%s7078_s7 + $0x10] sm:$0xf]  ;;  %v5801_v10 = vld [vmem:[%s7078_s7 + $0x18] sm:$0x8]  ;;  %v6018_v16 = vor.u32 %v6659_v6, %v6017_v5 }
  0x1c   : > { %1691 = vrot.lane.b32.xlu0 %v5946_v3, %s6982_s8  ;;  %v7093_v11 = vld [vmem:[%s7078_s7 + $0x1c] sm:$0xf]  ;;  %v755_v12 = vshrl.u32 %v5799_v8, 16  ;;  %v760_v13 = vshrl.u32 %v7088_v9, 16  ;;  %v763_v14 = vshll.u32 %v7088_v9, 16  ;;  %v768_v15 = vshrl.u32 %v5801_v10, 16 }
  0x1d   : > { %1844 = vrot.lane.b32.xlu1 %v5982_v7, %s6983_s9  ;;  %v773_v17 = vshrl.u32 %v7093_v11, 16  ;;  %v776_v18 = vshll.u32 %v7093_v11, 16  ;;  %v7101_v19 = vld [vmem:[%s7078_s7 + $0x4] sm:$0xf]  ;;  %v7104_v20 = vld [vmem:[%s7078_s7 + $0x10] sm:$0xf] }
  0x1e   : > { %v5835_v21 = vrot.slane %v755_v12, 11  ;;  %v762_v22 = vrot.slane %v760_v13, 7  ;;  %v5836_v23 = vrot.slane %v768_v15, 11  ;;  %v306_v24 = vshrl.u32 %v7101_v19, 16  ;;  %v534_v25 = vld [vmem:[%s7078_s7 + $0x8] sm:$0x1] }
  0x1f   : > { %v775_v27 = vrot.slane %v773_v17, 7  ;;  %v309_v28 = vshll.u32 %v7101_v19, 16  ;;  %v319_v29 = vshrl.u32 %v7104_v20, 16  ;;  %v322_v30 = vshll.u32 %v7104_v20, 16  ;;  %v535_v31 = vld [vmem:[%s7078_s7 + $0x14] sm:$0x1] }
  0x20   : > { %v765_v32 = vor.u32 %v763_v14, %v762_v22  ;;  %v555_v33 = vrot.slane %v306_v24, 4  ;;  %v560_v34 = vshll.u32 %v534_v25, 16  ;;  %v569_v35 = vshll.u32 %v535_v31, 16  ;;  %v7127_v36 = vld [vmem:[%s7078_s7 + $0x1c] sm:$0xf] }
  0x21   : > { %v778_v37 = vor.u32 %v776_v18, %v775_v27  ;;  %v556_v38 = vrot.slane %v309_v28, 5  ;;  %v564_v39 = vrot.slane %v319_v29, 4  ;;  %v565_v40 = vrot.slane %v322_v30, 5  ;;  %v7138_v41 = vld [vmem:[%s7078_s7 + $0x28] sm:$0xf] }
  0x22   : > { %v766_v42 = vsel %vm7112_vm4, %v5835_v21, %v765_v32  ;;  %v562_v43 = vrot.slane %v560_v34, 5  ;;  %v571_v44 = vrot.slane %v569_v35, 5  ;;  %v1211_v45 = vshrl.u32 %v7127_v36, 16  ;;  %v5925_v46 = vld [vmem:[%s7078_s7 + $0x20] sm:$0x1] }
  0x23   : > { %v779_v47 = vsel %vm7112_vm4, %v5836_v23, %v778_v37  ;;  %v1754_v48 = vunpack.c.l.b16 %v766_v42  ;;  %v557_v49 = vor.u32 %v556_v38, %v555_v33  ;;  %v566_v50 = vor.u32 %v565_v40, %v564_v39  ;;  %v5926_v56 = vld [vmem:[%s7078_s7 + $0x2c] sm:$0x1]  ;;  %v7160_v61 = vld [vmem:[%s7078_s7 + $0x1c] sm:$0xf]  ;;  %v7169_v2 = vld [vmem:[%s7078_s7 + $0x28] sm:$0xf] }
  0x24   : > { %1997 = vrot.lane.b32.xlu0 %v6018_v16, %s6984_s10  ;;  %v1755_v51 = vunpack.c.l.b16 %v779_v47  ;;  %v1214_v53 = vshll.u32 %v7127_v36, 16  ;;  %v1224_v54 = vshrl.u32 %v7138_v41, 16  ;;  %v1227_v55 = vshll.u32 %v7138_v41, 16  ;;  %v536_v15 = vld [vmem:[%s7078_s7 + $0x20] sm:$0x1] }
  0x25   : > { %v558_v57 = vrot.slane %v557_v49, 4  ;;  %v567_v58 = vrot.slane %v566_v50, 4  ;;  %v1457_v59 = vrot.slane %v1211_v45, 4  ;;  %v1462_v60 = vshll.u32 %v5925_v46, 16  ;;  %v537_v25 = vld [vmem:[%s7078_s7 + $0x2c] sm:$0x1] }
  0x26   : > { %v1772_v62 = vpack.c.b16 %v1755_v51, %v1754_v48  ;;  %v1458_v63 = vrot.slane %v1214_v53, 5  ;;  %v1466_v0 = vrot.slane %v1224_v54, 4  ;;  %v1467_v1 = vrot.slane %v1227_v55, 5  ;;  %v5803_v34 = vld [vmem:[%s7078_s7 + $0x24] sm:$0x8] }
  0x27   : > { %v563_v3 = vsel %vm7149_vm5, %v558_v57, %v562_v43  ;;  %v572_v4 = vsel %vm7149_vm5, %v567_v58, %v571_v44  ;;  %v1464_v5 = vrot.slane %v1462_v60, 5  ;;  %v1471_v6 = vshll.u32 %v5926_v56, 16  ;;  %v5804_v40 = vld [vmem:[%s7078_s7 + $0x28] sm:$0xf]  ;;  %v5805_v47 = vld [vmem:[%s7078_s7 + $0x30] sm:$0x8] }
  0x28   : > { %1781 = vrot.lane.b32.xlu1 %v1772_v62, %s6985_s11  ;;  %v1709_v7 = vunpack.c.l.b16 %v563_v3  ;;  %v1710_v8 = vunpack.c.l.b16 %v572_v4  ;;  %v1459_v10 = vor.u32 %v1458_v63, %v1457_v59  ;;  %v1468_v12 = vor.u32 %v1467_v1, %v1466_v0  ;;  %v5806_v56 = vld [vmem:[%s7078_s7 + $0x34] sm:$0xf]  ;;  %v5949_v57 = vld [vmem:[%s7078_s7 + $0x1c] sm:$0xf]  ;;  %v6642_v63 = vld [vmem:[%s7078_s7 + $0x24] sm:$0xf0] }
  0x29   : > { %v1473_v16 = vrot.slane %v1471_v6, 5  ;;  %v332_v21 = vshrl.u32 %v7160_v61, 16  ;;  %v9249_v22 = vshll.u32 %v7160_v61, 16  ;;  %v345_v23 = vshrl.u32 %v7169_v2, 16  ;;  %v7244_v36 = vld [vmem:[%s7078_s7 + $0x3c] sm:$0xf0] }
  0x2a   : > { %v1727_v27 = vpack.c.b16 %v1710_v8, %v1709_v7  ;;  %v1460_v31 = vrot.slane %v1459_v10, 4  ;;  %v1469_v32 = vrot.slane %v1468_v12, 4  ;;  %v9250_v33 = vshll.u32 %v7169_v2, 16  ;;  %v5855_v10 = vld [vmem:[%s7078_s7 + $0x2c] sm:$0x1] }
  0x2b   : > { %v573_v35 = vrot.slane %v332_v21, 4  ;;  %v574_v37 = vrot.slane %v9249_v22, 5  ;;  %v578_v38 = vshll.u32 %v536_v15, 16  ;;  %v582_v39 = vrot.slane %v345_v23, 4 }
  0x2c   : > { %1736 = vrot.lane.b32.xlu0 %v1727_v27, %s6986_s12  ;;  %v1465_v42 = vsel %vm7149_vm5, %v1460_v31, %v1464_v5  ;;  %v1474_v43 = vsel %vm7149_vm5, %v1469_v32, %v1473_v16  ;;  %v583_v44 = vrot.slane %v9250_v33, 5  ;;  %v587_v46 = vshll.u32 %v537_v25, 16 }
  0x2d   : > { %v2015_v48 = vunpack.c.l.b16 %v1465_v42  ;;  %v2016_v49 = vunpack.c.l.b16 %v1474_v43  ;;  %v575_v50 = vor.u32 %v574_v37, %v573_v35  ;;  %v580_v51 = vrot.slane %v578_v38, 5  ;;  %v5856_v35 = vld [vmem:[%s7078_s7 + $0x38] sm:$0x1]  ;;  %v5875_v42 = vld [vmem:[%s7078_s7 + $0x30] sm:$0x8] }
  0x2e   : > { %v584_v58 = vor.u32 %v583_v44, %v582_v39  ;;  %v589_v59 = vrot.slane %v587_v46, 5  ;;  %v781_v60 = vshrl.u32 %v5803_v34, 16  ;;  %v786_v62 = vshrl.u32 %v5804_v40, 16 }
  0x2f   : > { %v2033_v0 = vpack.c.b16 %v2016_v49, %v2015_v48  ;;  %v576_v1 = vrot.slane %v575_v50, 4  ;;  %v789_v3 = vshll.u32 %v5804_v40, 16  ;;  %v794_v4 = vshrl.u32 %v5805_v47, 16  ;;  %v5876_v48 = vld [vmem:[%s7078_s7 + $0x34] sm:$0xf] }
  0x30   : > { %v585_v5 = vrot.slane %v584_v58, 4  ;;  %v5837_v6 = vrot.slane %v781_v60, 11  ;;  %v788_v7 = vrot.slane %v786_v62, 7  ;;  %v799_v8 = vshrl.u32 %v5806_v56, 16 }
  0x31   : > { %2042 = vrot.lane.b32.xlu1 %v2033_v0, %s6987_s13  ;;  %v581_v12 = vsel %vm7149_vm5, %v576_v1, %v580_v51  ;;  %v5838_v15 = vrot.slane %v794_v4, 11  ;;  %v802_v16 = vshll.u32 %v5806_v56, 16  ;;  %v5950_v25 = vor.u32 %v6642_v63, %v5949_v57  ;;  %v5877_v57 = vld [vmem:[%s7078_s7 + $0x3c] sm:$0x8] }
  0x32   : > { %v590_v27 = vsel %vm7149_vm5, %v585_v5, %v589_v59  ;;  %v1711_v31 = vunpack.c.l.b16 %v581_v12  ;;  %v791_v32 = vor.u32 %v789_v3, %v788_v7  ;;  %v801_v34 = vrot.slane %v799_v8, 7 }
  0x33   : > { %v1712_v37 = vunpack.c.l.b16 %v590_v27  ;;  %1693 = vrot.lane.b32.xlu2 %v5950_v25, %s6982_s8  ;;  %v1024_v38 = vrot.slane %v786_v62, 4  ;;  %v1025_v39 = vrot.slane %v789_v3, 5  ;;  %v1029_v40 = vshll.u32 %v5855_v10, 16  ;;  %v5878_v62 = vld [vmem:[%s7078_s7 + $0x40] sm:$0xf] }
  0x34   : > { %v792_v43 = vsel %vm7112_vm4, %v5837_v6, %v791_v32  ;;  %v804_v44 = vor.u32 %v802_v16, %v801_v34  ;;  %v1033_v46 = vrot.slane %v799_v8, 4  ;;  %v1034_v47 = vrot.slane %v802_v16, 5  ;;  %v5871_v10 = vld [vmem:[%s7078_s7 + $0x18] sm:$0x8]  ;;  %v5873_v27 = vld [vmem:[%s7078_s7 + $0x24] sm:$0x8] }
  0x35   : > { %v1728_v49 = vpack.c.b16 %v1712_v37, %v1711_v31  ;;  %v1756_v50 = vunpack.c.l.b16 %v792_v43  ;;  %v1026_v51 = vor.u32 %v1025_v39, %v1024_v38  ;;  %v1031_v56 = vrot.slane %v1029_v40, 5 }
  0x36   : > { %v805_v58 = vsel %vm7112_vm4, %v5838_v15, %v804_v44  ;;  %v1035_v59 = vor.u32 %v1034_v47, %v1033_v46  ;;  %v1038_v60 = vshll.u32 %v5856_v35, 16  ;;  %v1232_v63 = vshrl.u32 %v5875_v42, 16  ;;  %v5927_v46 = vld [vmem:[%s7078_s7 + $0x38] sm:$0x1] }
  0x37   : > { %1738 = vrot.lane.b32.xlu0 %v1728_v49, %s6986_s12  ;;  %v1757_v0 = vunpack.c.l.b16 %v805_v58  ;;  %v1027_v1 = vrot.slane %v1026_v51, 4  ;;  %v1237_v3 = vshrl.u32 %v5876_v48, 16  ;;  %v1240_v4 = vshll.u32 %v5876_v48, 16 }
  0x38   : > { %v1036_v5 = vrot.slane %v1035_v59, 4  ;;  %v1040_v6 = vrot.slane %v1038_v60, 5  ;;  %v5909_v7 = vrot.slane %v1232_v63, 11  ;;  %v1245_v8 = vshrl.u32 %v5877_v57, 16  ;;  %v5928_v59 = vld [vmem:[%s7078_s7 + $0x44] sm:$0x1] }
  0x39   : > { %v1773_v12 = vpack.c.b16 %v1757_v0, %v1756_v50  ;;  %v1032_v15 = vsel %vm7149_vm5, %v1027_v1, %v1031_v56  ;;  %v1239_v16 = vrot.slane %v1237_v3, 7  ;;  %v1250_v25 = vshrl.u32 %v5878_v62, 16  ;;  %v7238_v60 = vld [vmem:[%s7078_s7 + $0x34] sm:$0xf] }
  0x3a   : > { %v1041_v31 = vsel %vm7149_vm5, %v1036_v5, %v1040_v6  ;;  %v1864_v32 = vunpack.c.l.b16 %v1032_v15  ;;  %v5910_v34 = vrot.slane %v1245_v8, 11  ;;  %v1253_v35 = vshll.u32 %v5878_v62, 16  ;;  %v5853_v8 = vld [vmem:[%s7078_s7 + $0x14] sm:$0x1] }
  0x3b   : > { %1783 = vrot.lane.b32.xlu1 %v1773_v12, %s6985_s11  ;;  %v1865_v37 = vunpack.c.l.b16 %v1041_v31  ;;  %v1242_v38 = vor.u32 %v1240_v4, %v1239_v16  ;;  %v1252_v39 = vrot.slane %v1250_v25, 7  ;;  %v1206_v40 = vshrl.u32 %v5871_v10, 16  ;;  %v5854_v16 = vld [vmem:[%s7078_s7 + $0x20] sm:$0x1] }
  0x3c   : > { %v1213_v42 = vrot.slane %v1211_v45, 7  ;;  %v1219_v43 = vshrl.u32 %v5873_v27, 16  ;;  %v1226_v44 = vrot.slane %v1224_v54, 7  ;;  %v1475_v47 = vrot.slane %v1237_v3, 4 }
  0x3d   : > { %v1881_v48 = vpack.c.b16 %v1865_v37, %v1864_v32  ;;  %v1243_v49 = vsel %vm7112_vm4, %v5909_v7, %v1242_v38  ;;  %v1255_v50 = vor.u32 %v1253_v35, %v1252_v39  ;;  %v5907_v51 = vrot.slane %v1206_v40, 11  ;;  %v7263_v40 = vld [vmem:[%s7078_s7 + $0x40] sm:$0xf] }
  0x3e   : > { %v1909_v56 = vunpack.c.l.b16 %v1243_v49  ;;  %v1216_v57 = vor.u32 %v1214_v53, %v1213_v42  ;;  %v5908_v58 = vrot.slane %v1219_v43, 11  ;;  %v1229_v45 = vor.u32 %v1227_v55, %v1226_v44  ;;  %v5809_v43 = vld [vmem:[%s7078_s7 + $0x48] sm:$0x8]  ;;  %v7272_v44 = vld [vmem:[%s7078_s7 + $0x4c] sm:$0xf] }
  0x3f   : > { %1891 = vrot.lane.b32.xlu0 %v1881_v48, %s6988_s14  ;;  %v1256_v54 = vsel %vm7112_vm4, %v5910_v34, %v1255_v50  ;;  %v1476_v62 = vrot.slane %v1240_v4, 5  ;;  %v1480_v63 = vshll.u32 %v5927_v46, 16  ;;  %v1484_v0 = vrot.slane %v1250_v25, 4  ;;  %v5807_v34 = vld [vmem:[%s7078_s7 + $0x3c] sm:$0x8] }
  0x40   : > { %v1910_v53 = vunpack.c.l.b16 %v1256_v54  ;;  %v1217_v41 = vsel %vm7112_vm4, %v5907_v51, %v1216_v57  ;;  %v1230_v55 = vsel %vm7112_vm4, %v5908_v58, %v1229_v45  ;;  %v1485_v1 = vrot.slane %v1253_v35, 5  ;;  %v7277_v49 = vld [vmem:[%s7078_s7 + $0x40] sm:$0xf]  ;;  %v7280_v50 = vld [vmem:[%s7078_s7 + $0x48] sm:$0xf0] }
  0x41   : > { %v1907_v3 = vunpack.c.l.b16 %v1217_v41  ;;  %v1908_v5 = vunpack.c.l.b16 %v1230_v55  ;;  %v1477_v6 = vor.u32 %v1476_v62, %v1475_v47  ;;  %v1482_v7 = vrot.slane %v1480_v63, 5  ;;  %v7283_v57 = vld [vmem:[%s7078_s7 + $0x28] sm:$0xf]  ;;  %v7286_v58 = vld [vmem:[%s7078_s7 + $0x30] sm:$0xf0] }
  0x42   : > { %v1926_v4 = vpack.c.b16 %v1910_v53, %v1909_v56  ;;  %v1486_v10 = vor.u32 %v1485_v1, %v1484_v0  ;;  %v1489_v12 = vshll.u32 %v5928_v59, 16  ;;  %v5954_v15 = vor.u32 %v7244_v36, %v7238_v60  ;;  %v5879_v62 = vld [vmem:[%s7078_s7 + $0x48] sm:$0x8]  ;;  %v7295_v41 = vld [vmem:[%s7078_s7 + $0x4c] sm:$0xf] }
  0x43   : > { %v1925_v25 = vpack.c.b16 %v1908_v5, %v1907_v3  ;;  %v1478_v27 = vrot.slane %v1477_v6, 4  ;;  %v1006_v31 = vrot.slane %v760_v13, 4  ;;  %v1007_v32 = vrot.slane %v763_v14, 5  ;;  %v5881_v55 = vld [vmem:[%s7078_s7 + $0x54] sm:$0x8] }
  0x44   : > { %1936 = vrot.lane.b32.xlu1 %v1926_v4, %s6989_s21  ;;  %v1487_v35 = vrot.slane %v1486_v10, 4  ;;  %v1491_v37 = vrot.slane %v1489_v12, 5  ;;  %v1011_v38 = vshll.u32 %v5853_v8, 16  ;;  %v1015_v39 = vrot.slane %v773_v17, 4 }
  0x45   : > { %1934 = vrot.lane.b32.xlu2 %v1925_v25, %s6989_s21  ;;  %v1483_v9 = vsel %vm7149_vm5, %v1478_v27, %v1482_v7  ;;  %v1008_v13 = vor.u32 %v1007_v32, %v1006_v31  ;;  %v1016_v14 = vrot.slane %v776_v18, 5  ;;  %v1020_v42 = vshll.u32 %v5854_v16, 16  ;;  %v7302_v7 = vld [vmem:[%s7078_s7 + $0x58] sm:$0xf]  ;;  %v7314_v16 = vld [vmem:[%s7078_s7 + $0x4c] sm:$0xf] }
  0x46   : > { %v1492_v17 = vsel %vm7149_vm5, %v1487_v35, %v1491_v37  ;;  %v2017_v46 = vunpack.c.l.b16 %v1483_v9  ;;  %v1013_v47 = vrot.slane %v1011_v38, 5  ;;  %v807_v48 = vshrl.u32 %v5807_v34, 16  ;;  %v7321_v34 = vld [vmem:[%s7078_s7 + $0x54] sm:$0xf0]  ;;  %v7324_v35 = vld [vmem:[%s7078_s7 + $0x34] sm:$0xf] }
  0x47   : > { %v2018_v51 = vunpack.c.l.b16 %v1492_v17  ;;  %v1009_v11 = vrot.slane %v1008_v13, 4  ;;  %v1017_v18 = vor.u32 %v1016_v14, %v1015_v39  ;;  %v1022_v56 = vrot.slane %v1020_v42, 5  ;;  %v7327_v37 = vld [vmem:[%s7078_s7 + $0x4c] sm:$0xf]  ;;  %v7334_v13 = vld [vmem:[%s7078_s7 + $0x3c] sm:$0xf0] }
  0x48   : > { %v5839_v45 = vrot.slane %v807_v48, 11  ;;  %v812_v59 = vshrl.u32 %v7263_v40, 16  ;;  %v815_v60 = vshll.u32 %v7263_v40, 16  ;;  %v820_v54 = vshrl.u32 %v5809_v43, 16 }
  0x49   : > { %v2034_v63 = vpack.c.b16 %v2018_v51, %v2017_v46  ;;  %v1014_v0 = vsel %vm7149_vm5, %v1009_v11, %v1013_v47  ;;  %v1018_v36 = vrot.slane %v1017_v18, 4  ;;  %v825_v53 = vshrl.u32 %v7272_v44, 16  ;;  %v7341_v46 = vld [vmem:[%s7078_s7 + $0x4c] sm:$0xf]  ;;  %v7344_v47 = vld [vmem:[%s7078_s7 + $0x54] sm:$0xf0] }
  0x4a   : > { %v1862_v1 = vunpack.c.l.b16 %v1014_v0  ;;  %v814_v3 = vrot.slane %v812_v59, 7  ;;  %v5840_v5 = vrot.slane %v820_v54, 11  ;;  %v828_v6 = vshll.u32 %v7272_v44, 16  ;;  %v7351_v11 = vld [vmem:[%s7078_s7 + $0x58] sm:$0xf] }
  0x4b   : > { %2044 = vrot.lane.b32.xlu0 %v2034_v63, %s6987_s13  ;;  %v1023_v8 = vsel %vm7149_vm5, %v1018_v36, %v1022_v56  ;;  %v827_v4 = vrot.slane %v825_v53, 7  ;;  %v5990_v10 = vor.u32 %v7280_v50, %v7277_v49  ;;  %v5986_v12 = vor.u32 %v7286_v58, %v7283_v57 }
  0x4c   : > { %1695 = vrot.lane.b32.xlu1 %v5954_v15, %s6982_s8  ;;  %v1863_v25 = vunpack.c.l.b16 %v1023_v8  ;;  %v817_v27 = vor.u32 %v815_v60, %v814_v3  ;;  %v1258_v31 = vshrl.u32 %v5879_v62, 16  ;;  %v1263_v32 = vshrl.u32 %v7295_v41, 16 }
  0x4d   : > { %v830_v38 = vor.u32 %v828_v6, %v827_v4  ;;  %v1266_v15 = vshll.u32 %v7295_v41, 16  ;;  %v1271_v39 = vshrl.u32 %v5881_v55, 16  ;;  %v1276_v9 = vshrl.u32 %v7302_v7, 16  ;;  %v540_v55 = vld [vmem:[%s7078_s7 + $0x50] sm:$0x1] }
  0x4e   : > { %v1880_v14 = vpack.c.b16 %v1863_v25, %v1862_v1  ;;  %v818_v42 = vsel %vm7112_vm4, %v5839_v45, %v817_v27  ;;  %v5911_v43 = vrot.slane %v1258_v31, 11  ;;  %v1265_v17 = vrot.slane %v1263_v32, 7  ;;  %v541_v1 = vld [vmem:[%s7078_s7 + $0x5c] sm:$0x1] }
  0x4f   : > { %v831_v48 = vsel %vm7112_vm4, %v5840_v5, %v830_v38  ;;  %v1758_v49 = vunpack.c.l.b16 %v818_v42  ;;  %v5912_v50 = vrot.slane %v1271_v39, 11  ;;  %v1278_v51 = vrot.slane %v1276_v9, 7  ;;  %v7381_v38 = vld [vmem:[%s7078_s7 + $0x40] sm:$0xf] }
  0x50   : > { %1889 = vrot.lane.b32.xlu2 %v1880_v14, %s6988_s14  ;;  %v1759_v18 = vunpack.c.l.b16 %v831_v48  ;;  %v1268_v56 = vor.u32 %v1266_v15, %v1265_v17  ;;  %v1279_v45 = vshll.u32 %v7302_v7, 16  ;;  %v6026_v54 = vor.u32 %v7321_v34, %v7314_v16  ;;  %v7373_v16 = vld [vmem:[%s7078_s7 + $0x34] sm:$0xf] }
  0x51   : > { %v6022_v62 = vor.u32 %v7334_v13, %v7324_v35  ;;  %v5958_v63 = vor.u32 %v7344_v47, %v7341_v46  ;;  %v9244_v0 = vshrl.u32 %v7327_v37, 16  ;;  %v9242_v36 = vshll.u32 %v7327_v37, 16  ;;  %v7466_v13 = vld [vmem:[%s7078_s7 + $0x6c] sm:$0xf0] }
  0x52   : > { %v1774_v3 = vpack.c.b16 %v1759_v18, %v1758_v49  ;;  %v1269_v5 = vsel %vm7112_vm4, %v5911_v43, %v1268_v56  ;;  %v1281_v8 = vor.u32 %v1279_v45, %v1278_v51  ;;  %v9243_v4 = vshrl.u32 %v7351_v11, 16  ;;  %v538_v18 = vld [vmem:[%s7078_s7 + $0x38] sm:$0x1] }
  0x53   : > { %v1911_v25 = vunpack.c.l.b16 %v1269_v5  ;;  %v9241_v27 = vshll.u32 %v7351_v11, 16  ;;  %v609_v31 = vrot.slane %v9244_v0, 4  ;;  %v610_v34 = vrot.slane %v9242_v36, 5  ;;  %v5859_v0 = vld [vmem:[%s7078_s7 + $0x5c] sm:$0x1] }
  0x54   : > { %1785 = vrot.lane.b32.xlu0 %v1774_v3, %s6985_s11  ;;  %1848 = vrot.lane.b32.xlu1 %v5990_v10, %s6983_s9  ;;  %v1282_v39 = vsel %vm7112_vm4, %v5912_v50, %v1281_v8  ;;  %v614_v14 = vshll.u32 %v540_v55, 16  ;;  %v618_v42 = vrot.slane %v9243_v4, 4  ;;  %v623_v43 = vshll.u32 %v541_v1, 16  ;;  %v539_v3 = vld [vmem:[%s7078_s7 + $0x44] sm:$0x1] }
  0x55   : > { %v1912_v17 = vunpack.c.l.b16 %v1282_v39  ;;  %v611_v48 = vor.u32 %v610_v34, %v609_v31  ;;  %v619_v49 = vrot.slane %v9241_v27, 5  ;;  %v9246_v51 = vshrl.u32 %v7373_v16, 16  ;;  %v7398_v34 = vld [vmem:[%s7078_s7 + $0x58] sm:$0xf]  ;;  %v7401_v39 = vld [vmem:[%s7078_s7 + $0x60] sm:$0xf0] }
  0x56   : > { %v616_v56 = vrot.slane %v614_v14, 5  ;;  %v625_v10 = vrot.slane %v623_v43, 5  ;;  %v9245_v50 = vshll.u32 %v7373_v16, 16  ;;  %v9248_v55 = vshrl.u32 %v7381_v38, 16 }
  0x57   : > { %v1927_v5 = vpack.c.b16 %v1912_v17, %v1911_v25  ;;  %v612_v1 = vrot.slane %v611_v48, 4  ;;  %v620_v8 = vor.u32 %v619_v49, %v618_v42  ;;  %v9247_v31 = vshll.u32 %v7381_v38, 16  ;;  %v7414_v17 = vld [vmem:[%s7078_s7 + $0x58] sm:$0xf] }
  0x58   : > { %1846 = vrot.lane.b32.xlu2 %v5986_v12, %s6983_s9  ;;  %v591_v14 = vrot.slane %v9246_v51, 4  ;;  %v592_v25 = vrot.slane %v9245_v50, 5  ;;  %v596_v43 = vshll.u32 %v538_v18, 16  ;;  %v600_v42 = vrot.slane %v9248_v55, 4  ;;  %v7421_v12 = vld [vmem:[%s7078_s7 + $0x64] sm:$0xf] }
  0x59   : > { %v617_v48 = vsel %vm7149_vm5, %v612_v1, %v616_v56  ;;  %v621_v49 = vrot.slane %v620_v8, 4  ;;  %v601_v57 = vrot.slane %v9247_v31, 5  ;;  %v605_v58 = vshll.u32 %v539_v3, 16 }
  0x5a   : > { %v1715_v27 = vunpack.c.l.b16 %v617_v48  ;;  %v593_v36 = vor.u32 %v592_v25, %v591_v14  ;;  %v598_v4 = vrot.slane %v596_v43, 5  ;;  %v5994_v18 = vor.u32 %v7401_v39, %v7398_v34 }
  0x5b   : > { %v626_v50 = vsel %vm7149_vm5, %v621_v49, %v625_v10  ;;  %v602_v51 = vor.u32 %v601_v57, %v600_v42  ;;  %v607_v56 = vrot.slane %v605_v58, 5  ;;  %v838_v1 = vshrl.u32 %v7414_v17, 16  ;;  %v5860_v10 = vld [vmem:[%s7078_s7 + $0x68] sm:$0x1] }
  0x5c   : > { %1938 = vrot.lane.b32.xlu0 %v1927_v5, %s6989_s21  ;;  %2001 = vrot.lane.b32.xlu1 %v6026_v54, %s6984_s10  ;;  %v1716_v3 = vunpack.c.l.b16 %v626_v50  ;;  %v594_v8 = vrot.slane %v593_v36, 4  ;;  %v841_v14 = vshll.u32 %v7414_v17, 16  ;;  %v851_v25 = vshrl.u32 %v7421_v12, 16 }
  0x5d   : > { %v603_v43 = vrot.slane %v602_v51, 4  ;;  %v854_v48 = vshll.u32 %v7421_v12, 16  ;;  %v1060_v42 = vrot.slane %v838_v1, 4  ;;  %v1065_v49 = vshll.u32 %v5859_v0, 16  ;;  %v5857_v51 = vld [vmem:[%s7078_s7 + $0x44] sm:$0x1] }
  0x5e   : > { %v1730_v57 = vpack.c.b16 %v1716_v3, %v1715_v27  ;;  %v599_v54 = vsel %vm7149_vm5, %v594_v8, %v598_v4  ;;  %v1061_v36 = vrot.slane %v841_v14, 5  ;;  %v1069_v50 = vrot.slane %v851_v25, 4  ;;  %v5858_v27 = vld [vmem:[%s7078_s7 + $0x50] sm:$0x1] }
  0x5f   : > { %v608_v5 = vsel %vm7149_vm5, %v603_v43, %v607_v56  ;;  %v1713_v58 = vunpack.c.l.b16 %v599_v54  ;;  %v1067_v31 = vrot.slane %v1065_v49, 5  ;;  %v1070_v0 = vrot.slane %v854_v48, 5  ;;  %v7456_v56 = vld [vmem:[%s7078_s7 + $0x64] sm:$0xf] }
  0x60   : > { %1999 = vrot.lane.b32.xlu2 %v6022_v62, %s6984_s10  ;;  %v1714_v4 = vunpack.c.l.b16 %v608_v5  ;;  %v1062_v3 = vor.u32 %v1061_v36, %v1060_v42  ;;  %v1074_v8 = vshll.u32 %v5860_v10, 16  ;;  %v1042_v55 = vrot.slane %v812_v59, 4  ;;  %v7459_v43 = vld [vmem:[%s7078_s7 + $0x64] sm:$0xf] }
  0x61   : > { %v1071_v49 = vor.u32 %v1070_v0, %v1069_v50  ;;  %v1043_v54 = vrot.slane %v815_v60, 5  ;;  %v1047_v22 = vshll.u32 %v5857_v51, 16  ;;  %v1051_v35 = vrot.slane %v825_v53, 4  ;;  %v7471_v0 = vld [vmem:[%s7078_s7 + $0x70] sm:$0xf] }
  0x62   : > { %v1729_v62 = vpack.c.b16 %v1714_v4, %v1713_v58  ;;  %v1063_v10 = vrot.slane %v1062_v3, 4  ;;  %v1076_v42 = vrot.slane %v1074_v8, 5  ;;  %v1052_v59 = vrot.slane %v828_v6, 5  ;;  %v5931_v53 = vld [vmem:[%s7078_s7 + $0x68] sm:$0x1] }
  0x63   : > { %v1072_v36 = vrot.slane %v1071_v49, 4  ;;  %v1044_v5 = vor.u32 %v1043_v54, %v1042_v55  ;;  %v1049_v33 = vrot.slane %v1047_v22, 5  ;;  %v1056_v50 = vshll.u32 %v5858_v27, 16  ;;  %v5932_v4 = vld [vmem:[%s7078_s7 + $0x74] sm:$0x1] }
  0x64   : > { %1697 = vrot.lane.b32.xlu0 %v5958_v63, %s6982_s8  ;;  %1742 = vrot.lane.b32.xlu1 %v1730_v57, %s6986_s12  ;;  %v1068_v40 = vsel %vm7149_vm5, %v1063_v10, %v1067_v31  ;;  %v1053_v60 = vor.u32 %v1052_v59, %v1051_v35  ;;  %v6030_v44 = vor.u32 %v7466_v13, %v7456_v56  ;;  %v1289_v22 = vshrl.u32 %v7459_v43, 16 }
  0x65   : > { %v1077_v6 = vsel %vm7149_vm5, %v1072_v36, %v1076_v42  ;;  %v1868_v55 = vunpack.c.l.b16 %v1068_v40  ;;  %v1045_v51 = vrot.slane %v1044_v5, 4  ;;  %v1058_v46 = vrot.slane %v1056_v50, 5  ;;  %v5929_v42 = vld [vmem:[%s7078_s7 + $0x50] sm:$0x1]  ;;  %v5930_v50 = vld [vmem:[%s7078_s7 + $0x5c] sm:$0x1] }
  0x66   : > { %v1869_v47 = vunpack.c.l.b16 %v1077_v6  ;;  %v1054_v63 = vrot.slane %v1053_v60, 4  ;;  %v1292_v57 = vshll.u32 %v7459_v43, 16  ;;  %v1302_v31 = vshrl.u32 %v7471_v0, 16  ;;  %v7510_v6 = vld [vmem:[%s7078_s7 + $0x64] sm:$0xf] }
  0x67   : > { %v1050_v58 = vsel %vm7149_vm5, %v1045_v51, %v1049_v33  ;;  %v1305_v27 = vshll.u32 %v7471_v0, 16  ;;  %v1511_v3 = vrot.slane %v1289_v22, 4  ;;  %v1516_v8 = vshll.u32 %v5931_v53, 16 }
  0x68   : > { %1740 = vrot.lane.b32.xlu2 %v1729_v62, %s6986_s12  ;;  %v1883_v49 = vpack.c.b16 %v1869_v47, %v1868_v55  ;;  %v1059_v54 = vsel %vm7149_vm5, %v1054_v63, %v1058_v46  ;;  %v1866_v35 = vunpack.c.l.b16 %v1050_v58  ;;  %v1512_v10 = vrot.slane %v1292_v57, 5  ;;  %v7522_v58 = vld [vmem:[%s7078_s7 + $0x70] sm:$0xf] }
  0x69   : > { %v1867_v33 = vunpack.c.l.b16 %v1059_v54  ;;  %v1518_v59 = vrot.slane %v1516_v8, 5  ;;  %v1520_v36 = vrot.slane %v1302_v31, 4  ;;  %v1521_v5 = vrot.slane %v1305_v27, 5  ;;  %v542_v54 = vld [vmem:[%s7078_s7 + $0x68] sm:$0x1] }
  0x6a   : > { %v1513_v62 = vor.u32 %v1512_v10, %v1511_v3  ;;  %v1525_v40 = vshll.u32 %v5932_v4, 16  ;;  %v1493_v60 = vrot.slane %v1263_v32, 4  ;;  %v1494_v53 = vrot.slane %v1266_v15, 5 }
  0x6b   : > { %v1882_v55 = vpack.c.b16 %v1867_v33, %v1866_v35  ;;  %v1522_v51 = vor.u32 %v1521_v5, %v1520_v36  ;;  %v1498_v46 = vshll.u32 %v5929_v42, 16  ;;  %v1502_v47 = vrot.slane %v1276_v9, 4  ;;  %v543_v5 = vld [vmem:[%s7078_s7 + $0x74] sm:$0x1] }
  0x6c   : > { %1850 = vrot.lane.b32.xlu0 %v5994_v18, %s6983_s9  ;;  %1895 = vrot.lane.b32.xlu1 %v1883_v49, %s6988_s14  ;;  %v1514_v32 = vrot.slane %v1513_v62, 4  ;;  %v1527_v63 = vrot.slane %v1525_v40, 5  ;;  %v1495_v41 = vor.u32 %v1494_v53, %v1493_v60  ;;  %v1503_v15 = vrot.slane %v1279_v45, 5 }
  0x6d   : > { %v1523_v4 = vrot.slane %v1522_v51, 4  ;;  %v1500_v3 = vrot.slane %v1498_v46, 5  ;;  %v1507_v8 = vshll.u32 %v5930_v50, 16  ;;  %v410_v9 = vshrl.u32 %v7510_v6, 16  ;;  %v5816_v50 = vld [vmem:[%s7078_s7 + $0x70] sm:$0xf] }
  0x6e   : > { %v1519_v34 = vsel %vm7149_vm5, %v1514_v32, %v1518_v59  ;;  %v1496_v39 = vrot.slane %v1495_v41, 4  ;;  %v1504_v18 = vor.u32 %v1503_v15, %v1502_v47  ;;  %v413_v49 = vshll.u32 %v7510_v6, 16 }
  0x6f   : > { %v1528_v7 = vsel %vm7149_vm5, %v1523_v4, %v1527_v63  ;;  %v2021_v45 = vunpack.c.l.b16 %v1519_v34  ;;  %v1509_v35 = vrot.slane %v1507_v8, 5  ;;  %v423_v10 = vshrl.u32 %v7522_v58, 16  ;;  %v5817_v63 = vld [vmem:[%s7078_s7 + $0x78] sm:$0x8]  ;;  %v5818_v8 = vld [vmem:[%s7078_s7 + $0x7c] sm:$0xf] }
  0x70   : > { %1893 = vrot.lane.b32.xlu2 %v1882_v55, %s6988_s14  ;;  %v2022_v42 = vunpack.c.l.b16 %v1528_v7  ;;  %v1501_v33 = vsel %vm7149_vm5, %v1496_v39, %v1500_v3  ;;  %v1505_v59 = vrot.slane %v1504_v18, 4  ;;  %v426_v36 = vshll.u32 %v7522_v58, 16  ;;  %v5815_v55 = vld [vmem:[%s7078_s7 + $0x6c] sm:$0x8]  ;;  %v5811_v7 = vld [vmem:[%s7078_s7 + $0x54] sm:$0x8] }
  0x71   : > { %v2019_v62 = vunpack.c.l.b16 %v1501_v33  ;;  %v627_v40 = vrot.slane %v410_v9, 4  ;;  %v628_v60 = vrot.slane %v413_v49, 5  ;;  %v632_v53 = vshll.u32 %v542_v54, 16 }
  0x72   : > { %v2036_v51 = vpack.c.b16 %v2022_v42, %v2021_v45  ;;  %v1510_v46 = vsel %vm7149_vm5, %v1505_v59, %v1509_v35  ;;  %v636_v47 = vrot.slane %v423_v10, 4  ;;  %v637_v32 = vrot.slane %v426_v36, 5 }
  0x73   : > { %v2020_v41 = vunpack.c.l.b16 %v1510_v46  ;;  %v629_v15 = vor.u32 %v628_v60, %v627_v40  ;;  %v634_v4 = vrot.slane %v632_v53, 5  ;;  %v641_v3 = vshll.u32 %v543_v5, 16  ;;  %v5813_v53 = vld [vmem:[%s7078_s7 + $0x60] sm:$0x8] }
  0x74   : > { %2003 = vrot.lane.b32.xlu0 %v6030_v44, %s6984_s10  ;;  %2048 = vrot.lane.b32.xlu1 %v2036_v51, %s6987_s13  ;;  %v638_v34 = vor.u32 %v637_v32, %v636_v47  ;;  %v859_v39 = vshrl.u32 %v5815_v55, 16  ;;  %v864_v18 = vshrl.u32 %v5816_v50, 16  ;;  %v867_v54 = vshll.u32 %v5816_v50, 16 }
  0x75   : > { %v2035_v45 = vpack.c.b16 %v2020_v41, %v2019_v62  ;;  %v630_v35 = vrot.slane %v629_v15, 4  ;;  %v643_v42 = vrot.slane %v641_v3, 5  ;;  %v872_v33 = vshrl.u32 %v5817_v63, 16  ;;  %v5861_v15 = vld [vmem:[%s7078_s7 + $0x74] sm:$0x1] }
  0x76   : > { %v639_v59 = vrot.slane %v638_v34, 4  ;;  %v5843_v5 = vrot.slane %v859_v39, 11  ;;  %v866_v40 = vrot.slane %v864_v18, 7  ;;  %v877_v60 = vshrl.u32 %v5818_v8, 16 }
  0x77   : > { %v635_v56 = vsel %vm7149_vm5, %v630_v35, %v634_v4  ;;  %v5844_v13 = vrot.slane %v872_v33, 11  ;;  %v880_v44 = vshll.u32 %v5818_v8, 16  ;;  %v833_v51 = vshrl.u32 %v5811_v7, 16  ;;  %v5862_v33 = vld [vmem:[%s7078_s7 + $0x80] sm:$0x1] }
  0x78   : > { %2046 = vrot.lane.b32.xlu2 %v2035_v45, %s6987_s13  ;;  %v644_v50 = vsel %vm7149_vm5, %v639_v59, %v643_v42  ;;  %v1717_v62 = vunpack.c.l.b16 %v635_v56  ;;  %v869_v55 = vor.u32 %v867_v54, %v866_v40  ;;  %v879_v46 = vrot.slane %v877_v60, 7  ;;  %v5887_v40 = vld [vmem:[%s7078_s7 + $0x78] sm:$0x8] }
  0x79   : > { %v1718_v47 = vunpack.c.l.b16 %v644_v50  ;;  %v5841_v32 = vrot.slane %v833_v51, 11  ;;  %v840_v63 = vrot.slane %v838_v1, 7  ;;  %v846_v41 = vshrl.u32 %v5813_v53, 16  ;;  %v5888_v53 = vld [vmem:[%s7078_s7 + $0x7c] sm:$0xf] }
  0x7a   : > { %v870_v4 = vsel %vm7112_vm4, %v5843_v5, %v869_v55  ;;  %v882_v3 = vor.u32 %v880_v44, %v879_v46  ;;  %v853_v8 = vrot.slane %v851_v25, 7  ;;  %v1078_v34 = vrot.slane %v864_v18, 4  ;;  %v5890_v46 = vld [vmem:[%s7078_s7 + $0x88] sm:$0xf] }
  0x7b   : > { %v1731_v39 = vpack.c.b16 %v1718_v47, %v1717_v62  ;;  %v1762_v7 = vunpack.c.l.b16 %v870_v4  ;;  %v843_v45 = vor.u32 %v841_v14, %v840_v63  ;;  %v5842_v35 = vrot.slane %v846_v41, 11 }
  0x7c   : > { %v883_v1 = vsel %vm7112_vm4, %v5844_v13, %v882_v3  ;;  %v856_v42 = vor.u32 %v854_v48, %v853_v8  ;;  %v1079_v59 = vrot.slane %v867_v54, 5  ;;  %v1083_v5 = vshll.u32 %v5861_v15, 16  ;;  %v5889_v54 = vld [vmem:[%s7078_s7 + $0x84] sm:$0x8]  ;;  %v5883_v3 = vld [vmem:[%s7078_s7 + $0x60] sm:$0x8] }
  0x7d   : > { %1744 = vrot.lane.b32.xlu0 %v1731_v39, %s6986_s12  ;;  %v1763_v25 = vunpack.c.l.b16 %v883_v1  ;;  %v844_v18 = vsel %vm7112_vm4, %v5841_v32, %v843_v45  ;;  %v1087_v17 = vrot.slane %v877_v60, 4  ;;  %v1088_v14 = vrot.slane %v880_v44, 5  ;;  %v5885_v45 = vld [vmem:[%s7078_s7 + $0x6c] sm:$0x8] }
  0x7e   : > { %v857_v56 = vsel %vm7112_vm4, %v5842_v35, %v856_v42  ;;  %v1760_v12 = vunpack.c.l.b16 %v844_v18  ;;  %v1080_v13 = vor.u32 %v1079_v59, %v1078_v34  ;;  %v1085_v48 = vrot.slane %v1083_v5, 5 }
  0x7f   : > { %v1776_v51 = vpack.c.b16 %v1763_v25, %v1762_v7  ;;  %v1761_v50 = vunpack.c.l.b16 %v857_v56  ;;  %v1089_v62 = vor.u32 %v1088_v14, %v1087_v17  ;;  %v1092_v55 = vshll.u32 %v5862_v33, 16 }
  0x80   : > { %v1081_v47 = vrot.slane %v1080_v13, 4  ;;  %v1310_v32 = vshrl.u32 %v5887_v40, 16  ;;  %v1315_v60 = vshrl.u32 %v5888_v53, 16  ;;  %v1318_v44 = vshll.u32 %v5888_v53, 16  ;;  %v5933_v53 = vld [vmem:[%s7078_s7 + $0x80] sm:$0x1] }
  0x81   : > { %1789 = vrot.lane.b32.xlu1 %v1776_v51, %s6985_s11  ;;  %v1775_v63 = vpack.c.b16 %v1761_v50, %v1760_v12  ;;  %v1090_v41 = vrot.slane %v1089_v62, 4  ;;  %v1094_v15 = vrot.slane %v1092_v55, 5  ;;  %v1323_v4 = vshrl.u32 %v5889_v54, 16  ;;  %v5934_v51 = vld [vmem:[%s7078_s7 + $0x8c] sm:$0x1] }
  0x82   : > { %v1086_v8 = vsel %vm7149_vm5, %v1081_v47, %v1085_v48  ;;  %v5915_v34 = vrot.slane %v1310_v32, 11  ;;  %v1317_v39 = vrot.slane %v1315_v60, 7  ;;  %v1328_v7 = vshrl.u32 %v5890_v46, 16  ;;  %v7607_v55 = vld [vmem:[%s7078_s7 + $0x7c] sm:$0xf] }
  0x83   : > { %1787 = vrot.lane.b32.xlu2 %v1775_v63, %s6985_s11  ;;  %v1095_v35 = vsel %vm7149_vm5, %v1090_v41, %v1094_v15  ;;  %v1870_v1 = vunpack.c.l.b16 %v1086_v8  ;;  %v5916_v42 = vrot.slane %v1323_v4, 11  ;;  %v1331_v33 = vshll.u32 %v5890_v46, 16  ;;  %v7610_v46 = vld [vmem:[%s7078_s7 + $0x84] sm:$0xf0]  ;;  %v7616_v63 = vld [vmem:[%s7078_s7 + $0x64] sm:$0xf] }
  0x84   : > { %v1871_v59 = vunpack.c.l.b16 %v1095_v35  ;;  %v1320_v5 = vor.u32 %v1318_v44, %v1317_v39  ;;  %v1330_v25 = vrot.slane %v1328_v7, 7  ;;  %v1284_v18 = vshrl.u32 %v5883_v3, 16  ;;  %v7623_v15 = vld [vmem:[%s7078_s7 + $0x6c] sm:$0xf0]  ;;  %v5819_v4 = vld [vmem:[%s7078_s7 + $0x84] sm:$0x8] }
  0x85   : > { %v1291_v17 = vrot.slane %v1289_v22, 7  ;;  %v1297_v14 = vshrl.u32 %v5885_v45, 16  ;;  %v1304_v40 = vrot.slane %v1302_v31, 7  ;;  %v1529_v56 = vrot.slane %v1315_v60, 4  ;;  %v7627_v39 = vld [vmem:[%s7078_s7 + $0x88] sm:$0xf] }
  0x86   : > { %v1884_v12 = vpack.c.b16 %v1871_v59, %v1870_v1  ;;  %v1321_v13 = vsel %vm7112_vm4, %v5915_v34, %v1320_v5  ;;  %v1333_v48 = vor.u32 %v1331_v33, %v1330_v25  ;;  %v5913_v54 = vrot.slane %v1284_v18, 11 }
  0x87   : > { %v1915_v50 = vunpack.c.l.b16 %v1321_v13  ;;  %v1294_v62 = vor.u32 %v1292_v57, %v1291_v17  ;;  %v5914_v22 = vrot.slane %v1297_v14, 11  ;;  %v1307_v31 = vor.u32 %v1305_v27, %v1304_v40  ;;  %v7638_v17 = vld [vmem:[%s7078_s7 + $0x88] sm:$0xf]  ;;  %v7641_v14 = vld [vmem:[%s7078_s7 + $0x90] sm:$0xf0] }
  0x88   : > { %1897 = vrot.lane.b32.xlu0 %v1884_v12, %s6988_s14  ;;  %v1334_v47 = vsel %vm7112_vm4, %v5916_v42, %v1333_v48  ;;  %v1530_v32 = vrot.slane %v1318_v44, 5  ;;  %v1534_v60 = vshll.u32 %v5933_v53, 16  ;;  %v1538_v43 = vrot.slane %v1328_v7, 4  ;;  %v5821_v42 = vld [vmem:[%s7078_s7 + $0x90] sm:$0x8] }
  0x89   : > { %v1916_v57 = vunpack.c.l.b16 %v1334_v47  ;;  %v1295_v0 = vsel %vm7112_vm4, %v5913_v54, %v1294_v62  ;;  %v1308_v27 = vsel %vm7112_vm4, %v5914_v22, %v1307_v31  ;;  %v1539_v41 = vrot.slane %v1331_v33, 5  ;;  %v7633_v33 = vld [vmem:[%s7078_s7 + $0x94] sm:$0xf]  ;;  %v263_v40 = vld [vmem:[%s7078_s7 + $0xc] sm:$0x8] }
  0x8a   : > { %v1913_v3 = vunpack.c.l.b16 %v1295_v0  ;;  %v1914_v44 = vunpack.c.l.b16 %v1308_v27  ;;  %v1531_v8 = vor.u32 %v1530_v32, %v1529_v56  ;;  %v1536_v34 = vrot.slane %v1534_v60, 5  ;;  %v7648_v48 = vld [vmem:[%s7078_s7 + $0x70] sm:$0xf]  ;;  %v7655_v22 = vld [vmem:[%s7078_s7 + $0x78] sm:$0xf0] }
  0x8b   : > { %v1929_v7 = vpack.c.b16 %v1916_v57, %v1915_v50  ;;  %v1540_v45 = vor.u32 %v1539_v41, %v1538_v43  ;;  %v1543_v35 = vshll.u32 %v5934_v51, 16  ;;  %v5966_v1 = vor.u32 %v7610_v46, %v7607_v55  ;;  %v261_v60 = vld [vmem:[%s7078_s7] sm:$0x8] }
  0x8c   : > { %v1928_v59 = vpack.c.b16 %v1914_v44, %v1913_v3  ;;  %v1532_v5 = vrot.slane %v1531_v8, 4  ;;  %v5962_v25 = vor.u32 %v7623_v15, %v7616_v63  ;;  %v885_v18 = vshrl.u32 %v5819_v4, 16  ;;  %v267_v44 = vld [vmem:[%s7078_s7 + $0x24] sm:$0x8] }
  0x8d   : > { %1942 = vrot.lane.b32.xlu1 %v1929_v7, %s6989_s21  ;;  %v1541_v53 = vrot.slane %v1540_v45, 4  ;;  %v1545_v56 = vrot.slane %v1543_v35, 5  ;;  %v890_v12 = vshrl.u32 %v7627_v39, 16  ;;  %v893_v13 = vshll.u32 %v7627_v39, 16 }
  0x8e   : > { %1940 = vrot.lane.b32.xlu2 %v1928_v59, %s6989_s21  ;;  %v1537_v54 = vsel %vm7149_vm5, %v1532_v5, %v1536_v34  ;;  %v5845_v51 = vrot.slane %v885_v18, 11  ;;  %v898_v50 = vshrl.u32 %v5821_v42, 16  ;;  %v903_v62 = vshrl.u32 %v7633_v33, 16  ;;  %v7657_v31 = vpop.permute.xlu0 %1691  ;;  %v265_v5 = vld [vmem:[%s7078_s7 + $0x18] sm:$0x8] }
  0x8f   : > { %v1546_v55 = vsel %vm7149_vm5, %v1541_v53, %v1545_v56  ;;  %v2023_v46 = vunpack.c.l.b16 %v1537_v54  ;;  %v892_v47 = vrot.slane %v890_v12, 7  ;;  %v906_v32 = vshll.u32 %v7633_v33, 16  ;;  %v7669_v27 = vpop.permute.xlu1 %1844  ;;  %v2229_v56 = vld [vmem:[%s9237_s1 + $0x20] sm:$0xf]  ;;  %v6041_v33 = vld [vmem:[%s7078_s7 + $0xac] sm:$0xf] }
  0x90   : > { %v2024_v43 = vunpack.c.l.b16 %v1546_v55  ;;  %v5846_v63 = vrot.slane %v898_v50, 11  ;;  %v905_v57 = vrot.slane %v903_v62, 7  ;;  %v6002_v0 = vor.u32 %v7641_v14, %v7638_v17 }
  0x91   : > { %v895_v41 = vor.u32 %v893_v13, %v892_v47  ;;  %v5998_v15 = vor.u32 %v7655_v22, %v7648_v48  ;;  %v314_v4 = vshrl.u32 %v263_v40, 16  ;;  %v321_v3 = vrot.slane %v319_v29, 7 }
  0x92   : > { %v2037_v8 = vpack.c.b16 %v2024_v43, %v2023_v46  ;;  %v908_v34 = vor.u32 %v906_v32, %v905_v57  ;;  %v301_v7 = vshrl.u32 %v261_v60, 16  ;;  %v308_v59 = vrot.slane %v306_v24, 7  ;;  %v5891_v60 = vld [vmem:[%s7078_s7 + $0x90] sm:$0x8]  ;;  %v7714_v57 = vld [vmem:[%s7078_s7 + $0xa0] sm:$0xf] }
  0x93   : > { %v896_v45 = vsel %vm7112_vm4, %v5845_v51, %v895_v41  ;;  %v5782_v35 = vrot.slane %v314_v4, 11  ;;  %v324_v42 = vor.u32 %v322_v30, %v321_v3  ;;  %v340_v53 = vshrl.u32 %v267_v44, 16  ;;  %v7701_v51 = vld [vmem:[%s7078_s7 + $0x94] sm:$0xf]  ;;  %v5893_v44 = vld [vmem:[%s7078_s7 + $0x9c] sm:$0x8] }
  0x94   : > { %2050 = vrot.lane.b32.xlu0 %v2037_v8, %s6987_s13  ;;  %v909_v29 = vsel %vm7112_vm4, %v5846_v63, %v908_v34  ;;  %v1764_v18 = vunpack.c.l.b16 %v896_v45  ;;  %v5781_v40 = vrot.slane %v301_v7, 11  ;;  %v311_v30 = vor.u32 %v309_v28, %v308_v59  ;;  %v7720_v8 = vld [vmem:[%s7078_s7 + $0x94] sm:$0xf] }
  0x95   : > { %1701 = vrot.lane.b32.xlu1 %v5966_v1, %s6982_s8  ;;  %v1765_v20 = vunpack.c.l.b16 %v909_v29  ;;  %v325_v24 = vsel %vm7112_vm4, %v5782_v35, %v324_v42  ;;  %v347_v54 = vrot.slane %v345_v23, 7  ;;  %v5784_v55 = vrot.slane %v340_v53, 11  ;;  %v1694_v1 = vpop.permute.xlu2 %1693  ;;  %v7726_v35 = vld [vmem:[%s7078_s7 + $0x9c] sm:$0xf0]  ;;  %v7729_v42 = vld [vmem:[%s7078_s7 + $0x7c] sm:$0xf] }
  0x96   : > { %1699 = vrot.lane.b32.xlu2 %v5962_v25, %s6982_s8  ;;  %v1620_v50 = vunpack.c.l.b16 %v325_v24  ;;  %v327_v46 = vshrl.u32 %v265_v5, 16  ;;  %v334_v47 = vrot.slane %v332_v21, 7  ;;  %v7707_v19 = vpop.permute.xlu0 %1997  ;;  %v312_v23 = vsel %vm7112_vm4, %v5781_v40, %v311_v30  ;;  %v7738_v40 = vld [vmem:[%s7078_s7 + $0x84] sm:$0xf0] }
  0x97   : > { %v1777_v28 = vpack.c.b16 %v1765_v20, %v1764_v18  ;;  %v9271_v25 = vshll.u32 %v7169_v2, 16  ;;  %v2249_v63 = vunpack.c.l.b16 %v2229_v56  ;;  %v1619_v41 = vunpack.c.l.b16 %v312_v23  ;;  %v7743_v56 = vld [vmem:[%s7078_s7 + $0x94] sm:$0xf]  ;;  %v6671_v23 = vld [vmem:[%s9237_s1 + $0x18] sm:$0xff] }
  0x98   : > { %v5783_v4 = vrot.slane %v327_v46, 11  ;;  %v9272_v21 = vshll.u32 %v7160_v61, 16  ;;  %v1336_v7 = vshrl.u32 %v5891_v60, 16  ;;  %v1341_v45 = vshrl.u32 %v7701_v51, 16  ;;  %v7732_v61 = vld [vmem:[%s7078_s7 + $0x94] sm:$0xf] }
  0x99   : > { %v350_v43 = vor.u32 %v9271_v25, %v347_v54  ;;  %v2254_v2 = vpack.c.b16 %v2249_v63, %v2249_v63  ;;  %v1637_v59 = vpack.c.b16 %v1620_v50, %v1619_v41  ;;  %v1344_v18 = vshll.u32 %v7701_v51, 16  ;;  %v7749_v50 = vld [vmem:[%s7078_s7 + $0x9c] sm:$0xf0]  ;;  %v546_v41 = vld [vmem:[%s7078_s7 + $0x98] sm:$0x1] }
  0x9a   : > { %v337_v3 = vor.u32 %v9272_v21, %v334_v47  ;;  %v7740_v53 = vpop.permute.xlu1 %1781  ;;  %v5917_v30 = vrot.slane %v1336_v7, 11  ;;  %v1343_v54 = vrot.slane %v1341_v45, 7  ;;  %v1349_v46 = vshrl.u32 %v5893_v44, 16  ;;  %v7762_v25 = vld [vmem:[%s7078_s7 + $0xa0] sm:$0xf] }
  0x9b   : > { %v351_v34 = vsel %vm7112_vm4, %v5784_v55, %v350_v43  ;;  %v2280_v24 = vsel %vm2278_vm7, %v2254_v2, 0  ;;  %v7754_v55 = vsel %vm2060_vm6, %v1637_v59, %v7657_v31  ;;  %v1354_v47 = vshrl.u32 %v7714_v57, 16  ;;  %v547_v21 = vld [vmem:[%s7078_s7 + $0xa4] sm:$0x1]  ;;  %v7958_v51 = vld [vmem:[%s7078_s7 + $0xac] sm:$0xf] }
  0x9c   : > { %v1622_v5 = vunpack.c.l.b16 %v351_v34  ;;  %v338_v29 = vsel %vm7112_vm4, %v5783_v4, %v337_v3  ;;  %1791 = vrot.lane.b32.xlu0 %v1777_v28, %s6985_s11  ;;  %2285 = vmatpush.bf16.msra.mxu0 %v2280_v24  ;;  %v1357_v60 = vshll.u32 %v7714_v57, 16  ;;  %v1346_v28 = vor.u32 %v1344_v18, %v1343_v54 }
  0x9d   : > { %v1621_v20 = vunpack.c.l.b16 %v338_v29  ;;  %1854 = vrot.lane.b32.xlu1 %v6002_v0, %s6983_s9  ;;  %v6038_v43 = vor.u32 %v7726_v35, %v7720_v8  ;;  %v6034_v63 = vor.u32 %v7738_v40, %v7729_v42  ;;  %v5918_v4 = vrot.slane %v1349_v46, 11 }
  0x9e   : > { %1852 = vrot.lane.b32.xlu2 %v5998_v15, %s6983_s9  ;;  %v1356_v17 = vrot.slane %v1354_v47, 7  ;;  %v5970_v14 = vor.u32 %v7749_v50, %v7743_v56  ;;  %v9254_v0 = vshrl.u32 %v7732_v61, 16  ;;  %v1347_v44 = vsel %vm7112_vm4, %v5917_v30, %v1346_v28  ;;  %v7793_v15 = vld [vmem:[%s7078_s7 + $0x7c] sm:$0xf]  ;;  %v1737_v8 = vpop.permute.xlu0 %1736 }
  0x9f   : > { %v1638_v31 = vpack.c.b16 %v1622_v5, %v1621_v20  ;;  %v9251_v48 = vshll.u32 %v7732_v61, 16  ;;  %v9252_v22 = vshrl.u32 %v7762_v25, 16  ;;  %v1917_v2 = vunpack.c.l.b16 %v1347_v44  ;;  %v7797_v7 = vpop.permute.xlu2 %1934  ;;  %v7810_v20 = vld [vmem:[%s7078_s7 + $0x88] sm:$0xf]  ;;  %v545_v44 = vld [vmem:[%s7078_s7 + $0x8c] sm:$0x1] }
  0xa0   : > { %v1359_v34 = vor.u32 %v1357_v60, %v1356_v17  ;;  %2286 = vmatpush.bf16.msra.mxu0 %v6671_v23  ;;  %v9253_v35 = vshll.u32 %v7762_v25, 16  ;;  %v663_v42 = vrot.slane %v9254_v0, 4  ;;  %v668_v5 = vshll.u32 %v546_v41, 16  ;;  %v544_v23 = vld [vmem:[%s7078_s7 + $0x80] sm:$0x1] }
  0xa1   : > { %v7786_v3 = vsel %vm2060_vm6, %v1638_v31, %v1694_v1  ;;  %v6670_v1 = vld [vmem:[%s9237_s1 + $0x10] sm:$0xff]  ;;  %v664_v59 = vrot.slane %v9251_v48, 5  ;;  %v672_v29 = vrot.slane %v9252_v22, 4  ;;  %v677_v40 = vshll.u32 %v547_v21, 16 }
  0xa2   : > { %v1360_v24 = vsel %vm7112_vm4, %v5918_v4, %v1359_v34  ;;  %v673_v30 = vrot.slane %v9253_v35, 5  ;;  %v9262_v54 = vshrl.u32 %v7793_v15, 16  ;;  %v9261_v46 = vshll.u32 %v7793_v15, 16  ;;  %v6669_v35 = vld [vmem:[%s9237_s1 + $0x8] sm:$0xff] }
  0xa3   : > { %v1918_v31 = vunpack.c.l.b16 %v1360_v24  ;;  %v665_v28 = vor.u32 %v664_v59, %v663_v42  ;;  %v670_v41 = vrot.slane %v668_v5, 5  ;;  %v679_v17 = vrot.slane %v677_v40, 5  ;;  %v7820_v48 = vpop.permute.xlu1 %2042 }
  0xa4   : > { %2287 = vmatpush.bf16.msra.mxu0 %v6670_v1  ;;  %v674_v21 = vor.u32 %v673_v30, %v672_v29  ;;  %v9260_v22 = vshrl.u32 %v7810_v20, 16  ;;  %v9259_v4 = vshll.u32 %v7810_v20, 16  ;;  %v645_v34 = vrot.slane %v9262_v54, 4 }
  0xa5   : > { %v1930_v24 = vpack.c.b16 %v1918_v31, %v1917_v2  ;;  %2007 = vrot.lane.b32.xlu1 %v6038_v43, %s6984_s10  ;;  %v666_v42 = vrot.slane %v665_v28, 4  ;;  %v646_v59 = vrot.slane %v9261_v46, 5  ;;  %v650_v1 = vshll.u32 %v544_v23, 16 }
  0xa6   : > { %2005 = vrot.lane.b32.xlu2 %v6034_v63, %s6984_s10  ;;  %v675_v5 = vrot.slane %v674_v21, 4  ;;  %v654_v29 = vrot.slane %v9260_v22, 4  ;;  %v655_v40 = vrot.slane %v9259_v4, 5  ;;  %v659_v30 = vshll.u32 %v545_v44, 16  ;;  %v6668_v44 = vld [vmem:[%s9237_s1] sm:$0xff] }
  0xa7   : > { %1944 = vrot.lane.b32.xlu0 %v1930_v24, %s6989_s21  ;;  %v671_v43 = vsel %vm7149_vm5, %v666_v42, %v670_v41  ;;  %v647_v2 = vor.u32 %v646_v59, %v645_v34  ;;  %v652_v23 = vrot.slane %v650_v1, 5  ;;  %v7846_v24 = vld [vmem:[%s7078_s7 + $0xa0] sm:$0xf]  ;;  %v2090_v34 = vsel %vm2088_vm8, %v7754_v55, %v1737_v8  ;;  %v7854_v42 = vld [vmem:[%s7078_s7 + $0xa8] sm:$0xf0] }
  0xa8   : > { %v680_v63 = vsel %vm7149_vm5, %v675_v5, %v679_v17  ;;  %v1721_v31 = vunpack.c.l.b16 %v671_v43  ;;  %v656_v28 = vor.u32 %v655_v40, %v654_v29  ;;  %v661_v21 = vrot.slane %v659_v30, 5  ;;  %2288 = vmatpush.bf16.msra.mxu0 %v6669_v35  ;;  %v7851_v17 = vld [vmem:[%s7078_s7 + $0xa0] sm:$0xf]  ;;  %v7859_v29 = vld [vmem:[%s7078_s7 + $0xac] sm:$0xf] }
  0xa9   : > { %v1722_v0 = vunpack.c.l.b16 %v680_v63  ;;  %v648_v41 = vrot.slane %v647_v2, 4  ;;  %v1739_v59 = vpop.permute.xlu0 %1738  ;;  %v2109_v1 = vsel %vm2107_vm9, %v2090_v34, %v7740_v53  ;;  %v5865_v8 = vld [vmem:[%s7078_s7 + $0xa4] sm:$0x1]  ;;  %v5866_v43 = vld [vmem:[%s7078_s7 + $0xb0] sm:$0x1]  ;;  %v932_v34 = vshll.u32 %v7859_v29, 16 }
  0xaa   : > { %v657_v35 = vrot.slane %v656_v28, 4  ;;  %v1890_v5 = vpop.permute.xlu2 %1889  ;;  %v2128_v55 = vsel %vm2126_vm10, %v2109_v1, %v7669_v27  ;;  %v919_v28 = vshll.u32 %v7846_v24, 16  ;;  %v5863_v1 = vld [vmem:[%s7078_s7 + $0x8c] sm:$0x1]  ;;  %v9273_v46 = vshrl.u32 %v7381_v38, 16 }
  0xab   : > { %v1733_v40 = vpack.c.b16 %v1722_v0, %v1721_v31  ;;  %v653_v30 = vsel %vm7149_vm5, %v648_v41, %v652_v23  ;;  %v2147_v63 = vsel %vm2145_vm11, %v2128_v55, %v1890_v5  ;;  %v6006_v0 = vor.u32 %v7854_v42, %v7851_v17  ;;  %v5864_v5 = vld [vmem:[%s7078_s7 + $0x98] sm:$0x1] }
  0xac   : > { %v662_v2 = vsel %vm7149_vm5, %v657_v35, %v661_v21  ;;  %v1719_v53 = vunpack.c.l.b16 %v653_v30  ;;  %2289 = vmatpush.bf16.msra.mxu0 %v6668_v44  ;;  %v2166_v27 = vsel %vm2164_vm12, %v2147_v63, %v7797_v7  ;;  %v916_v31 = vshrl.u32 %v7846_v24, 16 }
  0xad   : > { %1748 = vrot.lane.b32.xlu1 %v1733_v40, %s6986_s12  ;;  %v1720_v23 = vunpack.c.l.b16 %v662_v2  ;;  %v1784_v41 = vpop.permute.xlu1 %1783  ;;  %v929_v21 = vshrl.u32 %v7859_v29, 16  ;;  %v1119_v44 = vshll.u32 %v5865_v8, 16  ;;  %v1128_v35 = vshll.u32 %v5866_v43, 16 }
  0xae   : > { %v1114_v7 = vrot.slane %v916_v31, 4  ;;  %v1115_v42 = vrot.slane %v919_v28, 5  ;;  %v1096_v40 = vrot.slane %v890_v12, 4  ;;  %v1124_v8 = vrot.slane %v932_v34, 5 }
  0xaf   : > { %1703 = vrot.lane.b32.xlu0 %v5970_v14, %s6982_s8  ;;  %v1732_v17 = vpack.c.b16 %v1720_v23, %v1719_v53  ;;  %v1121_v30 = vrot.slane %v1119_v44, 5  ;;  %v1123_v55 = vrot.slane %v929_v21, 4  ;;  %v1130_v56 = vrot.slane %v1128_v35, 5 }
  0xb0   : > { %v1116_v50 = vor.u32 %v1115_v42, %v1114_v7  ;;  %v1097_v14 = vrot.slane %v893_v13, 5  ;;  %v1101_v43 = vshll.u32 %v5863_v1, 16  ;;  %v1105_v2 = vrot.slane %v903_v62, 4 }
  0xb1   : > { %1746 = vrot.lane.b32.xlu2 %v1732_v17, %s6986_s12  ;;  %v1125_v12 = vor.u32 %v1124_v8, %v1123_v55  ;;  %v1106_v53 = vrot.slane %v906_v32, 5  ;;  %v1110_v63 = vshll.u32 %v5864_v5, 16  ;;  %v2092_v23 = vsel %vm2088_vm8, %v7786_v3, %v1739_v59  ;;  %v1892_v13 = vpop.permute.xlu0 %1891  ;;  %v6665_v32 = vld [vmem:[%s7078_s7 + $0xb4] sm:$0xf0]  ;;  %v7911_v59 = vld [vmem:[%s7078_s7 + $0xac] sm:$0xf] }
  0xb2   : > { %v1847_v44 = vpop.permute.xlu2 %1846  ;;  %v1117_v35 = vrot.slane %v1116_v50, 4  ;;  %v1098_v17 = vor.u32 %v1097_v14, %v1096_v40  ;;  %v1103_v39 = vrot.slane %v1101_v43, 5  ;;  %v2185_v42 = vsel %vm2183_vm13, %v2166_v27, %v7707_v19  ;;  %v7918_v27 = vld [vmem:[%s7078_s7 + $0xb8] sm:$0xf] }
  0xb3   : > { %v1126_v1 = vrot.slane %v1125_v12, 4  ;;  %v1107_v7 = vor.u32 %v1106_v53, %v1105_v2  ;;  %v1112_v62 = vrot.slane %v1110_v63, 5  ;;  %v2204_v19 = vsel %vm2202_vm14, %v2185_v42, %v7820_v48  ;;  %v5937_v2 = vld [vmem:[%s7078_s7 + $0xb0] sm:$0x1]  ;;  %v5938_v12 = vld [vmem:[%s7078_s7 + $0xbc] sm:$0x1] }
  0xb4   : > { %v1122_v5 = vsel %vm7149_vm5, %v1117_v35, %v1121_v30  ;;  %v1099_v3 = vrot.slane %v1098_v17, 4  ;;  %6067 = vmatmul.msk.bf16.vlgmr.msra.gmra.mxu0 %vm2259_vm15, %v2204_v19  ;;  %v2111_v43 = vsel %vm2107_vm9, %v2092_v23, %v1784_v41  ;;  %v1383_v41 = vshll.u32 %v7918_v27, 16 }
  0xb5   : > { %v1131_v40 = vsel %vm7149_vm5, %v1126_v1, %v1130_v56  ;;  %v1874_v55 = vunpack.c.l.b16 %v1122_v5  ;;  %v1108_v8 = vrot.slane %v1107_v7, 4  ;;  %v6042_v56 = vor.u32 %v6665_v32, %v6041_v33 }
  0xb6   : > { %v1937_v50 = vpop.permute.xlu1 %1936  ;;  %v1875_v30 = vunpack.c.l.b16 %v1131_v40  ;;  %v1104_v14 = vsel %vm7149_vm5, %v1099_v3, %v1103_v39  ;;  %v2130_v63 = vsel %vm2126_vm10, %v2111_v43, %v1847_v44  ;;  %v1370_v39 = vshll.u32 %v7911_v59, 16  ;;  %v5936_v3 = vld [vmem:[%s7078_s7 + $0xa4] sm:$0x1] }
  0xb7   : > { %1856 = vrot.lane.b32.xlu0 %v6006_v0, %s6983_s9  ;;  %v1113_v48 = vsel %vm7149_vm5, %v1108_v8, %v1112_v62  ;;  %v1872_v53 = vunpack.c.l.b16 %v1104_v14  ;;  %v1367_v0 = vshrl.u32 %v7911_v59, 16  ;;  %v1380_v1 = vshrl.u32 %v7918_v27, 16  ;;  %v5935_v62 = vld [vmem:[%s7078_s7 + $0x98] sm:$0x1] }
  0xb8   : > { %v1886_v35 = vpack.c.b16 %v1875_v30, %v1874_v55  ;;  %v1873_v17 = vunpack.c.l.b16 %v1113_v48  ;;  %v1570_v7 = vshll.u32 %v5937_v2, 16  ;;  %v1579_v42 = vshll.u32 %v5938_v12, 16 }
  0xb9   : > { %v1565_v23 = vrot.slane %v1367_v0, 4  ;;  %v1566_v32 = vrot.slane %v1370_v39, 5  ;;  %v1574_v5 = vrot.slane %v1380_v1, 4  ;;  %v1547_v40 = vrot.slane %v1341_v45, 4 }
  0xba   : > { %v2000_v33 = vpop.permute.xlu2 %1999  ;;  %1901 = vrot.lane.b32.xlu1 %v1886_v35, %s6988_s14  ;;  %v1885_v44 = vpack.c.b16 %v1873_v17, %v1872_v53  ;;  %v1572_v55 = vrot.slane %v1570_v7, 5  ;;  %v1575_v8 = vrot.slane %v1383_v41, 5  ;;  %v1581_v19 = vrot.slane %v1579_v42, 5 }
  0xbb   : > { %v1548_v30 = vrot.slane %v1344_v18, 5  ;;  %v1567_v14 = vor.u32 %v1566_v32, %v1565_v23  ;;  %v1552_v43 = vshll.u32 %v5935_v62, 16  ;;  %v1556_v2 = vrot.slane %v1354_v47, 4 }
  0xbc   : > { %1899 = vrot.lane.b32.xlu2 %v1885_v44, %s6988_s14  ;;  %v1557_v12 = vrot.slane %v1357_v60, 5  ;;  %v1576_v48 = vor.u32 %v1575_v8, %v1574_v5  ;;  %v1561_v35 = vshll.u32 %v5936_v3, 16  ;;  %v2149_v17 = vsel %vm2145_vm11, %v2130_v63, %v1892_v13  ;;  %v7965_v60 = vld [vmem:[%s7078_s7 + $0xb8] sm:$0xf]  ;;  %v548_v3 = vld [vmem:[%s7078_s7 + $0xb0] sm:$0x1] }
  0xbd   : > { %v7954_v45 = vpop.permute.xlu0 %2044  ;;  %v1549_v53 = vor.u32 %v1548_v30, %v1547_v40  ;;  %v1568_v23 = vrot.slane %v1567_v14, 4  ;;  %v1554_v7 = vrot.slane %v1552_v43, 5  ;;  %v2168_v57 = vsel %vm2164_vm12, %v2149_v17, %v1937_v50  ;;  %v549_v30 = vld [vmem:[%s7078_s7 + $0xbc] sm:$0x1] }
  0xbe   : > { %v7960_v18 = vpop.permute.xlu1 %1695  ;;  %v1558_v47 = vor.u32 %v1557_v12, %v1556_v2  ;;  %v1577_v42 = vrot.slane %v1576_v48, 4  ;;  %v1563_v44 = vrot.slane %v1561_v35, 5  ;;  %v7968_v13 = vsel %vm2183_vm13, %v2168_v57, %v2000_v33  ;;  %v5827_v48 = vld [vmem:[%s7078_s7 + $0xb4] sm:$0x8] }
  0xbf   : > { %2009 = vrot.lane.b32.xlu0 %v6042_v56, %s6984_s10  ;;  %v1550_v62 = vrot.slane %v1549_v53, 4  ;;  %v1573_v63 = vsel %vm7149_vm5, %v1568_v23, %v1572_v55  ;;  %v9255_v32 = vshrl.u32 %v7958_v51, 16  ;;  %v9256_v5 = vshll.u32 %v7958_v51, 16 }
  0xc0   : > { %v1559_v56 = vrot.slane %v1558_v47, 4  ;;  %v1582_v50 = vsel %vm7149_vm5, %v1577_v42, %v1581_v19  ;;  %v2027_v40 = vunpack.c.l.b16 %v1573_v63  ;;  %v9258_v8 = vshrl.u32 %v7965_v60, 16  ;;  %v7988_v19 = vld [vmem:[%s7078_s7 + $0xb8] sm:$0xf] }
  0xc1   : > { %v1555_v33 = vsel %vm7149_vm5, %v1550_v62, %v1554_v7  ;;  %v2028_v55 = vunpack.c.l.b16 %v1582_v50  ;;  %v9257_v12 = vshll.u32 %v7965_v60, 16  ;;  %v681_v35 = vrot.slane %v9255_v32, 4  ;;  %v5829_v7 = vld [vmem:[%s7078_s7 + $0xc0] sm:$0x8] }
  0xc2   : > { %v7981_v14 = vpop.permute.xlu2 %1740  ;;  %v1564_v43 = vsel %vm7149_vm5, %v1559_v56, %v1563_v44  ;;  %v2025_v2 = vunpack.c.l.b16 %v1555_v33  ;;  %v682_v17 = vrot.slane %v9256_v5, 5  ;;  %v686_v23 = vshll.u32 %v548_v3, 16  ;;  %v8000_v44 = vld [vmem:[%s7078_s7 + $0xc4] sm:$0xf] }
  0xc3   : > { %v2026_v53 = vunpack.c.l.b16 %v1564_v43  ;;  %v2039_v47 = vpack.c.b16 %v2028_v55, %v2027_v40  ;;  %v690_v57 = vrot.slane %v9258_v8, 4  ;;  %v691_v42 = vrot.slane %v9257_v12, 5  ;;  %v5823_v43 = vld [vmem:[%s7078_s7 + $0x9c] sm:$0x8]  ;;  %v5825_v8 = vld [vmem:[%s7078_s7 + $0xa8] sm:$0x8] }
  0xc4   : > { %v695_v62 = vshll.u32 %v549_v30, 16  ;;  %v683_v56 = vor.u32 %v682_v17, %v681_v35  ;;  %v688_v50 = vrot.slane %v686_v23, 5  ;;  %v937_v33 = vshrl.u32 %v5827_v48, 16 }
  0xc5   : > { %v2038_v63 = vpack.c.b16 %v2026_v53, %v2025_v2  ;;  %2054 = vrot.lane.b32.xlu1 %v2039_v47, %s6987_s13  ;;  %v692_v40 = vor.u32 %v691_v42, %v690_v57  ;;  %v942_v5 = vshrl.u32 %v7988_v19, 16  ;;  %v945_v30 = vshll.u32 %v7988_v19, 16 }
  0xc6   : > { %v8003_v32 = vpop.permute.xlu0 %1785  ;;  %v8005_v3 = vpop.permute.xlu1 %1848  ;;  %v697_v55 = vrot.slane %v695_v62, 5  ;;  %v684_v2 = vrot.slane %v683_v56, 4  ;;  %v5849_v53 = vrot.slane %v937_v33, 11  ;;  %v950_v48 = vshrl.u32 %v5829_v7, 16 }
  0xc7   : > { %2052 = vrot.lane.b32.xlu2 %v2038_v63, %s6987_s13  ;;  %v955_v35 = vshrl.u32 %v8000_v44, 16  ;;  %v693_v17 = vrot.slane %v692_v40, 4  ;;  %v944_v23 = vrot.slane %v942_v5, 7  ;;  %v958_v12 = vshll.u32 %v8000_v44, 16  ;;  %v271_v63 = vld [vmem:[%s7078_s7 + $0x3c] sm:$0x8] }
  0xc8   : > { %v911_v47 = vshrl.u32 %v5823_v43, 16  ;;  %v689_v57 = vsel %vm7149_vm5, %v684_v2, %v688_v50  ;;  %v5850_v42 = vrot.slane %v950_v48, 11  ;;  %v918_v19 = vrot.slane %v916_v31, 7 }
  0xc9   : > { %v957_v62 = vrot.slane %v955_v35, 7  ;;  %v698_v7 = vsel %vm7149_vm5, %v693_v17, %v697_v55  ;;  %v1723_v33 = vunpack.c.l.b16 %v689_v57  ;;  %v947_v40 = vor.u32 %v945_v30, %v944_v23  ;;  %v269_v55 = vld [vmem:[%s7078_s7 + $0x30] sm:$0x8] }
  0xca   : > { %v8019_v56 = vpop.permute.xlu2 %1893  ;;  %v5847_v44 = vrot.slane %v911_v47, 11  ;;  %v1724_v4 = vunpack.c.l.b16 %v698_v7  ;;  %v921_v50 = vor.u32 %v919_v28, %v918_v19  ;;  %v924_v2 = vshrl.u32 %v5825_v8, 16 }
  0xcb   : > { %v960_v43 = vor.u32 %v958_v12, %v957_v62  ;;  %v948_v48 = vsel %vm7112_vm4, %v5849_v53, %v947_v40  ;;  %v931_v31 = vrot.slane %v929_v21, 7  ;;  %v366_v22 = vshrl.u32 %v271_v63, 16 }
  0xcc   : > { %v373_v54 = vrot.slane %v9273_v46, 7  ;;  %v1734_v17 = vpack.c.b16 %v1724_v4, %v1723_v33  ;;  %v1768_v47 = vunpack.c.l.b16 %v948_v48  ;;  %v922_v24 = vsel %vm7112_vm4, %v5847_v44, %v921_v50  ;;  %v5867_v33 = vld [vmem:[%s7078_s7 + $0xbc] sm:$0x1]  ;;  %v5899_v48 = vld [vmem:[%s7078_s7 + $0xc0] sm:$0x8] }
  0xcd   : > { %v961_v23 = vsel %vm7112_vm4, %v5850_v42, %v960_v43  ;;  %v5848_v53 = vrot.slane %v924_v2, 11  ;;  %v934_v46 = vor.u32 %v932_v34, %v931_v31  ;;  %v1766_v57 = vunpack.c.l.b16 %v922_v24  ;;  %v5868_v34 = vld [vmem:[%s7078_s7 + $0xc8] sm:$0x1] }
  0xce   : > { %v8036_v28 = vpop.permute.xlu0 %1938  ;;  %v8038_v8 = vpop.permute.xlu1 %2001  ;;  %v1769_v21 = vunpack.c.l.b16 %v961_v23  ;;  %1750 = vrot.lane.b32.xlu0 %v1734_v17, %s6986_s12  ;;  %v5786_v4 = vrot.slane %v366_v22, 11  ;;  %v9274_v42 = vshll.u32 %v7381_v38, 16  ;;  %v353_v19 = vshrl.u32 %v269_v55, 16 }
  0xcf   : > { %v9275_v63 = vshrl.u32 %v7373_v16, 16  ;;  %v935_v44 = vsel %vm7112_vm4, %v5848_v53, %v934_v46  ;;  %v2206_v29 = vsel %vm2202_vm14, %v7968_v13, %v7954_v45  ;;  %v1132_v43 = vrot.slane %v942_v5, 4  ;;  %v5900_v5 = vld [vmem:[%s7078_s7 + $0xc4] sm:$0xf] }
  0xd0   : > { %v376_v62 = vor.u32 %v9274_v42, %v373_v54  ;;  %v1779_v40 = vpack.c.b16 %v1769_v21, %v1768_v47  ;;  %v1767_v22 = vunpack.c.l.b16 %v935_v44  ;;  %v5785_v54 = vrot.slane %v353_v19, 11  ;;  %6068 = vmatmul.msk.bf16.gmra.mxu0 %vm2259_vm15, %v2206_v29  ;;  %v8068_v42 = vld [vmem:[%s7078_s7 + $0xd0] sm:$0xf] }
  0xd1   : > { %v360_v7 = vrot.slane %v9275_v63, 7  ;;  %v9276_v50 = vshll.u32 %v7373_v16, 16  ;;  %v1133_v55 = vrot.slane %v945_v30, 5  ;;  %v1137_v45 = vshll.u32 %v5867_v33, 16  ;;  %v5901_v16 = vld [vmem:[%s7078_s7 + $0xcc] sm:$0x8] }
  0xd2   : > { %v377_v38 = vsel %vm7112_vm4, %v5786_v4, %v376_v62  ;;  %1795 = vrot.lane.b32.xlu1 %v1779_v40, %s6985_s11  ;;  %v1141_v13 = vrot.slane %v955_v35, 4  ;;  %v1778_v17 = vpack.c.b16 %v1767_v22, %v1766_v57  ;;  %v1142_v47 = vrot.slane %v958_v12, 5  ;;  %v8065_v21 = vpop.permute.xlu2 %2046  ;;  %v5895_v63 = vld [vmem:[%s7078_s7 + $0xa8] sm:$0x8] }
  0xd3   : > { %v363_v2 = vor.u32 %v9276_v50, %v360_v7  ;;  %v1624_v31 = vunpack.c.l.b16 %v377_v38  ;;  %v1146_v24 = vshll.u32 %v5868_v34, 16  ;;  %v1134_v46 = vor.u32 %v1133_v55, %v1132_v43 }
  0xd4   : > { %v1139_v4 = vrot.slane %v1137_v45, 5  ;;  %v1388_v62 = vshrl.u32 %v5899_v48, 16  ;;  %1793 = vrot.lane.b32.xlu2 %v1778_v17, %s6985_s11  ;;  %v1143_v30 = vor.u32 %v1142_v47, %v1141_v13  ;;  %v1393_v57 = vshrl.u32 %v5900_v5, 16  ;;  %v5897_v48 = vld [vmem:[%s7078_s7 + $0xb4] sm:$0x8] }
  0xd5   : > { %v364_v23 = vsel %vm7112_vm4, %v5785_v54, %v363_v2  ;;  %v1148_v35 = vrot.slane %v1146_v24, 5  ;;  %v1396_v19 = vshll.u32 %v5900_v5, 16  ;;  %v1135_v33 = vrot.slane %v1134_v46, 4 }
  0xd6   : > { %v1623_v53 = vunpack.c.l.b16 %v364_v23  ;;  %v8072_v7 = vpop.permute.xlu0 %1697  ;;  %v5921_v40 = vrot.slane %v1388_v62, 11  ;;  %v1401_v44 = vshrl.u32 %v5901_v16, 16  ;;  %v8074_v29 = vpop.permute.xlu1 %1742  ;;  %v1144_v34 = vrot.slane %v1143_v30, 4  ;;  %v5939_v30 = vld [vmem:[%s7078_s7 + $0xc8] sm:$0x1] }
  0xd7   : > { %v1395_v43 = vrot.slane %v1393_v57, 7  ;;  %v1406_v22 = vshrl.u32 %v8068_v42, 16  ;;  %v1409_v38 = vshll.u32 %v8068_v42, 16  ;;  %v1140_v50 = vsel %vm7149_vm5, %v1135_v33, %v1139_v4 }
  0xd8   : > { %v1639_v12 = vpack.c.b16 %v1624_v31, %v1623_v53  ;;  %v5922_v2 = vrot.slane %v1401_v44, 11  ;;  %v1362_v31 = vshrl.u32 %v5895_v63, 16  ;;  %v1149_v45 = vsel %vm7149_vm5, %v1144_v34, %v1148_v35 }
  0xd9   : > { %v1876_v13 = vunpack.c.l.b16 %v1140_v50  ;;  %v1398_v5 = vor.u32 %v1396_v19, %v1395_v43  ;;  %v1877_v17 = vunpack.c.l.b16 %v1149_v45  ;;  %v1408_v23 = vrot.slane %v1406_v22, 7  ;;  %v8126_v50 = vld [vmem:[%s7078_s7 + $0xb4] sm:$0xf0] }
  0xda   : > { %v2069_v54 = vsel %vm2060_vm6, %v1639_v12, %v7960_v18  ;;  %v5919_v47 = vrot.slane %v1362_v31, 11  ;;  %v1369_v18 = vrot.slane %v1367_v0, 7  ;;  %v1375_v16 = vshrl.u32 %v5897_v48, 16  ;;  %v5831_v31 = vld [vmem:[%s7078_s7 + $0xcc] sm:$0x8] }
  0xdb   : > { %v2094_v55 = vsel %vm2088_vm8, %v2069_v54, %v7981_v14  ;;  %v1399_v24 = vsel %vm7112_vm4, %v5921_v40, %v1398_v5  ;;  %v1382_v14 = vrot.slane %v1380_v1, 7  ;;  %v1887_v46 = vpack.c.b16 %v1877_v17, %v1876_v13  ;;  %v5940_v1 = vld [vmem:[%s7078_s7 + $0xd4] sm:$0x1]  ;;  %v8123_v54 = vld [vmem:[%s7078_s7 + $0xac] sm:$0xf] }
  0xdc   : > { %v2113_v53 = vsel %vm2107_vm9, %v2094_v55, %v8003_v32  ;;  %v1411_v4 = vor.u32 %v1409_v38, %v1408_v23  ;;  %v1921_v42 = vunpack.c.l.b16 %v1399_v24  ;;  %v1372_v62 = vor.u32 %v1370_v39, %v1369_v18  ;;  %v8130_v55 = vld [vmem:[%s7078_s7 + $0xd0] sm:$0xf] }
  0xdd   : > { %v5920_v0 = vrot.slane %v1375_v16, 11  ;;  %v1385_v35 = vor.u32 %v1383_v41, %v1382_v14  ;;  %v2132_v63 = vsel %vm2126_vm10, %v2113_v53, %v8005_v3  ;;  %v1583_v32 = vrot.slane %v1393_v57, 4  ;;  %v8103_v12 = vpop.permute.xlu2 %1787  ;;  %1903 = vrot.lane.b32.xlu0 %v1887_v46, %s6988_s14  ;;  %v8115_v3 = vld [vmem:[%s7078_s7 + $0xc4] sm:$0xf]  ;;  %v8118_v57 = vld [vmem:[%s7078_s7 + $0xcc] sm:$0xf0] }
  0xde   : > { %v8105_v33 = vpop.permute.xlu0 %1850  ;;  %v1412_v59 = vsel %vm7112_vm4, %v5922_v2, %v1411_v4  ;;  %v1373_v27 = vsel %vm7112_vm4, %v5919_v47, %v1372_v62  ;;  %v2151_v39 = vsel %vm2145_vm11, %v2132_v63, %v8019_v56  ;;  %v1584_v41 = vrot.slane %v1396_v19, 5  ;;  %v8132_v45 = vpop.permute.xlu1 %1895  ;;  %v8137_v47 = vld [vmem:[%s7078_s7 + $0xdc] sm:$0xf]  ;;  %v8143_v14 = vld [vmem:[%s7078_s7 + $0xd0] sm:$0xf] }
  0xdf   : > { %v1922_v40 = vunpack.c.l.b16 %v1412_v59  ;;  %v1386_v44 = vsel %vm7112_vm4, %v5920_v0, %v1385_v35  ;;  %v1919_v34 = vunpack.c.l.b16 %v1373_v27  ;;  %v1588_v43 = vshll.u32 %v5939_v30, 16  ;;  %v8150_v62 = vld [vmem:[%s7078_s7 + $0xd8] sm:$0xf0] }
  0xe0   : > { %v1920_v2 = vunpack.c.l.b16 %v1386_v44  ;;  %v1585_v48 = vor.u32 %v1584_v41, %v1583_v32  ;;  %v1592_v56 = vrot.slane %v1406_v22, 4  ;;  %v1593_v19 = vrot.slane %v1409_v38, 5  ;;  %v5833_v38 = vld [vmem:[%s7078_s7 + $0xd8] sm:$0x8]  ;;  %v273_v41 = vld [vmem:[%s7078_s7 + $0x48] sm:$0x8] }
  0xe1   : > { %v1932_v13 = vpack.c.b16 %v1922_v40, %v1921_v42  ;;  %v1590_v5 = vrot.slane %v1588_v43, 5  ;;  %v1597_v17 = vshll.u32 %v5940_v1, 16  ;;  %v5978_v23 = vor.u32 %v8118_v57, %v8115_v3  ;;  %v8159_v1 = vld [vmem:[%s7078_s7 + $0xb8] sm:$0xf]  ;;  %v275_v44 = vld [vmem:[%s7078_s7 + $0x54] sm:$0x8] }
  0xe2   : > { %v1931_v18 = vpack.c.b16 %v1920_v2, %v1919_v34  ;;  %v1586_v24 = vrot.slane %v1585_v48, 4  ;;  %v1594_v16 = vor.u32 %v1593_v19, %v1592_v56  ;;  %v5974_v22 = vor.u32 %v8126_v50, %v8123_v54  ;;  %v8182_v50 = vld [vmem:[%s7078_s7 + $0xdc] sm:$0xf] }
  0xe3   : > { %1948 = vrot.lane.b32.xlu1 %v1932_v13, %s6989_s21  ;;  %v1599_v53 = vrot.slane %v1597_v17, 5  ;;  %v2170_v46 = vsel %vm2164_vm12, %v2151_v39, %v8036_v28  ;;  %v963_v4 = vshrl.u32 %v5831_v31, 16  ;;  %v968_v42 = vshrl.u32 %v8130_v55, 16  ;;  %v8162_v28 = vld [vmem:[%s7078_s7 + $0xc0] sm:$0xf0] }
  0xe4   : > { %1946 = vrot.lane.b32.xlu2 %v1931_v18, %s6989_s21  ;;  %v1591_v30 = vsel %vm7149_vm5, %v1586_v24, %v1590_v5  ;;  %v1595_v0 = vrot.slane %v1594_v16, 4  ;;  %v2189_v35 = vsel %vm2183_vm13, %v2170_v46, %v8038_v8  ;;  %v971_v63 = vshll.u32 %v8130_v55, 16  ;;  %v5903_v17 = vld [vmem:[%s7078_s7 + $0xd8] sm:$0x8]  ;;  %v5905_v46 = vld [vmem:[%s7078_s7 + $0xe4] sm:$0x8] }
  0xe5   : > { %v2029_v32 = vunpack.c.l.b16 %v1591_v30  ;;  %v2208_v59 = vsel %vm2202_vm14, %v2189_v35, %v8065_v21  ;;  %v5851_v27 = vrot.slane %v963_v4, 11  ;;  %v970_v39 = vrot.slane %v968_v42, 7 }
  0xe6   : > { %v1600_v3 = vsel %vm7149_vm5, %v1595_v0, %v1599_v53  ;;  %6069 = vmatmul.msk.bf16.gmra.mxu0 %vm2259_vm15, %v2208_v59  ;;  %v976_v8 = vshrl.u32 %v5833_v38, 16  ;;  %v981_v57 = vshrl.u32 %v8137_v47, 16  ;;  %v984_v40 = vshll.u32 %v8137_v47, 16  ;;  %v8186_v48 = vpop.permute.xlu0 %2003 }
  0xe7   : > { %v2030_v34 = vunpack.c.l.b16 %v1600_v3  ;;  %v973_v21 = vor.u32 %v971_v63, %v970_v39  ;;  %v6014_v43 = vor.u32 %v8150_v62, %v8143_v14  ;;  %v6010_v54 = vor.u32 %v8162_v28, %v8159_v1  ;;  %v8203_v39 = vld [vmem:[%s7078_s7 + $0xe8] sm:$0xf] }
  0xe8   : > { %v8184_v2 = vpop.permute.xlu2 %1940  ;;  %v5852_v56 = vrot.slane %v976_v8, 11  ;;  %v983_v19 = vrot.slane %v981_v57, 7  ;;  %v379_v31 = vshrl.u32 %v273_v41, 16  ;;  %v9277_v13 = vshrl.u32 %v7327_v37, 16 }
  0xe9   : > { %v2040_v18 = vpack.c.b16 %v2030_v34, %v2029_v32  ;;  %v974_v24 = vsel %vm7112_vm4, %v5851_v27, %v973_v21  ;;  %v392_v16 = vshrl.u32 %v275_v44, 16  ;;  %v9278_v38 = vshrl.u32 %v7351_v11, 16  ;;  %v8206_v32 = vld [vmem:[%s7078_s7 + $0xdc] sm:$0xf]  ;;  %v8208_v27 = vpop.permute.xlu1 %2048  ;;  %v8216_v34 = vld [vmem:[%s7078_s7 + $0xe4] sm:$0xf0] }
  0xea   : > { %v386_v5 = vrot.slane %v9277_v13, 7  ;;  %v986_v4 = vor.u32 %v984_v40, %v983_v19  ;;  %v1770_v30 = vunpack.c.l.b16 %v974_v24  ;;  %v5787_v0 = vrot.slane %v379_v31, 11  ;;  %v8225_v31 = vld [vmem:[%s7078_s7 + $0xc4] sm:$0xf]  ;;  %v8228_v13 = vld [vmem:[%s7078_s7 + $0xcc] sm:$0xf0] }
  0xeb   : > { %v399_v53 = vrot.slane %v9278_v38, 7  ;;  %v9279_v35 = vshll.u32 %v7327_v37, 16  ;;  %2056 = vrot.lane.b32.xlu0 %v2040_v18, %s6987_s13  ;;  %1707 = vrot.lane.b32.xlu1 %v5978_v23, %s6982_s8  ;;  %v5788_v41 = vrot.slane %v392_v16, 11  ;;  %v9280_v3 = vshll.u32 %v7351_v11, 16  ;;  %v8233_v24 = vld [vmem:[%s7078_s7 + $0xc4] sm:$0xf] }
  0xec   : > { %v1414_v37 = vshrl.u32 %v5903_v17, 16  ;;  %v1419_v44 = vshrl.u32 %v8182_v50, 16  ;;  %1705 = vrot.lane.b32.xlu2 %v5974_v22, %s6982_s8  ;;  %v987_v21 = vsel %vm7112_vm4, %v5852_v56, %v986_v4  ;;  %v1422_v19 = vshll.u32 %v8182_v50, 16  ;;  %v8236_v56 = vld [vmem:[%s7078_s7 + $0xd0] sm:$0xf] }
  0xed   : > { %v389_v59 = vor.u32 %v9279_v35, %v386_v5  ;;  %v402_v8 = vor.u32 %v9280_v3, %v399_v53  ;;  %v1427_v11 = vshrl.u32 %v5905_v46, 16  ;;  %v1771_v5 = vunpack.c.l.b16 %v987_v21  ;;  %v550_v4 = vld [vmem:[%s7078_s7 + $0xc8] sm:$0x1] }
  0xee   : > { %v5923_v22 = vrot.slane %v1414_v37, 11  ;;  %v1421_v38 = vrot.slane %v1419_v44, 7  ;;  %v9263_v46 = vshrl.u32 %v8203_v39, 16  ;;  %v1435_v35 = vshll.u32 %v8203_v39, 16 }
  0xef   : > { %v390_v23 = vsel %vm7112_vm4, %v5787_v0, %v389_v59  ;;  %v403_v17 = vsel %vm7112_vm4, %v5788_v41, %v402_v8  ;;  %v5924_v53 = vrot.slane %v1427_v11, 11  ;;  %v1780_v0 = vpack.c.b16 %v1771_v5, %v1770_v30  ;;  %v8257_v5 = vpop.permute.xlu0 %1744 }
  0xf0   : > { %v1625_v18 = vunpack.c.l.b16 %v390_v23  ;;  %v1626_v16 = vunpack.c.l.b16 %v403_v17  ;;  %v6050_v59 = vor.u32 %v8216_v34, %v8206_v32  ;;  %v6046_v41 = vor.u32 %v8228_v13, %v8225_v31  ;;  %v8247_v3 = vpop.permute.xlu2 %1699 }
  0xf1   : > { %v1424_v37 = vor.u32 %v1422_v19, %v1421_v38  ;;  %v1434_v21 = vrot.slane %v9263_v46, 7  ;;  %v514_v30 = vshrl.u32 %v8233_v24, 16  ;;  %v517_v23 = vshll.u32 %v8233_v24, 16  ;;  %v551_v38 = vld [vmem:[%s7078_s7 + $0xd4] sm:$0x1] }
  0xf2   : > { %v1640_v8 = vpack.c.b16 %v1626_v16, %v1625_v18  ;;  %v527_v11 = vshrl.u32 %v8236_v56, 16  ;;  %v9264_v32 = vshll.u32 %v8236_v56, 16  ;;  %v704_v34 = vshll.u32 %v550_v4, 16 }
  0xf3   : > { %v1425_v18 = vsel %vm7112_vm4, %v5923_v22, %v1424_v37  ;;  %v1437_v16 = vor.u32 %v1435_v35, %v1434_v21  ;;  %v699_v46 = vrot.slane %v514_v30, 4  ;;  %1797 = vrot.lane.b32.xlu0 %v1780_v0, %s6985_s11  ;;  %1860 = vrot.lane.b32.xlu1 %v6014_v43, %s6983_s9  ;;  %v700_v22 = vrot.slane %v517_v23, 5  ;;  %v277_v37 = vld [vmem:[%s7078_s7 + $0x60] sm:$0x8]  ;;  %v8290_v43 = vpop.permute.xlu1 %1789 }
  0xf4   : > { %v2072_v17 = vsel %vm2060_vm6, %v1640_v8, %v8072_v7  ;;  %v1923_v4 = vunpack.c.l.b16 %v1425_v18  ;;  %v706_v8 = vrot.slane %v704_v34, 5  ;;  %1858 = vrot.lane.b32.xlu2 %v6010_v54, %s6983_s9  ;;  %v709_v62 = vrot.slane %v9264_v32, 5  ;;  %s212_s9 = sand.u32 1, %s6964_s16  }
  0xf5   : > { %v2096_v7 = vsel %vm2088_vm8, %v2072_v17, %v8074_v29  ;;  %v1438_v14 = vsel %vm7112_vm4, %v5924_v53, %v1437_v16  ;;  %v708_v29 = vrot.slane %v527_v11, 4  ;;  %v701_v1 = vor.u32 %v700_v22, %v699_v46  ;;  %v279_v53 = vld [vmem:[%s7078_s7 + $0x6c] sm:$0x8] }
  0xf6   : > { %v2115_v0 = vsel %vm2107_vm9, %v2096_v7, %v8103_v12  ;;  %v1924_v21 = vunpack.c.l.b16 %v1438_v14  ;;  %v713_v28 = vshll.u32 %v551_v38, 16  ;;  %v405_v17 = vshrl.u32 %v277_v37, 16 }
  0xf7   : > { %v2134_v34 = vsel %vm2126_vm10, %v2115_v0, %v8105_v33  ;;  %v710_v54 = vor.u32 %v709_v62, %v708_v29  ;;  %v412_v18 = vrot.slane %v410_v9, 7  ;;  %v702_v14 = vrot.slane %v701_v1, 4 }
  0xf8   : > { %v2153_v12 = vsel %vm2145_vm11, %v2134_v34, %v8132_v45  ;;  %v1933_v16 = vpack.c.b16 %v1924_v21, %v1923_v4  ;;  %v715_v32 = vrot.slane %v713_v28, 5  ;;  %v5789_v38 = vrot.slane %v405_v17, 11  ;;  %v5869_v4 = vld [vmem:[%s7078_s7 + $0xd4] sm:$0x1]  ;;  %v1853_v0 = vpop.permute.xlu2 %1852  ;;  %v281_v17 = vld [vmem:[%s7078_s7 + $0x78] sm:$0x8] }
  0xf9   : > { %v2172_v7 = vsel %vm2164_vm12, %v2153_v12, %v8184_v2  ;;  %v711_v33 = vrot.slane %v710_v54, 4  ;;  %v415_v45 = vor.u32 %v413_v49, %v412_v18  ;;  %v707_v22 = vsel %vm7149_vm5, %v702_v14, %v706_v8  ;;  %v5870_v49 = vld [vmem:[%s7078_s7 + $0xe0] sm:$0x1]  ;;  %v5942_v54 = vld [vmem:[%s7078_s7 + $0xec] sm:$0x1] }
  0xfa   : > { %v2191_v46 = vsel %vm2183_vm13, %v2172_v7, %v8186_v48  ;;  %v418_v37 = vshrl.u32 %v279_v53, 16  ;;  %v425_v9 = vrot.slane %v423_v10, 7  ;;  %v1725_v48 = vunpack.c.l.b16 %v707_v22  ;;  %v1898_v21 = vpop.permute.xlu0 %1897 }
  0xfb   : > { %v2210_v2 = vsel %vm2202_vm14, %v2191_v46, %v8208_v27  ;;  %v716_v29 = vsel %vm7149_vm5, %v711_v33, %v715_v32  ;;  %v416_v6 = vsel %vm7112_vm4, %v5789_v38, %v415_v45  ;;  %v1150_v8 = vrot.slane %v968_v42, 4  ;;  %1950 = vrot.lane.b32.xlu0 %v1933_v16, %s6989_s21  ;;  %2013 = vrot.lane.b32.xlu1 %v6050_v59, %s6984_s10 }
  0xfc   : > { %6070 = vmatmul.msk.bf16.gmra.mxu0 %vm2259_vm15, %v2210_v2  ;;  %v1726_v10 = vunpack.c.l.b16 %v716_v29  ;;  %v5790_v27 = vrot.slane %v418_v37, 11  ;;  %v428_v32 = vor.u32 %v426_v36, %v425_v9  ;;  %v1627_v62 = vunpack.c.l.b16 %v416_v6  ;;  %2011 = vrot.lane.b32.xlu2 %v6046_v41, %s6984_s10  ;;  %v5941_v36 = vld [vmem:[%s7078_s7 + $0xe0] sm:$0x1]  ;;  %s5779_s10 = sshll.u32 %s212_s9, 6 }
  0xfd   : > { %v1151_v42 = vrot.slane %v971_v63, 5  ;;  %v1155_v34 = vshll.u32 %v5869_v4, 16  ;;  %v1159_v59 = vrot.slane %v981_v57, 4  ;;  %v1160_v58 = vrot.slane %v984_v40, 5  ;;  %s9159_s11 = scalar_lea.vmem [#allocation3], %s5779_s10 }
  0xfe   : > { %v1735_v1 = vpack.c.b16 %v1726_v10, %v1725_v48  ;;  %v429_v28 = vsel %vm7112_vm4, %v5790_v27, %v428_v32  ;;  %v1164_v12 = vshll.u32 %v5870_v49, 16  ;;  %v1601_v31 = vrot.slane %v1419_v44, 4  ;;  %s5689_s30 = sshll.u32 %s9159_s11, 4  ;;  %s5690_s30 = int_to_ptr.vmem [resolvable:$true] %s5689_s30 }
  0xff   : > { %v1628_v13 = vunpack.c.l.b16 %v429_v28  ;;  %v1152_v55 = vor.u32 %v1151_v42, %v1150_v8  ;;  %v1157_v41 = vrot.slane %v1155_v34, 5  ;;  %v1161_v63 = vor.u32 %v1160_v58, %v1159_v59  ;;  %v1943_v53 = vpop.permute.xlu1 %1942 }
 0x100   : > { %v1166_v57 = vrot.slane %v1164_v12, 5  ;;  %v1602_v47 = vrot.slane %v1422_v19, 5  ;;  %v1606_v40 = vshll.u32 %v5941_v36, 16  ;;  %v9281_v18 = vshrl.u32 %v8203_v39, 16  ;;  %v2006_v39 = vpop.permute.xlu2 %2005 }
 0x101   : > { %v1641_v7 = vpack.c.b16 %v1628_v13, %v1627_v62  ;;  %v1153_v14 = vrot.slane %v1152_v55, 4  ;;  %v1162_v33 = vrot.slane %v1161_v63, 4  ;;  %v1611_v44 = vrot.slane %v1435_v35, 5  ;;  %v283_v35 = vld [vmem:[%s7078_s7 + $0x84] sm:$0x8] }
 0x102   : > { %v1610_v16 = vrot.slane %v9281_v18, 4  ;;  %v1603_v46 = vor.u32 %v1602_v47, %v1601_v31  ;;  %v1615_v38 = vshll.u32 %v5942_v54, 16  ;;  %v431_v45 = vshrl.u32 %v281_v17, 16 }
 0x103   : > { %v2075_v22 = vsel %vm2060_vm6, %v1641_v7, %v8247_v3  ;;  %v1158_v50 = vsel %vm7149_vm5, %v1153_v14, %v1157_v41  ;;  %v1167_v19 = vsel %vm7149_vm5, %v1162_v33, %v1166_v57  ;;  %v1608_v4 = vrot.slane %v1606_v40, 5 }
 0x104   : > { %v1612_v37 = vor.u32 %v1611_v44, %v1610_v16  ;;  %v1878_v9 = vunpack.c.l.b16 %v1158_v50  ;;  %v2098_v2 = vsel %vm2088_vm8, %v2075_v22, %v8257_v5  ;;  %1752 = vrot.lane.b32.xlu2 %v1735_v1, %s6986_s12  ;;  %v1879_v29 = vunpack.c.l.b16 %v1167_v19  ;;  %v285_v22 = vld [vmem:[%s7078_s7 + $0x90] sm:$0x8]  ;;  %s6768_s12 = sshll.u32 %s6972_s18, 6  ;;  %s5675_s18 = scalar_lea.sflag [#allocation4], %s212_s9 }
 0x105   : > { %v2117_v3 = vsel %vm2107_vm9, %v2098_v2, %v8290_v43  ;;  %v1604_v48 = vrot.slane %v1603_v46, 4  ;;  %v1617_v8 = vrot.slane %v1615_v38, 5  ;;  %v5791_v27 = vrot.slane %v431_v45, 11  ;;  %s5688_s29 = scalar_lea.hbm %s9240_s4, %s6768_s12 }
 0x106   : > { %v1613_v6 = vrot.slane %v1612_v37, 4  ;;  %v2136_v49 = vsel %vm2126_vm10, %v2117_v3, %v1853_v0  ;;  %v2051_v10 = vpop.permute.xlu0 %2050  ;;  %v9282_v32 = vshrl.u32 %v7793_v15, 16  ;;  %v444_v42 = vshrl.u32 %v283_v35, 16  ;;  %v287_v37 = vld [vmem:[%s7078_s7 + $0x9c] sm:$0x8]  ;;  %s5691_s5 = sshll.u32 %s5688_s29, 4  ;;  %s5692_s5 = int_to_ptr.hbm [resolvable:$true] %s5691_s5 }
 0x107   : > { %v2155_v5 = vsel %vm2145_vm11, %v2136_v49, %v1898_v21  ;;  %v9283_v59 = vshll.u32 %v7793_v15, 16  ;;  %v9284_v43 = vshrl.u32 %v7810_v20, 16  ;;  %v1888_v1 = vpack.c.b16 %v1879_v29, %v1878_v9  ;;  %v1702_v31 = vpop.permute.xlu1 %1701  ;;  %s6916_s6 = sshra.s32 %s5692_s5, 4  ;;  %s6917_s6 = int_to_ptr.hbm [resolvable:$true] %s6916_s6 }
 0x108   : > { %v438_v62 = vrot.slane %v9282_v32, 7  ;;  %v2174_v34 = vsel %vm2164_vm12, %v2155_v5, %v1943_v53  ;;  %v1609_v0 = vsel %vm7149_vm5, %v1604_v48, %v1608_v4  ;;  %v5792_v12 = vrot.slane %v444_v42, 11  ;;  %v6695_v48 = vld [vmem:[%s9238_s2 + $0x78] sm:$0xff]  ;;  %s6918_s22 = scalar_lea.hbm %s6917_s6, 64  ;;  %p6923_p1 = scmp.lt.s32.totalorder %s6917_s6, %s9240_s4 }
 0x109   : > { %v451_v36 = vrot.slane %v9284_v43, 7  ;;  %v2193_v28 = vsel %vm2183_vm13, %v2174_v34, %v2006_v39  ;;  %v1618_v21 = vsel %vm7149_vm5, %v1613_v6, %v1617_v8  ;;  %v9285_v15 = vshll.u32 %v7810_v20, 16  ;;  %2982 = vmatpush.bf16.msra.mxu1 %v6695_v48  ;;  %6816 = vmatpush.bf16.msra.mxu3 %v6695_v48  ;;  %v6688_v48 = vld [vmem:[%s9238_s2 + $0x40] sm:$0xff]  ;;  %p6919_p12 = scmp.ne.s32.totalorder %s6917_s6, %s6918_s22  ;;  %p6924_p2 = scmp.lt.s32.totalorder %s6922_s26, %s6918_s22 }
 0x10a   : > { %v441_v58 = vor.u32 %v9283_v59, %v438_v62  ;;  %v2212_v41 = vsel %vm2202_vm14, %v2193_v28, %v2051_v10  ;;  %v2031_v53 = vunpack.c.l.b16 %v1609_v0  ;;  %v2032_v17 = vunpack.c.l.b16 %v1618_v21  ;;  %v6694_v59 = vld [vmem:[%s9238_s2 + $0x70] sm:$0xff]  ;;  %v6692_v0 = vld [vmem:[%s9238_s2 + $0x60] sm:$0xff]  ;;  %v6691_v28 = vld [vmem:[%s9238_s2 + $0x58] sm:$0xff] }
 0x10b   : > { %v454_v55 = vor.u32 %v9285_v15, %v451_v36  ;;  %v1747_v47 = vpop.permute.xlu2 %1746  ;;  %v457_v9 = vshrl.u32 %v285_v22, 16  ;;  %v9286_v4 = vshrl.u32 %v7732_v61, 16  ;;  %v470_v35 = vshrl.u32 %v287_v37, 16  ;;  %p6920_p13 = pnand %p6919_p12, %p7058_p4  ;;  %p6925_p3 = por %p6924_p2, %p6923_p1 }
 0x10c   : > { %v442_v13 = vsel %vm7112_vm4, %v5791_v27, %v441_v58  ;;  %6071 = vmatmul.msk.bf16.gmra.mxu0 %vm2259_vm15, %v2212_v41  ;;  %1905 = vrot.lane.b32.xlu2 %v1888_v1, %s6988_s14  ;;  %v2041_v20 = vpack.c.b16 %v2032_v17, %v2031_v53  ;;  %v9287_v29 = vshrl.u32 %v7762_v25, 16  ;;  %v9288_v10 = vshll.u32 %v7732_v61, 16  ;;  %v6693_v61 = vld [vmem:[%s9238_s2 + $0x68] sm:$0xff]  ;;  %v8432_v17 = vld [vmem:[%s9239_s3] ss:$0 sm:$0xff] }
 0x10d   : > { %v1629_v63 = vunpack.c.l.b16 %v442_v13  ;;  %v455_v54 = vsel %vm7112_vm4, %v5792_v12, %v454_v55  ;;  %v464_v39 = vrot.slane %v9286_v4, 7  ;;  %v5793_v8 = vrot.slane %v457_v9, 11  ;;  %2983 = vmatpush.bf16.msra.mxu1 %v6694_v59  ;;  %6817 = vmatpush.bf16.msra.mxu3 %v6694_v59  ;;  %v289_v41 = vld [vmem:[%s7078_s7 + $0xa8] sm:$0x8]  ;;  %p6921_p0 = pneg %p6920_p13 }
 0x10e   : > { %v1630_v57 = vunpack.c.l.b16 %v455_v54  ;;  %v1792_v18 = vpop.permute.xlu0 %1791  ;;  %v477_v3 = vrot.slane %v9287_v29, 7  ;;  %v5794_v32 = vrot.slane %v470_v35, 11  ;;  %v9289_v62 = vshll.u32 %v7762_v25, 16  ;;  %v6690_v54 = vld [vmem:[%s9238_s2 + $0x50] sm:$0xff]  ;;  %v6685_v59 = vld [vmem:[%s9238_s2 + $0x28] sm:$0xff] }
 0x10f   : > { %v1855_v14 = vpop.permute.xlu1 %1854  ;;  %v467_v27 = vor.u32 %v9288_v10, %v464_v39  ;;  %v9293_v37 = vshll.u32 %v7965_v60, 16  ;;  %p6926_p5 = pnand %p6925_p3, %p6921_p0 }
 0x110   : > { %v1642_v40 = vpack.c.b16 %v1630_v57, %v1629_v63  ;;  %v480_v5 = vor.u32 %v9289_v62, %v477_v3  ;;  %v291_v63 = vld [vmem:[%s7078_s7 + $0xb4] sm:$0x8] }
 0x111   : > { %v468_v42 = vsel %vm7112_vm4, %v5793_v8, %v467_v27  ;;  %2984 = vmatpush.bf16.msra.mxu1 %v6693_v61  ;;  %6818 = vmatpush.bf16.msra.mxu3 %v6693_v61 }
 0x112   : > { %v2078_v16 = vsel %vm2060_vm6, %v1642_v40, %v1702_v31  ;;  %v481_v34 = vsel %vm7112_vm4, %v5794_v32, %v480_v5  ;;  %v1631_v43 = vunpack.c.l.b16 %v468_v42  ;;  %v6686_v32 = vld [vmem:[%s9238_s2 + $0x30] sm:$0xff] }
 0x113   : > { %v2100_v7 = vsel %vm2088_vm8, %v2078_v16, %v1747_v47  ;;  %v1632_v25 = vunpack.c.l.b16 %v481_v34  ;;  %v9290_v47 = vshrl.u32 %v7958_v51, 16  ;;  %v6689_v16 = vld [vmem:[%s9238_s2 + $0x48] sm:$0xff] }
 0x114   : > { %2058 = vrot.lane.b32.xlu2 %v2041_v20, %s6987_s13  ;;  %v2119_v33 = vsel %vm2107_vm9, %v2100_v7, %v1792_v18  ;;  %v9291_v18 = vshrl.u32 %v7965_v60, 16  ;;  %v483_v7 = vshrl.u32 %v289_v41, 16 }
 0x115   : > { %v2138_v46 = vsel %vm2126_vm10, %v2119_v33, %v1855_v14  ;;  %v1643_v1 = vpack.c.b16 %v1632_v25, %v1631_v43  ;;  %2985 = vmatpush.bf16.msra.mxu1 %v6692_v0  ;;  %6819 = vmatpush.bf16.msra.mxu3 %v6692_v0  ;;  %v490_v40 = vrot.slane %v9290_v47, 7  ;;  %v496_v14 = vshrl.u32 %v291_v63, 16  ;;  %v293_v43 = vld [vmem:[%s7078_s7 + $0xc0] sm:$0x8]  ;;  %v295_v25 = vld [vmem:[%s7078_s7 + $0xcc] sm:$0x8] }
 0x116   : > { %v1900_v44 = vpop.permute.xlu2 %1899  ;;  %v503_v20 = vrot.slane %v9291_v18, 7  ;;  %v6990_v33 = vmov 0.0|0.0   ;;  %v5795_v39 = vrot.slane %v483_v7, 11 }
 0x117   : > { %v2157_v45 = vsel %vm2145_vm11, %v2138_v46, %v1900_v44  ;;  %v2008_v19 = vpop.permute.xlu1 %2007  ;;  %2555 = vst [vmem:[#allocation2 + $0x4] sm:$0xf] %v6990_v33  ;;  %v5796_v35 = vrot.slane %v496_v14, 11 }
 0x118   : > { %2572 = vst [vmem:[#allocation2 + $0xd0] sm:$0xf] %v6990_v33  ;;  %v506_v9 = vor.u32 %v9293_v37, %v503_v20 }
 0x119   : > { %v1945_v38 = vpop.permute.xlu0 %1944  ;;  %2986 = vmatpush.bf16.msra.mxu1 %v6691_v28  ;;  %6820 = vmatpush.bf16.msra.mxu3 %v6691_v28  ;;  %v509_v28 = vshrl.u32 %v293_v43, 16 }
 0x11a   : > { %v2176_v50 = vsel %vm2164_vm12, %v2157_v45, %v1945_v38  ;;  %v6991_v45 = vmov 0   ;;  %v507_v27 = vsel %vm7112_vm4, %v5796_v35, %v506_v9 }
 0x11b   : > { %v2195_v2 = vsel %vm2183_vm13, %v2176_v50, %v2008_v19  ;;  %225 = vst [vmem:[#allocation2] sm:$0xf] %v6991_v45  ;;  %v9292_v50 = vshll.u32 %v7958_v51, 16  ;;  %v6687_v51 = vld [vmem:[%s9238_s2 + $0x38] sm:$0xff]  ;;  %v1634_v5 = vunpack.c.l.b16 %v507_v27 }
 0x11c   : > { %226 = vst [vmem:[#allocation2 + $0xc] sm:$0xf] %v6991_v45  ;;  %3111 = vmatpush.bf16.msrb.mxu0 %v6687_v51  ;;  %6824 = vmatpush.bf16.msra.mxu2 %v6687_v51 }
 0x11d   : > { %2987 = vmatpush.bf16.msra.mxu1 %v6690_v54  ;;  %6821 = vmatpush.bf16.msra.mxu3 %v6690_v54  ;;  %v493_v19 = vor.u32 %v9292_v50, %v490_v40  ;;  %227 = vst [vmem:[#allocation2 + $0x18] sm:$0xf] %v6991_v45  ;;  %v5797_v54 = vrot.slane %v509_v28, 11  ;;  %v9294_v40 = vshll.u32 %v8236_v56, 16 }
 0x11e   : > { %228 = vst [vmem:[#allocation2 + $0x24] sm:$0xf] %v6991_v45  ;;  %v6110_v34 = vld [vmem:[#allocation2 + $0x4] sm:$0xf] }
 0x11f   : > { %v1749_v36 = vpop.permute.xlu1 %1748  ;;  %v494_v10 = vsel %vm7112_vm4, %v5795_v39, %v493_v19  ;;  %229 = vst [vmem:[#allocation2 + $0x30] sm:$0xf] %v6991_v45  ;;  %v6680_v39 = vld [vmem:[%s9238_s2] sm:$0xff] }
 0x120   : > { %230 = vst [vmem:[#allocation2 + $0x3c] sm:$0xf] %v6991_v45  ;;  %v1633_v62 = vunpack.c.l.b16 %v494_v10  ;;  %3112 = vmatpush.bf16.msrb.mxu0 %v6686_v32  ;;  %6825 = vmatpush.bf16.msra.mxu2 %v6686_v32 }
 0x121   : > { %v2053_v6 = vpop.permute.xlu2 %2052  ;;  %v1704_v58 = vpop.permute.xlu0 %1703  ;;  %2988 = vmatpush.bf16.msra.mxu1 %v6689_v16  ;;  %6822 = vmatpush.bf16.msra.mxu3 %v6689_v16  ;;  %231 = vst [vmem:[#allocation2 + $0x48] sm:$0xf] %v6991_v45  ;;  %v6682_v16 = vld [vmem:[%s9238_s2 + $0x10] sm:$0xff] }
 0x122   : > { %v2214_v49 = vsel %vm2202_vm14, %v2195_v2, %v2053_v6  ;;  %v2081_v12 = vsel %vm2060_vm6, %v1643_v1, %v1704_v58  ;;  %232 = vst [vmem:[#allocation2 + $0x54] sm:$0xf] %v6991_v45  ;;  %v1644_v58 = vpack.c.b16 %v1634_v5, %v1633_v62 }
 0x123   : > { %6072 = vmatmul.msk.bf16.gmra.mxu0 %vm2259_vm15, %v2214_v49  ;;  %v2102_v55 = vsel %vm2088_vm8, %v2081_v12, %v1749_v36  ;;  %233 = vst [vmem:[#allocation2 + $0x60] sm:$0xf] %v6991_v45  ;;  %v516_v12 = vrot.slane %v514_v30, 7 }
 0x124   : > { %234 = vst [vmem:[#allocation2 + $0x6c] sm:$0xf] %v6991_v45  ;;  %3113 = vmatpush.bf16.msrb.mxu0 %v6685_v59  ;;  %6826 = vmatpush.bf16.msra.mxu2 %v6685_v59 }
 0x125   : > { %2989 = vmatpush.bf16.msra.mxu1 %v6688_v48  ;;  %6823 = vmatpush.bf16.msra.mxu3 %v6688_v48  ;;  %235 = vst [vmem:[#allocation2 + $0x78] sm:$0xf] %v6991_v45 }
 0x126   : > { %236 = vst [vmem:[#allocation2 + $0x84] sm:$0xf] %v6991_v45 }
 0x127   : > { %237 = vst [vmem:[#allocation2 + $0x90] sm:$0xf] %v6991_v45 }
 0x128   : > { %238 = vst [vmem:[#allocation2 + $0x9c] sm:$0xf] %v6991_v45 }
 0x129   : > { %v1857_v31 = vpop.permute.xlu0 %1856  ;;  %239 = vst [vmem:[#allocation2 + $0xa8] sm:$0xf] %v6991_v45 }
 0x12a   : > { %240 = vst [vmem:[#allocation2 + $0xb4] sm:$0xf] %v6991_v45 }
 0x12b   : > { %241 = vst [vmem:[#allocation2 + $0xc0] sm:$0xf] %v6991_v45 }
 0x12c   : > { %v1902_v15 = vpop.permute.xlu1 %1901  ;;  %242 = vst [vmem:[#allocation2 + $0xcc] sm:$0xf] %v6991_v45 }
 0x12d   : > { %243 = vst [vmem:[#allocation2 + $0x8] sm:$0xf] %v6991_v45 }
 0x12e   : > { %v1794_v13 = vpop.permute.xlu2 %1793  ;;  %244 = vst [vmem:[#allocation2 + $0x14] sm:$0xf] %v6991_v45 }
 0x12f   : > { %v2121_v53 = vsel %vm2107_vm9, %v2102_v55, %v1794_v13  ;;  %v522_v13 = vshrl.u32 %v295_v25, 16  ;;  %245 = vst [vmem:[#allocation2 + $0x20] sm:$0xf] %v6991_v45 }
 0x130   : > { %v2140_v57 = vsel %vm2126_vm10, %v2121_v53, %v1857_v31  ;;  %v6684_v31 = vld [vmem:[%s9238_s2 + $0x20] sm:$0xff]  ;;  %v519_v53 = vor.u32 %v517_v23, %v516_v12  ;;  %246 = vst [vmem:[#allocation2 + $0x2c] sm:$0xf] %v6991_v45 }
 0x131   : > { %v2291_v21 = vpop.f32.mrf.mxu0  ;;  %v2159_v46 = vsel %vm2145_vm11, %v2140_v57, %v1902_v15  ;;  %v2010_v22 = vpop.permute.xlu0 %2009  ;;  %v529_v15 = vrot.slane %v527_v11, 7  ;;  %3114 = vmatpush.bf16.msrb.mxu0 %v6684_v31  ;;  %6827 = vmatpush.bf16.msra.mxu2 %v6684_v31  ;;  %v6683_v11 = vld [vmem:[%s9238_s2 + $0x18] sm:$0xff]  ;;  %v5798_v47 = vrot.slane %v522_v13, 11  ;;  %247 = vst [vmem:[#allocation2 + $0x38] sm:$0xf] %v6991_v45 }
 0x132   : > { %v520_v14 = vsel %vm7112_vm4, %v5797_v54, %v519_v53  ;;  %248 = vst [vmem:[#allocation2 + $0x44] sm:$0xf] %v6991_v45  ;;  %v2613_v13 = vld [vmem:[#allocation2] sm:$0x8] }
 0x133   : > { %v532_v18 = vor.u32 %v9294_v40, %v529_v15  ;;  %v1635_v37 = vunpack.c.l.b16 %v520_v14  ;;  %249 = vst [vmem:[#allocation2 + $0x50] sm:$0xf] %v6991_v45  ;;  %v6750_v14 = vld [vmem:[%s9238_s2 + $0x1b0] sm:$0xff] }
 0x134   : > { %250 = vst [vmem:[#allocation2 + $0x5c] sm:$0xf] %v6991_v45 }
 0x135   : > { %3115 = vmatpush.bf16.msrb.mxu0 %v6683_v11  ;;  %6828 = vmatpush.bf16.msra.mxu2 %v6683_v11  ;;  %v533_v33 = vsel %vm7112_vm4, %v5798_v47, %v532_v18  ;;  %251 = vst [vmem:[#allocation2 + $0x68] sm:$0xf] %v6991_v45 }
 0x136   : > { %v1636_v9 = vunpack.c.l.b16 %v533_v33  ;;  %252 = vst [vmem:[#allocation2 + $0x74] sm:$0xf] %v6991_v45 }
 0x137   : > { %v2055_v4 = vpop.permute.xlu1 %2054  ;;  %253 = vst [vmem:[#allocation2 + $0x80] sm:$0xf] %v6991_v45 }
 0x138   : > { %254 = vst [vmem:[#allocation2 + $0x8c] sm:$0xf] %v6991_v45 }
 0x139   : > { %v2293_v44 = vpop.f32.mrf.mxu0  ;;  %3116 = vmatpush.bf16.msrb.mxu0 %v6682_v16  ;;  %6829 = vmatpush.bf16.msra.mxu2 %v6682_v16  ;;  %255 = vst [vmem:[#allocation2 + $0x98] sm:$0xf] %v6991_v45  ;;  %v6751_v16 = vld [vmem:[%s9238_s2 + $0x1b8] sm:$0xff] }
 0x13a   : > { %v2294_v38 = vadd.f32 %v8432_v17, %v2293_v44  ;;  %256 = vst [vmem:[#allocation2 + $0xa4] sm:$0xf] %v6991_v45 }
 0x13b   : > { %257 = vst [vmem:[#allocation2 + $0xb0] sm:$0xf] %v6991_v45 }
 0x13c   : > { %vm2337_vm0 = vcmp.ge.f32.partialorder %v2294_v38, 0.0  ;;  %v2355_v29 = vmul.f32 0.01, %v2294_v38  ;;  %258 = vst [vmem:[#allocation2 + $0xbc] sm:$0xf] %v6991_v45 }
 0x13d   : > { %259 = vst [vmem:[#allocation2 + $0xc8] sm:$0xf] %v6991_v45 }
 0x13e   : > { %v1947_v2 = vpop.permute.xlu2 %1946  ;;  %v2373_v6 = vsel %vm2337_vm0, %v2294_v38, %v2355_v29  ;;  %v1645_v29 = vpack.c.b16 %v1636_v9, %v1635_v37  ;;  %260 = vst [vmem:[#allocation2 + $0xd4] sm:$0xf] %v6991_v45 }
 0x13f   : > { %v2178_v3 = vsel %vm2164_vm12, %v2159_v46, %v1947_v2  ;;  %v2538_v8 = vpack.c.bf16 %v2373_v6, %v2373_v6 }
 0x140   : > { %v2197_v60 = vsel %vm2183_vm13, %v2178_v3, %v2010_v22  ;;  %v1751_v61 = vpop.permute.xlu0 %1750  ;;  %v6681_v22 = vld [vmem:[%s9238_s2 + $0x8] sm:$0xff] }
 0x141   : > { %v2216_v49 = vsel %vm2202_vm14, %v2197_v60, %v2055_v4  ;;  %2556 = vst [vmem:[#allocation2 + $0x10] sm:$0xf] %v2538_v8  ;;  %3117 = vmatpush.bf16.msrb.mxu0 %v6681_v22  ;;  %6830 = vmatpush.bf16.msra.mxu2 %v6681_v22  ;;  %v6749_v22 = vld [vmem:[%s9238_s2 + $0x1a8] sm:$0xff] }
 0x142   : > { %6073 = vmatmul.msk.bf16.gmra.mxu0 %vm2259_vm15, %v2216_v49 }
 0x144   : > { %v1796_v1 = vpop.permute.xlu1 %1795 }
 0x145   : > { %3118 = vmatpush.bf16.msrb.mxu0 %v6680_v39  ;;  %6831 = vmatpush.bf16.msra.mxu2 %v6680_v39 }
 0x146   : > { %v1706_v42 = vpop.permute.xlu2 %1705 }
 0x147   : > { %v2084_v21 = vsel %vm2060_vm6, %v1644_v58, %v1706_v42 }
 0x148   : > { %v6672_v36 = vld [vmem:[#allocation2 + $0xc] sm:$0xf0]  ;;  %v2104_v63 = vsel %vm2088_vm8, %v2084_v21, %v1751_v61 }
 0x149   : > { %v6111_v0 = vor.u32 %v6672_v36, %v6110_v34  ;;  %v2123_v24 = vsel %vm2107_vm9, %v2104_v63, %v1796_v1  ;;  %v2614_v1 = vld [vmem:[#allocation2 + $0x4] sm:$0xf]  ;;  %v2616_v28 = vld [vmem:[#allocation2 + $0x10] sm:$0xf]  ;;  %4915 = vmatpush.bf16.msra.mxu0 %v6751_v16 }
 0x14a   : > { %v2651_v31 = vshrl.u32 %v2614_v1, 16  ;;  %v2664_v15 = vshrl.u32 %v2616_v28, 16  ;;  %v2654_v40 = vshll.u32 %v2614_v1, 16 }
 0x14b   : > { %2990 = vmatmul.bf16.vlgmr.msra.gmra.mxu1 %v6111_v0 }
 0x14c   : > { %v2653_v47 = vrot.slane %v2651_v31, 7  ;;  %v6718_v31 = vld [vmem:[%s9238_s2 + $0xf0] sm:$0xff] }
 0x14d   : > { %v2296_v41 = vpop.f32.mrf.mxu0  ;;  %4916 = vmatpush.bf16.msra.mxu0 %v6750_v14  ;;  %v6744_v14 = vld [vmem:[%s9238_s2 + $0x180] sm:$0xff] }
 0x14e   : > { %v1859_v55 = vpop.permute.xlu2 %1858  ;;  %v2297_v30 = vadd.f32 %v8432_v17, %v2296_v41 }
 0x14f   : > { %v1904_v23 = vpop.permute.xlu0 %1903  ;;  %v2142_v44 = vsel %vm2126_vm10, %v2123_v24, %v1859_v55 }
 0x150   : > { %vm2338_vm1 = vcmp.ge.f32.partialorder %v2297_v30, 0.0  ;;  %v2356_v57 = vmul.f32 0.01, %v2297_v30  ;;  %v2161_v50 = vsel %vm2145_vm11, %v2142_v44, %v1904_v23  ;;  %v2656_v44 = vor.u32 %v2654_v40, %v2653_v47  ;;  %v6717_v40 = vld [vmem:[%s9238_s2 + $0xe8] sm:$0xff] }
 0x151   : > { %4917 = vmatpush.bf16.msra.mxu0 %v6749_v22 }
 0x152   : > { %v2374_v20 = vsel %vm2338_vm1, %v2297_v30, %v2356_v57  ;;  %v2615_v30 = vld [vmem:[#allocation2 + $0xc] sm:$0x8]  ;;  %v2646_v57 = vshrl.u32 %v2613_v13, 16 }
 0x153   : > { %v2539_v7 = vpack.c.bf16 %v2374_v20, %v2374_v20  ;;  %v2659_v23 = vshrl.u32 %v2615_v30, 16  ;;  %v2666_v20 = vrot.slane %v2664_v15, 7 }
 0x154   : > { %v6076_v33 = vrot.slane %v2646_v57, 11 }
 0x155   : > { %v1949_v56 = vpop.permute.xlu1 %1948  ;;  %2557 = vst [vmem:[#allocation2 + $0x1c] sm:$0xf] %v2539_v7  ;;  %v2298_v38 = vpop.f32.mrf.mxu0 }
 0x156   : > { %v2012_v46 = vpop.permute.xlu2 %2011  ;;  %v2299_v19 = vadd.f32 %v8432_v17, %v2298_v38  ;;  %v2180_v4 = vsel %vm2164_vm12, %v2161_v50, %v1949_v56  ;;  %v2667_v56 = vshll.u32 %v2616_v28, 16 }
 0x157   : > { %v2199_v48 = vsel %vm2183_vm13, %v2180_v4, %v2012_v46  ;;  %v6077_v46 = vrot.slane %v2659_v23, 11  ;;  %v2623_v23 = vld [vmem:[#allocation2 + $0x3c] sm:$0x8] }
 0x158   : > { %vm2339_vm2 = vcmp.ge.f32.partialorder %v2299_v19, 0.0  ;;  %v2357_v2 = vmul.f32 0.01, %v2299_v19  ;;  %v2669_v38 = vor.u32 %v2667_v56, %v2666_v20  ;;  %v2627_v56 = vld [vmem:[#allocation2 + $0x54] sm:$0x8] }
 0x15a   : > { %v2375_v35 = vsel %vm2339_vm2, %v2299_v19, %v2357_v2  ;;  %v2657_v19 = vsel %vm7112_vm4, %v6076_v33, %v2656_v44  ;;  %v2670_v37 = vsel %vm7112_vm4, %v6077_v46, %v2669_v38 }
 0x15b   : > { %v2540_v3 = vpack.c.bf16 %v2375_v35, %v2375_v35 }
 0x15c   : > { %v6114_v42 = vld [vmem:[#allocation2 + $0x1c] sm:$0xf] }
 0x15d   : > { %v2057_v51 = vpop.permute.xlu0 %2056  ;;  %v1708_v60 = vpop.permute.xlu1 %1707  ;;  %2558 = vst [vmem:[#allocation2 + $0x28] sm:$0xf] %v2540_v3  ;;  %v2618_v39 = vld [vmem:[#allocation2 + $0x1c] sm:$0xf]  ;;  %v6748_v3 = vld [vmem:[%s9238_s2 + $0x1a0] sm:$0xff] }
 0x15e   : > { %v1753_v6 = vpop.permute.xlu2 %1752  ;;  %v2218_v49 = vsel %vm2202_vm14, %v2199_v48, %v2057_v51  ;;  %v2087_v8 = vsel %vm2060_vm6, %v1645_v29, %v1708_v60  ;;  %v3031_v48 = vunpack.c.l.b16 %v2657_v19  ;;  %v3032_v51 = vunpack.c.l.b16 %v2670_v37  ;;  %4918 = vmatpush.bf16.msra.mxu0 %v6748_v3  ;;  %v2621_v37 = vld [vmem:[#allocation2 + $0x30] sm:$0x8] }
 0x15f   : > { %6074 = vmatmul.msk.bf16.gmra.mxu0 %vm2259_vm15, %v2218_v49  ;;  %v2106_v10 = vsel %vm2088_vm8, %v2087_v8, %v1753_v6  ;;  %v2619_v8 = vld [vmem:[#allocation2 + $0x24] sm:$0x8]  ;;  %v2680_v28 = vshll.u32 %v2618_v39, 16 }
 0x163   : > { %v2301_v27 = vpop.f32.mrf.mxu0 }
 0x164   : > { %v2302_v32 = vadd.f32 %v8432_v17, %v2301_v27  ;;  %v6673_v34 = vld [vmem:[#allocation2 + $0x24] sm:$0xf0]  ;;  %v2677_v27 = vshrl.u32 %v2618_v39, 16 }
 0x165   : > { %v1798_v62 = vpop.permute.xlu0 %1797  ;;  %v1861_v5 = vpop.permute.xlu1 %1860  ;;  %v6115_v43 = vor.u32 %v6673_v34, %v6114_v42  ;;  %v2620_v2 = vld [vmem:[#allocation2 + $0x28] sm:$0xf]  ;;  %v2685_v42 = vshrl.u32 %v2619_v8, 16  ;;  %v2698_v8 = vshrl.u32 %v2621_v37, 16 }
 0x166   : > { %v2125_v59 = vsel %vm2107_vm9, %v2106_v10, %v1798_v62  ;;  %v1906_v58 = vpop.permute.xlu2 %1905  ;;  %vm2340_vm3 = vcmp.ge.f32.partialorder %v2302_v32, 0.0  ;;  %v2358_v61 = vmul.f32 0.01, %v2302_v32  ;;  %v2690_v6 = vshrl.u32 %v2620_v2, 16 }
 0x167   : > { %v2144_v25 = vsel %vm2126_vm10, %v2125_v59, %v1861_v5  ;;  %2995 = vmatmul.bf16.gmra.mxu1 %v6115_v43  ;;  %v3047_v62 = vpack.c.b16 %v3032_v51, %v3031_v48  ;;  %v2679_v43 = vrot.slane %v2677_v27, 7 }
 0x168   : > { %v2376_v36 = vsel %vm2340_vm3, %v2302_v32, %v2358_v61  ;;  %v2163_v12 = vsel %vm2145_vm11, %v2144_v25, %v1906_v58  ;;  %v2617_v32 = vld [vmem:[#allocation2 + $0x18] sm:$0x8]  ;;  %v2692_v34 = vrot.slane %v2690_v6, 7  ;;  %v2693_v25 = vshll.u32 %v2620_v2, 16 }
 0x169   : > { %v2541_v0 = vpack.c.bf16 %v2376_v36, %v2376_v36  ;;  %v6747_v58 = vld [vmem:[%s9238_s2 + $0x198] sm:$0xff]  ;;  %v2672_v61 = vshrl.u32 %v2617_v32, 16 }
 0x16a   : > { %v6719_v36 = vld [vmem:[%s9238_s2 + $0xf8] sm:$0xff]  ;;  %4919 = vmatpush.bf16.msra.mxu0 %v6747_v58 }
 0x16b   : > { %2559 = vst [vmem:[#allocation2 + $0x34] sm:$0xf] %v2541_v0  ;;  %v2303_v45 = vpop.f32.mrf.mxu0  ;;  %v6746_v0 = vld [vmem:[%s9238_s2 + $0x190] sm:$0xff]  ;;  %3916 = vmatpush.bf16.msrb.mxu1 %v6719_v36  ;;  %v6078_v15 = vrot.slane %v2672_v61, 11 }
 0x16c   : > { %v2304_v21 = vadd.f32 %v8432_v17, %v2303_v45  ;;  %v2695_v45 = vor.u32 %v2693_v25, %v2692_v34  ;;  %v6716_v34 = vld [vmem:[%s9238_s2 + $0xe0] sm:$0xff] }
 0x16d   : > { %v1951_v55 = vpop.permute.xlu0 %1950  ;;  %v2014_v41 = vpop.permute.xlu1 %2013 }
 0x16e   : > { %v2182_v63 = vsel %vm2164_vm12, %v2163_v12, %v1951_v55  ;;  %v2059_v54 = vpop.permute.xlu2 %2058  ;;  %vm2341_vm6 = vcmp.ge.f32.partialorder %v2304_v21, 0.0  ;;  %v2359_v53 = vmul.f32 0.01, %v2304_v21  ;;  %v6079_v12 = vrot.slane %v2685_v42, 11  ;;  %4920 = vmatpush.bf16.msra.mxu0 %v6746_v0  ;;  %v6727_v0 = vld [vmem:[%s9238_s2 + $0x138] sm:$0xff] }
 0x16f   : > { %v2201_v11 = vsel %vm2183_vm13, %v2182_v63, %v2014_v41  ;;  %v2682_v55 = vor.u32 %v2680_v28, %v2679_v43  ;;  %v2625_v41 = vld [vmem:[#allocation2 + $0x48] sm:$0x8]  ;;  %3917 = vmatpush.bf16.msrb.mxu1 %v6718_v31  ;;  %4094 = vmatpush.bf16.msrb.mxu2 %v6727_v0 }
 0x170   : > { %v2220_v18 = vsel %vm2202_vm14, %v2201_v11, %v2059_v54  ;;  %v2377_v24 = vsel %vm2341_vm6, %v2304_v21, %v2359_v53  ;;  %v6745_v63 = vld [vmem:[%s9238_s2 + $0x188] sm:$0xff]  ;;  %v2696_v54 = vsel %vm7112_vm4, %v6079_v12, %v2695_v45  ;;  %v2724_v20 = vshrl.u32 %v2625_v41, 16  ;;  %v8611_v12 = vld [vmem:[#allocation2 + $0x10] sm:$0xf] }
 0x171   : > { %6075 = vmatmul.msk.bf16.gmra.mxu0 %vm2259_vm15, %v2220_v18  ;;  %v2542_v7 = vpack.c.bf16 %v2377_v24, %v2377_v24  ;;  %v2683_v18 = vsel %vm7112_vm4, %v6078_v15, %v2682_v55  ;;  %v3034_v16 = vunpack.c.l.b16 %v2696_v54  ;;  %v6080_v45 = vrot.slane %v2698_v8, 11  ;;  %v8615_v15 = vld [vmem:[#allocation2 + $0xc] sm:$0x8]  ;;  %v3582_v54 = vld [vmem:[#allocation2 + $0x1c] sm:$0xf] }
 0x172   : > { %v6118_v4 = vld [vmem:[#allocation2 + $0x34] sm:$0xf]  ;;  %4921 = vmatpush.bf16.msra.mxu0 %v6745_v63  ;;  %v3033_v46 = vunpack.c.l.b16 %v2683_v18  ;;  %v2629_v18 = vld [vmem:[#allocation2 + $0x60] sm:$0x8] }
 0x173   : > { %2560 = vst [vmem:[#allocation2 + $0x40] sm:$0xf] %v2542_v7  ;;  %v2622_v24 = vld [vmem:[#allocation2 + $0x34] sm:$0xf]  ;;  %3918 = vmatpush.bf16.msrb.mxu1 %v6717_v40 }
 0x174   : > { %v2703_v22 = vshrl.u32 %v2622_v24, 16  ;;  %v3048_v39 = vpack.c.b16 %v3034_v16, %v3033_v46  ;;  %v2706_v61 = vshll.u32 %v2622_v24, 16  ;;  %v3581_v24 = vld [vmem:[#allocation2 + $0x18] sm:$0x8]  ;;  %v4580_v16 = vld [vmem:[#allocation2 + $0x24] sm:$0x8] }
 0x175   : > { %v2750_v46 = vshrl.u32 %v2629_v18, 16  ;;  %v6726_v18 = vld [vmem:[%s9238_s2 + $0x130] sm:$0xff] }
 0x176   : > { %4922 = vmatpush.bf16.msra.mxu0 %v6744_v14  ;;  %4095 = vmatpush.bf16.msrb.mxu2 %v6726_v18 }
 0x177   : > { %3919 = vmatpush.bf16.msrb.mxu1 %v6716_v34 }
 0x179   : > { %v2306_v50 = vpop.f32.mrf.mxu0 }
 0x17a   : > { %v2307_v9 = vadd.f32 %v8432_v17, %v2306_v50  ;;  %v6674_v29 = vld [vmem:[#allocation2 + $0x3c] sm:$0xf0]  ;;  %v2711_v50 = vshrl.u32 %v2623_v23, 16 }
 0x17b   : > { %v6119_v60 = vor.u32 %v6674_v29, %v6118_v4  ;;  %v2624_v47 = vld [vmem:[#allocation2 + $0x40] sm:$0xf]  ;;  %v2737_v4 = vshrl.u32 %v2627_v56, 16  ;;  %v3630_v56 = vshrl.u32 %v3582_v54, 16 }
 0x17c   : > { %vm2342_vm7 = vcmp.ge.f32.partialorder %v2307_v9, 0.0  ;;  %v2360_v35 = vmul.f32 0.01, %v2307_v9  ;;  %v2716_v33 = vshrl.u32 %v2624_v47, 16  ;;  %v2719_v32 = vshll.u32 %v2624_v47, 16 }
 0x17d   : > { %3000 = vmatmul.bf16.gmra.mxu1 %v6119_v60  ;;  %v3617_v47 = vshrl.u32 %v8611_v12, 16 }
 0x17e   : > { %v2378_v49 = vsel %vm2342_vm7, %v2307_v9, %v2360_v35  ;;  %v6082_v9 = vrot.slane %v2724_v20, 11  ;;  %v2718_v51 = vrot.slane %v2716_v33, 7  ;;  %v4579_v20 = vld [vmem:[#allocation2 + $0x1c] sm:$0xf]  ;;  %v2631_v33 = vld [vmem:[#allocation2 + $0x6c] sm:$0x8] }
 0x17f   : > { %v2543_v10 = vpack.c.bf16 %v2378_v49, %v2378_v49 }
 0x180   : > { %v2721_v43 = vor.u32 %v2719_v32, %v2718_v51 }
 0x181   : > { %2561 = vst [vmem:[#allocation2 + $0x4c] sm:$0xf] %v2543_v10  ;;  %v2308_v5 = vpop.f32.mrf.mxu0  ;;  %3119 = vmatmul.bf16.vlgmr.msrb.gmra.mxu0 %v3047_v62  ;;  %v2705_v10 = vrot.slane %v2703_v22, 7  ;;  %v6083_v62 = vrot.slane %v2737_v4, 11  ;;  %v6713_v22 = vld [vmem:[%s9238_s2 + $0xc8] sm:$0xff]  ;;  %v3625_v4 = vshrl.u32 %v3581_v24, 16 }
 0x182   : > { %v2309_v59 = vadd.f32 %v8432_v17, %v2308_v5 }
 0x183   : > { %v2708_v31 = vor.u32 %v2706_v61, %v2705_v10  ;;  %v6084_v10 = vrot.slane %v2750_v46, 11  ;;  %v6253_v34 = vrot.slane %v3625_v4, 11  ;;  %v4584_v46 = vld [vmem:[#allocation2 + $0x3c] sm:$0x8] }
 0x184   : > { %vm2343_vm8 = vcmp.ge.f32.partialorder %v2309_v59, 0.0  ;;  %v2361_v1 = vmul.f32 0.01, %v2309_v59 }
 0x185   : > { %v2709_v23 = vsel %vm7112_vm4, %v6080_v45, %v2708_v31 }
 0x186   : > { %v2379_v21 = vsel %vm2343_vm8, %v2309_v59, %v2361_v1  ;;  %v6081_v59 = vrot.slane %v2711_v50, 11  ;;  %v6715_v1 = vld [vmem:[%s9238_s2 + $0xd8] sm:$0xff]  ;;  %v3619_v50 = vrot.slane %v3617_v47, 7  ;;  %v3035_v37 = vunpack.c.l.b16 %v2709_v23 }
 0x187   : > { %v2544_v13 = vpack.c.bf16 %v2379_v21, %v2379_v21  ;;  %3920 = vmatpush.bf16.msrb.mxu1 %v6715_v1 }
 0x188   : > { %v2626_v30 = vld [vmem:[#allocation2 + $0x4c] sm:$0xf] }
 0x189   : > { %2562 = vst [vmem:[#allocation2 + $0x58] sm:$0xf] %v2544_v13  ;;  %v2311_v53 = vpop.f32.mrf.mxu0  ;;  %v2729_v11 = vshrl.u32 %v2626_v30, 16  ;;  %v2732_v2 = vshll.u32 %v2626_v30, 16  ;;  %v6122_v35 = vld [vmem:[#allocation2 + $0x4c] sm:$0xf] }
 0x18a   : > { %v2312_v57 = vadd.f32 %v8432_v17, %v2311_v53  ;;  %v4581_v30 = vld [vmem:[#allocation2 + $0x28] sm:$0xf]  ;;  %v2722_v53 = vsel %vm7112_vm4, %v6081_v59, %v2721_v43  ;;  %v3633_v59 = vshll.u32 %v3582_v54, 16 }
 0x18b   : > { %v2731_v44 = vrot.slane %v2729_v11, 7  ;;  %v6714_v11 = vld [vmem:[%s9238_s2 + $0xd0] sm:$0xff]  ;;  %v3036_v14 = vunpack.c.l.b16 %v2722_v53 }
 0x18c   : > { %vm2344_vm9 = vcmp.ge.f32.partialorder %v2312_v57, 0.0  ;;  %v2362_v7 = vmul.f32 0.01, %v2312_v57  ;;  %3921 = vmatpush.bf16.msrb.mxu1 %v6714_v11 }
 0x18d   : > { %v2734_v6 = vor.u32 %v2732_v2, %v2731_v44  ;;  %v3612_v44 = vshrl.u32 %v8615_v15, 16  ;;  %v4624_v2 = vshrl.u32 %v4580_v16, 16  ;;  %v3049_v51 = vpack.c.b16 %v3036_v14, %v3035_v37  ;;  %v3586_v16 = vld [vmem:[#allocation2 + $0x34] sm:$0xf] }
 0x18e   : > { %v2380_v38 = vsel %vm2344_vm9, %v2312_v57, %v2362_v7  ;;  %v4629_v7 = vshrl.u32 %v4581_v30, 16 }
 0x18f   : > { %v2545_v19 = vpack.c.bf16 %v2380_v38, %v2380_v38  ;;  %v2735_v25 = vsel %vm7112_vm4, %v6082_v9, %v2734_v6  ;;  %v4616_v9 = vshrl.u32 %v4579_v20, 16  ;;  %v6445_v0 = vrot.slane %v4624_v2, 11 }
 0x190   : > { %v6675_v29 = vld [vmem:[#allocation2 + $0x54] sm:$0xf0]  ;;  %v3037_v55 = vunpack.c.l.b16 %v2735_v25  ;;  %3922 = vmatpush.bf16.msrb.mxu1 %v6713_v22  ;;  %v6252_v15 = vrot.slane %v3612_v44, 11  ;;  %v4583_v44 = vld [vmem:[#allocation2 + $0x34] sm:$0xf] }
 0x191   : > { %v2628_v3 = vld [vmem:[#allocation2 + $0x58] sm:$0xf]  ;;  %2563 = vst [vmem:[#allocation2 + $0x64] sm:$0xf] %v2545_v19  ;;  %v6123_v48 = vor.u32 %v6675_v29, %v6122_v35  ;;  %v2313_v60 = vpop.f32.mrf.mxu0  ;;  %3124 = vmatmul.bf16.gmra.mxu0 %v3048_v39  ;;  %v3620_v19 = vshll.u32 %v8611_v12, 16  ;;  %v4631_v35 = vrot.slane %v4629_v7, 7 }
 0x192   : > { %v2742_v49 = vshrl.u32 %v2628_v3, 16  ;;  %v2314_v27 = vadd.f32 %v8432_v17, %v2313_v60  ;;  %v2745_v42 = vshll.u32 %v2628_v3, 16  ;;  %v4578_v39 = vld [vmem:[#allocation2 + $0x18] sm:$0x8]  ;;  %v2763_v3 = vshrl.u32 %v2631_v33, 16 }
 0x193   : > { %3005 = vmatmul.bf16.gmra.mxu1 %v6123_v48  ;;  %v3632_v48 = vrot.slane %v3630_v56, 7  ;;  %v4618_v1 = vrot.slane %v4616_v9, 7  ;;  %v3584_v56 = vld [vmem:[#allocation2 + $0x28] sm:$0xf]  ;;  %v3656_v9 = vshrl.u32 %v3586_v16, 16 }
 0x194   : > { %v2744_v5 = vrot.slane %v2742_v49, 7  ;;  %vm2345_vm10 = vcmp.ge.f32.partialorder %v2314_v27, 0.0  ;;  %v2363_v58 = vmul.f32 0.01, %v2314_v27  ;;  %v6085_v61 = vrot.slane %v2763_v3, 11 }
 0x195   : > { %v3635_v12 = vor.u32 %v3633_v59, %v3632_v48  ;;  %v3643_v2 = vshrl.u32 %v3584_v56, 16  ;;  %v4642_v3 = vshrl.u32 %v4583_v44, 16  ;;  %v4650_v48 = vshrl.u32 %v4584_v46, 16  ;;  %v6725_v59 = vld [vmem:[%s9238_s2 + $0x128] sm:$0xff] }
 0x196   : > { %v2747_v36 = vor.u32 %v2745_v42, %v2744_v5  ;;  %v2381_v28 = vsel %vm2345_vm10, %v2314_v27, %v2363_v58  ;;  %v4611_v5 = vshrl.u32 %v4578_v39, 16  ;;  %v4632_v42 = vshll.u32 %v4581_v30, 16  ;;  %4096 = vmatpush.bf16.msrb.mxu2 %v6725_v59 }
 0x197   : > { %v2546_v21 = vpack.c.bf16 %v2381_v28, %v2381_v28 }
 0x198   : > { %v2748_v13 = vsel %vm7112_vm4, %v6083_v62, %v2747_v36  ;;  %v2630_v63 = vld [vmem:[#allocation2 + $0x64] sm:$0xf]  ;;  %v4634_v28 = vor.u32 %v4632_v42, %v4631_v35 }
 0x199   : > { %v3038_v41 = vunpack.c.l.b16 %v2748_v13  ;;  %2564 = vst [vmem:[#allocation2 + $0x70] sm:$0xf] %v2546_v21  ;;  %v2755_v57 = vshrl.u32 %v2630_v63, 16  ;;  %v2758_v29 = vshll.u32 %v2630_v63, 16  ;;  %v6126_v60 = vld [vmem:[#allocation2 + $0x64] sm:$0xf]  ;;  %v3622_v63 = vor.u32 %v3620_v19, %v3619_v50 }
 0x19a   : > { %v6712_v36 = vld [vmem:[%s9238_s2 + $0xc0] sm:$0xff]  ;;  %v4619_v13 = vshll.u32 %v4579_v20, 16  ;;  %v4635_v47 = vsel %vm7112_vm4, %v6445_v0, %v4634_v28  ;;  %v3585_v50 = vld [vmem:[#allocation2 + $0x30] sm:$0x8] }
 0x19b   : > { %v3050_v40 = vpack.c.b16 %v3038_v41, %v3037_v55  ;;  %v2757_v38 = vrot.slane %v2755_v57, 7  ;;  %3923 = vmatpush.bf16.msrb.mxu1 %v6712_v36  ;;  %v6444_v41 = vrot.slane %v4611_v5, 11  ;;  %v4585_v20 = vld [vmem:[#allocation2 + $0x40] sm:$0xf]  ;;  %v4836_v33 = vunpack.c.l.b16 %v4635_v47  ;;  %v3583_v35 = vld [vmem:[#allocation2 + $0x24] sm:$0x8] }
 0x19c   : > { %v4621_v53 = vor.u32 %v4619_v13, %v4618_v1  ;;  %v4655_v37 = vshrl.u32 %v4585_v20, 16  ;;  %v3645_v5 = vrot.slane %v3643_v2, 7  ;;  %v4658_v42 = vshll.u32 %v4585_v20, 16  ;;  %v2635_v28 = vld [vmem:[#allocation2 + $0x84] sm:$0x8] }
 0x19d   : > { %3134 = vmatmul.bf16.vlgmr.msra.gmra.mxu2 %v3050_v40  ;;  %v2760_v27 = vor.u32 %v2758_v29, %v2757_v38  ;;  %v3636_v40 = vsel %vm7112_vm4, %v6253_v34, %v3635_v12  ;;  %v3623_v38 = vsel %vm7112_vm4, %v6252_v15, %v3622_v63  ;;  %v2633_v34 = vld [vmem:[#allocation2 + $0x78] sm:$0x8]  ;;  %v3646_v36 = vshll.u32 %v3584_v56, 16  ;;  %v3588_v56 = vld [vmem:[#allocation2 + $0x40] sm:$0xf] }
 0x19e   : > { %v4622_v14 = vsel %vm7112_vm4, %v6444_v41, %v4621_v53  ;;  %v3837_v22 = vunpack.c.l.b16 %v3636_v40  ;;  %v3836_v39 = vunpack.c.l.b16 %v3623_v38  ;;  %v6447_v1 = vrot.slane %v4650_v48, 11  ;;  %v3589_v48 = vld [vmem:[#allocation2 + $0x48] sm:$0x8] }
 0x19f   : > { %v2761_v31 = vsel %vm7112_vm4, %v6084_v10, %v2760_v27  ;;  %v3658_v27 = vrot.slane %v3656_v9, 7  ;;  %v3587_v9 = vld [vmem:[#allocation2 + $0x3c] sm:$0x8] }
 0x1a0   : > { %v6676_v6 = vld [vmem:[#allocation2 + $0x6c] sm:$0xf0]  ;;  %v2316_v62 = vpop.f32.mrf.mxu0  ;;  %v3039_v11 = vunpack.c.l.b16 %v2761_v31  ;;  %v4645_v31 = vshll.u32 %v4583_v44, 16 }
 0x1a1   : > { %v2632_v49 = vld [vmem:[#allocation2 + $0x70] sm:$0xf]  ;;  %v6127_v8 = vor.u32 %v6676_v6, %v6126_v60  ;;  %3129 = vmatmul.bf16.gmra.mxu0 %v3049_v51  ;;  %v2317_v58 = vadd.f32 %v8432_v17, %v2316_v62  ;;  %v3651_v51 = vshrl.u32 %v3585_v50, 16  ;;  %v3638_v62 = vshrl.u32 %v3583_v35, 16 }
 0x1a2   : > { %v2768_v32 = vshrl.u32 %v2632_v49, 16  ;;  %v2771_v25 = vshll.u32 %v2632_v49, 16  ;;  %v4582_v6 = vld [vmem:[#allocation2 + $0x30] sm:$0x8]  ;;  %v4657_v49 = vrot.slane %v4655_v37, 7 }
 0x1a3   : > { %3010 = vmatmul.bf16.gmra.mxu1 %v6127_v8  ;;  %vm2346_vm11 = vcmp.ge.f32.partialorder %v2317_v58, 0.0  ;;  %v2364_v45 = vmul.f32 0.01, %v2317_v58  ;;  %v3852_v8 = vpack.c.b16 %v3837_v22, %v3836_v39  ;;  %v6255_v12 = vrot.slane %v3651_v51, 11  ;;  %v4587_v22 = vld [vmem:[#allocation2 + $0x4c] sm:$0xf] }
 0x1a4   : > { %v2770_v43 = vrot.slane %v2768_v32, 7  ;;  %v4660_v0 = vor.u32 %v4658_v42, %v4657_v49  ;;  %v6254_v15 = vrot.slane %v3638_v62, 11  ;;  %v3669_v51 = vshrl.u32 %v3588_v56, 16  ;;  %v8671_v42 = vld [vmem:[%s9239_s3] ss:$0 sm:$0xff] }
 0x1a5   : > { %v2382_v55 = vsel %vm2346_vm11, %v2317_v58, %v2364_v45  ;;  %v3659_v58 = vshll.u32 %v3586_v16, 16  ;;  %v4589_v16 = vld [vmem:[#allocation2 + $0x58] sm:$0xf] }
 0x1a6   : > { %v2773_v21 = vor.u32 %v2771_v25, %v2770_v43  ;;  %v2547_v54 = vpack.c.bf16 %v2382_v55, %v2382_v55  ;;  %v4637_v43 = vshrl.u32 %v4582_v6, 16  ;;  %v4644_v25 = vrot.slane %v4642_v3, 7  ;;  %v4586_v6 = vld [vmem:[#allocation2 + $0x48] sm:$0x8] }
 0x1a7   : > { %v3661_v45 = vor.u32 %v3659_v58, %v3658_v27  ;;  %v3648_v55 = vor.u32 %v3646_v36, %v3645_v5  ;;  %v4661_v53 = vsel %vm7112_vm4, %v6447_v1, %v4660_v0  ;;  %v3677_v58 = vshrl.u32 %v3589_v48, 16 }
 0x1a8   : > { %v2774_v30 = vsel %vm7112_vm4, %v6085_v61, %v2773_v21  ;;  %2565 = vst [vmem:[#allocation2 + $0x7c] sm:$0xf] %v2547_v54  ;;  %v2318_v24 = vpop.f32.mrf.mxu0  ;;  %v6703_v61 = vld [vmem:[%s9238_s2 + $0xb8] sm:$0xff]  ;;  %v2776_v21 = vshrl.u32 %v2633_v34, 16  ;;  %v6446_v41 = vrot.slane %v4637_v43, 11  ;;  %v2789_v54 = vshrl.u32 %v2635_v28, 16 }
 0x1a9   : > { %v3040_v57 = vunpack.c.l.b16 %v2774_v30  ;;  %v2319_v7 = vadd.f32 %v8432_v17, %v2318_v24  ;;  %v4835_v17 = vunpack.c.l.b16 %v4622_v14  ;;  %3513 = vmatpush.bf16.msrb.mxu3 %v6703_v61  ;;  %v4647_v30 = vor.u32 %v4645_v31, %v4644_v25  ;;  %v3590_v14 = vld [vmem:[#allocation2 + $0x4c] sm:$0xf] }
 0x1aa   : > { %v3662_v40 = vsel %vm7112_vm4, %v6255_v12, %v3661_v45  ;;  %v6086_v24 = vrot.slane %v2776_v21, 11  ;;  %v6087_v44 = vrot.slane %v2789_v54, 11  ;;  %v4838_v50 = vunpack.c.l.b16 %v4661_v53 }
 0x1ab   : > { %v3051_v23 = vpack.c.b16 %v3040_v57, %v3039_v11  ;;  %vm2347_vm12 = vcmp.ge.f32.partialorder %v2319_v7, 0.0  ;;  %v2365_v19 = vmul.f32 0.01, %v2319_v7  ;;  %v4851_v60 = vpack.c.b16 %v4836_v33, %v4835_v17 }
 0x1ac   : > { %v4648_v33 = vsel %vm7112_vm4, %v6446_v41, %v4647_v30  ;;  %v3839_v37 = vunpack.c.l.b16 %v3662_v40  ;;  %v3682_v39 = vshrl.u32 %v3590_v14, 16  ;;  %v4663_v25 = vshrl.u32 %v4586_v6, 16  ;;  %v6724_v41 = vld [vmem:[%s9238_s2 + $0x120] sm:$0xff]  ;;  %v6702_v30 = vld [vmem:[%s9238_s2 + $0xb0] sm:$0xff] }
 0x1ad   : > { %3139 = vmatmul.bf16.gmra.mxu2 %v3051_v23  ;;  %v2383_v4 = vsel %vm2347_vm12, %v2319_v7, %v2365_v19  ;;  %v3649_v7 = vsel %vm7112_vm4, %v6254_v15, %v3648_v55  ;;  %v4588_v19 = vld [vmem:[#allocation2 + $0x54] sm:$0x8]  ;;  %v4837_v35 = vunpack.c.l.b16 %v4648_v33  ;;  %v3671_v1 = vrot.slane %v3669_v51, 7  ;;  %3514 = vmatpush.bf16.msrb.mxu3 %v6702_v30  ;;  %v3594_v40 = vld [vmem:[#allocation2 + $0x64] sm:$0xf] }
 0x1ae   : > { %v2548_v29 = vpack.c.bf16 %v2383_v4, %v2383_v4  ;;  %v4681_v4 = vshrl.u32 %v4589_v16, 16  ;;  %v3838_v3 = vunpack.c.l.b16 %v3649_v7  ;;  %v4676_v49 = vshrl.u32 %v4588_v19, 16  ;;  %4097 = vmatpush.bf16.msrb.mxu2 %v6724_v41  ;;  %v4591_v33 = vld [vmem:[#allocation2 + $0x64] sm:$0xf] }
 0x1af   : > { %v2634_v10 = vld [vmem:[#allocation2 + $0x7c] sm:$0xf]  ;;  %v3684_v61 = vrot.slane %v3682_v39, 7  ;;  %v4684_v28 = vshll.u32 %v4589_v16, 16  ;;  %v3685_v12 = vshll.u32 %v3590_v14, 16  ;;  %v4671_v45 = vshll.u32 %v4587_v22, 16 }
 0x1b0   : > { %2566 = vst [vmem:[#allocation2 + $0x88] sm:$0xf] %v2548_v29  ;;  %v2781_v32 = vshrl.u32 %v2634_v10, 16  ;;  %v2784_v63 = vshll.u32 %v2634_v10, 16  ;;  %v6130_v11 = vld [vmem:[#allocation2 + $0x7c] sm:$0xf]  ;;  %v4852_v10 = vpack.c.b16 %v4838_v50, %v4837_v35  ;;  %v3853_v5 = vpack.c.b16 %v3839_v37, %v3838_v3 }
 0x1b1   : > { %4923 = vmatmul.bf16.vlgmr.msra.gmra.mxu0 %v4851_v60  ;;  %v4668_v29 = vshrl.u32 %v4587_v22, 16  ;;  %v4683_v59 = vrot.slane %v4681_v4, 7  ;;  %v6449_v31 = vrot.slane %v4676_v49, 11  ;;  %v3687_v54 = vor.u32 %v3685_v12, %v3684_v61  ;;  %v6701_v39 = vld [vmem:[%s9238_s2 + $0xa8] sm:$0xff] }
 0x1b2   : > { %v2783_v13 = vrot.slane %v2781_v32, 7  ;;  %v4694_v4 = vshrl.u32 %v4591_v33, 16  ;;  %3515 = vmatpush.bf16.msrb.mxu3 %v6701_v39 }
 0x1b3   : > { %3924 = vmatmul.bf16.vlgmr.msrb.gmra.mxu1 %v3852_v8  ;;  %v3664_v8 = vshrl.u32 %v3587_v9, 16  ;;  %v4670_v36 = vrot.slane %v4668_v29, 7  ;;  %v4686_v55 = vor.u32 %v4684_v28, %v4683_v59  ;;  %v4592_v9 = vld [vmem:[#allocation2 + $0x6c] sm:$0x8]  ;;  %v6723_v29 = vld [vmem:[%s9238_s2 + $0x118] sm:$0xff] }
 0x1b4   : > { %v2786_v23 = vor.u32 %v2784_v63, %v2783_v13  ;;  %v3672_v13 = vshll.u32 %v3588_v56, 16  ;;  %v6257_v63 = vrot.slane %v3677_v58, 11  ;;  %v3591_v56 = vld [vmem:[#allocation2 + $0x54] sm:$0x8]  ;;  %4098 = vmatpush.bf16.msrb.mxu2 %v6723_v29  ;;  %v3711_v58 = vshll.u32 %v3594_v40, 16 }
 0x1b5   : > { %v6256_v21 = vrot.slane %v3664_v8, 11  ;;  %v4687_v16 = vsel %vm7112_vm4, %v6449_v31, %v4686_v55  ;;  %v3690_v3 = vshrl.u32 %v3591_v56, 16  ;;  %v4702_v8 = vshrl.u32 %v4592_v9, 16  ;;  %v3160_v55 = vld [vmem:[#allocation2 + $0x4] sm:$0xf]  ;;  %v6721_v9 = vld [vmem:[%s9238_s2 + $0x108] sm:$0xff] }
 0x1b6   : > { %v2787_v2 = vsel %vm7112_vm4, %v6086_v24, %v2786_v23  ;;  %v4593_v24 = vld [vmem:[#allocation2 + $0x70] sm:$0xf]  ;;  %v3592_v23 = vld [vmem:[#allocation2 + $0x58] sm:$0xf]  ;;  %v3688_v7 = vsel %vm7112_vm4, %v6257_v63, %v3687_v54  ;;  %v4840_v37 = vunpack.c.l.b16 %v4687_v16  ;;  %v3196_v56 = vshll.u32 %v3160_v55, 16 }
 0x1b7   : > { %v6677_v57 = vld [vmem:[#allocation2 + $0x84] sm:$0xf0]  ;;  %v3041_v32 = vunpack.c.l.b16 %v2787_v2  ;;  %v4707_v50 = vshrl.u32 %v4593_v24, 16  ;;  %v3695_v19 = vshrl.u32 %v3592_v23, 16  ;;  %v3841_v2 = vunpack.c.l.b16 %v3688_v7  ;;  %v6722_v16 = vld [vmem:[%s9238_s2 + $0x110] sm:$0xff] }
 0x1b8   : > { %v2636_v47 = vld [vmem:[#allocation2 + $0x88] sm:$0xf]  ;;  %v6131_v18 = vor.u32 %v6677_v57, %v6130_v11  ;;  %v6448_v11 = vrot.slane %v4663_v25, 11  ;;  %v4673_v57 = vor.u32 %v4671_v45, %v4670_v36  ;;  %v4710_v25 = vshll.u32 %v4593_v24, 16  ;;  %v2637_v36 = vld [vmem:[#allocation2 + $0x90] sm:$0x8]  ;;  %4099 = vmatpush.bf16.msrb.mxu2 %v6722_v16 }
 0x1b9   : > { %v2794_v20 = vshrl.u32 %v2636_v47, 16  ;;  %v2797_v38 = vshll.u32 %v2636_v47, 16  ;;  %v3674_v47 = vor.u32 %v3672_v13, %v3671_v1  ;;  %v3698_v1 = vshll.u32 %v3592_v23, 16  ;;  %v2639_v13 = vld [vmem:[#allocation2 + $0x9c] sm:$0x8] }
 0x1ba   : > { %3015 = vmatmul.bf16.vlgmr.msra.gmra.mxu3 %v6131_v18  ;;  %v4674_v14 = vsel %vm7112_vm4, %v6448_v11, %v4673_v57  ;;  %v4697_v45 = vshll.u32 %v4591_v33, 16  ;;  %v6451_v31 = vrot.slane %v4702_v8, 11  ;;  %v2802_v41 = vshrl.u32 %v2637_v36, 16  ;;  %v8724_v29 = vld [vmem:[#allocation2 + $0x70] sm:$0xf] }
 0x1bb   : > { %v2796_v46 = vrot.slane %v2794_v20, 7  ;;  %v4839_v51 = vunpack.c.l.b16 %v4674_v14  ;;  %v2815_v57 = vshrl.u32 %v2639_v13, 16 }
 0x1bc   : > { %v6088_v33 = vrot.slane %v2802_v41, 11  ;;  %4100 = vmatpush.bf16.msrb.mxu2 %v6721_v9 }
 0x1bd   : > { %v2799_v17 = vor.u32 %v2797_v38, %v2796_v46  ;;  %v3593_v46 = vld [vmem:[#allocation2 + $0x60] sm:$0x8]  ;;  %v3708_v38 = vshrl.u32 %v3594_v40, 16 }
 0x1be   : > { %v3703_v6 = vshrl.u32 %v3593_v46, 16 }
 0x1bf   : > { %v2800_v60 = vsel %vm7112_vm4, %v6087_v44, %v2799_v17  ;;  %v2321_v27 = vpop.f32.mrf.mxu0  ;;  %v3675_v44 = vsel %vm7112_vm4, %v6256_v21, %v3674_v47  ;;  %v3710_v49 = vrot.slane %v3708_v38, 7  ;;  %v6699_v47 = vld [vmem:[%s9238_s2 + $0x98] sm:$0xff]  ;;  %v6698_v38 = vld [vmem:[%s9238_s2 + $0x90] sm:$0xff] }
 0x1c0   : > { %v3042_v62 = vunpack.c.l.b16 %v2800_v60  ;;  %v2322_v34 = vadd.f32 %v8671_v42, %v2321_v27  ;;  %v3840_v35 = vunpack.c.l.b16 %v3675_v44  ;;  %v4590_v60 = vld [vmem:[#allocation2 + $0x60] sm:$0x8]  ;;  %v6259_v28 = vrot.slane %v3703_v6, 11 }
 0x1c1   : > { %4928 = vmatmul.bf16.gmra.mxu0 %v4852_v10  ;;  %v4709_v10 = vrot.slane %v4707_v50, 7  ;;  %v4689_v61 = vshrl.u32 %v4590_v60, 16  ;;  %v3713_v12 = vor.u32 %v3711_v58, %v3710_v49  ;;  %v8730_v60 = vrot.slane %v3196_v56, 5 }
 0x1c2   : > { %v3052_v43 = vpack.c.b16 %v3042_v62, %v3041_v32  ;;  %vm2348_vm13 = vcmp.ge.f32.partialorder %v2322_v34, 0.0  ;;  %v2366_v0 = vmul.f32 0.01, %v2322_v34  ;;  %v6700_v32 = vld [vmem:[%s9238_s2 + $0xa0] sm:$0xff]  ;;  %v3697_v62 = vrot.slane %v3695_v19, 7 }
 0x1c3   : > { %3929 = vmatmul.bf16.gmra.mxu1 %v3853_v5  ;;  %v4853_v5 = vpack.c.b16 %v4840_v37, %v4839_v51  ;;  %v4712_v21 = vor.u32 %v4710_v25, %v4709_v10  ;;  %3516 = vmatpush.bf16.msrb.mxu3 %v6700_v32  ;;  %v6450_v63 = vrot.slane %v4689_v61, 11  ;;  %v3714_v40 = vsel %vm7112_vm4, %v6259_v28, %v3713_v12  ;;  %v8717_v19 = vld [vmem:[#allocation2 + $0x88] sm:$0xf]  ;;  %v3595_v28 = vld [vmem:[#allocation2 + $0x6c] sm:$0x8] }
 0x1c4   : > { %3144 = vmatmul.bf16.gmra.mxu2 %v3052_v43  ;;  %v2384_v15 = vsel %vm2348_vm13, %v2322_v34, %v2366_v0  ;;  %v3854_v34 = vpack.c.b16 %v3841_v2, %v3840_v35  ;;  %v4696_v43 = vrot.slane %v4694_v4, 7  ;;  %v6258_v0 = vrot.slane %v3690_v3, 11  ;;  %v8722_v2 = vld [vmem:[#allocation2 + $0x10] sm:$0xf]  ;;  %v8726_v3 = vld [vmem:[#allocation2 + $0x7c] sm:$0xf] }
 0x1c5   : > { %v2549_v53 = vpack.c.bf16 %v2384_v15, %v2384_v15  ;;  %v3700_v15 = vor.u32 %v3698_v1, %v3697_v62  ;;  %v4713_v23 = vsel %vm7112_vm4, %v6451_v31, %v4712_v21  ;;  %v3843_v37 = vunpack.c.l.b16 %v3714_v40  ;;  %v6697_v32 = vld [vmem:[%s9238_s2 + $0x88] sm:$0xff]  ;;  %v3597_v62 = vld [vmem:[#allocation2 + $0x78] sm:$0x8] }
 0x1c6   : > { %v4699_v54 = vor.u32 %v4697_v45, %v4696_v43  ;;  %v6089_v4 = vrot.slane %v2815_v57, 11  ;;  %v3207_v58 = vshrl.u32 %v8722_v2, 16  ;;  %v3210_v61 = vshll.u32 %v8722_v2, 16  ;;  %v4594_v31 = vld [vmem:[#allocation2 + $0x78] sm:$0x8] }
 0x1c7   : > { %2567 = vst [vmem:[#allocation2 + $0x94] sm:$0xf] %v2549_v53  ;;  %v2323_v18 = vpop.f32.mrf.mxu0  ;;  %v3701_v7 = vsel %vm7112_vm4, %v6258_v0, %v3700_v15  ;;  %3517 = vmatpush.bf16.msrb.mxu3 %v6699_v47  ;;  %v3721_v43 = vshrl.u32 %v8724_v29, 16  ;;  %v4720_v0 = vshrl.u32 %v8726_v3, 16  ;;  %v3729_v21 = vshrl.u32 %v3597_v62, 16 }
 0x1c8   : > { %v2324_v20 = vadd.f32 %v8671_v42, %v2323_v18  ;;  %v3193_v18 = vshrl.u32 %v3160_v55, 16  ;;  %v4700_v50 = vsel %vm7112_vm4, %v6450_v63, %v4699_v54  ;;  %v3716_v63 = vshrl.u32 %v3595_v28, 16 }
 0x1c9   : > { %v4841_v49 = vunpack.c.l.b16 %v4700_v50  ;;  %v3723_v54 = vrot.slane %v3721_v43, 7  ;;  %v4715_v57 = vshrl.u32 %v4594_v31, 16  ;;  %v4722_v47 = vrot.slane %v4720_v0, 7  ;;  %v8783_v0 = vld [vmem:[#allocation2 + $0x88] sm:$0xf] }
 0x1ca   : > { %vm2349_vm14 = vcmp.ge.f32.partialorder %v2324_v20, 0.0  ;;  %v2367_v22 = vmul.f32 0.01, %v2324_v20  ;;  %v8728_v51 = vrot.slane %v3193_v18, 4  ;;  %v4736_v40 = vshll.u32 %v8717_v19, 16  ;;  %v6696_v18 = vld [vmem:[%s9238_s2 + $0x80] sm:$0xff] }
 0x1cb   : > { %3518 = vmatpush.bf16.msrb.mxu3 %v6698_v38  ;;  %v6261_v16 = vrot.slane %v3729_v21, 11  ;;  %v4723_v56 = vshll.u32 %v8726_v3, 16  ;;  %v3209_v38 = vrot.slane %v3207_v58, 4  ;;  %v6260_v50 = vrot.slane %v3716_v63, 11  ;;  %v3601_v31 = vld [vmem:[#allocation2 + $0x90] sm:$0x8] }
 0x1cc   : > { %v2385_v17 = vsel %vm2349_vm14, %v2324_v20, %v2367_v22  ;;  %v8713_v22 = vld [vmem:[#allocation2 + $0x7c] sm:$0xf]  ;;  %v6452_v2 = vrot.slane %v4715_v57, 11 }
 0x1cd   : > { %v2550_v48 = vpack.c.bf16 %v2385_v17, %v2385_v17  ;;  %v4842_v17 = vunpack.c.l.b16 %v4713_v23  ;;  %v3734_v6 = vshrl.u32 %v8713_v22, 16 }
 0x1ce   : > { %v2638_v27 = vld [vmem:[#allocation2 + $0x94] sm:$0xf] }
 0x1cf   : > { %2568 = vst [vmem:[#allocation2 + $0xa0] sm:$0xf] %v2550_v48  ;;  %v2807_v59 = vshrl.u32 %v2638_v27, 16  ;;  %v6134_v53 = vld [vmem:[#allocation2 + $0x94] sm:$0xf]  ;;  %v2810_v11 = vshll.u32 %v2638_v27, 16  ;;  %v3842_v48 = vunpack.c.l.b16 %v3701_v7  ;;  %v4854_v36 = vpack.c.b16 %v4842_v17, %v4841_v49  ;;  %3519 = vmatpush.bf16.msrb.mxu3 %v6697_v32 }
 0x1d0   : > { %v4733_v27 = vshrl.u32 %v8717_v19, 16  ;;  %v3736_v13 = vrot.slane %v3734_v6, 7  ;;  %v4725_v17 = vor.u32 %v4723_v56, %v4722_v47  ;;  %v8776_v32 = vld [vmem:[#allocation2 + $0x94] sm:$0xf]  ;;  %v6767_v56 = vld [vmem:[%s9238_s2 + $0x238] sm:$0xff] }
 0x1d1   : > { %4933 = vmatmul.bf16.gmra.mxu0 %v4853_v5  ;;  %v2809_v30 = vrot.slane %v2807_v59, 7  ;;  %v3855_v59 = vpack.c.b16 %v3843_v37, %v3842_v48  ;;  %v8758_v37 = vpop.f32.mrf.mxu1  ;;  %v3760_v21 = vshrl.u32 %v8776_v32, 16 }
 0x1d2   : > { %v4735_v41 = vrot.slane %v4733_v27, 7 }
 0x1d3   : > { %3934 = vmatmul.bf16.gmra.mxu1 %v3854_v34  ;;  %v2812_v44 = vor.u32 %v2810_v11, %v2809_v30  ;;  %v4596_v34 = vld [vmem:[#allocation2 + $0x84] sm:$0x8]  ;;  %3520 = vmatpush.bf16.msrb.mxu3 %v6696_v18  ;;  %v3747_v18 = vshrl.u32 %v8783_v0, 16 }
 0x1d4   : > { %v4728_v55 = vshrl.u32 %v4596_v34, 16  ;;  %v8780_v34 = vld [vmem:[#allocation2 + $0x94] sm:$0xf] }
 0x1d5   : > { %v2813_v8 = vsel %vm7112_vm4, %v6088_v33, %v2812_v44  ;;  %v4738_v33 = vor.u32 %v4736_v40, %v4735_v41  ;;  %v3199_v44 = vor.u32 %v8730_v60, %v8728_v51  ;;  %v2641_v51 = vld [vmem:[#allocation2 + $0xa8] sm:$0x8]  ;;  %v6735_v60 = vld [vmem:[%s9238_s2 + $0x178] sm:$0xff] }
 0x1d6   : > { %v6678_v24 = vld [vmem:[#allocation2 + $0x9c] sm:$0xf0]  ;;  %v3043_v12 = vunpack.c.l.b16 %v2813_v8 }
 0x1d7   : > { %v2640_v20 = vld [vmem:[#allocation2 + $0xa0] sm:$0xf]  ;;  %v6135_v14 = vor.u32 %v6678_v24, %v6134_v53  ;;  %v3737_v53 = vshll.u32 %v8713_v22, 16  ;;  %v3212_v22 = vrot.slane %v3210_v61, 5  ;;  %v8772_v49 = vrot.slane %v3199_v44, 4  ;;  %4512 = vmatpush.bf16.msra.mxu3 %v6735_v60 }
 0x1d8   : > { %v2820_v46 = vshrl.u32 %v2640_v20, 16  ;;  %v2823_v35 = vshll.u32 %v2640_v20, 16  ;;  %v6720_v24 = vld [vmem:[%s9238_s2 + $0x100] sm:$0xff]  ;;  %v3724_v20 = vshll.u32 %v8724_v29, 16 }
 0x1d9   : > { %3020 = vmatmul.bf16.gmra.mxu3 %v6135_v14  ;;  %v3739_v7 = vor.u32 %v3737_v53, %v3736_v13  ;;  %v6453_v14 = vrot.slane %v4728_v55, 11  ;;  %4101 = vmatpush.bf16.msrb.mxu2 %v6720_v24  ;;  %v8770_v6 = vld [vmem:[#allocation2 + $0xa0] sm:$0xf]  ;;  %v4746_v55 = vshrl.u32 %v8780_v34, 16  ;;  %v3755_v24 = vshrl.u32 %v3601_v31, 16 }
 0x1da   : > { %v2822_v39 = vrot.slane %v2820_v46, 7  ;;  %v3726_v19 = vor.u32 %v3724_v20, %v3723_v54 }
 0x1db   : > { %v3740_v29 = vsel %vm7112_vm4, %v6261_v16, %v3739_v7  ;;  %v4739_v48 = vsel %vm7112_vm4, %v6453_v14, %v4738_v33  ;;  %v4749_v16 = vshll.u32 %v8780_v34, 16  ;;  %v3599_v14 = vld [vmem:[#allocation2 + $0x84] sm:$0x8]  ;;  %v3762_v33 = vrot.slane %v3760_v21, 7 }
 0x1dc   : > { %v2825_v10 = vor.u32 %v2823_v35, %v2822_v39  ;;  %v2326_v5 = vpop.f32.mrf.mxu0  ;;  %v4600_v39 = vld [vmem:[#allocation2 + $0x9c] sm:$0x8]  ;;  %v8761_v35 = vld [vmem:[#allocation2 + $0x14] sm:$0x1]  ;;  %v3727_v27 = vsel %vm7112_vm4, %v6260_v50, %v3726_v19  ;;  %v3845_v58 = vunpack.c.l.b16 %v3740_v29  ;;  %v4844_v43 = vunpack.c.l.b16 %v4739_v48 }
 0x1dd   : > { %v2327_v25 = vadd.f32 %v8671_v42, %v2326_v5  ;;  %v4726_v5 = vsel %vm7112_vm4, %v6452_v2, %v4725_v17  ;;  %v4762_v19 = vshll.u32 %v8770_v6, 16  ;;  %5511 = vmatpush.bf16.msra.mxu2 %v6767_v56  ;;  %v3742_v17 = vshrl.u32 %v3599_v14, 16  ;;  %v4604_v56 = vld [vmem:[#allocation2 + $0xb4] sm:$0x8] }
 0x1de   : > { %v2826_v1 = vsel %vm7112_vm4, %v6089_v4, %v2825_v10  ;;  %v3161_v4 = vld [vmem:[#allocation2 + $0x8] sm:$0x1]  ;;  %v3213_v10 = vor.u32 %v3212_v22, %v3209_v38  ;;  %v4843_v13 = vunpack.c.l.b16 %v4726_v5  ;;  %v4748_v38 = vrot.slane %v4746_v55, 7 }
 0x1df   : > { %v3044_v45 = vunpack.c.l.b16 %v2826_v1  ;;  %vm2350_vm15 = vcmp.ge.f32.partialorder %v2327_v25, 0.0  ;;  %v2368_v15 = vmul.f32 0.01, %v2327_v25  ;;  %v3202_v8 = vshll.u32 %v3161_v4, 16 }
 0x1e0   : > { %v3216_v1 = vshll.u32 %v8761_v35, 16  ;;  %v8792_v53 = vrot.slane %v3213_v10, 4  ;;  %v4855_v47 = vpack.c.b16 %v4844_v43, %v4843_v13  ;;  %v3750_v22 = vshll.u32 %v8783_v0, 16 }
 0x1e1   : > { %v3053_v30 = vpack.c.b16 %v3044_v45, %v3043_v12  ;;  %v2386_v11 = vsel %vm2350_vm15, %v2327_v25, %v2368_v15  ;;  %4938 = vmatmul.bf16.gmra.mxu0 %v4854_v36  ;;  %v2828_v25 = vshrl.u32 %v2641_v51, 16  ;;  %v4598_v36 = vld [vmem:[#allocation2 + $0x90] sm:$0x8]  ;;  %v4759_v12 = vshrl.u32 %v8770_v6, 16 }
 0x1e2   : > { %v2551_v23 = vpack.c.bf16 %v2386_v11, %v2386_v11  ;;  %v3844_v45 = vunpack.c.l.b16 %v3727_v27  ;;  %v8788_v41 = vrot.slane %v3202_v8, 5  ;;  %v4741_v63 = vshrl.u32 %v4598_v36, 16 }
 0x1e3   : > { %3939 = vmatmul.bf16.gmra.mxu1 %v3855_v59  ;;  %3149 = vmatmul.bf16.gmra.mxu2 %v3053_v30  ;;  %v4754_v59 = vshrl.u32 %v4600_v39, 16  ;;  %v2643_v30 = vld [vmem:[#allocation2 + $0xb4] sm:$0x8]  ;;  %v8794_v40 = vrot.slane %v2828_v25, 11  ;;  %v4761_v7 = vrot.slane %v4759_v12, 7  ;;  %v3749_v4 = vrot.slane %v3747_v18, 7 }
 0x1e4   : > { %2569 = vst [vmem:[#allocation2 + $0xac] sm:$0xf] %v2551_v23  ;;  %v2328_v46 = vpop.f32.mrf.mxu0  ;;  %v3856_v11 = vpack.c.b16 %v3845_v58, %v3844_v45  ;;  %v8797_v23 = vpop.f32.mrf.mxu1  ;;  %v6263_v39 = vrot.slane %v3755_v24, 11  ;;  %v3205_v60 = vsel %vm7149_vm5, %v8772_v49, %v8788_v41  ;;  %v6454_v34 = vrot.slane %v4741_v63, 11  ;;  %v6734_v12 = vld [vmem:[%s9238_s2 + $0x170] sm:$0xff] }
 0x1e5   : > { %v2329_v9 = vadd.f32 %v8671_v42, %v2328_v46  ;;  %v8790_v54 = vrot.slane %v4754_v59, 11  ;;  %v2841_v46 = vshrl.u32 %v2643_v30, 16  ;;  %v4764_v51 = vor.u32 %v4762_v19, %v4761_v7  ;;  %4513 = vmatpush.bf16.msra.mxu3 %v6734_v12 }
 0x1e6   : > { %v4751_v59 = vor.u32 %v4749_v16, %v4748_v38  ;;  %v3218_v58 = vrot.slane %v3216_v1, 5  ;;  %v6262_v0 = vrot.slane %v3742_v17, 11  ;;  %v3752_v49 = vor.u32 %v3750_v22, %v3749_v4 }
 0x1e7   : > { %vm2351_vm0 = vcmp.ge.f32.partialorder %v2329_v9, 0.0  ;;  %v2369_v3 = vmul.f32 0.01, %v2329_v9  ;;  %v6091_v5 = vrot.slane %v2841_v46, 11  ;;  %v4765_v1 = vsel %vm7112_vm4, %v8790_v54, %v4764_v51 }
 0x1e8   : > { %v3219_v13 = vsel %vm7149_vm5, %v8792_v53, %v3218_v58  ;;  %v4752_v54 = vsel %vm7112_vm4, %v6454_v34, %v4751_v59  ;;  %v4846_v24 = vunpack.c.l.b16 %v4765_v1  ;;  %v4780_v4 = vshrl.u32 %v4604_v56, 16 }
 0x1e9   : > { %v2387_v62 = vsel %vm2351_vm0, %v2329_v9, %v2369_v3  ;;  %v3763_v9 = vshll.u32 %v8776_v32, 16  ;;  %v3434_v7 = vunpack.c.l.b16 %v3219_v13  ;;  %v4845_v38 = vunpack.c.l.b16 %v4752_v54  ;;  %v6733_v54 = vld [vmem:[%s9238_s2 + $0x168] sm:$0xff] }
 0x1ea   : > { %v2552_v61 = vpack.c.bf16 %v2387_v62, %v2387_v62  ;;  %v8814_v62 = vld [vmem:[#allocation2 + $0x1c] sm:$0xf]  ;;  %4514 = vmatpush.bf16.msra.mxu3 %v6733_v54 }
 0x1eb   : > { %v2642_v28 = vld [vmem:[#allocation2 + $0xac] sm:$0xf]  ;;  %v3765_v6 = vor.u32 %v3763_v9, %v3762_v33  ;;  %v3221_v41 = vshrl.u32 %v8814_v62, 16  ;;  %v3224_v33 = vshll.u32 %v8814_v62, 16  ;;  %v4856_v17 = vpack.c.b16 %v4846_v24, %v4845_v38  ;;  %v6755_v54 = vld [vmem:[%s9238_s2 + $0x1d8] sm:$0xff] }
 0x1ec   : > { %2570 = vst [vmem:[#allocation2 + $0xb8] sm:$0xf] %v2552_v61  ;;  %v2833_v15 = vshrl.u32 %v2642_v28, 16  ;;  %v2836_v2 = vshll.u32 %v2642_v28, 16  ;;  %v6138_v29 = vld [vmem:[#allocation2 + $0xac] sm:$0xf]  ;;  %v8816_v28 = vpop.f32.mrf.mxu1 }
 0x1ed   : > { %v3166_v61 = vld [vmem:[#allocation2 + $0x28] sm:$0xf]  ;;  %v3766_v21 = vsel %vm7112_vm4, %v6263_v39, %v3765_v6  ;;  %v3606_v63 = vld [vmem:[#allocation2 + $0xac] sm:$0xf]  ;;  %v3223_v62 = vrot.slane %v3221_v41, 4 }
 0x1ee   : > { %v2331_v57 = vpop.f32.mrf.mxu0  ;;  %v2835_v44 = vrot.slane %v2833_v15, 7  ;;  %v8832_v15 = vunpack.c.l.b16 %v3205_v60  ;;  %v3235_v30 = vshrl.u32 %v3166_v61, 16  ;;  %v3847_v16 = vunpack.c.l.b16 %v3766_v21  ;;  %v3167_v6 = vld [vmem:[#allocation2 + $0x2c] sm:$0x1] }
 0x1ef   : > { %v2332_v20 = vadd.f32 %v8671_v42, %v2331_v57  ;;  %v6759_v42 = vld [vmem:[%s9238_s2 + $0x1f8] sm:$0xff]  ;;  %v3238_v57 = vshll.u32 %v3166_v61, 16  ;;  %v3165_v61 = vld [vmem:[#allocation2 + $0x20] sm:$0x1] }
 0x1f0   : > { %5093 = vmatpush.bf16.msra.mxu1 %v6759_v42  ;;  %v2838_v27 = vor.u32 %v2836_v2, %v2835_v44  ;;  %v3786_v44 = vshrl.u32 %v3606_v63, 16  ;;  %v4602_v42 = vld [vmem:[#allocation2 + $0xa8] sm:$0x8]  ;;  %v3237_v2 = vrot.slane %v3235_v30, 4  ;;  %v3449_v51 = vpack.c.b16 %v3434_v7, %v8832_v15  ;;  %v3170_v7 = vld [vmem:[#allocation2 + $0x40] sm:$0xf] }
 0x1f1   : > { %vm2352_vm1 = vcmp.ge.f32.partialorder %v2332_v20, 0.0  ;;  %v2370_v50 = vmul.f32 0.01, %v2332_v20  ;;  %4943 = vmatmul.bf16.gmra.mxu0 %v4855_v47  ;;  %v3753_v47 = vsel %vm7112_vm4, %v6262_v0, %v3752_v49  ;;  %v3240_v39 = vrot.slane %v3238_v57, 5 }
 0x1f2   : > { %v2839_v45 = vsel %vm7112_vm4, %v8794_v40, %v2838_v27  ;;  %v3604_v40 = vld [vmem:[#allocation2 + $0xa0] sm:$0xf]  ;;  %v3846_v22 = vunpack.c.l.b16 %v3753_v47  ;;  %v3244_v49 = vshll.u32 %v3167_v6, 16  ;;  %v3230_v15 = vshll.u32 %v3165_v61, 16  ;;  %v6757_v6 = vld [vmem:[%s9238_s2 + $0x1e8] sm:$0xff] }
 0x1f3   : > { %3944 = vmatmul.bf16.gmra.mxu1 %v3856_v11  ;;  %v2388_v35 = vsel %vm2352_vm1, %v2332_v20, %v2370_v50  ;;  %v6679_v3 = vld [vmem:[#allocation2 + $0xb4] sm:$0xf0]  ;;  %v3045_v53 = vunpack.c.l.b16 %v2839_v45  ;;  %v4603_v20 = vld [vmem:[#allocation2 + $0xac] sm:$0xf]  ;;  %v3605_v50 = vld [vmem:[#allocation2 + $0xa8] sm:$0x8]  ;;  %v3241_v0 = vor.u32 %v3240_v39, %v3237_v2 }
 0x1f4   : > { %v2644_v48 = vld [vmem:[#allocation2 + $0xb8] sm:$0xf]  ;;  %v2553_v8 = vpack.c.bf16 %v2388_v35, %v2388_v35  ;;  %v6139_v10 = vor.u32 %v6679_v3, %v6138_v29  ;;  %v3773_v19 = vshrl.u32 %v3604_v40, 16  ;;  %v4772_v9 = vshrl.u32 %v4603_v20, 16  ;;  %v6766_v29 = vld [vmem:[%s9238_s2 + $0x230] sm:$0xff]  ;;  %v8849_v27 = vpop.f32.mrf.mxu1 }
 0x1f5   : > { %v2846_v32 = vshrl.u32 %v2644_v48, 16  ;;  %v2849_v36 = vshll.u32 %v2644_v48, 16  ;;  %v4605_v55 = vld [vmem:[#allocation2 + $0xb8] sm:$0xf]  ;;  %v3857_v35 = vpack.c.b16 %v3847_v16, %v3846_v22  ;;  %v6758_v3 = vld [vmem:[%s9238_s2 + $0x1f0] sm:$0xff]  ;;  %5512 = vmatpush.bf16.msra.mxu2 %v6766_v29  ;;  %v3776_v12 = vshll.u32 %v3604_v40, 16 }
 0x1f6   : > { %2571 = vst [vmem:[#allocation2 + $0xc4] sm:$0xf] %v2553_v8  ;;  %v2333_v43 = vpop.f32.mrf.mxu0  ;;  %3025 = vmatmul.bf16.gmra.mxu3 %v6139_v10  ;;  %v4785_v14 = vshrl.u32 %v4605_v55, 16  ;;  %v3603_v48 = vld [vmem:[#allocation2 + $0x9c] sm:$0x8]  ;;  %v3781_v8 = vshrl.u32 %v3605_v50, 16  ;;  %5094 = vmatpush.bf16.msra.mxu1 %v6758_v3 }
 0x1f7   : > { %v2848_v25 = vrot.slane %v2846_v32, 7  ;;  %v3788_v10 = vrot.slane %v3786_v44, 7  ;;  %v4767_v32 = vshrl.u32 %v4602_v42, 16  ;;  %v3775_v34 = vrot.slane %v3773_v19, 7  ;;  %v3608_v38 = vld [vmem:[#allocation2 + $0xb8] sm:$0xf] }
 0x1f8   : > { %v4787_v60 = vrot.slane %v4785_v14, 7  ;;  %v4774_v59 = vrot.slane %v4772_v9, 7  ;;  %v4788_v58 = vshll.u32 %v4605_v55, 16  ;;  %v3768_v43 = vshrl.u32 %v3603_v48, 16  ;;  %v3168_v19 = vld [vmem:[#allocation2 + $0x34] sm:$0xf] }
 0x1f9   : > { %v2851_v31 = vor.u32 %v2849_v36, %v2848_v25  ;;  %v3789_v25 = vshll.u32 %v3606_v63, 16  ;;  %v6457_v36 = vrot.slane %v4780_v4, 11  ;;  %v4775_v45 = vshll.u32 %v4603_v20, 16  ;;  %v3609_v39 = vld [vmem:[#allocation2 + $0xc0] sm:$0x8] }
 0x1fa   : > { %v6265_v1 = vrot.slane %v3781_v8, 11  ;;  %v6456_v41 = vrot.slane %v4767_v32, 11  ;;  %v3778_v55 = vor.u32 %v3776_v12, %v3775_v34  ;;  %v3242_v57 = vrot.slane %v3241_v0, 4  ;;  %v6765_v8 = vld [vmem:[%s9238_s2 + $0x228] sm:$0xff]  ;;  %5095 = vmatpush.bf16.msra.mxu1 %v6757_v6 }
 0x1fb   : > { %v2852_v11 = vsel %vm7112_vm4, %v6091_v5, %v2851_v31  ;;  %v3226_v5 = vrot.slane %v3224_v33, 5  ;;  %v4790_v31 = vor.u32 %v4788_v58, %v4787_v60  ;;  %v3791_v21 = vor.u32 %v3789_v25, %v3788_v10  ;;  %v6334_v33 = vld [vmem:[#allocation2 + $0x10] sm:$0xf]  ;;  %v3607_v10 = vld [vmem:[#allocation2 + $0xb4] sm:$0x8]  ;;  %5513 = vmatpush.bf16.msra.mxu2 %v6765_v8  ;;  %v6756_v25 = vld [vmem:[%s9238_s2 + $0x1e0] sm:$0xff] }
 0x1fc   : > { %v3046_v18 = vunpack.c.l.b16 %v2852_v11  ;;  %v4777_v30 = vor.u32 %v4775_v45, %v4774_v59  ;;  %v6264_v11 = vrot.slane %v3768_v43, 11  ;;  %v3246_v47 = vrot.slane %v3244_v49, 5  ;;  %v3171_v43 = vld [vmem:[#allocation2 + $0x44] sm:$0x1] }
 0x1fd   : > { %v3227_v13 = vor.u32 %v3226_v5, %v3223_v62  ;;  %v4791_v63 = vsel %vm7112_vm4, %v6457_v36, %v4790_v31  ;;  %v3792_v40 = vsel %vm7112_vm4, %v6265_v1, %v3791_v21  ;;  %v3232_v16 = vrot.slane %v3230_v15, 5  ;;  %v3610_v14 = vld [vmem:[#allocation2 + $0xc4] sm:$0xf]  ;;  %v3169_v1 = vld [vmem:[#allocation2 + $0x38] sm:$0x1] }
 0x1fe   : > { %v3054_v46 = vpack.c.b16 %v3046_v18, %v3045_v53  ;;  %v8858_v53 = vpop.f32.mrf.mxu1  ;;  %v6704_v18 = vld [vmem:[#allocation2 + $0x18] sm:$0xf0]  ;;  %v4778_v24 = vsel %vm7112_vm4, %v6456_v41, %v4777_v30  ;;  %v3779_v56 = vsel %vm7112_vm4, %v6264_v11, %v3778_v55  ;;  %v4848_v44 = vunpack.c.l.b16 %v4791_v63  ;;  %5096 = vmatpush.bf16.msra.mxu1 %v6756_v25  ;;  %v6732_v63 = vld [vmem:[%s9238_s2 + $0x160] sm:$0xff] }
 0x1ff   : > { %v3228_v20 = vrot.slane %v3227_v13, 4  ;;  %v6335_v22 = vor.u32 %v6704_v18, %v6334_v33  ;;  %v3247_v50 = vsel %vm7149_vm5, %v3242_v57, %v3246_v47  ;;  %v3812_v42 = vshrl.u32 %v3610_v14, 16  ;;  %4515 = vmatpush.bf16.msra.mxu3 %v6732_v63  ;;  %v6705_v18 = vld [vmem:[#allocation2 + $0x30] sm:$0xf0]  ;;  %v6338_v33 = vld [vmem:[#allocation2 + $0x28] sm:$0xf] }
 0x200   : > { %3154 = vmatmul.bf16.gmra.mxu2 %v3054_v46  ;;  %v3849_v46 = vunpack.c.l.b16 %v3792_v40  ;;  %v4847_v9 = vunpack.c.l.b16 %v4778_v24  ;;  %v3263_v2 = vshrl.u32 %v3170_v7, 16  ;;  %v3848_v4 = vunpack.c.l.b16 %v3779_v56  ;;  %v6754_v56 = vld [vmem:[%s9238_s2 + $0x1d0] sm:$0xff] }
 0x201   : > { %4948 = vmatmul.bf16.gmra.mxu0 %v4856_v17  ;;  %v3266_v17 = vshll.u32 %v3170_v7, 16  ;;  %v3799_v29 = vshrl.u32 %v3608_v38, 16  ;;  %v3249_v48 = vshrl.u32 %v3168_v19, 16  ;;  %v3436_v32 = vunpack.c.l.b16 %v3247_v50  ;;  %v3172_v50 = vld [vmem:[#allocation2 + $0x4c] sm:$0xf] }
 0x202   : > { %v4857_v3 = vpack.c.b16 %v4848_v44, %v4847_v9  ;;  %v3858_v60 = vpack.c.b16 %v3849_v46, %v3848_v4  ;;  %v3807_v62 = vshrl.u32 %v3609_v39, 16  ;;  %v3814_v5 = vrot.slane %v3812_v42, 7  ;;  %5097 = vmatpush.bf16.msra.mxu1 %v6755_v54 }
 0x203   : > { %3949 = vmatmul.bf16.gmra.mxu1 %v3857_v35  ;;  %v3233_v35 = vsel %vm7149_vm5, %v3228_v20, %v3232_v16  ;;  %v3815_v34 = vshll.u32 %v3610_v14, 16  ;;  %v3265_v59 = vrot.slane %v3263_v2, 4  ;;  %v3268_v58 = vrot.slane %v3266_v17, 5  ;;  %v3174_v16 = vld [vmem:[#allocation2 + $0x58] sm:$0xf] }
 0x204   : > { %v3435_v61 = vunpack.c.l.b16 %v3233_v35  ;;  %v3794_v36 = vshrl.u32 %v3607_v10, 16  ;;  %v3801_v0 = vrot.slane %v3799_v29, 7  ;;  %v3251_v12 = vrot.slane %v3249_v48, 4  ;;  %v6753_v48 = vld [vmem:[%s9238_s2 + $0x1c8] sm:$0xff] }
 0x205   : > { %v3802_v21 = vshll.u32 %v3608_v38, 16  ;;  %v6267_v13 = vrot.slane %v3807_v62, 11  ;;  %v3817_v15 = vor.u32 %v3815_v34, %v3814_v5  ;;  %v3269_v41 = vor.u32 %v3268_v58, %v3265_v59  ;;  %v6752_v62 = vld [vmem:[%s9238_s2 + $0x1c0] sm:$0xff]  ;;  %v3173_v58 = vld [vmem:[#allocation2 + $0x50] sm:$0x1] }
 0x206   : > { %3521 = vmatmul.bf16.vlgmr.msrb.gmra.mxu3 %v3449_v51  ;;  %v3252_v51 = vshll.u32 %v3168_v19, 16  ;;  %v8877_v49 = vpop.f32.mrf.mxu1  ;;  %v3450_v31 = vpack.c.b16 %v3436_v32, %v3435_v61  ;;  %v3272_v30 = vshll.u32 %v3171_v43, 16  ;;  %v6266_v11 = vrot.slane %v3794_v36, 11  ;;  %5098 = vmatpush.bf16.msra.mxu1 %v6754_v56  ;;  %v3175_v32 = vld [vmem:[#allocation2 + $0x5c] sm:$0x1] }
 0x207   : > { %v3804_v55 = vor.u32 %v3802_v21, %v3801_v0  ;;  %v3258_v47 = vshll.u32 %v3169_v1, 16  ;;  %v3818_v40 = vsel %vm7112_vm4, %v6267_v13, %v3817_v15  ;;  %v3270_v24 = vrot.slane %v3269_v41, 4  ;;  %v6731_v0 = vld [vmem:[%s9238_s2 + $0x158] sm:$0xff]  ;;  %v6706_v21 = vld [vmem:[#allocation2 + $0x48] sm:$0xf0] }
 0x208   : > { %v3254_v45 = vrot.slane %v3252_v51, 5  ;;  %v3274_v20 = vrot.slane %v3272_v30, 5  ;;  %v3851_v38 = vunpack.c.l.b16 %v3818_v40  ;;  %v3291_v9 = vshrl.u32 %v3174_v16, 16  ;;  %v6764_v51 = vld [vmem:[%s9238_s2 + $0x220] sm:$0xff]  ;;  %4516 = vmatpush.bf16.msra.mxu3 %v6731_v0  ;;  %v3178_v13 = vld [vmem:[#allocation2 + $0x70] sm:$0xf] }
 0x209   : > { %v3805_v7 = vsel %vm7112_vm4, %v6266_v11, %v3804_v55  ;;  %v3260_v46 = vrot.slane %v3258_v47, 5  ;;  %v3294_v2 = vshll.u32 %v3174_v16, 16  ;;  %v3277_v35 = vshrl.u32 %v3172_v50, 16  ;;  %5514 = vmatpush.bf16.msra.mxu2 %v6764_v51  ;;  %v6342_v30 = vld [vmem:[#allocation2 + $0x40] sm:$0xf] }
 0x20a   : > { %v3255_v57 = vor.u32 %v3254_v45, %v3251_v12  ;;  %v3275_v19 = vsel %vm7149_vm5, %v3270_v24, %v3274_v20  ;;  %v3850_v17 = vunpack.c.l.b16 %v3805_v7  ;;  %v3280_v29 = vshll.u32 %v3172_v50, 16  ;;  %5099 = vmatpush.bf16.msra.mxu1 %v6753_v48  ;;  %v3176_v11 = vld [vmem:[#allocation2 + $0x64] sm:$0xf]  ;;  %v6736_v55 = vld [vmem:[#allocation2 + $0x24] sm:$0xf0] }
 0x20b   : > { %v3293_v6 = vrot.slane %v3291_v9, 4  ;;  %v3296_v8 = vrot.slane %v3294_v2, 5  ;;  %v3279_v5 = vrot.slane %v3277_v35, 4  ;;  %v3300_v36 = vshll.u32 %v3175_v32, 16  ;;  %v6526_v20 = vld [vmem:[#allocation2 + $0x1c] sm:$0xf] }
 0x20c   : > { %v3256_v44 = vrot.slane %v3255_v57, 4  ;;  %v3282_v34 = vrot.slane %v3280_v29, 5  ;;  %v3286_v45 = vshll.u32 %v3173_v58, 16  ;;  %v6343_v54 = vor.u32 %v6706_v21, %v6342_v30  ;;  %v3179_v50 = vld [vmem:[#allocation2 + $0x74] sm:$0x1] }
 0x20d   : > { %v3297_v25 = vor.u32 %v3296_v8, %v3293_v6  ;;  %v3302_v1 = vrot.slane %v3300_v36, 5  ;;  %v3319_v40 = vshrl.u32 %v3178_v13, 16  ;;  %v3305_v7 = vshrl.u32 %v3176_v11, 16  ;;  %v3177_v2 = vld [vmem:[#allocation2 + $0x68] sm:$0x1]  ;;  %v6730_v35 = vld [vmem:[%s9238_s2 + $0x150] sm:$0xff] }
 0x20e   : > { %v3261_v39 = vsel %vm7149_vm5, %v3256_v44, %v3260_v46  ;;  %5100 = vmatpush.bf16.msra.mxu1 %v6752_v62  ;;  %v3283_v12 = vor.u32 %v3282_v34, %v3279_v5  ;;  %v3288_v41 = vrot.slane %v3286_v45, 5  ;;  %v3308_v56 = vshll.u32 %v3176_v11, 16  ;;  %4517 = vmatpush.bf16.msra.mxu3 %v6730_v35  ;;  %v3182_v6 = vld [vmem:[#allocation2 + $0x88] sm:$0xf]  ;;  %v6346_v32 = vld [vmem:[#allocation2 + $0x58] sm:$0xf] }
 0x20f   : > { %v3437_v10 = vunpack.c.l.b16 %v3261_v39  ;;  %v3321_v46 = vrot.slane %v3319_v40, 4  ;;  %v3328_v39 = vshll.u32 %v3179_v50, 16  ;;  %v3180_v62 = vld [vmem:[#allocation2 + $0x7c] sm:$0xf]  ;;  %v6737_v5 = vld [vmem:[#allocation2 + $0x3c] sm:$0xf0] }
 0x210   : > { %4102 = vmatmul.bf16.vlgmr.msrb.gmra.mxu2 %v6335_v22  ;;  %v3006_v14 = vpop.f32.mrf.mxu1  ;;  %v6339_v22 = vor.u32 %v6705_v18, %v6338_v33  ;;  %v3284_v15 = vrot.slane %v3283_v12, 4  ;;  %v3322_v18 = vshll.u32 %v3178_v13, 16  ;;  %v6763_v33 = vld [vmem:[%s9238_s2 + $0x218] sm:$0xff]  ;;  %v3347_v58 = vshrl.u32 %v3182_v6, 16  ;;  %v6530_v0 = vld [vmem:[#allocation2 + $0x34] sm:$0xf] }
 0x211   : > { %4953 = vmatmul.bf16.gmra.mxu0 %v4857_v3  ;;  %v3859_v3 = vpack.c.b16 %v3851_v38, %v3850_v17  ;;  %5515 = vmatpush.bf16.msra.mxu2 %v6763_v33  ;;  %v3330_v51 = vrot.slane %v3328_v39, 5  ;;  %v3333_v45 = vshrl.u32 %v3180_v62, 16  ;;  %v6762_v21 = vld [vmem:[%s9238_s2 + $0x210] sm:$0xff]  ;;  %v3183_v11 = vld [vmem:[#allocation2 + $0x8c] sm:$0x1] }
 0x212   : > { %v3289_v16 = vsel %vm7149_vm5, %v3284_v15, %v3288_v41  ;;  %v3324_v38 = vrot.slane %v3322_v18, 5  ;;  %v3349_v15 = vrot.slane %v3347_v58, 4  ;;  %v3356_v40 = vshll.u32 %v3183_v11, 16  ;;  %v6708_v39 = vld [vmem:[#allocation2 + $0x78] sm:$0xf0] }
 0x213   : > { %3954 = vmatmul.bf16.gmra.mxu1 %v3858_v60  ;;  %v3438_v60 = vunpack.c.l.b16 %v3275_v19  ;;  %v3307_v19 = vrot.slane %v3305_v7, 4  ;;  %v6729_v7 = vld [vmem:[%s9238_s2 + $0x148] sm:$0xff] }
 0x214   : > { %v3325_v17 = vor.u32 %v3324_v38, %v3321_v46  ;;  %v4608_v46 = vld [vmem:[#allocation2 + $0xcc] sm:$0x8]  ;;  %v4609_v38 = vld [vmem:[#allocation2 + $0xd0] sm:$0xf]  ;;  %4518 = vmatpush.bf16.msra.mxu3 %v6729_v7 }
 0x215   : > { %v3451_v59 = vpack.c.b16 %v3438_v60, %v3437_v10  ;;  %v6707_v60 = vld [vmem:[#allocation2 + $0x60] sm:$0xf0]  ;;  %5516 = vmatpush.bf16.msra.mxu2 %v6762_v21 }
 0x216   : > { %3526 = vmatmul.bf16.gmra.mxu3 %v3450_v31  ;;  %v3298_v31 = vrot.slane %v3297_v25, 4  ;;  %v3326_v48 = vrot.slane %v3325_v17, 4  ;;  %v6347_v34 = vor.u32 %v6707_v60, %v6346_v32  ;;  %v3350_v25 = vshll.u32 %v3182_v6, 16 }
 0x217   : > { %v4814_v17 = vshll.u32 %v4609_v38, 16 }
 0x218   : > { %v8907_v61 = vpop.f32.mrf.mxu1  ;;  %v3303_v57 = vsel %vm7149_vm5, %v3298_v31, %v3302_v1  ;;  %v3336_v31 = vshll.u32 %v3180_v62, 16  ;;  %v6531_v1 = vor.u32 %v6737_v5, %v6530_v0  ;;  %v3352_v41 = vrot.slane %v3350_v25, 5  ;;  %v6738_v62 = vld [vmem:[#allocation2 + $0x54] sm:$0xf0] }
 0x219   : > { %v3440_v44 = vunpack.c.l.b16 %v3303_v57 }
 0x220   : > { %v3135_v42 = vpop.f32.mrf.mxu2  ;;  %4107 = vmatmul.bf16.gmra.mxu2 %v6339_v22  ;;  %v3011_v63 = vpop.f32.mrf.mxu1  ;;  %v3439_v22 = vunpack.c.l.b16 %v3289_v16 }
 0x221   : > { %v8894_v4 = vadd.f32 %v3135_v42, %v3006_v14  ;;  %v6527_v14 = vor.u32 %v6736_v55, %v6526_v20  ;;  %v3310_v42 = vrot.slane %v3308_v56, 5  ;;  %v3181_v55 = vld [vmem:[#allocation2 + $0x80] sm:$0x1]  ;;  %v4606_v56 = vld [vmem:[#allocation2 + $0xc0] sm:$0x8] }
 0x222   : > { %v3452_v9 = vpack.c.b16 %v3440_v44, %v3439_v22  ;;  %v3342_v16 = vshll.u32 %v3181_v55, 16  ;;  %v4793_v22 = vshrl.u32 %v4606_v56, 16  ;;  %v6761_v55 = vld [vmem:[%s9238_s2 + $0x208] sm:$0xff]  ;;  %v3185_v56 = vld [vmem:[#allocation2 + $0x98] sm:$0x1] }
 0x223   : > { %3959 = vmatmul.bf16.gmra.mxu1 %v3859_v3  ;;  %v3311_v29 = vor.u32 %v3310_v42, %v3307_v19  ;;  %v3314_v3 = vshll.u32 %v3177_v2, 16  ;;  %v4811_v2 = vshrl.u32 %v4609_v38, 16  ;;  %5517 = vmatpush.bf16.msra.mxu2 %v6761_v55  ;;  %v3370_v38 = vshll.u32 %v3185_v56, 16 }
 0x224   : > { %v3344_v32 = vrot.slane %v3342_v16, 5 }
 0x225   : > { %v3312_v8 = vrot.slane %v3311_v29, 4  ;;  %v3316_v10 = vrot.slane %v3314_v3, 5  ;;  %v3358_v29 = vrot.slane %v3356_v40, 5  ;;  %v6458_v3 = vrot.slane %v4793_v22, 11 }
 0x226   : > { %3531 = vmatmul.bf16.gmra.mxu3 %v3451_v59  ;;  %v3331_v59 = vsel %vm7149_vm5, %v3326_v48, %v3330_v51  ;;  %v3186_v51 = vld [vmem:[#allocation2 + $0xa0] sm:$0xf]  ;;  %v4813_v6 = vrot.slane %v4811_v2, 7  ;;  %v3190_v2 = vld [vmem:[#allocation2 + $0xb8] sm:$0xf] }
 0x227   : > { %v3317_v12 = vsel %vm7149_vm5, %v3312_v8, %v3316_v10  ;;  %v3442_v13 = vunpack.c.l.b16 %v3331_v59  ;;  %v6350_v8 = vld [vmem:[#allocation2 + $0x70] sm:$0xf]  ;;  %v3184_v59 = vld [vmem:[#allocation2 + $0x94] sm:$0xf]  ;;  %v3375_v0 = vshrl.u32 %v3186_v51, 16 }
 0x228   : > { %v8909_v43 = vpop.f32.mrf.mxu2  ;;  %v3441_v30 = vunpack.c.l.b16 %v3317_v12  ;;  %v8940_v19 = vpop.f32.mrf.mxu1  ;;  %v4816_v58 = vor.u32 %v4814_v17, %v4813_v6  ;;  %v3378_v12 = vshll.u32 %v3186_v51, 16 }
 0x22a   : > { %v3453_v57 = vpack.c.b16 %v3442_v13, %v3441_v30  ;;  %v3364_v30 = vshll.u32 %v3184_v59, 16 }
 0x22c   : > { %v3366_v16 = vrot.slane %v3364_v30, 5 }
 0x230   : > { %v3140_v47 = vpop.f32.mrf.mxu2  ;;  %4112 = vmatmul.bf16.gmra.mxu2 %v6343_v54  ;;  %v3335_v54 = vrot.slane %v3333_v45, 4  ;;  %v6534_v45 = vld [vmem:[#allocation2 + $0x4c] sm:$0xf]  ;;  %v8953_v26 = vpop.f32.mrf.mxu1 }
 0x231   : > { %v8916_v24 = vadd.f32 %v3140_v47, %v3011_v63  ;;  %v3338_v63 = vrot.slane %v3336_v31, 5  ;;  %v3353_v47 = vor.u32 %v3352_v41, %v3349_v15  ;;  %v3361_v41 = vshrl.u32 %v3184_v59, 16 }
 0x233   : > { %5101 = vmatmul.bf16.vlgmr.msra.gmra.mxu1 %v6527_v14  ;;  %v4607_v14 = vld [vmem:[#allocation2 + $0xc4] sm:$0xf]  ;;  %v3339_v44 = vor.u32 %v3338_v63, %v3335_v54  ;;  %v3354_v35 = vrot.slane %v3353_v47, 4  ;;  %v3377_v63 = vrot.slane %v3375_v0, 4 }
 0x234   : > { %v4798_v50 = vshrl.u32 %v4607_v14, 16  ;;  %v4801_v42 = vshll.u32 %v4607_v14, 16 }
 0x235   : > { %v3340_v10 = vrot.slane %v3339_v44, 4  ;;  %v3359_v25 = vsel %vm7149_vm5, %v3354_v35, %v3358_v29  ;;  %v6354_v29 = vld [vmem:[#allocation2 + $0x88] sm:$0xf] }
 0x236   : > { %3536 = vmatmul.bf16.gmra.mxu3 %v3452_v9  ;;  %v4806_v9 = vshrl.u32 %v4608_v46, 16  ;;  %v4800_v48 = vrot.slane %v4798_v50, 7  ;;  %v3444_v54 = vunpack.c.l.b16 %v3359_v25  ;;  %v6760_v25 = vld [vmem:[%s9238_s2 + $0x200] sm:$0xff] }
 0x237   : > { %v3345_v15 = vsel %vm7149_vm5, %v3340_v10, %v3344_v32  ;;  %v3403_v10 = vshrl.u32 %v3190_v2, 16  ;;  %v3406_v32 = vshll.u32 %v3190_v2, 16  ;;  %5518 = vmatpush.bf16.msra.mxu2 %v6760_v25  ;;  %v4160_v25 = vld [vmem:[#allocation2 + $0x14] sm:$0x1] }
 0x238   : > { %v8928_v36 = vpop.f32.mrf.mxu2  ;;  %v6459_v60 = vrot.slane %v4806_v9, 11  ;;  %v4803_v5 = vor.u32 %v4801_v42, %v4800_v48  ;;  %v3443_v40 = vunpack.c.l.b16 %v3345_v15  ;;  %v6728_v42 = vld [vmem:[%s9238_s2 + $0x140] sm:$0xff]  ;;  %v6709_v9 = vld [vmem:[#allocation2 + $0x90] sm:$0xf0]  ;;  %v8958_v35 = vpop.f32.mrf.mxu1  ;;  %v6739_v48 = vld [vmem:[#allocation2 + $0x6c] sm:$0xf0] }
 0x239   : > { %4519 = vmatpush.bf16.msra.mxu3 %v6728_v42  ;;  %v6355_v6 = vor.u32 %v6709_v9, %v6354_v29 }
 0x23a   : > { %v4804_v31 = vsel %vm7112_vm4, %v6458_v3, %v4803_v5  ;;  %v4817_v21 = vsel %vm7112_vm4, %v6459_v60, %v4816_v58  ;;  %v3454_v7 = vpack.c.b16 %v3444_v54, %v3443_v40  ;;  %v3188_v3 = vld [vmem:[#allocation2 + $0xac] sm:$0xf] }
 0x23b   : > { %v4849_v13 = vunpack.c.l.b16 %v4804_v31  ;;  %v4850_v11 = vunpack.c.l.b16 %v4817_v21  ;;  %v3392_v59 = vshll.u32 %v3188_v3, 16 }
 0x23d   : > { %v3016_v18 = vpop.f32.mrf.mxu3  ;;  %v4858_v47 = vpack.c.b16 %v4850_v11, %v4849_v13  ;;  %v3394_v13 = vrot.slane %v3392_v59, 5 }
 0x23f   : > { %4958 = vmatmul.bf16.gmra.mxu0 %v4858_v47 }
 0x240   : > { %4117 = vmatmul.bf16.gmra.mxu2 %v6347_v34  ;;  %v6351_v34 = vor.u32 %v6708_v39, %v6350_v8  ;;  %v3372_v39 = vrot.slane %v3370_v38, 5  ;;  %v6740_v38 = vld [vmem:[#allocation2 + $0x84] sm:$0xf0] }
 0x243   : > { %5106 = vmatmul.bf16.gmra.mxu1 %v6531_v1  ;;  %v6535_v1 = vor.u32 %v6738_v62, %v6534_v45  ;;  %v6538_v62 = vld [vmem:[#allocation2 + $0x64] sm:$0xf]  ;;  %v3408_v45 = vrot.slane %v3406_v32, 5 }
 0x244   : > { %v6539_v58 = vor.u32 %v6739_v48, %v6538_v62  ;;  %v5160_v62 = vld [vmem:[#allocation2 + $0x28] sm:$0xf] }
 0x245   : > { %v8960_v51 = vpop.f32.mrf.mxu3 }
 0x246   : > { %3541 = vmatmul.bf16.gmra.mxu3 %v3453_v57  ;;  %v3380_v57 = vrot.slane %v3378_v12, 5  ;;  %v3405_v12 = vrot.slane %v3403_v10, 4 }
 0x247   : > { %v3145_v20 = vpop.f32.mrf.mxu2 }
 0x248   : > { %v8938_v33 = vadd.f32 %v3145_v20, %v3016_v18  ;;  %v3187_v18 = vld [vmem:[#allocation2 + $0xa4] sm:$0x1]  ;;  %v3363_v20 = vrot.slane %v3361_v41, 4  ;;  %v3381_v14 = vor.u32 %v3380_v57, %v3377_v63  ;;  %v3189_v41 = vld [vmem:[#allocation2 + $0xb0] sm:$0x1]  ;;  %v3409_v55 = vor.u32 %v3408_v45, %v3405_v12  ;;  %v8971_v63 = vpop.f32.mrf.mxu1 }
 0x249   : > { %v3384_v44 = vshll.u32 %v3187_v18, 16  ;;  %v3398_v40 = vshll.u32 %v3189_v41, 16  ;;  %v5158_v12 = vld [vmem:[#allocation2 + $0x1c] sm:$0xf]  ;;  %v5205_v45 = vshrl.u32 %v5160_v62, 16 }
 0x24a   : > { %v3367_v46 = vor.u32 %v3366_v16, %v3363_v20  ;;  %v3382_v22 = vrot.slane %v3381_v14, 4  ;;  %v3410_v18 = vrot.slane %v3409_v55, 4  ;;  %v6710_v16 = vld [vmem:[#allocation2 + $0xa8] sm:$0xf0]  ;;  %v5191_v41 = vshrl.u32 %v5158_v12, 16 }
 0x24b   : > { %v3386_v50 = vrot.slane %v3384_v44, 5  ;;  %v3400_v14 = vrot.slane %v3398_v40, 5  ;;  %v4159_v44 = vld [vmem:[#allocation2 + $0x10] sm:$0xf] }
 0x24c   : > { %v3368_v17 = vrot.slane %v3367_v46, 4  ;;  %v6358_v46 = vld [vmem:[#allocation2 + $0xa0] sm:$0xf]  ;;  %v4192_v2 = vshrl.u32 %v4159_v44, 16 }
 0x24d   : > { %v3387_v8 = vsel %vm7149_vm5, %v3382_v22, %v3386_v50  ;;  %v6359_v22 = vor.u32 %v6710_v16, %v6358_v46  ;;  %v3120_v46 = vpop.f32.mrf.mxu0 }
 0x24e   : > { %v3373_v5 = vsel %vm7149_vm5, %v3368_v17, %v3372_v39  ;;  %v3446_v0 = vunpack.c.l.b16 %v3387_v8  ;;  %v4195_v17 = vshll.u32 %v4159_v44, 16  ;;  %v6542_v39 = vld [vmem:[#allocation2 + $0x7c] sm:$0xf]  ;;  %v4194_v59 = vrot.slane %v4192_v2, 4  ;;  %v4165_v44 = vld [vmem:[#allocation2 + $0x34] sm:$0xf] }
 0x24f   : > { %v8962_v60 = vpop.f32.mrf.mxu2  ;;  %v3445_v31 = vunpack.c.l.b16 %v3373_v5 }
 0x250   : > { %4122 = vmatmul.bf16.gmra.mxu2 %v6351_v34  ;;  %v3389_v34 = vshrl.u32 %v3188_v3, 16  ;;  %v6543_v3 = vor.u32 %v6740_v38, %v6542_v39  ;;  %v8979_v48 = vpop.f32.mrf.mxu1  ;;  %v5159_v38 = vld [vmem:[#allocation2 + $0x20] sm:$0x1] }
 0x251   : > { %v3455_v15 = vpack.c.b16 %v3446_v0, %v3445_v31  ;;  %v5208_v31 = vshll.u32 %v5160_v62, 16  ;;  %v6741_v39 = vld [vmem:[#allocation2 + $0x9c] sm:$0xf0]  ;;  %v5200_v62 = vshll.u32 %v5159_v38, 16  ;;  %v5162_v38 = vld [vmem:[#allocation2 + $0x34] sm:$0xf] }
 0x252   : > { %v3391_v21 = vrot.slane %v3389_v34, 4  ;;  %v4162_v34 = vld [vmem:[#allocation2 + $0x20] sm:$0x1] }
 0x253   : > { %5111 = vmatmul.bf16.gmra.mxu1 %v6535_v1  ;;  %v3191_v1 = vld [vmem:[#allocation2 + $0xbc] sm:$0x1]  ;;  %v5210_v55 = vrot.slane %v5208_v31, 5 }
 0x254   : > { %v3412_v54 = vshll.u32 %v3191_v1, 16  ;;  %v3395_v47 = vor.u32 %v3394_v13, %v3391_v21  ;;  %v4215_v21 = vshll.u32 %v4162_v34, 16 }
 0x256   : > { %3546 = vmatmul.bf16.gmra.mxu3 %v3454_v7  ;;  %v3414_v20 = vrot.slane %v3412_v54, 5  ;;  %v4161_v7 = vld [vmem:[#allocation2 + $0x1c] sm:$0xf]  ;;  %v3396_v56 = vrot.slane %v3395_v47, 4  ;;  %v4217_v40 = vrot.slane %v4215_v21, 5 }
 0x257   : > { %v4206_v42 = vshrl.u32 %v4161_v7, 16  ;;  %v4209_v9 = vshll.u32 %v4161_v7, 16  ;;  %v6711_v7 = vld [vmem:[#allocation2 + $0xc0] sm:$0xf0] }
 0x258   : > { %v3415_v50 = vsel %vm7149_vm5, %v3410_v18, %v3414_v20  ;;  %v3401_v29 = vsel %vm7149_vm5, %v3396_v56, %v3400_v14  ;;  %v5161_v18 = vld [vmem:[#allocation2 + $0x2c] sm:$0x1]  ;;  %v8983_v20 = vpop.f32.mrf.mxu1 }
 0x259   : > { %v4208_v10 = vrot.slane %v4206_v42, 4  ;;  %v4211_v32 = vrot.slane %v4209_v9, 5  ;;  %v3447_v5 = vunpack.c.l.b16 %v3401_v29  ;;  %v4163_v42 = vld [vmem:[#allocation2 + $0x28] sm:$0xf]  ;;  %v6362_v9 = vld [vmem:[#allocation2 + $0xb8] sm:$0xf] }
 0x25a   : > { %v6363_v29 = vor.u32 %v6711_v7, %v6362_v9 }
 0x25b   : > { %v4212_v1 = vor.u32 %v4211_v32, %v4208_v10  ;;  %v4237_v10 = vshll.u32 %v4165_v44, 16 }
 0x25c   : > { %v3021_v30 = vpop.f32.mrf.mxu3 }
 0x25d   : > { %v4213_v47 = vrot.slane %v4212_v1, 4  ;;  %v4239_v21 = vrot.slane %v4237_v10, 5 }
 0x260   : > { %4127 = vmatmul.bf16.gmra.mxu2 %v6355_v6  ;;  %v3448_v6 = vunpack.c.l.b16 %v3415_v50 }
 0x262   : > { %v3456_v0 = vpack.c.b16 %v3448_v6, %v3447_v5  ;;  %v4234_v6 = vshrl.u32 %v4165_v44, 16  ;;  %v6546_v5 = vld [vmem:[#allocation2 + $0x94] sm:$0xf] }
 0x263   : > { %5116 = vmatmul.bf16.gmra.mxu1 %v6539_v58  ;;  %v4197_v58 = vrot.slane %v4195_v17, 5  ;;  %v5214_v17 = vshll.u32 %v5161_v18, 16 }
 0x264   : > { %v8981_v8 = vpop.f32.mrf.mxu3  ;;  %v4236_v1 = vrot.slane %v4234_v6, 4  ;;  %v3121_v6 = vadd.f32 %v3120_v46, %v8758_v37  ;;  %v5163_v37 = vld [vmem:[#allocation2 + $0x38] sm:$0x1] }
 0x265   : > { %v4198_v13 = vor.u32 %v4197_v58, %v4194_v59  ;;  %v4220_v59 = vshrl.u32 %v4163_v42, 16  ;;  %v4223_v58 = vshll.u32 %v4163_v42, 16 }
 0x266   : > { %v3150_v11 = vpop.f32.mrf.mxu2  ;;  %3551 = vmatmul.bf16.gmra.mxu3 %v3455_v15  ;;  %v4201_v15 = vshll.u32 %v4160_v25, 16  ;;  %v6547_v25 = vor.u32 %v6741_v39, %v6546_v5 }
 0x267   : > { %v8973_v57 = vadd.f32 %v3150_v11, %v3021_v30  ;;  %v5194_v30 = vshll.u32 %v5158_v12, 16  ;;  %v5207_v11 = vrot.slane %v5205_v45, 4  ;;  %v4199_v56 = vrot.slane %v4198_v13, 4 }
 0x268   : > { %v4203_v14 = vrot.slane %v4201_v15, 5  ;;  %v5216_v45 = vrot.slane %v5214_v17, 5  ;;  %v4222_v18 = vrot.slane %v4220_v59, 4  ;;  %v4225_v7 = vrot.slane %v4223_v58, 5 }
 0x269   : > { %v5196_v50 = vrot.slane %v5194_v30, 5  ;;  %v5211_v2 = vor.u32 %v5210_v55, %v5207_v11  ;;  %v4166_v30 = vld [vmem:[#allocation2 + $0x38] sm:$0x1]  ;;  %v5164_v11 = vld [vmem:[#allocation2 + $0x40] sm:$0xf] }
 0x26a   : > { %v4204_v32 = vsel %vm7149_vm5, %v4199_v56, %v4203_v14  ;;  %v8993_v56 = vpop.f32.mrf.mxu1  ;;  %v4243_v42 = vshll.u32 %v4166_v30, 16  ;;  %v5233_v9 = vshrl.u32 %v5164_v11, 16  ;;  %v4226_v39 = vor.u32 %v4225_v7, %v4222_v18  ;;  %v4167_v30 = vld [vmem:[#allocation2 + $0x40] sm:$0xf] }
 0x26b   : > { %v5212_v12 = vrot.slane %v5211_v2, 4  ;;  %v4432_v15 = vunpack.c.l.b16 %v4204_v32  ;;  %v5236_v2 = vshll.u32 %v5164_v11, 16 }
 0x26c   : > { %v4245_v5 = vrot.slane %v4243_v42, 5  ;;  %v5235_v59 = vrot.slane %v5233_v9, 4 }
 0x26d   : > { %v5217_v44 = vsel %vm7149_vm5, %v5212_v12, %v5216_v45  ;;  %v5238_v58 = vrot.slane %v5236_v2, 5 }
 0x26e   : > { %v8985_v16 = vpop.f32.mrf.mxu2  ;;  %v5432_v10 = vunpack.c.l.b16 %v5217_v44 }
 0x26f   : > { %v5239_v18 = vor.u32 %v5238_v58, %v5235_v59 }
 0x270   : > { %4132 = vmatmul.bf16.gmra.mxu2 %v6359_v22  ;;  %v5193_v22 = vrot.slane %v5191_v41, 4  ;;  %v5202_v41 = vrot.slane %v5200_v62, 5 }
 0x272   : > { %v5197_v34 = vor.u32 %v5196_v50, %v5193_v22  ;;  %v3122_v22 = vpop.f32.mrf.mxu0  ;;  %v4240_v50 = vor.u32 %v4239_v21, %v4236_v1  ;;  %v4169_v1 = vld [vmem:[#allocation2 + $0x4c] sm:$0xf]  ;;  %v9004_v44 = vpop.f32.mrf.mxu1 }
 0x273   : > { %5121 = vmatmul.bf16.gmra.mxu1 %v6543_v3  ;;  %v4218_v3 = vsel %vm7149_vm5, %v4213_v47, %v4217_v40  ;;  %v4164_v40 = vld [vmem:[#allocation2 + $0x2c] sm:$0x1]  ;;  %v4262_v7 = vshrl.u32 %v4169_v1, 16 }
 0x274   : > { %v5198_v47 = vrot.slane %v5197_v34, 4  ;;  %v4229_v17 = vshll.u32 %v4164_v40, 16  ;;  %v4241_v62 = vrot.slane %v4240_v50, 4  ;;  %v5165_v34 = vld [vmem:[#allocation2 + $0x44] sm:$0x1]  ;;  %v4251_v50 = vshll.u32 %v4167_v30, 16 }
 0x275   : > { %v5242_v46 = vshll.u32 %v5165_v34, 16 }
 0x276   : > { %3556 = vmatmul.bf16.gmra.mxu3 %v3456_v0  ;;  %v4433_v0 = vunpack.c.l.b16 %v4218_v3  ;;  %v5222_v3 = vshll.u32 %v5162_v38, 16  ;;  %v4231_v45 = vrot.slane %v4229_v17, 5  ;;  %v4246_v40 = vsel %vm7149_vm5, %v4241_v62, %v4245_v5  ;;  %v4170_v62 = vld [vmem:[#allocation2 + $0x50] sm:$0x1] }
 0x277   : > { %v5228_v17 = vshll.u32 %v5163_v37, 16  ;;  %v4264_v5 = vrot.slane %v4262_v7, 4 }
 0x278   : > { %v4448_v14 = vpack.c.b16 %v4433_v0, %v4432_v15 }
 0x279   : > { %v3026_v54 = vpop.f32.mrf.mxu3 }
 0x27a   : > { %v3125_v42 = vpop.f32.mrf.mxu0 }
 0x280   : > { %4137 = vmatmul.bf16.gmra.mxu2 %v6363_v29  ;;  %v5219_v29 = vshrl.u32 %v5162_v38, 16  ;;  %v4248_v38 = vshrl.u32 %v4167_v30, 16  ;;  %v4271_v30 = vshll.u32 %v4170_v62, 16 }
 0x281   : > { %v3028_v31 = vpop.f32.mrf.mxu3 }
 0x282   : > { %v5221_v15 = vrot.slane %v5219_v29, 4  ;;  %v4435_v29 = vunpack.c.l.b16 %v4246_v40 }
 0x283   : > { %5126 = vmatmul.bf16.gmra.mxu1 %v6547_v25  ;;  %v3155_v13 = vpop.f32.mrf.mxu2 }
 0x284   : > { %v8991_v55 = vadd.f32 %v3155_v13, %v3026_v54  ;;  %v5203_v54 = vsel %vm7149_vm5, %v5198_v47, %v5202_v41  ;;  %v4227_v13 = vrot.slane %v4226_v39, 4  ;;  %v5224_v41 = vrot.slane %v5222_v3, 5  ;;  %v6742_v47 = vld [vmem:[#allocation2 + $0xb4] sm:$0xf0] }
 0x285   : > { %v5431_v12 = vunpack.c.l.b16 %v5203_v54  ;;  %v3123_v39 = vadd.f32 %v3122_v22, %v8797_v23  ;;  %v5244_v3 = vrot.slane %v5242_v46, 5  ;;  %v5230_v23 = vrot.slane %v5228_v17, 5  ;;  %v4168_v22 = vld [vmem:[#allocation2 + $0x44] sm:$0x1] }
 0x286   : > { %4520 = vmatmul.bf16.vlgmr.msra.gmra.mxu3 %v4448_v14  ;;  %v4265_v14 = vshll.u32 %v4169_v1, 16  ;;  %v4232_v9 = vsel %vm7149_vm5, %v4227_v13, %v4231_v45  ;;  %v5225_v2 = vor.u32 %v5224_v41, %v5221_v15  ;;  %v4253_v45 = vrot.slane %v4251_v50, 5  ;;  %v5168_v1 = vld [vmem:[#allocation2 + $0x58] sm:$0xf]  ;;  %v9017_v50 = vpop.f32.mrf.mxu1 }
 0x287   : > { %v5447_v11 = vpack.c.b16 %v5432_v10, %v5431_v12  ;;  %v4250_v12 = vrot.slane %v4248_v38, 4  ;;  %v5261_v37 = vshrl.u32 %v5168_v1, 16  ;;  %v5264_v46 = vshll.u32 %v5168_v1, 16 }
 0x288   : > { %v4267_v34 = vrot.slane %v4265_v14, 5  ;;  %v5226_v15 = vrot.slane %v5225_v2, 4  ;;  %v4257_v40 = vshll.u32 %v4168_v22, 16  ;;  %v3126_v38 = vadd.f32 %v3125_v42, %v8816_v28  ;;  %v3127_v2 = vpop.f32.mrf.mxu0  ;;  %v5167_v28 = vld [vmem:[#allocation2 + $0x50] sm:$0x1] }
 0x289   : > { %v3522_v32 = vpop.f32.mrf.mxu3 }
 0x28a   : > { %v3562_v25 = vadd.f32 %v3522_v32, %v3121_v6  ;;  %v5240_v32 = vrot.slane %v5239_v18, 4  ;;  %v5231_v18 = vsel %vm7149_vm5, %v5226_v15, %v5230_v23  ;;  %v6554_v23 = vld [vmem:[#allocation2 + $0xc4] sm:$0xf] }
 0x28b   : > { %v3157_v0 = vpop.f32.mrf.mxu2  ;;  %v5433_v62 = vunpack.c.l.b16 %v5231_v18 }
 0x28c   : > { %v9000_v21 = vadd.f32 %v3157_v0, %v3028_v31  ;;  %v6550_v31 = vld [vmem:[#allocation2 + $0xac] sm:$0xf]  ;;  %v3965_v10 = vadd.f32 %v8953_v26, %v3562_v25  ;;  %v4434_v0 = vunpack.c.l.b16 %v4232_v9  ;;  %v5245_v26 = vsel %vm7149_vm5, %v5240_v32, %v5244_v3 }
 0x28d   : > { %v6551_v54 = vor.u32 %v6742_v47, %v6550_v31  ;;  %v4268_v25 = vor.u32 %v4267_v34, %v4264_v5  ;;  %v4254_v47 = vor.u32 %v4253_v45, %v4250_v12  ;;  %v5434_v31 = vunpack.c.l.b16 %v5245_v26  ;;  %v4171_v45 = vld [vmem:[#allocation2 + $0x58] sm:$0xf] }
 0x28e   : > { %v4449_v41 = vpack.c.b16 %v4435_v29, %v4434_v0  ;;  %v4273_v9 = vrot.slane %v4271_v30, 5  ;;  %v5169_v29 = vld [vmem:[#allocation2 + $0x5c] sm:$0x1]  ;;  %v5263_v3 = vrot.slane %v5261_v37, 4  ;;  %v4259_v34 = vrot.slane %v4257_v40, 5 }
 0x28f   : > { %v4255_v5 = vrot.slane %v4254_v47, 4  ;;  %v5448_v1 = vpack.c.b16 %v5434_v31, %v5433_v62  ;;  %v5270_v15 = vshll.u32 %v5169_v29, 16  ;;  %v5256_v26 = vshll.u32 %v5167_v28, 16  ;;  %v5172_v62 = vld [vmem:[#allocation2 + $0x70] sm:$0xf] }
 0x290   : > { %5519 = vmatmul.bf16.vlgmr.msra.gmra.mxu2 %v5447_v11  ;;  %v5166_v11 = vld [vmem:[#allocation2 + $0x4c] sm:$0xf]  ;;  %v4276_v37 = vshrl.u32 %v4171_v45, 16  ;;  %v3128_v40 = vadd.f32 %v3127_v2, %v8849_v27  ;;  %v4172_v2 = vld [vmem:[#allocation2 + $0x5c] sm:$0x1] }
 0x291   : > { %v3524_v6 = vpop.f32.mrf.mxu3  ;;  %v5247_v7 = vshrl.u32 %v5166_v11, 16  ;;  %v5250_v14 = vshll.u32 %v5166_v11, 16  ;;  %v4260_v11 = vsel %vm7149_vm5, %v4255_v5, %v4259_v34  ;;  %v3130_v5 = vpop.f32.mrf.mxu0 }
 0x292   : > { %v3563_v59 = vadd.f32 %v3524_v6, %v3123_v39  ;;  %v4269_v39 = vrot.slane %v4268_v25, 4  ;;  %v5266_v6 = vrot.slane %v5264_v46, 5  ;;  %v4279_v46 = vshll.u32 %v4171_v45, 16 }
 0x293   : > { %5131 = vmatmul.bf16.gmra.mxu1 %v6551_v54  ;;  %v4103_v58 = vpop.f32.mrf.mxu2  ;;  %v5249_v42 = vrot.slane %v5247_v7, 4  ;;  %v5252_v12 = vrot.slane %v5250_v14, 5  ;;  %v5272_v7 = vrot.slane %v5270_v15, 5  ;;  %v5292_v15 = vshll.u32 %v5172_v62, 16 }
 0x294   : > { %v9010_v13 = vadd.f32 %v4103_v58, %v3965_v10  ;;  %v3966_v54 = vadd.f32 %v8958_v35, %v3563_v59  ;;  %v4173_v58 = vld [vmem:[#allocation2 + $0x64] sm:$0xf]  ;;  %v6743_v35 = vld [vmem:[#allocation2 + $0xcc] sm:$0xf0]  ;;  %v4274_v59 = vsel %vm7149_vm5, %v4269_v39, %v4273_v9  ;;  %v5267_v22 = vor.u32 %v5266_v6, %v5263_v3  ;;  %v4174_v9 = vld [vmem:[#allocation2 + $0x68] sm:$0x1]  ;;  %v9028_v39 = vpop.f32.mrf.mxu1 }
 0x295   : > { %v4293_v30 = vshll.u32 %v4173_v58, 16  ;;  %v5253_v25 = vor.u32 %v5252_v12, %v5249_v42  ;;  %v6555_v47 = vor.u32 %v6743_v35, %v6554_v23  ;;  %v4437_v18 = vunpack.c.l.b16 %v4274_v59  ;;  %v5170_v42 = vld [vmem:[#allocation2 + $0x64] sm:$0xf] }
 0x296   : > { %4525 = vmatmul.bf16.gmra.mxu3 %v4449_v41  ;;  %v4290_v41 = vshrl.u32 %v4173_v58, 16  ;;  %v5268_v31 = vrot.slane %v5267_v22, 4  ;;  %v4436_v6 = vunpack.c.l.b16 %v4260_v11  ;;  %v4278_v58 = vrot.slane %v4276_v37, 4 }
 0x297   : > { %v5254_v27 = vrot.slane %v5253_v25, 4  ;;  %v4281_v28 = vrot.slane %v4279_v46, 5  ;;  %v4285_v23 = vshll.u32 %v4172_v2, 16  ;;  %v5275_v22 = vshrl.u32 %v5170_v42, 16 }
 0x298   : > { %v5273_v12 = vsel %vm7149_vm5, %v5268_v31, %v5272_v7 }
 0x299   : > { %v3527_v17 = vpop.f32.mrf.mxu3  ;;  %v4282_v59 = vor.u32 %v4281_v28, %v4278_v58  ;;  %v5436_v11 = vunpack.c.l.b16 %v5273_v12  ;;  %v4287_v31 = vrot.slane %v4285_v23, 5 }
 0x29a   : > { %v3564_v10 = vadd.f32 %v3527_v17, %v3126_v38  ;;  %v4292_v17 = vrot.slane %v4290_v41, 4  ;;  %v5278_v41 = vshll.u32 %v5170_v42, 16 }
 0x29b   : > { %v4105_v32 = vpop.f32.mrf.mxu2 }
 0x29c   : > { %v9020_v0 = vadd.f32 %v4105_v32, %v3966_v54  ;;  %v3967_v38 = vadd.f32 %v8971_v63, %v3564_v10  ;;  %v4295_v54 = vrot.slane %v4293_v30, 5  ;;  %v5258_v32 = vrot.slane %v5256_v26, 5 }
 0x29d   : > { %v4450_v63 = vpack.c.b16 %v4437_v18, %v4436_v6  ;;  %v4299_v10 = vshll.u32 %v4174_v9, 16  ;;  %v3131_v30 = vadd.f32 %v3130_v5, %v8858_v53  ;;  %v5294_v18 = vrot.slane %v5292_v15, 5  ;;  %v4177_v9 = vld [vmem:[#allocation2 + $0x7c] sm:$0xf] }
 0x29e   : > { %v4296_v45 = vor.u32 %v4295_v54, %v4292_v17  ;;  %v5259_v35 = vsel %vm7149_vm5, %v5254_v27, %v5258_v32  ;;  %v4283_v54 = vrot.slane %v4282_v59, 4  ;;  %v5277_v6 = vrot.slane %v5275_v22, 4  ;;  %v9040_v32 = vpop.f32.mrf.mxu1 }
 0x29f   : > { %v4301_v26 = vrot.slane %v4299_v10, 5  ;;  %v5280_v53 = vrot.slane %v5278_v41, 5  ;;  %v4318_v58 = vshrl.u32 %v4177_v9, 16  ;;  %v4321_v28 = vshll.u32 %v4177_v9, 16  ;;  %v5174_v9 = vld [vmem:[#allocation2 + $0x7c] sm:$0xf] }
 0x2a0   : > { %5524 = vmatmul.bf16.gmra.mxu2 %v5448_v1  ;;  %v5289_v1 = vshrl.u32 %v5172_v62, 16  ;;  %v4297_v46 = vrot.slane %v4296_v45, 4  ;;  %v4288_v10 = vsel %vm7149_vm5, %v4283_v54, %v4287_v31 }
 0x2a1   : > { %v3529_v14 = vpop.f32.mrf.mxu3  ;;  %v5281_v42 = vor.u32 %v5280_v53, %v5277_v6  ;;  %v4320_v41 = vrot.slane %v4318_v58, 4 }
 0x2a2   : > { %v3565_v29 = vadd.f32 %v3529_v14, %v3128_v40  ;;  %v5291_v40 = vrot.slane %v5289_v1, 4  ;;  %v4302_v27 = vsel %vm7149_vm5, %v4297_v46, %v4301_v26 }
 0x2a3   : > { %5136 = vmatmul.bf16.gmra.mxu1 %v6555_v47  ;;  %v4108_v3 = vpop.f32.mrf.mxu2  ;;  %v5173_v47 = vld [vmem:[#allocation2 + $0x74] sm:$0x1]  ;;  %v4439_v15 = vunpack.c.l.b16 %v4302_v27  ;;  %v5306_v27 = vshll.u32 %v5174_v9, 16 }
 0x2a4   : > { %v9030_v34 = vadd.f32 %v4108_v3, %v3967_v38  ;;  %v3968_v37 = vadd.f32 %v8979_v48, %v3565_v29  ;;  %v5435_v38 = vunpack.c.l.b16 %v5259_v35  ;;  %v5171_v3 = vld [vmem:[#allocation2 + $0x68] sm:$0x1]  ;;  %v5298_v5 = vshll.u32 %v5173_v47, 16  ;;  %v4175_v48 = vld [vmem:[#allocation2 + $0x70] sm:$0xf]  ;;  %v3132_v29 = vpop.f32.mrf.mxu0 }
 0x2a5   : > { %v5295_v2 = vor.u32 %v5294_v18, %v5291_v40  ;;  %v4304_v12 = vshrl.u32 %v4175_v48, 16  ;;  %v4307_v45 = vshll.u32 %v4175_v48, 16  ;;  %v3133_v1 = vadd.f32 %v3132_v29, %v8877_v49  ;;  %v4178_v47 = vld [vmem:[#allocation2 + $0x80] sm:$0x1] }
 0x2a6   : > { %4530 = vmatmul.bf16.gmra.mxu3 %v4450_v63  ;;  %v5449_v62 = vpack.c.b16 %v5436_v11, %v5435_v38  ;;  %v5284_v63 = vshll.u32 %v5171_v3, 16  ;;  %v5300_v23 = vrot.slane %v5298_v5, 5  ;;  %v5176_v11 = vld [vmem:[#allocation2 + $0x88] sm:$0xf]  ;;  %v5282_v18 = vrot.slane %v5281_v42, 4  ;;  %v9052_v53 = vpop.f32.mrf.mxu1 }
 0x2a7   : > { %v5296_v22 = vrot.slane %v5295_v2, 4  ;;  %v4306_v38 = vrot.slane %v4304_v12, 4  ;;  %v4309_v49 = vrot.slane %v4307_v45, 5  ;;  %v5317_v54 = vshrl.u32 %v5176_v11, 16  ;;  %v4179_v45 = vld [vmem:[#allocation2 + $0x88] sm:$0xf] }
 0x2a8   : > { %v5286_v46 = vrot.slane %v5284_v63, 5  ;;  %v5320_v3 = vshll.u32 %v5176_v11, 16  ;;  %v4327_v6 = vshll.u32 %v4178_v47, 16  ;;  %v5303_v29 = vshrl.u32 %v5174_v9, 16 }
 0x2a9   : > { %v3532_v25 = vpop.f32.mrf.mxu3  ;;  %v4310_v48 = vor.u32 %v4309_v49, %v4306_v38  ;;  %v5319_v58 = vrot.slane %v5317_v54, 4  ;;  %v3138_v49 = vadd.f32 %v8909_v43, %v8907_v61  ;;  %v5178_v61 = vld [vmem:[#allocation2 + $0x94] sm:$0xf] }
 0x2aa   : > { %v3566_v7 = vadd.f32 %v3532_v25, %v3131_v30  ;;  %v4323_v30 = vrot.slane %v4321_v28, 5  ;;  %v5287_v5 = vsel %vm7149_vm5, %v5282_v18, %v5286_v46  ;;  %v5322_v28 = vrot.slane %v5320_v3, 5  ;;  %v5175_v46 = vld [vmem:[#allocation2 + $0x80] sm:$0x1] }
 0x2ab   : > { %v4110_v14 = vpop.f32.mrf.mxu2  ;;  %v4329_v12 = vrot.slane %v4327_v6, 5  ;;  %v5305_v11 = vrot.slane %v5303_v29, 4  ;;  %v4332_v18 = vshrl.u32 %v4179_v45, 16  ;;  %v5312_v54 = vshll.u32 %v5175_v46, 16  ;;  %v4180_v6 = vld [vmem:[#allocation2 + $0x8c] sm:$0x1] }
 0x2ac   : > { %v9038_v17 = vadd.f32 %v4110_v14, %v3968_v37  ;;  %v3969_v59 = vadd.f32 %v8983_v20, %v3566_v7  ;;  %v4438_v37 = vunpack.c.l.b16 %v4288_v10  ;;  %v4176_v14 = vld [vmem:[#allocation2 + $0x74] sm:$0x1]  ;;  %v5301_v20 = vsel %vm7149_vm5, %v5296_v22, %v5300_v23 }
 0x2ad   : > { %v4324_v7 = vor.u32 %v4323_v30, %v4320_v41  ;;  %v5438_v2 = vunpack.c.l.b16 %v5301_v20  ;;  %v5437_v23 = vunpack.c.l.b16 %v5287_v5  ;;  %v4181_v22 = vld [vmem:[#allocation2 + $0x94] sm:$0xf]  ;;  %v4311_v30 = vrot.slane %v4310_v48, 4 }
 0x2ae   : > { %v4451_v31 = vpack.c.b16 %v4439_v15, %v4438_v37  ;;  %v5323_v47 = vor.u32 %v5322_v28, %v5319_v58  ;;  %v4349_v38 = vshll.u32 %v4181_v22, 16  ;;  %v9066_v3 = vpop.f32.mrf.mxu1 }
 0x2af   : > { %v4325_v42 = vrot.slane %v4324_v7, 4  ;;  %v5450_v37 = vpack.c.b16 %v5438_v2, %v5437_v23 }
 0x2b0   : > { %5529 = vmatmul.bf16.gmra.mxu2 %v5449_v62  ;;  %v4313_v62 = vshll.u32 %v4176_v14, 16  ;;  %v5324_v7 = vrot.slane %v5323_v47, 4  ;;  %v4351_v58 = vrot.slane %v4349_v38, 5 }
 0x2b1   : > { %v3534_v35 = vpop.f32.mrf.mxu3 }
 0x2b2   : > { %v3567_v26 = vadd.f32 %v3534_v35, %v3133_v1  ;;  %v4315_v35 = vrot.slane %v4313_v62, 5  ;;  %v4334_v62 = vrot.slane %v4332_v18, 4 }
 0x2b3   : > { %v4113_v25 = vpop.f32.mrf.mxu2 }
 0x2b4   : > { %v9048_v40 = vadd.f32 %v4113_v25, %v3969_v59  ;;  %v3970_v10 = vadd.f32 %v8993_v56, %v3567_v26  ;;  %v5177_v59 = vld [vmem:[#allocation2 + $0x8c] sm:$0x1]  ;;  %v5308_v25 = vrot.slane %v5306_v27, 5  ;;  %v4335_v56 = vshll.u32 %v4179_v45, 16 }
 0x2b5   : > { %v4330_v26 = vsel %vm7149_vm5, %v4325_v42, %v4329_v12  ;;  %v5326_v14 = vshll.u32 %v5177_v59, 16  ;;  %v5314_v45 = vrot.slane %v5312_v54, 5  ;;  %v4341_v59 = vshll.u32 %v4180_v6, 16 }
 0x2b6   : > { %4535 = vmatmul.bf16.gmra.mxu3 %v4451_v31  ;;  %v4316_v31 = vsel %vm7149_vm5, %v4311_v30, %v4315_v35  ;;  %v5309_v9 = vor.u32 %v5308_v25, %v5305_v11  ;;  %v4441_v20 = vunpack.c.l.b16 %v4330_v26  ;;  %v4337_v5 = vrot.slane %v4335_v56, 5  ;;  %v9076_v54 = vpop.f32.mrf.mxu1 }
 0x2b7   : > { %v5328_v27 = vrot.slane %v5326_v14, 5  ;;  %v5334_v11 = vshll.u32 %v5178_v61, 16  ;;  %v4343_v56 = vrot.slane %v4341_v59, 5  ;;  %v4185_v14 = vld [vmem:[#allocation2 + $0xac] sm:$0xf]  ;;  %v3143_v59 = vadd.f32 %v8928_v36, %v8940_v19 }
 0x2b8   : > { %v5310_v12 = vrot.slane %v5309_v9, 4  ;;  %v4338_v35 = vor.u32 %v4337_v5, %v4334_v62  ;;  %v5179_v62 = vld [vmem:[#allocation2 + $0x98] sm:$0x1]  ;;  %v5181_v5 = vld [vmem:[#allocation2 + $0xa4] sm:$0x1] }
 0x2b9   : > { %v3537_v63 = vpop.f32.mrf.mxu3  ;;  %v5336_v9 = vrot.slane %v5334_v11, 5 }
 0x2ba   : > { %v3568_v1 = vadd.f32 %v3537_v63, %v8894_v4  ;;  %v4346_v4 = vshrl.u32 %v4181_v22, 16  ;;  %v4440_v63 = vunpack.c.l.b16 %v4316_v31  ;;  %v5331_v22 = vshrl.u32 %v5178_v61, 16 }
 0x2bb   : > { %v4115_v15 = vpop.f32.mrf.mxu2  ;;  %v5315_v46 = vsel %vm7149_vm5, %v5310_v12, %v5314_v45  ;;  %v4339_v18 = vrot.slane %v4338_v35, 4  ;;  %v4377_v61 = vshll.u32 %v4185_v14, 16 }
 0x2bc   : > { %v9058_v41 = vadd.f32 %v4115_v15, %v3970_v10  ;;  %v3971_v29 = vadd.f32 %v9004_v44, %v3568_v1  ;;  %v4348_v2 = vrot.slane %v4346_v4, 4  ;;  %v4182_v10 = vld [vmem:[#allocation2 + $0x98] sm:$0x1]  ;;  %v5180_v15 = vld [vmem:[#allocation2 + $0xa0] sm:$0xf]  ;;  %v4452_v23 = vpack.c.b16 %v4441_v20, %v4440_v63 }
 0x2bd   : > { %v5329_v44 = vsel %vm7149_vm5, %v5324_v7, %v5328_v27  ;;  %v4355_v30 = vshll.u32 %v4182_v10, 16  ;;  %v5345_v25 = vshrl.u32 %v5180_v15, 16  ;;  %v5333_v26 = vrot.slane %v5331_v22, 4 }
 0x2be   : > { %v4352_v1 = vor.u32 %v4351_v58, %v4348_v2  ;;  %v5440_v47 = vunpack.c.l.b16 %v5329_v44  ;;  %v5439_v6 = vunpack.c.l.b16 %v5315_v46  ;;  %v4183_v2 = vld [vmem:[#allocation2 + $0xa0] sm:$0xf]  ;;  %v4374_v58 = vshrl.u32 %v4185_v14, 16  ;;  %v9090_v19 = vpop.f32.mrf.mxu1 }
 0x2bf   : > { %v4357_v31 = vrot.slane %v4355_v30, 5  ;;  %v5337_v63 = vor.u32 %v5336_v9, %v5333_v26  ;;  %v5354_v10 = vshll.u32 %v5181_v5, 16  ;;  %v4360_v45 = vshrl.u32 %v4183_v2, 16 }
 0x2c0   : > { %5534 = vmatmul.bf16.gmra.mxu2 %v5450_v37  ;;  %v5348_v37 = vshll.u32 %v5180_v15, 16  ;;  %v4363_v15 = vshll.u32 %v4183_v2, 16  ;;  %v4379_v35 = vrot.slane %v4377_v61, 5 }
 0x2c1   : > { %v3539_v48 = vpop.f32.mrf.mxu3  ;;  %v5356_v46 = vrot.slane %v5354_v10, 5  ;;  %v4362_v14 = vrot.slane %v4360_v45, 4  ;;  %v5185_v10 = vld [vmem:[#allocation2 + $0xbc] sm:$0x1] }
 0x2c2   : > { %v3569_v43 = vadd.f32 %v3539_v48, %v3138_v49  ;;  %v4353_v49 = vrot.slane %v4352_v1, 4  ;;  %v5347_v48 = vrot.slane %v5345_v25, 4  ;;  %v4186_v1 = vld [vmem:[#allocation2 + $0xb0] sm:$0x1]  ;;  %v5338_v25 = vrot.slane %v5337_v63, 4 }
 0x2c3   : > { %v4118_v28 = vpop.f32.mrf.mxu2  ;;  %v4383_v36 = vshll.u32 %v4186_v1, 16 }
 0x2c4   : > { %v9069_v42 = vadd.f32 %v4118_v28, %v3971_v29  ;;  %v3972_v38 = vadd.f32 %v9017_v50, %v3569_v43  ;;  %v5350_v29 = vrot.slane %v5348_v37, 5  ;;  %v5451_v28 = vpack.c.b16 %v5440_v47, %v5439_v6  ;;  %v5184_v47 = vld [vmem:[#allocation2 + $0xb8] sm:$0xf] }
 0x2c5   : > { %v4344_v50 = vsel %vm7149_vm5, %v4339_v18, %v4343_v56  ;;  %v4358_v43 = vsel %vm7149_vm5, %v4353_v49, %v4357_v31  ;;  %v4184_v49 = vld [vmem:[#allocation2 + $0xa4] sm:$0x1]  ;;  %v5373_v6 = vshrl.u32 %v5184_v47, 16  ;;  %v4385_v2 = vrot.slane %v4383_v36, 5 }
 0x2c6   : > { %4540 = vmatmul.bf16.gmra.mxu3 %v4452_v23  ;;  %v5351_v12 = vor.u32 %v5350_v29, %v5347_v48  ;;  %v4376_v23 = vrot.slane %v4374_v58, 4  ;;  %v4442_v22 = vunpack.c.l.b16 %v4344_v50  ;;  %v4443_v44 = vunpack.c.l.b16 %v4358_v43 }
 0x2c7   : > { %v4369_v48 = vshll.u32 %v4184_v49, 16 }
 0x2c8   : > { %v5352_v26 = vrot.slane %v5351_v12, 4  ;;  %v4380_v31 = vor.u32 %v4379_v35, %v4376_v23  ;;  %v4453_v9 = vpack.c.b16 %v4443_v44, %v4442_v22  ;;  %v4189_v12 = vld [vmem:[#allocation2 + $0xc4] sm:$0xf] }
 0x2c9   : > { %v3542_v4 = vpop.f32.mrf.mxu3 }
 0x2ca   : > { %v3570_v20 = vadd.f32 %v3542_v4, %v8916_v24  ;;  %v5340_v24 = vshll.u32 %v5179_v62, 16  ;;  %v4365_v4 = vrot.slane %v4363_v15, 5  ;;  %v5357_v62 = vsel %vm7149_vm5, %v5352_v26, %v5356_v46 }
 0x2cb   : > { %v4120_v7 = vpop.f32.mrf.mxu2  ;;  %v4381_v29 = vrot.slane %v4380_v31, 4  ;;  %v4402_v46 = vshrl.u32 %v4189_v12, 16 }
 0x2cc   : > { %v9079_v27 = vadd.f32 %v4120_v7, %v3972_v38  ;;  %v3973_v11 = vadd.f32 %v9028_v39, %v3570_v20  ;;  %v5342_v37 = vrot.slane %v5340_v24, 5  ;;  %v5182_v7 = vld [vmem:[#allocation2 + $0xac] sm:$0xf]  ;;  %v5376_v39 = vshll.u32 %v5184_v47, 16 }
 0x2cd   : > { %v4366_v5 = vor.u32 %v4365_v4, %v4362_v14  ;;  %v5359_v58 = vshrl.u32 %v5182_v7, 16  ;;  %v5362_v61 = vshll.u32 %v5182_v7, 16  ;;  %v5442_v24 = vunpack.c.l.b16 %v5357_v62  ;;  %v4188_v62 = vld [vmem:[#allocation2 + $0xbc] sm:$0x1] }
 0x2ce   : > { %v5343_v20 = vsel %vm7149_vm5, %v5338_v25, %v5342_v37  ;;  %v5378_v50 = vrot.slane %v5376_v39, 5  ;;  %v4386_v44 = vsel %vm7149_vm5, %v4381_v29, %v4385_v2  ;;  %v5183_v25 = vld [vmem:[#allocation2 + $0xb0] sm:$0x1]  ;;  %v4405_v47 = vshll.u32 %v4189_v12, 16  ;;  %v4190_v29 = vld [vmem:[#allocation2 + $0xc8] sm:$0x1] }
 0x2cf   : > { %v5441_v23 = vunpack.c.l.b16 %v5343_v20  ;;  %v4367_v35 = vrot.slane %v4366_v5, 4  ;;  %v5361_v1 = vrot.slane %v5359_v58, 4  ;;  %v4445_v4 = vunpack.c.l.b16 %v4386_v44 }
 0x2d0   : > { %5539 = vmatmul.bf16.gmra.mxu2 %v5451_v28  ;;  %v5375_v28 = vrot.slane %v5373_v6, 4  ;;  %v5368_v31 = vshll.u32 %v5183_v25, 16  ;;  %v4404_v7 = vrot.slane %v4402_v46, 4  ;;  %v4407_v6 = vrot.slane %v4405_v47, 5 }
 0x2d1   : > { %v3544_v30 = vpop.f32.mrf.mxu3 }
 0x2d2   : > { %v3571_v18 = vadd.f32 %v3544_v30, %v3143_v59  ;;  %v4371_v59 = vrot.slane %v4369_v48, 5  ;;  %v5364_v30 = vrot.slane %v5362_v61, 5  ;;  %v5379_v37 = vor.u32 %v5378_v50, %v5375_v28  ;;  %v5186_v61 = vld [vmem:[#allocation2 + $0xc4] sm:$0xf] }
 0x2d3   : > { %v4123_v56 = vpop.f32.mrf.mxu2  ;;  %v3148_v28 = vadd.f32 %v8962_v60, %v8960_v51 }
 0x2d4   : > { %v9088_v38 = vadd.f32 %v4123_v56, %v3973_v11  ;;  %v3974_v63 = vadd.f32 %v9040_v32, %v3571_v18  ;;  %v4187_v11 = vld [vmem:[#allocation2 + $0xb8] sm:$0xf]  ;;  %v5382_v32 = vshll.u32 %v5185_v10, 16  ;;  %v5452_v18 = vpack.c.b16 %v5442_v24, %v5441_v23  ;;  %v9102_v56 = vpop.f32.mrf.mxu1  ;;  %v5188_v24 = vld [vmem:[#allocation2 + $0xd0] sm:$0xf] }
 0x2d5   : > { %v4391_v26 = vshll.u32 %v4187_v11, 16  ;;  %v4372_v14 = vsel %vm7149_vm5, %v4367_v35, %v4371_v59  ;;  %v5365_v49 = vor.u32 %v5364_v30, %v5361_v1  ;;  %v5380_v36 = vrot.slane %v5379_v37, 4 }
 0x2d6   : > { %4545 = vmatmul.bf16.gmra.mxu3 %v4453_v9  ;;  %v5384_v9 = vrot.slane %v5382_v32, 5  ;;  %v4444_v48 = vunpack.c.l.b16 %v4372_v14  ;;  %v4411_v23 = vshll.u32 %v4190_v29, 16  ;;  %v5387_v35 = vshrl.u32 %v5186_v61, 16  ;;  %v4924_v29 = vpop.f32.mrf.mxu0 }
 0x2d7   : > { %v4393_v58 = vrot.slane %v4391_v26, 5  ;;  %v5390_v59 = vshll.u32 %v5186_v61, 16  ;;  %v5401_v1 = vshrl.u32 %v5188_v24, 16  ;;  %v5404_v30 = vshll.u32 %v5188_v24, 16 }
 0x2d8   : > { %v4454_v10 = vpack.c.b16 %v4445_v4, %v4444_v48  ;;  %v5385_v12 = vsel %vm7149_vm5, %v5380_v36, %v5384_v9  ;;  %v4413_v47 = vrot.slane %v4411_v23, 5 }
 0x2d9   : > { %v3547_v43 = vpop.f32.mrf.mxu3 }
 0x2da   : > { %v3572_v45 = vadd.f32 %v3547_v43, %v8938_v33  ;;  %v4388_v33 = vshrl.u32 %v4187_v11, 16  ;;  %v5366_v43 = vrot.slane %v5365_v49, 4  ;;  %v5444_v11 = vunpack.c.l.b16 %v5385_v12 }
 0x2db   : > { %v4125_v15 = vpop.f32.mrf.mxu2  ;;  %v5403_v49 = vrot.slane %v5401_v1, 4 }
 0x2dc   : > { %v9098_v22 = vadd.f32 %v4125_v15, %v3974_v63  ;;  %v3975_v20 = vadd.f32 %v9052_v53, %v3572_v45  ;;  %v4390_v2 = vrot.slane %v4388_v33, 4  ;;  %v5370_v63 = vrot.slane %v5368_v31, 5  ;;  %v9113_v51 = vpop.f32.mrf.mxu1 }
 0x2dd   : > { %v4397_v53 = vshll.u32 %v4188_v62, 16  ;;  %v4408_v45 = vor.u32 %v4407_v6, %v4404_v7  ;;  %v5392_v33 = vrot.slane %v5390_v59, 5  ;;  %v5406_v31 = vrot.slane %v5404_v30, 5  ;;  %v5187_v7 = vld [vmem:[#allocation2 + $0xc8] sm:$0x1] }
 0x2de   : > { %v4394_v44 = vor.u32 %v4393_v58, %v4390_v2  ;;  %v5371_v60 = vsel %vm7149_vm5, %v5366_v43, %v5370_v63  ;;  %v5189_v6 = vld [vmem:[#allocation2 + $0xd4] sm:$0x1]  ;;  %v3153_v2 = vadd.f32 %v8985_v16, %v8981_v8  ;;  %v4926_v30 = vpop.f32.mrf.mxu0 }
 0x2df   : > { %v4399_v25 = vrot.slane %v4397_v53, 5  ;;  %v4409_v37 = vrot.slane %v4408_v45, 4  ;;  %v5443_v9 = vunpack.c.l.b16 %v5371_v60  ;;  %v5407_v48 = vor.u32 %v5406_v31, %v5403_v49 }
 0x2e0   : > { %5544 = vmatmul.bf16.gmra.mxu2 %v5452_v18  ;;  %v5389_v18 = vrot.slane %v5387_v35, 4  ;;  %v4395_v4 = vrot.slane %v4394_v44, 4 }
 0x2e1   : > { %v3549_v39 = vpop.f32.mrf.mxu3  ;;  %v5408_v45 = vrot.slane %v5407_v48, 4 }
 0x2e2   : > { %v3573_v15 = vadd.f32 %v3549_v39, %v3148_v28  ;;  %v5453_v39 = vpack.c.b16 %v5444_v11, %v5443_v9  ;;  %v5393_v62 = vor.u32 %v5392_v33, %v5389_v18 }
 0x2e3   : > { %v4128_v5 = vpop.f32.mrf.mxu2 }
 0x2e4   : > { %v9109_v50 = vadd.f32 %v4128_v5, %v3975_v20  ;;  %v3976_v46 = vadd.f32 %v9066_v3, %v3573_v15  ;;  %v4414_v20 = vsel %vm7149_vm5, %v4409_v37, %v4413_v47  ;;  %v4400_v3 = vsel %vm7149_vm5, %v4395_v4, %v4399_v25  ;;  %v5102_v24 = vpop.f32.mrf.mxu1 }
 0x2e5   : > { %v5396_v5 = vshll.u32 %v5187_v7, 16  ;;  %v4447_v58 = vunpack.c.l.b16 %v4414_v20  ;;  %v4446_v43 = vunpack.c.l.b16 %v4400_v3  ;;  %v5394_v63 = vrot.slane %v5393_v62, 4 }
 0x2e6   : > { %4550 = vmatmul.bf16.gmra.mxu3 %v4454_v10 }
 0x2e7   : > { %v5398_v53 = vrot.slane %v5396_v5, 5  ;;  %v4455_v35 = vpack.c.b16 %v4447_v58, %v4446_v43 }
 0x2e9   : > { %v3552_v32 = vpop.f32.mrf.mxu3  ;;  %v5399_v59 = vsel %vm7149_vm5, %v5394_v63, %v5398_v53 }
 0x2ea   : > { %v3574_v26 = vadd.f32 %v3552_v32, %v8973_v57  ;;  %v5410_v57 = vshll.u32 %v5189_v6, 16  ;;  %v5445_v44 = vunpack.c.l.b16 %v5399_v59 }
 0x2eb   : > { %v4130_v14 = vpop.f32.mrf.mxu2 }
 0x2ec   : > { %v9119_v36 = vadd.f32 %v4130_v14, %v3976_v46  ;;  %v3977_v28 = vadd.f32 %v9076_v54, %v3574_v26  ;;  %v5412_v15 = vrot.slane %v5410_v57, 5  ;;  %v5104_v37 = vpop.f32.mrf.mxu1 }
 0x2ee   : > { %v5413_v8 = vsel %vm7149_vm5, %v5408_v45, %v5412_v15 }
 0x2ef   : > { %v5446_v1 = vunpack.c.l.b16 %v5413_v8 }
 0x2f0   : > { %5549 = vmatmul.bf16.gmra.mxu2 %v5453_v39 }
 0x2f1   : > { %v3554_v61 = vpop.f32.mrf.mxu3  ;;  %v5454_v32 = vpack.c.b16 %v5446_v1, %v5445_v44 }
 0x2f2   : > { %v3575_v10 = vadd.f32 %v3554_v61, %v3153_v2 }
 0x2f3   : > { %v4133_v12 = vpop.f32.mrf.mxu2 }
 0x2f4   : > { %v9128_v23 = vadd.f32 %v4133_v12, %v3977_v28  ;;  %v3978_v54 = vadd.f32 %v9090_v19, %v3575_v10  ;;  %v4929_v19 = vpop.f32.mrf.mxu0  ;;  %v5107_v26 = vpop.f32.mrf.mxu1 }
 0x2f6   : > { %4555 = vmatmul.bf16.gmra.mxu3 %v4455_v35 }
 0x2f9   : > { %v3557_v16 = vpop.f32.mrf.mxu3 }
 0x2fa   : > { %v3576_v60 = vadd.f32 %v3557_v16, %v8991_v55 }
 0x2fb   : > { %v4135_v11 = vpop.f32.mrf.mxu2 }
 0x2fc   : > { %v9136_v25 = vadd.f32 %v4135_v11, %v3978_v54  ;;  %v3979_v47 = vadd.f32 %v9102_v56, %v3576_v60  ;;  %v4931_v9 = vpop.f32.mrf.mxu0  ;;  %v5109_v6 = vpop.f32.mrf.mxu1 }
 0x300   : > { %5554 = vmatmul.bf16.gmra.mxu2 %v5454_v32 }
 0x301   : > { %v3559_v46 = vpop.f32.mrf.mxu3 }
 0x302   : > { %v3577_v52 = vadd.f32 %v3559_v46, %v9000_v21 }
 0x303   : > { %v4138_v18 = vpop.f32.mrf.mxu2 }
 0x304   : > { %v9140_v33 = vadd.f32 %v4138_v18, %v3979_v47  ;;  %v3980_v4 = vadd.f32 %v9113_v51, %v3577_v52  ;;  %v9150_v51 = vld [vmem:[%s9239_s3 + $0x1] ss:$0 sm:$0xff] }
 0x309   : > { %v4521_v14 = vpop.f32.mrf.mxu3 }
 0x30a   : > { %v4561_v49 = vadd.f32 %v4521_v14, %v9010_v13  ;;  %v4934_v13 = vpop.f32.mrf.mxu0 }
 0x30b   : > { %v4140_v55 = vpop.f32.mrf.mxu2 }
 0x30c   : > { %v9144_v31 = vadd.f32 %v4140_v55, %v3980_v4  ;;  %v4964_v7 = vadd.f32 %v4924_v29, %v4561_v49  ;;  %v5112_v29 = vpop.f32.mrf.mxu1 }
 0x30e   : > { %v5142_v20 = vadd.f32 %v5102_v24, %v4964_v7 }
 0x311   : > { %v4523_v56 = vpop.f32.mrf.mxu3 }
 0x312   : > { %v4562_v21 = vadd.f32 %v4523_v56, %v9020_v0  ;;  %v4936_v53 = vpop.f32.mrf.mxu0 }
 0x313   : > { %v5520_v39 = vpop.f32.mrf.mxu2 }
 0x314   : > { %v4965_v62 = vadd.f32 %v4926_v30, %v4562_v21  ;;  %v5560_v3 = vadd.f32 %v5520_v39, %v5142_v20  ;;  %v5114_v59 = vpop.f32.mrf.mxu1 }
 0x316   : > { %v5578_v5 = vadd.f32 %v9150_v51, %v5560_v3  ;;  %v5143_v57 = vadd.f32 %v5104_v37, %v4965_v62 }
 0x318   : > { %v5610_v61 = vmul.f32 0.01, %v5578_v5  ;;  %vm5594_vm4 = vcmp.ge.f32.partialorder %v5578_v5, 0.0 }
 0x319   : > { %v4526_v48 = vpop.f32.mrf.mxu3 }
 0x31a   : > { %v4563_v58 = vadd.f32 %v4526_v48, %v9030_v34  ;;  %v5626_v24 = vsel %vm5594_vm4, %v5578_v5, %v5610_v61  ;;  %v4939_v37 = vpop.f32.mrf.mxu0 }
 0x31b   : > { %v5522_v2 = vpop.f32.mrf.mxu2 }
 0x31c   : > { %v5561_v0 = vadd.f32 %v5522_v2, %v5143_v57  ;;  %v4966_v43 = vadd.f32 %v4929_v19, %v4563_v58  ;;  %v5117_v46 = vpop.f32.mrf.mxu1 }
 0x31e   : > { %v5579_v28 = vadd.f32 %v9150_v51, %v5561_v0  ;;  %v5144_v34 = vadd.f32 %v5107_v26, %v4966_v43 }
 0x320   : > { %vm5595_vm5 = vcmp.ge.f32.partialorder %v5579_v28, 0.0  ;;  %v5611_v63 = vmul.f32 0.01, %v5579_v28 }
 0x321   : > { %v4528_v12 = vpop.f32.mrf.mxu3 }
 0x322   : > { %v5627_v10 = vsel %vm5595_vm5, %v5579_v28, %v5611_v63  ;;  %v4564_v15 = vadd.f32 %v4528_v12, %v9038_v17  ;;  %v4941_v7 = vpop.f32.mrf.mxu0 }
 0x323   : > { %v6772_v45 = vpack.c.bf16 %v5627_v10, %v5626_v24  ;;  %v5525_v35 = vpop.f32.mrf.mxu2 }
 0x324   : > { %v4967_v8 = vadd.f32 %v4931_v9, %v4564_v15  ;;  %v5562_v16 = vadd.f32 %v5525_v35, %v5144_v34 }
 0x325   : > { %6773 = vst [vmem:[%s9159_s11] sm:$0xff] %v6772_v45  }
 0x326   : > { %v5580_v54 = vadd.f32 %v9150_v51, %v5562_v16  ;;  %v5145_v1 = vadd.f32 %v5109_v6, %v4967_v8  ;;  %v5119_v6 = vpop.f32.mrf.mxu1 }
 0x328   : > { %v5612_v17 = vmul.f32 0.01, %v5580_v54  ;;  %vm5596_vm2 = vcmp.ge.f32.partialorder %v5580_v54, 0.0 }
 0x329   : > { %v4531_v44 = vpop.f32.mrf.mxu3 }
 0x32a   : > { %v4565_v60 = vadd.f32 %v4531_v44, %v9048_v40  ;;  %v5628_v18 = vsel %vm5596_vm2, %v5580_v54, %v5612_v17  ;;  %v4944_v57 = vpop.f32.mrf.mxu0 }
 0x32b   : > { %v5527_v30 = vpop.f32.mrf.mxu2 }
 0x32c   : > { %v5563_v11 = vadd.f32 %v5527_v30, %v5145_v1  ;;  %v4968_v47 = vadd.f32 %v4934_v13, %v4565_v60 }
 0x32e   : > { %v5581_v32 = vadd.f32 %v9150_v51, %v5563_v11  ;;  %v5146_v49 = vadd.f32 %v5112_v29, %v4968_v47  ;;  %v5122_v0 = vpop.f32.mrf.mxu1 }
 0x330   : > { %vm5597_vm3 = vcmp.ge.f32.partialorder %v5581_v32, 0.0  ;;  %v5613_v52 = vmul.f32 0.01, %v5581_v32 }
 0x331   : > { %v4533_v26 = vpop.f32.mrf.mxu3 }
 0x332   : > { %v5629_v19 = vsel %vm5597_vm3, %v5581_v32, %v5613_v52  ;;  %v4566_v4 = vadd.f32 %v4533_v26, %v9058_v41  ;;  %v4946_v45 = vpop.f32.mrf.mxu0 }
 0x333   : > { %v6777_v14 = vpack.c.bf16 %v5629_v19, %v5628_v18  ;;  %v5530_v55 = vpop.f32.mrf.mxu2 }
 0x334   : > { %v4969_v40 = vadd.f32 %v4936_v53, %v4566_v4  ;;  %v5564_v9 = vadd.f32 %v5530_v55, %v5146_v49 }
 0x335   : > { %6809 = vst [vmem:[%s9159_s11 + $0x8] sm:$0xff] %v6777_v14  }
 0x336   : > { %v5582_v56 = vadd.f32 %v9150_v51, %v5564_v9  ;;  %v5147_v39 = vadd.f32 %v5114_v59, %v4969_v40  ;;  %v5124_v59 = vpop.f32.mrf.mxu1 }
 0x338   : > { %v5614_v13 = vmul.f32 0.01, %v5582_v56  ;;  %vm5598_vm6 = vcmp.ge.f32.partialorder %v5582_v56, 0.0 }
 0x339   : > { %v4536_v21 = vpop.f32.mrf.mxu3 }
 0x33a   : > { %v4567_v62 = vadd.f32 %v4536_v21, %v9069_v42  ;;  %v5630_v29 = vsel %vm5598_vm6, %v5582_v56, %v5614_v13  ;;  %v4949_v32 = vpop.f32.mrf.mxu0 }
 0x33b   : > { %v5532_v20 = vpop.f32.mrf.mxu2 }
 0x33c   : > { %v5565_v3 = vadd.f32 %v5532_v20, %v5147_v39  ;;  %v4970_v41 = vadd.f32 %v4939_v37, %v4567_v62 }
 0x33e   : > { %v5583_v5 = vadd.f32 %v9150_v51, %v5565_v3  ;;  %v5148_v63 = vadd.f32 %v5117_v46, %v4970_v41  ;;  %v5127_v47 = vpop.f32.mrf.mxu1 }
 0x340   : > { %vm5599_vm7 = vcmp.ge.f32.partialorder %v5583_v5, 0.0  ;;  %v5615_v48 = vmul.f32 0.01, %v5583_v5 }
 0x341   : > { %v4538_v58 = vpop.f32.mrf.mxu3 }
 0x342   : > { %v5631_v2 = vsel %vm5599_vm7, %v5583_v5, %v5615_v48  ;;  %v4568_v28 = vadd.f32 %v4538_v58, %v9079_v27 }
 0x343   : > { %v6782_v61 = vpack.c.bf16 %v5631_v2, %v5630_v29  ;;  %v5535_v43 = vpop.f32.mrf.mxu2 }
 0x344   : > { %v4971_v42 = vadd.f32 %v4941_v7, %v4568_v28  ;;  %v5566_v24 = vadd.f32 %v5535_v43, %v5148_v63 }
 0x345   : > { %6810 = vst [vmem:[%s9159_s11 + $0x10] sm:$0xff] %v6782_v61  }
 0x346   : > { %v5584_v10 = vadd.f32 %v9150_v51, %v5566_v24  ;;  %v5149_v53 = vadd.f32 %v5119_v6, %v4971_v42  ;;  %v5129_v7 = vpop.f32.mrf.mxu1 }
 0x348   : > { %v5616_v8 = vmul.f32 0.01, %v5584_v10  ;;  %vm5600_vm8 = vcmp.ge.f32.partialorder %v5584_v10, 0.0 }
 0x349   : > { %v4541_v12 = vpop.f32.mrf.mxu3 }
 0x34a   : > { %v4569_v35 = vadd.f32 %v4541_v12, %v9088_v38  ;;  %v5632_v44 = vsel %vm5600_vm8, %v5584_v10, %v5616_v8 }
 0x34b   : > { %v5537_v15 = vpop.f32.mrf.mxu2 }
 0x34c   : > { %v5567_v34 = vadd.f32 %v5537_v15, %v5149_v53  ;;  %v4972_v27 = vadd.f32 %v4944_v57, %v4569_v35 }
 0x34e   : > { %v5585_v16 = vadd.f32 %v9150_v51, %v5567_v34  ;;  %v5150_v17 = vadd.f32 %v5122_v0, %v4972_v27  ;;  %v5132_v29 = vpop.f32.mrf.mxu1 }
 0x350   : > { %vm5601_vm9 = vcmp.ge.f32.partialorder %v5585_v16, 0.0  ;;  %v5617_v54 = vmul.f32 0.01, %v5585_v16 }
 0x351   : > { %v4543_v30 = vpop.f32.mrf.mxu3 }
 0x352   : > { %v5633_v1 = vsel %vm5601_vm9, %v5585_v16, %v5617_v54  ;;  %v4570_v11 = vadd.f32 %v4543_v30, %v9098_v22  ;;  %v4951_v22 = vpop.f32.mrf.mxu0 }
 0x353   : > { %v6787_v60 = vpack.c.bf16 %v5633_v1, %v5632_v44  ;;  %v5540_v37 = vpop.f32.mrf.mxu2 }
 0x354   : > { %v4973_v38 = vadd.f32 %v4946_v45, %v4570_v11  ;;  %v5568_v46 = vadd.f32 %v5540_v37, %v5150_v17 }
 0x355   : > { %6811 = vst [vmem:[%s9159_s11 + $0x18] sm:$0xff] %v6787_v60  }
 0x356   : > { %v5586_v52 = vadd.f32 %v9150_v51, %v5568_v46  ;;  %v5151_v19 = vadd.f32 %v5124_v59, %v4973_v38  ;;  %v5134_v35 = vpop.f32.mrf.mxu1 }
 0x358   : > { %v5618_v55 = vmul.f32 0.01, %v5586_v52  ;;  %vm5602_vm10 = vcmp.ge.f32.partialorder %v5586_v52, 0.0 }
 0x359   : > { %v4546_v18 = vpop.f32.mrf.mxu3 }
 0x35a   : > { %v4571_v14 = vadd.f32 %v4546_v18, %v9109_v50  ;;  %v5634_v6 = vsel %vm5602_vm10, %v5586_v52, %v5618_v55  ;;  %v4954_v5 = vpop.f32.mrf.mxu0 }
 0x35b   : > { %v5542_v26 = vpop.f32.mrf.mxu2 }
 0x35c   : > { %v5569_v4 = vadd.f32 %v5542_v26, %v5151_v19  ;;  %v4974_v40 = vadd.f32 %v4949_v32, %v4571_v14 }
 0x35e   : > { %v5587_v49 = vadd.f32 %v9150_v51, %v5569_v4  ;;  %v5152_v3 = vadd.f32 %v5127_v47, %v4974_v40 }
 0x360   : > { %vm5603_vm11 = vcmp.ge.f32.partialorder %v5587_v49, 0.0  ;;  %v5619_v9 = vmul.f32 0.01, %v5587_v49 }
 0x361   : > { %v4548_v21 = vpop.f32.mrf.mxu3 }
 0x362   : > { %v5635_v56 = vsel %vm5603_vm11, %v5587_v49, %v5619_v9  ;;  %v4572_v20 = vadd.f32 %v4548_v21, %v9119_v36  ;;  %v4956_v10 = vpop.f32.mrf.mxu0 }
 0x363   : > { %v6792_v39 = vpack.c.bf16 %v5635_v56, %v5634_v6  ;;  %v5545_v62 = vpop.f32.mrf.mxu2 }
 0x364   : > { %v4975_v50 = vadd.f32 %v4951_v22, %v4572_v20  ;;  %v5570_v13 = vadd.f32 %v5545_v62, %v5152_v3 }
 0x365   : > { %6812 = vst [vmem:[%s9159_s11 + $0x20] sm:$0xff] %v6792_v39  }
 0x366   : > { %v5588_v41 = vadd.f32 %v9150_v51, %v5570_v13  ;;  %v5153_v57 = vadd.f32 %v5129_v7, %v4975_v50 }
 0x368   : > { %v5620_v61 = vmul.f32 0.01, %v5588_v41  ;;  %vm5604_vm12 = vcmp.ge.f32.partialorder %v5588_v41, 0.0 }
 0x369   : > { %v4551_v48 = vpop.f32.mrf.mxu3 }
 0x36a   : > { %v4573_v58 = vadd.f32 %v4551_v48, %v9128_v23  ;;  %v5636_v63 = vsel %vm5604_vm12, %v5588_v41, %v5620_v61  ;;  %v4959_v27 = vpop.f32.mrf.mxu0 }
 0x36b   : > { %v5547_v2 = vpop.f32.mrf.mxu2 }
 0x36c   : > { %v5571_v0 = vadd.f32 %v5547_v2, %v5153_v57  ;;  %v4976_v36 = vadd.f32 %v4954_v5, %v4573_v58 }
 0x36e   : > { %v5589_v28 = vadd.f32 %v9150_v51, %v5571_v0  ;;  %v5154_v15 = vadd.f32 %v5132_v29, %v4976_v36 }
 0x370   : > { %vm5605_vm13 = vcmp.ge.f32.partialorder %v5589_v28, 0.0  ;;  %v5621_v43 = vmul.f32 0.01, %v5589_v28 }
 0x371   : > { %v4553_v24 = vpop.f32.mrf.mxu3 }
 0x372   : > { %v5637_v42 = vsel %vm5605_vm13, %v5589_v28, %v5621_v43  ;;  %v4574_v53 = vadd.f32 %v4553_v24, %v9136_v25  ;;  %v5137_v25 = vpop.f32.mrf.mxu1  ;;  %v4961_v18 = vpop.f32.mrf.mxu0 }
 0x373   : > { %v6797_v12 = vpack.c.bf16 %v5637_v42, %v5636_v63  ;;  %v5550_v45 = vpop.f32.mrf.mxu2 }
 0x374   : > { %v4977_v23 = vadd.f32 %v4956_v10, %v4574_v53  ;;  %v5572_v34 = vadd.f32 %v5550_v45, %v5154_v15 }
 0x375   : > { %6813 = vst [vmem:[%s9159_s11 + $0x28] sm:$0xff] %v6797_v12  }
 0x376   : > { %v5590_v59 = vadd.f32 %v9150_v51, %v5572_v34  ;;  %v5155_v16 = vadd.f32 %v5134_v35, %v4977_v23 }
 0x378   : > { %v5622_v30 = vmul.f32 0.01, %v5590_v59  ;;  %vm5606_vm14 = vcmp.ge.f32.partialorder %v5590_v59, 0.0 }
 0x379   : > { %v4556_v8 = vpop.f32.mrf.mxu3 }
 0x37a   : > { %v4575_v44 = vadd.f32 %v4556_v8, %v9140_v33  ;;  %v5638_v17 = vsel %vm5606_vm14, %v5590_v59, %v5622_v30  ;;  %v5139_v14 = vpop.f32.mrf.mxu1 }
 0x37b   : > { %v5552_v54 = vpop.f32.mrf.mxu2 }
 0x37c   : > { %v5573_v1 = vadd.f32 %v5552_v54, %v5155_v16  ;;  %v4978_v11 = vadd.f32 %v4959_v27, %v4575_v44 }
 0x37e   : > { %v5591_v60 = vadd.f32 %v9150_v51, %v5573_v1  ;;  %v5156_v33 = vadd.f32 %v5137_v25, %v4978_v11 }
 0x380   : > { %vm5607_vm15 = vcmp.ge.f32.partialorder %v5591_v60, 0.0  ;;  %v5623_v37 = vmul.f32 0.01, %v5591_v60 }
 0x381   : > { %v4558_v38 = vpop.f32.mrf.mxu3 }
 0x382   : > { %v5639_v32 = vsel %vm5607_vm15, %v5591_v60, %v5623_v37  ;;  %v4576_v47 = vadd.f32 %v4558_v38, %v9144_v31 }
 0x383   : > { %v6802_v46 = vpack.c.bf16 %v5639_v32, %v5638_v17  ;;  %v5555_v52 = vpop.f32.mrf.mxu2 }
 0x384   : > { %v4979_v19 = vadd.f32 %v4961_v18, %v4576_v47  ;;  %v5574_v26 = vadd.f32 %v5555_v52, %v5156_v33 }
 0x385   : > { %6814 = vst [vmem:[%s9159_s11 + $0x30] sm:$0xff] %v6802_v46  }
 0x386   : > { %v5592_v4 = vadd.f32 %v9150_v51, %v5574_v26  ;;  %v5157_v55 = vadd.f32 %v5139_v14, %v4979_v19 }
 0x388   : > { %v5624_v31 = vmul.f32 0.01, %v5592_v4  ;;  %vm5608_vm0 = vcmp.ge.f32.partialorder %v5592_v4, 0.0 }
 0x38a   : > { %v5640_v7 = vsel %vm5608_vm0, %v5592_v4, %v5624_v31 }
 0x38b   : > { %v5557_v49 = vpop.f32.mrf.mxu2 }
 0x38c   : > { %v5575_v22 = vadd.f32 %v5557_v49, %v5157_v55 }
 0x38e   : > { %v5593_v40 = vadd.f32 %v9150_v51, %v5575_v22 }
 0x390   : > { %vm5609_vm1 = vcmp.ge.f32.partialorder %v5593_v40, 0.0  ;;  %v5625_v9 = vmul.f32 0.01, %v5593_v40 }
 0x392   : > { %v5641_v6 = vsel %vm5609_vm1, %v5593_v40, %v5625_v9 }
 0x393   : > { %v6807_v56 = vpack.c.bf16 %v5641_v6, %v5640_v7 }
 0x395   : > { %6815 = vst [vmem:[%s9159_s11 + $0x38] sm:$0xff] %v6807_v56  }
 0x396   : > { %6929 = shalt.err (!%p6926_p5)
}
 0x397   : > { %s6992_s9 = smov 4  }
 0x398   : > { %6833 = dma.vmem_to_hbm [thread:$0]  (%p7058_p4), %s5690_s30, 1024, %s5692_s5, %s5675_s18, %s6987_s13, %s6987_s13, %s6992_s9  }
 0x399 PF: > { %p6839_p6 = scmp.ge.s32.totalorder %s6980_s20, 2  ;;  %s5706_s11 = sand.u32 1, %s6960_s15  }
 0x39a   : > { %s5707_s12 = scalar_lea.sflag [#allocation4], %s5706_s11 }
 0x39b   : > { %p6836_p7 = pnand %p6839_p6, %p7065_p8 }
 0x39d   : > { %p6837_p9 = pneg %p6836_p7 }
 0x39f   : > { %6955 = dma.done.wait (%p6837_p9), %s5707_s12, 1024  }
 0x3a0   : > { %6957 = vsyncadd (%p6837_p9), %s5707_s12, 4294966272  ;;  %s17_s20 = sadd.s32 1, %s6980_s20   ;;  %s9295_s15 = smov %s6964_s16 }
 0x3a1   : > { %p14_p10 = scmp.ge.s32.totalorder %s17_s20, 4   ;;  %s9296_s16 = smov %s6968_s17 }
 0x3a2   : > { %s9297_s17 = smov %s7071_s28  ;;  %s9298_s18 = smov %s6976_s19 }
 0x3a3   : > { %s9299_s19 = smov %s9301_s23  ;;  %16 = sbr.rel (!%p14_p10) target bundleno = 4 (0x4), region = 91 }
 0x3a8   :  { %5713 = vsyncpa [#allocation4], 1 }
 0x3a9   :  { %5715 = vsyncpa [#allocation4 + $0x1], 1 }

// kernel: tpu_custom_call.1
= control target key start
LH: loop header
LB: loop body
LE: loop exit
PB: predicated region body
PF: predicated region fallthrough
CT: control target
= control target key end

     0   :  { %9 = vsyncpa [#allocation4], 0  ;;  %s9236_s0 = inlined_call_operand.vmem [shape: bf16[2,1,20,24,8], index: 0, kind: input, shape index: {}]   ;;  %s9237_s1 = inlined_call_operand.vmem [shape: bf16[72,128], index: 1, kind: input, shape index: {}]   ;;  %s9238_s2 = inlined_call_operand.vmem [shape: bf16[1,9,128,128], index: 2, kind: input, shape index: {}]   ;;  %s9239_s3 = inlined_call_operand.vmem [shape: f32[2,128], index: 3, kind: input, shape index: {}]   ;;  %s9240_s4 = inlined_call_operand.hbm [shape: bf16[2,1,16,8,128], index: 4, kind: output, shape index: {}]  }
   0x1   :  { %11 = vsyncpa [#allocation4 + $0x1], 0  ;;  %s7018_s15 = smov 0   ;;  %s7020_s16 = smov 0  }
   0x2   :  { %s7022_s17 = smov 0   ;;  %s7024_s18 = smov 0  }
   0x3   :  { %s7026_s19 = smov 0   ;;  %s7028_s20 = smov 0  }
   0x4 LB: > { %s5774_s21 = sadd.s32 4294967295, %s6980_s20   ;;  %s5775_s22 = sadd.s32 4294967294, %s6980_s20   ;;  %s6980_s20 = sphi %s7028_s20, %s17_s20   ;;  %s6976_s19 = sphi %s7026_s19, %s9299_s19   ;;  %s6972_s18 = sphi %s7024_s18, %s9298_s18   ;;  %s6968_s17 = sphi %s7022_s17, %s9297_s17   ;;  %s6964_s16 = sphi %s7020_s16, %s9296_s16   ;;  %s6960_s15 = sphi %s7018_s15, %s9295_s15  }
   0x5   : > { %s29_s23 = sadd.s32 1, %s6976_s19  ;;  %s129_s24 = sadd.s32 1, %s6968_s17 }
   0x6   : > { %p31_p0 = scmp.ge.s32.totalorder %s29_s23, 2  ;;  %p139_p1 = scmp.ne.s32.totalorder %s6968_s17, %s6964_s16 }
   0x7   : > { %p140_p2 = scmp.eq.s32.totalorder %s5774_s21, 1  ;;  %p145_p3 = scmp.ne.s32.totalorder %s6964_s16, %s6960_s15 }
   0x8   : > { %s9301_s23 = smov (%p31_p0, %s29_s23), 0  ;;  %p146_p5 = scmp.eq.s32.totalorder %s5775_s22, 1 }
   0x9   : > { %p7058_p4 = por %p140_p2, %p139_p1  ;;  %s124_s26 = ssub.s32 %s6976_s19, %s9301_s23 }
   0xa   : > { %p5778_p6 = scmp.ge.s32.totalorder %s6980_s20, 1  ;;  %p127_p7 = scmp.eq.s32.totalorder %s124_s26, 0 }
   0xb   : > { %p7065_p8 = por %p146_p5, %p145_p3  ;;  %p185_p9 = scmp.lt.s32.totalorder %s6980_s20, 3 }
   0xc   : > { %s7071_s28 = scalar_select %p127_p7, %s6968_s17, %s129_s24  }
   0xd   : > { %p186_p10 = pnand %p5778_p6, %p185_p9 }
   0xe   : > { %p215_p11 = scmp.lt.s32.totalorder (!%p186_p10), %s6972_s18, 1  ;;  %s6982_s8 = smov (!%p186_p10), 8  }
   0xf   : > { %189 = sbr.rel (%p186_p10) target bundleno = 921 (0x399), region = 36  ;;  %s6983_s9 = smov (!%p186_p10), 32  }
  0x10   : > { %s6984_s10 = smov (!%p186_p10), 56   ;;  %s6985_s11 = smov (!%p186_p10), 24  }
  0x11   : > { %s6986_s12 = smov (!%p186_p10), 16   ;;  %s6987_s13 = smov (!%p186_p10), 64  }
  0x12   : > { %s6988_s14 = smov (!%p186_p10), 40   ;;  %s6989_s21 = smov (!%p186_p10), 48  }
  0x13   : > { %s6922_s26 = scalar_lea.hbm (!%p186_p10), %s9240_s4, 128 }
  0x14   : > { %s216_s29 = scalar_select %p215_p11, %s6972_s18, 1  ;;  %vm297_vm0 = vsmask.f32 256  ;;  %vm298_vm1 = vsmask.f32 4368  ;;  %vm2060_vm6 = vcmask 64512  }
  0x15   : > { %vm552_vm2 = vsmask.f32 3328  ;;  %vm553_vm3 = vsmask.f32 7440  ;;  %vm7112_vm4 = vmor %vm297_vm0, %vm298_vm1  ;;  %vm2278_vm7 = vcmask 1043456   ;;  %vm2088_vm8 = vcmask 130048  }
  0x16   : > { %s6832_s30 = smul.u32 240, %s216_s29  ;;  %vm7149_vm5 = vmor %vm552_vm2, %vm553_vm3  ;;  %vm2107_vm9 = vcmask 195584   ;;  %vm2126_vm10 = vcmask 261120   ;;  %vm2145_vm11 = vcmask 326656   ;;  %vm2164_vm12 = vcmask 392192  }
  0x17   : > { %vm2183_vm13 = vcmask 457728   ;;  %vm2202_vm14 = vcmask 523264   ;;  %vm2259_vm15 = vcmask 588800  }
  0x18   : > { %s7078_s7 = scalar_lea.vmem %s9236_s0, %s6832_s30 }
  0x19   : > { %v5945_v0 = vld [vmem:[%s7078_s7 + $0x4] sm:$0xf]  ;;  %v6641_v1 = vld [vmem:[%s7078_s7 + $0xc] sm:$0xf0]  ;;  %v6650_v4 = vld [vmem:[%s7078_s7 + $0x18] sm:$0xf0] }
  0x1a   : > { %v5981_v2 = vld [vmem:[%s7078_s7 + $0x10] sm:$0xf]  ;;  %v5946_v3 = vor.u32 %v6641_v1, %v5945_v0  ;;  %v6017_v5 = vld [vmem:[%s7078_s7 + $0x1c] sm:$0xf]  ;;  %v6659_v6 = vld [vmem:[%s7078_s7 + $0x24] sm:$0xf0] }
  0x1b   : > { %v5982_v7 = vor.u32 %v6650_v4, %v5981_v2  ;;  %v5799_v8 = vld [vmem:[%s7078_s7 + $0xc] sm:$0x8]  ;;  %v7088_v9 = vld [vmem:[%s7078_s7 + $0x10] sm:$0xf]  ;;  %v5801_v10 = vld [vmem:[%s7078_s7 + $0x18] sm:$0x8]  ;;  %v6018_v16 = vor.u32 %v6659_v6, %v6017_v5 }
  0x1c   : > { %1691 = vrot.lane.b32.xlu0 %v5946_v3, %s6982_s8  ;;  %v7093_v11 = vld [vmem:[%s7078_s7 + $0x1c] sm:$0xf]  ;;  %v755_v12 = vshrl.u32 %v5799_v8, 16  ;;  %v760_v13 = vshrl.u32 %v7088_v9, 16  ;;  %v763_v14 = vshll.u32 %v7088_v9, 16  ;;  %v768_v15 = vshrl.u32 %v5801_v10, 16 }
  0x1d   : > { %1844 = vrot.lane.b32.xlu1 %v5982_v7, %s6983_s9  ;;  %v773_v17 = vshrl.u32 %v7093_v11, 16  ;;  %v776_v18 = vshll.u32 %v7093_v11, 16  ;;  %v7101_v19 = vld [vmem:[%s7078_s7 + $0x4] sm:$0xf]  ;;  %v7104_v20 = vld [vmem:[%s7078_s7 + $0x10] sm:$0xf] }
  0x1e   : > { %v5835_v21 = vrot.slane %v755_v12, 11  ;;  %v762_v22 = vrot.slane %v760_v13, 7  ;;  %v5836_v23 = vrot.slane %v768_v15, 11  ;;  %v306_v24 = vshrl.u32 %v7101_v19, 16  ;;  %v534_v25 = vld [vmem:[%s7078_s7 + $0x8] sm:$0x1] }
  0x1f   : > { %v775_v27 = vrot.slane %v773_v17, 7  ;;  %v309_v28 = vshll.u32 %v7101_v19, 16  ;;  %v319_v29 = vshrl.u32 %v7104_v20, 16  ;;  %v322_v30 = vshll.u32 %v7104_v20, 16  ;;  %v535_v31 = vld [vmem:[%s7078_s7 + $0x14] sm:$0x1] }
  0x20   : > { %v765_v32 = vor.u32 %v763_v14, %v762_v22  ;;  %v555_v33 = vrot.slane %v306_v24, 4  ;;  %v560_v34 = vshll.u32 %v534_v25, 16  ;;  %v569_v35 = vshll.u32 %v535_v31, 16  ;;  %v7127_v36 = vld [vmem:[%s7078_s7 + $0x1c] sm:$0xf] }
  0x21   : > { %v778_v37 = vor.u32 %v776_v18, %v775_v27  ;;  %v556_v38 = vrot.slane %v309_v28, 5  ;;  %v564_v39 = vrot.slane %v319_v29, 4  ;;  %v565_v40 = vrot.slane %v322_v30, 5  ;;  %v7138_v41 = vld [vmem:[%s7078_s7 + $0x28] sm:$0xf] }
  0x22   : > { %v766_v42 = vsel %vm7112_vm4, %v5835_v21, %v765_v32  ;;  %v562_v43 = vrot.slane %v560_v34, 5  ;;  %v571_v44 = vrot.slane %v569_v35, 5  ;;  %v1211_v45 = vshrl.u32 %v7127_v36, 16  ;;  %v5925_v46 = vld [vmem:[%s7078_s7 + $0x20] sm:$0x1] }
  0x23   : > { %v779_v47 = vsel %vm7112_vm4, %v5836_v23, %v778_v37  ;;  %v1754_v48 = vunpack.c.l.b16 %v766_v42  ;;  %v557_v49 = vor.u32 %v556_v38, %v555_v33  ;;  %v566_v50 = vor.u32 %v565_v40, %v564_v39  ;;  %v5926_v56 = vld [vmem:[%s7078_s7 + $0x2c] sm:$0x1]  ;;  %v7160_v61 = vld [vmem:[%s7078_s7 + $0x1c] sm:$0xf]  ;;  %v7169_v2 = vld [vmem:[%s7078_s7 + $0x28] sm:$0xf] }
  0x24   : > { %1997 = vrot.lane.b32.xlu0 %v6018_v16, %s6984_s10  ;;  %v1755_v51 = vunpack.c.l.b16 %v779_v47  ;;  %v1214_v53 = vshll.u32 %v7127_v36, 16  ;;  %v1224_v54 = vshrl.u32 %v7138_v41, 16  ;;  %v1227_v55 = vshll.u32 %v7138_v41, 16  ;;  %v536_v15 = vld [vmem:[%s7078_s7 + $0x20] sm:$0x1] }
  0x25   : > { %v558_v57 = vrot.slane %v557_v49, 4  ;;  %v567_v58 = vrot.slane %v566_v50, 4  ;;  %v1457_v59 = vrot.slane %v1211_v45, 4  ;;  %v1462_v60 = vshll.u32 %v5925_v46, 16  ;;  %v537_v25 = vld [vmem:[%s7078_s7 + $0x2c] sm:$0x1] }
  0x26   : > { %v1772_v62 = vpack.c.b16 %v1755_v51, %v1754_v48  ;;  %v1458_v63 = vrot.slane %v1214_v53, 5  ;;  %v1466_v0 = vrot.slane %v1224_v54, 4  ;;  %v1467_v1 = vrot.slane %v1227_v55, 5  ;;  %v5803_v34 = vld [vmem:[%s7078_s7 + $0x24] sm:$0x8] }
  0x27   : > { %v563_v3 = vsel %vm7149_vm5, %v558_v57, %v562_v43  ;;  %v572_v4 = vsel %vm7149_vm5, %v567_v58, %v571_v44  ;;  %v1464_v5 = vrot.slane %v1462_v60, 5  ;;  %v1471_v6 = vshll.u32 %v5926_v56, 16  ;;  %v5804_v40 = vld [vmem:[%s7078_s7 + $0x28] sm:$0xf]  ;;  %v5805_v47 = vld [vmem:[%s7078_s7 + $0x30] sm:$0x8] }
  0x28   : > { %1781 = vrot.lane.b32.xlu1 %v1772_v62, %s6985_s11  ;;  %v1709_v7 = vunpack.c.l.b16 %v563_v3  ;;  %v1710_v8 = vunpack.c.l.b16 %v572_v4  ;;  %v1459_v10 = vor.u32 %v1458_v63, %v1457_v59  ;;  %v1468_v12 = vor.u32 %v1467_v1, %v1466_v0  ;;  %v5806_v56 = vld [vmem:[%s7078_s7 + $0x34] sm:$0xf]  ;;  %v5949_v57 = vld [vmem:[%s7078_s7 + $0x1c] sm:$0xf]  ;;  %v6642_v63 = vld [vmem:[%s7078_s7 + $0x24] sm:$0xf0] }
  0x29   : > { %v1473_v16 = vrot.slane %v1471_v6, 5  ;;  %v332_v21 = vshrl.u32 %v7160_v61, 16  ;;  %v9249_v22 = vshll.u32 %v7160_v61, 16  ;;  %v345_v23 = vshrl.u32 %v7169_v2, 16  ;;  %v7244_v36 = vld [vmem:[%s7078_s7 + $0x3c] sm:$0xf0] }
  0x2a   : > { %v1727_v27 = vpack.c.b16 %v1710_v8, %v1709_v7  ;;  %v1460_v31 = vrot.slane %v1459_v10, 4  ;;  %v1469_v32 = vrot.slane %v1468_v12, 4  ;;  %v9250_v33 = vshll.u32 %v7169_v2, 16  ;;  %v5855_v10 = vld [vmem:[%s7078_s7 + $0x2c] sm:$0x1] }
  0x2b   : > { %v573_v35 = vrot.slane %v332_v21, 4  ;;  %v574_v37 = vrot.slane %v9249_v22, 5  ;;  %v578_v38 = vshll.u32 %v536_v15, 16  ;;  %v582_v39 = vrot.slane %v345_v23, 4 }
  0x2c   : > { %1736 = vrot.lane.b32.xlu0 %v1727_v27, %s6986_s12  ;;  %v1465_v42 = vsel %vm7149_vm5, %v1460_v31, %v1464_v5  ;;  %v1474_v43 = vsel %vm7149_vm5, %v1469_v32, %v1473_v16  ;;  %v583_v44 = vrot.slane %v9250_v33, 5  ;;  %v587_v46 = vshll.u32 %v537_v25, 16 }
  0x2d   : > { %v2015_v48 = vunpack.c.l.b16 %v1465_v42  ;;  %v2016_v49 = vunpack.c.l.b16 %v1474_v43  ;;  %v575_v50 = vor.u32 %v574_v37, %v573_v35  ;;  %v580_v51 = vrot.slane %v578_v38, 5  ;;  %v5856_v35 = vld [vmem:[%s7078_s7 + $0x38] sm:$0x1]  ;;  %v5875_v42 = vld [vmem:[%s7078_s7 + $0x30] sm:$0x8] }
  0x2e   : > { %v584_v58 = vor.u32 %v583_v44, %v582_v39  ;;  %v589_v59 = vrot.slane %v587_v46, 5  ;;  %v781_v60 = vshrl.u32 %v5803_v34, 16  ;;  %v786_v62 = vshrl.u32 %v5804_v40, 16 }
  0x2f   : > { %v2033_v0 = vpack.c.b16 %v2016_v49, %v2015_v48  ;;  %v576_v1 = vrot.slane %v575_v50, 4  ;;  %v789_v3 = vshll.u32 %v5804_v40, 16  ;;  %v794_v4 = vshrl.u32 %v5805_v47, 16  ;;  %v5876_v48 = vld [vmem:[%s7078_s7 + $0x34] sm:$0xf] }
  0x30   : > { %v585_v5 = vrot.slane %v584_v58, 4  ;;  %v5837_v6 = vrot.slane %v781_v60, 11  ;;  %v788_v7 = vrot.slane %v786_v62, 7  ;;  %v799_v8 = vshrl.u32 %v5806_v56, 16 }
  0x31   : > { %2042 = vrot.lane.b32.xlu1 %v2033_v0, %s6987_s13  ;;  %v581_v12 = vsel %vm7149_vm5, %v576_v1, %v580_v51  ;;  %v5838_v15 = vrot.slane %v794_v4, 11  ;;  %v802_v16 = vshll.u32 %v5806_v56, 16  ;;  %v5950_v25 = vor.u32 %v6642_v63, %v5949_v57  ;;  %v5877_v57 = vld [vmem:[%s7078_s7 + $0x3c] sm:$0x8] }
  0x32   : > { %v590_v27 = vsel %vm7149_vm5, %v585_v5, %v589_v59  ;;  %v1711_v31 = vunpack.c.l.b16 %v581_v12  ;;  %v791_v32 = vor.u32 %v789_v3, %v788_v7  ;;  %v801_v34 = vrot.slane %v799_v8, 7 }
  0x33   : > { %v1712_v37 = vunpack.c.l.b16 %v590_v27  ;;  %1693 = vrot.lane.b32.xlu2 %v5950_v25, %s6982_s8  ;;  %v1024_v38 = vrot.slane %v786_v62, 4  ;;  %v1025_v39 = vrot.slane %v789_v3, 5  ;;  %v1029_v40 = vshll.u32 %v5855_v10, 16  ;;  %v5878_v62 = vld [vmem:[%s7078_s7 + $0x40] sm:$0xf] }
  0x34   : > { %v792_v43 = vsel %vm7112_vm4, %v5837_v6, %v791_v32  ;;  %v804_v44 = vor.u32 %v802_v16, %v801_v34  ;;  %v1033_v46 = vrot.slane %v799_v8, 4  ;;  %v1034_v47 = vrot.slane %v802_v16, 5  ;;  %v5871_v10 = vld [vmem:[%s7078_s7 + $0x18] sm:$0x8]  ;;  %v5873_v27 = vld [vmem:[%s7078_s7 + $0x24] sm:$0x8] }
  0x35   : > { %v1728_v49 = vpack.c.b16 %v1712_v37, %v1711_v31  ;;  %v1756_v50 = vunpack.c.l.b16 %v792_v43  ;;  %v1026_v51 = vor.u32 %v1025_v39, %v1024_v38  ;;  %v1031_v56 = vrot.slane %v1029_v40, 5 }
  0x36   : > { %v805_v58 = vsel %vm7112_vm4, %v5838_v15, %v804_v44  ;;  %v1035_v59 = vor.u32 %v1034_v47, %v1033_v46  ;;  %v1038_v60 = vshll.u32 %v5856_v35, 16  ;;  %v1232_v63 = vshrl.u32 %v5875_v42, 16  ;;  %v5927_v46 = vld [vmem:[%s7078_s7 + $0x38] sm:$0x1] }
  0x37   : > { %1738 = vrot.lane.b32.xlu0 %v1728_v49, %s6986_s12  ;;  %v1757_v0 = vunpack.c.l.b16 %v805_v58  ;;  %v1027_v1 = vrot.slane %v1026_v51, 4  ;;  %v1237_v3 = vshrl.u32 %v5876_v48, 16  ;;  %v1240_v4 = vshll.u32 %v5876_v48, 16 }
  0x38   : > { %v1036_v5 = vrot.slane %v1035_v59, 4  ;;  %v1040_v6 = vrot.slane %v1038_v60, 5  ;;  %v5909_v7 = vrot.slane %v1232_v63, 11  ;;  %v1245_v8 = vshrl.u32 %v5877_v57, 16  ;;  %v5928_v59 = vld [vmem:[%s7078_s7 + $0x44] sm:$0x1] }
  0x39   : > { %v1773_v12 = vpack.c.b16 %v1757_v0, %v1756_v50  ;;  %v1032_v15 = vsel %vm7149_vm5, %v1027_v1, %v1031_v56  ;;  %v1239_v16 = vrot.slane %v1237_v3, 7  ;;  %v1250_v25 = vshrl.u32 %v5878_v62, 16  ;;  %v7238_v60 = vld [vmem:[%s7078_s7 + $0x34] sm:$0xf] }
  0x3a   : > { %v1041_v31 = vsel %vm7149_vm5, %v1036_v5, %v1040_v6  ;;  %v1864_v32 = vunpack.c.l.b16 %v1032_v15  ;;  %v5910_v34 = vrot.slane %v1245_v8, 11  ;;  %v1253_v35 = vshll.u32 %v5878_v62, 16  ;;  %v5853_v8 = vld [vmem:[%s7078_s7 + $0x14] sm:$0x1] }
  0x3b   : > { %1783 = vrot.lane.b32.xlu1 %v1773_v12, %s6985_s11  ;;  %v1865_v37 = vunpack.c.l.b16 %v1041_v31  ;;  %v1242_v38 = vor.u32 %v1240_v4, %v1239_v16  ;;  %v1252_v39 = vrot.slane %v1250_v25, 7  ;;  %v1206_v40 = vshrl.u32 %v5871_v10, 16  ;;  %v5854_v16 = vld [vmem:[%s7078_s7 + $0x20] sm:$0x1] }
  0x3c   : > { %v1213_v42 = vrot.slane %v1211_v45, 7  ;;  %v1219_v43 = vshrl.u32 %v5873_v27, 16  ;;  %v1226_v44 = vrot.slane %v1224_v54, 7  ;;  %v1475_v47 = vrot.slane %v1237_v3, 4 }
  0x3d   : > { %v1881_v48 = vpack.c.b16 %v1865_v37, %v1864_v32  ;;  %v1243_v49 = vsel %vm7112_vm4, %v5909_v7, %v1242_v38  ;;  %v1255_v50 = vor.u32 %v1253_v35, %v1252_v39  ;;  %v5907_v51 = vrot.slane %v1206_v40, 11  ;;  %v7263_v40 = vld [vmem:[%s7078_s7 + $0x40] sm:$0xf] }
  0x3e   : > { %v1909_v56 = vunpack.c.l.b16 %v1243_v49  ;;  %v1216_v57 = vor.u32 %v1214_v53, %v1213_v42  ;;  %v5908_v58 = vrot.slane %v1219_v43, 11  ;;  %v1229_v45 = vor.u32 %v1227_v55, %v1226_v44  ;;  %v5809_v43 = vld [vmem:[%s7078_s7 + $0x48] sm:$0x8]  ;;  %v7272_v44 = vld [vmem:[%s7078_s7 + $0x4c] sm:$0xf] }
  0x3f   : > { %1891 = vrot.lane.b32.xlu0 %v1881_v48, %s6988_s14  ;;  %v1256_v54 = vsel %vm7112_vm4, %v5910_v34, %v1255_v50  ;;  %v1476_v62 = vrot.slane %v1240_v4, 5  ;;  %v1480_v63 = vshll.u32 %v5927_v46, 16  ;;  %v1484_v0 = vrot.slane %v1250_v25, 4  ;;  %v5807_v34 = vld [vmem:[%s7078_s7 + $0x3c] sm:$0x8] }
  0x40   : > { %v1910_v53 = vunpack.c.l.b16 %v1256_v54  ;;  %v1217_v41 = vsel %vm7112_vm4, %v5907_v51, %v1216_v57  ;;  %v1230_v55 = vsel %vm7112_vm4, %v5908_v58, %v1229_v45  ;;  %v1485_v1 = vrot.slane %v1253_v35, 5  ;;  %v7277_v49 = vld [vmem:[%s7078_s7 + $0x40] sm:$0xf]  ;;  %v7280_v50 = vld [vmem:[%s7078_s7 + $0x48] sm:$0xf0] }
  0x41   : > { %v1907_v3 = vunpack.c.l.b16 %v1217_v41  ;;  %v1908_v5 = vunpack.c.l.b16 %v1230_v55  ;;  %v1477_v6 = vor.u32 %v1476_v62, %v1475_v47  ;;  %v1482_v7 = vrot.slane %v1480_v63, 5  ;;  %v7283_v57 = vld [vmem:[%s7078_s7 + $0x28] sm:$0xf]  ;;  %v7286_v58 = vld [vmem:[%s7078_s7 + $0x30] sm:$0xf0] }
  0x42   : > { %v1926_v4 = vpack.c.b16 %v1910_v53, %v1909_v56  ;;  %v1486_v10 = vor.u32 %v1485_v1, %v1484_v0  ;;  %v1489_v12 = vshll.u32 %v5928_v59, 16  ;;  %v5954_v15 = vor.u32 %v7244_v36, %v7238_v60  ;;  %v5879_v62 = vld [vmem:[%s7078_s7 + $0x48] sm:$0x8]  ;;  %v7295_v41 = vld [vmem:[%s7078_s7 + $0x4c] sm:$0xf] }
  0x43   : > { %v1925_v25 = vpack.c.b16 %v1908_v5, %v1907_v3  ;;  %v1478_v27 = vrot.slane %v1477_v6, 4  ;;  %v1006_v31 = vrot.slane %v760_v13, 4  ;;  %v1007_v32 = vrot.slane %v763_v14, 5  ;;  %v5881_v55 = vld [vmem:[%s7078_s7 + $0x54] sm:$0x8] }
  0x44   : > { %1936 = vrot.lane.b32.xlu1 %v1926_v4, %s6989_s21  ;;  %v1487_v35 = vrot.slane %v1486_v10, 4  ;;  %v1491_v37 = vrot.slane %v1489_v12, 5  ;;  %v1011_v38 = vshll.u32 %v5853_v8, 16  ;;  %v1015_v39 = vrot.slane %v773_v17, 4 }
  0x45   : > { %1934 = vrot.lane.b32.xlu2 %v1925_v25, %s6989_s21  ;;  %v1483_v9 = vsel %vm7149_vm5, %v1478_v27, %v1482_v7  ;;  %v1008_v13 = vor.u32 %v1007_v32, %v1006_v31  ;;  %v1016_v14 = vrot.slane %v776_v18, 5  ;;  %v1020_v42 = vshll.u32 %v5854_v16, 16  ;;  %v7302_v7 = vld [vmem:[%s7078_s7 + $0x58] sm:$0xf]  ;;  %v7314_v16 = vld [vmem:[%s7078_s7 + $0x4c] sm:$0xf] }
  0x46   : > { %v1492_v17 = vsel %vm7149_vm5, %v1487_v35, %v1491_v37  ;;  %v2017_v46 = vunpack.c.l.b16 %v1483_v9  ;;  %v1013_v47 = vrot.slane %v1011_v38, 5  ;;  %v807_v48 = vshrl.u32 %v5807_v34, 16  ;;  %v7321_v34 = vld [vmem:[%s7078_s7 + $0x54] sm:$0xf0]  ;;  %v7324_v35 = vld [vmem:[%s7078_s7 + $0x34] sm:$0xf] }
  0x47   : > { %v2018_v51 = vunpack.c.l.b16 %v1492_v17  ;;  %v1009_v11 = vrot.slane %v1008_v13, 4  ;;  %v1017_v18 = vor.u32 %v1016_v14, %v1015_v39  ;;  %v1022_v56 = vrot.slane %v1020_v42, 5  ;;  %v7327_v37 = vld [vmem:[%s7078_s7 + $0x4c] sm:$0xf]  ;;  %v7334_v13 = vld [vmem:[%s7078_s7 + $0x3c] sm:$0xf0] }
  0x48   : > { %v5839_v45 = vrot.slane %v807_v48, 11  ;;  %v812_v59 = vshrl.u32 %v7263_v40, 16  ;;  %v815_v60 = vshll.u32 %v7263_v40, 16  ;;  %v820_v54 = vshrl.u32 %v5809_v43, 16 }
  0x49   : > { %v2034_v63 = vpack.c.b16 %v2018_v51, %v2017_v46  ;;  %v1014_v0 = vsel %vm7149_vm5, %v1009_v11, %v1013_v47  ;;  %v1018_v36 = vrot.slane %v1017_v18, 4  ;;  %v825_v53 = vshrl.u32 %v7272_v44, 16  ;;  %v7341_v46 = vld [vmem:[%s7078_s7 + $0x4c] sm:$0xf]  ;;  %v7344_v47 = vld [vmem:[%s7078_s7 + $0x54] sm:$0xf0] }
  0x4a   : > { %v1862_v1 = vunpack.c.l.b16 %v1014_v0  ;;  %v814_v3 = vrot.slane %v812_v59, 7  ;;  %v5840_v5 = vrot.slane %v820_v54, 11  ;;  %v828_v6 = vshll.u32 %v7272_v44, 16  ;;  %v7351_v11 = vld [vmem:[%s7078_s7 + $0x58] sm:$0xf] }
  0x4b   : > { %2044 = vrot.lane.b32.xlu0 %v2034_v63, %s6987_s13  ;;  %v1023_v8 = vsel %vm7149_vm5, %v1018_v36, %v1022_v56  ;;  %v827_v4 = vrot.slane %v825_v53, 7  ;;  %v5990_v10 = vor.u32 %v7280_v50, %v7277_v49  ;;  %v5986_v12 = vor.u32 %v7286_v58, %v7283_v57 }
  0x4c   : > { %1695 = vrot.lane.b32.xlu1 %v5954_v15, %s6982_s8  ;;  %v1863_v25 = vunpack.c.l.b16 %v1023_v8  ;;  %v817_v27 = vor.u32 %v815_v60, %v814_v3  ;;  %v1258_v31 = vshrl.u32 %v5879_v62, 16  ;;  %v1263_v32 = vshrl.u32 %v7295_v41, 16 }
  0x4d   : > { %v830_v38 = vor.u32 %v828_v6, %v827_v4  ;;  %v1266_v15 = vshll.u32 %v7295_v41, 16  ;;  %v1271_v39 = vshrl.u32 %v5881_v55, 16  ;;  %v1276_v9 = vshrl.u32 %v7302_v7, 16  ;;  %v540_v55 = vld [vmem:[%s7078_s7 + $0x50] sm:$0x1] }
  0x4e   : > { %v1880_v14 = vpack.c.b16 %v1863_v25, %v1862_v1  ;;  %v818_v42 = vsel %vm7112_vm4, %v5839_v45, %v817_v27  ;;  %v5911_v43 = vrot.slane %v1258_v31, 11  ;;  %v1265_v17 = vrot.slane %v1263_v32, 7  ;;  %v541_v1 = vld [vmem:[%s7078_s7 + $0x5c] sm:$0x1] }
  0x4f   : > { %v831_v48 = vsel %vm7112_vm4, %v5840_v5, %v830_v38  ;;  %v1758_v49 = vunpack.c.l.b16 %v818_v42  ;;  %v5912_v50 = vrot.slane %v1271_v39, 11  ;;  %v1278_v51 = vrot.slane %v1276_v9, 7  ;;  %v7381_v38 = vld [vmem:[%s7078_s7 + $0x40] sm:$0xf] }
  0x50   : > { %1889 = vrot.lane.b32.xlu2 %v1880_v14, %s6988_s14  ;;  %v1759_v18 = vunpack.c.l.b16 %v831_v48  ;;  %v1268_v56 = vor.u32 %v1266_v15, %v1265_v17  ;;  %v1279_v45 = vshll.u32 %v7302_v7, 16  ;;  %v6026_v54 = vor.u32 %v7321_v34, %v7314_v16  ;;  %v7373_v16 = vld [vmem:[%s7078_s7 + $0x34] sm:$0xf] }
  0x51   : > { %v6022_v62 = vor.u32 %v7334_v13, %v7324_v35  ;;  %v5958_v63 = vor.u32 %v7344_v47, %v7341_v46  ;;  %v9244_v0 = vshrl.u32 %v7327_v37, 16  ;;  %v9242_v36 = vshll.u32 %v7327_v37, 16  ;;  %v7466_v13 = vld [vmem:[%s7078_s7 + $0x6c] sm:$0xf0] }
  0x52   : > { %v1774_v3 = vpack.c.b16 %v1759_v18, %v1758_v49  ;;  %v1269_v5 = vsel %vm7112_vm4, %v5911_v43, %v1268_v56  ;;  %v1281_v8 = vor.u32 %v1279_v45, %v1278_v51  ;;  %v9243_v4 = vshrl.u32 %v7351_v11, 16  ;;  %v538_v18 = vld [vmem:[%s7078_s7 + $0x38] sm:$0x1] }
  0x53   : > { %v1911_v25 = vunpack.c.l.b16 %v1269_v5  ;;  %v9241_v27 = vshll.u32 %v7351_v11, 16  ;;  %v609_v31 = vrot.slane %v9244_v0, 4  ;;  %v610_v34 = vrot.slane %v9242_v36, 5  ;;  %v5859_v0 = vld [vmem:[%s7078_s7 + $0x5c] sm:$0x1] }
  0x54   : > { %1785 = vrot.lane.b32.xlu0 %v1774_v3, %s6985_s11  ;;  %1848 = vrot.lane.b32.xlu1 %v5990_v10, %s6983_s9  ;;  %v1282_v39 = vsel %vm7112_vm4, %v5912_v50, %v1281_v8  ;;  %v614_v14 = vshll.u32 %v540_v55, 16  ;;  %v618_v42 = vrot.slane %v9243_v4, 4  ;;  %v623_v43 = vshll.u32 %v541_v1, 16  ;;  %v539_v3 = vld [vmem:[%s7078_s7 + $0x44] sm:$0x1] }
  0x55   : > { %v1912_v17 = vunpack.c.l.b16 %v1282_v39  ;;  %v611_v48 = vor.u32 %v610_v34, %v609_v31  ;;  %v619_v49 = vrot.slane %v9241_v27, 5  ;;  %v9246_v51 = vshrl.u32 %v7373_v16, 16  ;;  %v7398_v34 = vld [vmem:[%s7078_s7 + $0x58] sm:$0xf]  ;;  %v7401_v39 = vld [vmem:[%s7078_s7 + $0x60] sm:$0xf0] }
  0x56   : > { %v616_v56 = vrot.slane %v614_v14, 5  ;;  %v625_v10 = vrot.slane %v623_v43, 5  ;;  %v9245_v50 = vshll.u32 %v7373_v16, 16  ;;  %v9248_v55 = vshrl.u32 %v7381_v38, 16 }
  0x57   : > { %v1927_v5 = vpack.c.b16 %v1912_v17, %v1911_v25  ;;  %v612_v1 = vrot.slane %v611_v48, 4  ;;  %v620_v8 = vor.u32 %v619_v49, %v618_v42  ;;  %v9247_v31 = vshll.u32 %v7381_v38, 16  ;;  %v7414_v17 = vld [vmem:[%s7078_s7 + $0x58] sm:$0xf] }
  0x58   : > { %1846 = vrot.lane.b32.xlu2 %v5986_v12, %s6983_s9  ;;  %v591_v14 = vrot.slane %v9246_v51, 4  ;;  %v592_v25 = vrot.slane %v9245_v50, 5  ;;  %v596_v43 = vshll.u32 %v538_v18, 16  ;;  %v600_v42 = vrot.slane %v9248_v55, 4  ;;  %v7421_v12 = vld [vmem:[%s7078_s7 + $0x64] sm:$0xf] }
  0x59   : > { %v617_v48 = vsel %vm7149_vm5, %v612_v1, %v616_v56  ;;  %v621_v49 = vrot.slane %v620_v8, 4  ;;  %v601_v57 = vrot.slane %v9247_v31, 5  ;;  %v605_v58 = vshll.u32 %v539_v3, 16 }
  0x5a   : > { %v1715_v27 = vunpack.c.l.b16 %v617_v48  ;;  %v593_v36 = vor.u32 %v592_v25, %v591_v14  ;;  %v598_v4 = vrot.slane %v596_v43, 5  ;;  %v5994_v18 = vor.u32 %v7401_v39, %v7398_v34 }
  0x5b   : > { %v626_v50 = vsel %vm7149_vm5, %v621_v49, %v625_v10  ;;  %v602_v51 = vor.u32 %v601_v57, %v600_v42  ;;  %v607_v56 = vrot.slane %v605_v58, 5  ;;  %v838_v1 = vshrl.u32 %v7414_v17, 16  ;;  %v5860_v10 = vld [vmem:[%s7078_s7 + $0x68] sm:$0x1] }
  0x5c   : > { %1938 = vrot.lane.b32.xlu0 %v1927_v5, %s6989_s21  ;;  %2001 = vrot.lane.b32.xlu1 %v6026_v54, %s6984_s10  ;;  %v1716_v3 = vunpack.c.l.b16 %v626_v50  ;;  %v594_v8 = vrot.slane %v593_v36, 4  ;;  %v841_v14 = vshll.u32 %v7414_v17, 16  ;;  %v851_v25 = vshrl.u32 %v7421_v12, 16 }
  0x5d   : > { %v603_v43 = vrot.slane %v602_v51, 4  ;;  %v854_v48 = vshll.u32 %v7421_v12, 16  ;;  %v1060_v42 = vrot.slane %v838_v1, 4  ;;  %v1065_v49 = vshll.u32 %v5859_v0, 16  ;;  %v5857_v51 = vld [vmem:[%s7078_s7 + $0x44] sm:$0x1] }
  0x5e   : > { %v1730_v57 = vpack.c.b16 %v1716_v3, %v1715_v27  ;;  %v599_v54 = vsel %vm7149_vm5, %v594_v8, %v598_v4  ;;  %v1061_v36 = vrot.slane %v841_v14, 5  ;;  %v1069_v50 = vrot.slane %v851_v25, 4  ;;  %v5858_v27 = vld [vmem:[%s7078_s7 + $0x50] sm:$0x1] }
  0x5f   : > { %v608_v5 = vsel %vm7149_vm5, %v603_v43, %v607_v56  ;;  %v1713_v58 = vunpack.c.l.b16 %v599_v54  ;;  %v1067_v31 = vrot.slane %v1065_v49, 5  ;;  %v1070_v0 = vrot.slane %v854_v48, 5  ;;  %v7456_v56 = vld [vmem:[%s7078_s7 + $0x64] sm:$0xf] }
  0x60   : > { %1999 = vrot.lane.b32.xlu2 %v6022_v62, %s6984_s10  ;;  %v1714_v4 = vunpack.c.l.b16 %v608_v5  ;;  %v1062_v3 = vor.u32 %v1061_v36, %v1060_v42  ;;  %v1074_v8 = vshll.u32 %v5860_v10, 16  ;;  %v1042_v55 = vrot.slane %v812_v59, 4  ;;  %v7459_v43 = vld [vmem:[%s7078_s7 + $0x64] sm:$0xf] }
  0x61   : > { %v1071_v49 = vor.u32 %v1070_v0, %v1069_v50  ;;  %v1043_v54 = vrot.slane %v815_v60, 5  ;;  %v1047_v22 = vshll.u32 %v5857_v51, 16  ;;  %v1051_v35 = vrot.slane %v825_v53, 4  ;;  %v7471_v0 = vld [vmem:[%s7078_s7 + $0x70] sm:$0xf] }
  0x62   : > { %v1729_v62 = vpack.c.b16 %v1714_v4, %v1713_v58  ;;  %v1063_v10 = vrot.slane %v1062_v3, 4  ;;  %v1076_v42 = vrot.slane %v1074_v8, 5  ;;  %v1052_v59 = vrot.slane %v828_v6, 5  ;;  %v5931_v53 = vld [vmem:[%s7078_s7 + $0x68] sm:$0x1] }
  0x63   : > { %v1072_v36 = vrot.slane %v1071_v49, 4  ;;  %v1044_v5 = vor.u32 %v1043_v54, %v1042_v55  ;;  %v1049_v33 = vrot.slane %v1047_v22, 5  ;;  %v1056_v50 = vshll.u32 %v5858_v27, 16  ;;  %v5932_v4 = vld [vmem:[%s7078_s7 + $0x74] sm:$0x1] }
  0x64   : > { %1697 = vrot.lane.b32.xlu0 %v5958_v63, %s6982_s8  ;;  %1742 = vrot.lane.b32.xlu1 %v1730_v57, %s6986_s12  ;;  %v1068_v40 = vsel %vm7149_vm5, %v1063_v10, %v1067_v31  ;;  %v1053_v60 = vor.u32 %v1052_v59, %v1051_v35  ;;  %v6030_v44 = vor.u32 %v7466_v13, %v7456_v56  ;;  %v1289_v22 = vshrl.u32 %v7459_v43, 16 }
  0x65   : > { %v1077_v6 = vsel %vm7149_vm5, %v1072_v36, %v1076_v42  ;;  %v1868_v55 = vunpack.c.l.b16 %v1068_v40  ;;  %v1045_v51 = vrot.slane %v1044_v5, 4  ;;  %v1058_v46 = vrot.slane %v1056_v50, 5  ;;  %v5929_v42 = vld [vmem:[%s7078_s7 + $0x50] sm:$0x1]  ;;  %v5930_v50 = vld [vmem:[%s7078_s7 + $0x5c] sm:$0x1] }
  0x66   : > { %v1869_v47 = vunpack.c.l.b16 %v1077_v6  ;;  %v1054_v63 = vrot.slane %v1053_v60, 4  ;;  %v1292_v57 = vshll.u32 %v7459_v43, 16  ;;  %v1302_v31 = vshrl.u32 %v7471_v0, 16  ;;  %v7510_v6 = vld [vmem:[%s7078_s7 + $0x64] sm:$0xf] }
  0x67   : > { %v1050_v58 = vsel %vm7149_vm5, %v1045_v51, %v1049_v33  ;;  %v1305_v27 = vshll.u32 %v7471_v0, 16  ;;  %v1511_v3 = vrot.slane %v1289_v22, 4  ;;  %v1516_v8 = vshll.u32 %v5931_v53, 16 }
  0x68   : > { %1740 = vrot.lane.b32.xlu2 %v1729_v62, %s6986_s12  ;;  %v1883_v49 = vpack.c.b16 %v1869_v47, %v1868_v55  ;;  %v1059_v54 = vsel %vm7149_vm5, %v1054_v63, %v1058_v46  ;;  %v1866_v35 = vunpack.c.l.b16 %v1050_v58  ;;  %v1512_v10 = vrot.slane %v1292_v57, 5  ;;  %v7522_v58 = vld [vmem:[%s7078_s7 + $0x70] sm:$0xf] }
  0x69   : > { %v1867_v33 = vunpack.c.l.b16 %v1059_v54  ;;  %v1518_v59 = vrot.slane %v1516_v8, 5  ;;  %v1520_v36 = vrot.slane %v1302_v31, 4  ;;  %v1521_v5 = vrot.slane %v1305_v27, 5  ;;  %v542_v54 = vld [vmem:[%s7078_s7 + $0x68] sm:$0x1] }
  0x6a   : > { %v1513_v62 = vor.u32 %v1512_v10, %v1511_v3  ;;  %v1525_v40 = vshll.u32 %v5932_v4, 16  ;;  %v1493_v60 = vrot.slane %v1263_v32, 4  ;;  %v1494_v53 = vrot.slane %v1266_v15, 5 }
  0x6b   : > { %v1882_v55 = vpack.c.b16 %v1867_v33, %v1866_v35  ;;  %v1522_v51 = vor.u32 %v1521_v5, %v1520_v36  ;;  %v1498_v46 = vshll.u32 %v5929_v42, 16  ;;  %v1502_v47 = vrot.slane %v1276_v9, 4  ;;  %v543_v5 = vld [vmem:[%s7078_s7 + $0x74] sm:$0x1] }
  0x6c   : > { %1850 = vrot.lane.b32.xlu0 %v5994_v18, %s6983_s9  ;;  %1895 = vrot.lane.b32.xlu1 %v1883_v49, %s6988_s14  ;;  %v1514_v32 = vrot.slane %v1513_v62, 4  ;;  %v1527_v63 = vrot.slane %v1525_v40, 5  ;;  %v1495_v41 = vor.u32 %v1494_v53, %v1493_v60  ;;  %v1503_v15 = vrot.slane %v1279_v45, 5 }
  0x6d   : > { %v1523_v4 = vrot.slane %v1522_v51, 4  ;;  %v1500_v3 = vrot.slane %v1498_v46, 5  ;;  %v1507_v8 = vshll.u32 %v5930_v50, 16  ;;  %v410_v9 = vshrl.u32 %v7510_v6, 16  ;;  %v5816_v50 = vld [vmem:[%s7078_s7 + $0x70] sm:$0xf] }
  0x6e   : > { %v1519_v34 = vsel %vm7149_vm5, %v1514_v32, %v1518_v59  ;;  %v1496_v39 = vrot.slane %v1495_v41, 4  ;;  %v1504_v18 = vor.u32 %v1503_v15, %v1502_v47  ;;  %v413_v49 = vshll.u32 %v7510_v6, 16 }
  0x6f   : > { %v1528_v7 = vsel %vm7149_vm5, %v1523_v4, %v1527_v63  ;;  %v2021_v45 = vunpack.c.l.b16 %v1519_v34  ;;  %v1509_v35 = vrot.slane %v1507_v8, 5  ;;  %v423_v10 = vshrl.u32 %v7522_v58, 16  ;;  %v5817_v63 = vld [vmem:[%s7078_s7 + $0x78] sm:$0x8]  ;;  %v5818_v8 = vld [vmem:[%s7078_s7 + $0x7c] sm:$0xf] }
  0x70   : > { %1893 = vrot.lane.b32.xlu2 %v1882_v55, %s6988_s14  ;;  %v2022_v42 = vunpack.c.l.b16 %v1528_v7  ;;  %v1501_v33 = vsel %vm7149_vm5, %v1496_v39, %v1500_v3  ;;  %v1505_v59 = vrot.slane %v1504_v18, 4  ;;  %v426_v36 = vshll.u32 %v7522_v58, 16  ;;  %v5815_v55 = vld [vmem:[%s7078_s7 + $0x6c] sm:$0x8]  ;;  %v5811_v7 = vld [vmem:[%s7078_s7 + $0x54] sm:$0x8] }
  0x71   : > { %v2019_v62 = vunpack.c.l.b16 %v1501_v33  ;;  %v627_v40 = vrot.slane %v410_v9, 4  ;;  %v628_v60 = vrot.slane %v413_v49, 5  ;;  %v632_v53 = vshll.u32 %v542_v54, 16 }
  0x72   : > { %v2036_v51 = vpack.c.b16 %v2022_v42, %v2021_v45  ;;  %v1510_v46 = vsel %vm7149_vm5, %v1505_v59, %v1509_v35  ;;  %v636_v47 = vrot.slane %v423_v10, 4  ;;  %v637_v32 = vrot.slane %v426_v36, 5 }
  0x73   : > { %v2020_v41 = vunpack.c.l.b16 %v1510_v46  ;;  %v629_v15 = vor.u32 %v628_v60, %v627_v40  ;;  %v634_v4 = vrot.slane %v632_v53, 5  ;;  %v641_v3 = vshll.u32 %v543_v5, 16  ;;  %v5813_v53 = vld [vmem:[%s7078_s7 + $0x60] sm:$0x8] }
  0x74   : > { %2003 = vrot.lane.b32.xlu0 %v6030_v44, %s6984_s10  ;;  %2048 = vrot.lane.b32.xlu1 %v2036_v51, %s6987_s13  ;;  %v638_v34 = vor.u32 %v637_v32, %v636_v47  ;;  %v859_v39 = vshrl.u32 %v5815_v55, 16  ;;  %v864_v18 = vshrl.u32 %v5816_v50, 16  ;;  %v867_v54 = vshll.u32 %v5816_v50, 16 }
  0x75   : > { %v2035_v45 = vpack.c.b16 %v2020_v41, %v2019_v62  ;;  %v630_v35 = vrot.slane %v629_v15, 4  ;;  %v643_v42 = vrot.slane %v641_v3, 5  ;;  %v872_v33 = vshrl.u32 %v5817_v63, 16  ;;  %v5861_v15 = vld [vmem:[%s7078_s7 + $0x74] sm:$0x1] }
  0x76   : > { %v639_v59 = vrot.slane %v638_v34, 4  ;;  %v5843_v5 = vrot.slane %v859_v39, 11  ;;  %v866_v40 = vrot.slane %v864_v18, 7  ;;  %v877_v60 = vshrl.u32 %v5818_v8, 16 }
  0x77   : > { %v635_v56 = vsel %vm7149_vm5, %v630_v35, %v634_v4  ;;  %v5844_v13 = vrot.slane %v872_v33, 11  ;;  %v880_v44 = vshll.u32 %v5818_v8, 16  ;;  %v833_v51 = vshrl.u32 %v5811_v7, 16  ;;  %v5862_v33 = vld [vmem:[%s7078_s7 + $0x80] sm:$0x1] }
  0x78   : > { %2046 = vrot.lane.b32.xlu2 %v2035_v45, %s6987_s13  ;;  %v644_v50 = vsel %vm7149_vm5, %v639_v59, %v643_v42  ;;  %v1717_v62 = vunpack.c.l.b16 %v635_v56  ;;  %v869_v55 = vor.u32 %v867_v54, %v866_v40  ;;  %v879_v46 = vrot.slane %v877_v60, 7  ;;  %v5887_v40 = vld [vmem:[%s7078_s7 + $0x78] sm:$0x8] }
  0x79   : > { %v1718_v47 = vunpack.c.l.b16 %v644_v50  ;;  %v5841_v32 = vrot.slane %v833_v51, 11  ;;  %v840_v63 = vrot.slane %v838_v1, 7  ;;  %v846_v41 = vshrl.u32 %v5813_v53, 16  ;;  %v5888_v53 = vld [vmem:[%s7078_s7 + $0x7c] sm:$0xf] }
  0x7a   : > { %v870_v4 = vsel %vm7112_vm4, %v5843_v5, %v869_v55  ;;  %v882_v3 = vor.u32 %v880_v44, %v879_v46  ;;  %v853_v8 = vrot.slane %v851_v25, 7  ;;  %v1078_v34 = vrot.slane %v864_v18, 4  ;;  %v5890_v46 = vld [vmem:[%s7078_s7 + $0x88] sm:$0xf] }
  0x7b   : > { %v1731_v39 = vpack.c.b16 %v1718_v47, %v1717_v62  ;;  %v1762_v7 = vunpack.c.l.b16 %v870_v4  ;;  %v843_v45 = vor.u32 %v841_v14, %v840_v63  ;;  %v5842_v35 = vrot.slane %v846_v41, 11 }
  0x7c   : > { %v883_v1 = vsel %vm7112_vm4, %v5844_v13, %v882_v3  ;;  %v856_v42 = vor.u32 %v854_v48, %v853_v8  ;;  %v1079_v59 = vrot.slane %v867_v54, 5  ;;  %v1083_v5 = vshll.u32 %v5861_v15, 16  ;;  %v5889_v54 = vld [vmem:[%s7078_s7 + $0x84] sm:$0x8]  ;;  %v5883_v3 = vld [vmem:[%s7078_s7 + $0x60] sm:$0x8] }
  0x7d   : > { %1744 = vrot.lane.b32.xlu0 %v1731_v39, %s6986_s12  ;;  %v1763_v25 = vunpack.c.l.b16 %v883_v1  ;;  %v844_v18 = vsel %vm7112_vm4, %v5841_v32, %v843_v45  ;;  %v1087_v17 = vrot.slane %v877_v60, 4  ;;  %v1088_v14 = vrot.slane %v880_v44, 5  ;;  %v5885_v45 = vld [vmem:[%s7078_s7 + $0x6c] sm:$0x8] }
  0x7e   : > { %v857_v56 = vsel %vm7112_vm4, %v5842_v35, %v856_v42  ;;  %v1760_v12 = vunpack.c.l.b16 %v844_v18  ;;  %v1080_v13 = vor.u32 %v1079_v59, %v1078_v34  ;;  %v1085_v48 = vrot.slane %v1083_v5, 5 }
  0x7f   : > { %v1776_v51 = vpack.c.b16 %v1763_v25, %v1762_v7  ;;  %v1761_v50 = vunpack.c.l.b16 %v857_v56  ;;  %v1089_v62 = vor.u32 %v1088_v14, %v1087_v17  ;;  %v1092_v55 = vshll.u32 %v5862_v33, 16 }
  0x80   : > { %v1081_v47 = vrot.slane %v1080_v13, 4  ;;  %v1310_v32 = vshrl.u32 %v5887_v40, 16  ;;  %v1315_v60 = vshrl.u32 %v5888_v53, 16  ;;  %v1318_v44 = vshll.u32 %v5888_v53, 16  ;;  %v5933_v53 = vld [vmem:[%s7078_s7 + $0x80] sm:$0x1] }
  0x81   : > { %1789 = vrot.lane.b32.xlu1 %v1776_v51, %s6985_s11  ;;  %v1775_v63 = vpack.c.b16 %v1761_v50, %v1760_v12  ;;  %v1090_v41 = vrot.slane %v1089_v62, 4  ;;  %v1094_v15 = vrot.slane %v1092_v55, 5  ;;  %v1323_v4 = vshrl.u32 %v5889_v54, 16  ;;  %v5934_v51 = vld [vmem:[%s7078_s7 + $0x8c] sm:$0x1] }
  0x82   : > { %v1086_v8 = vsel %vm7149_vm5, %v1081_v47, %v1085_v48  ;;  %v5915_v34 = vrot.slane %v1310_v32, 11  ;;  %v1317_v39 = vrot.slane %v1315_v60, 7  ;;  %v1328_v7 = vshrl.u32 %v5890_v46, 16  ;;  %v7607_v55 = vld [vmem:[%s7078_s7 + $0x7c] sm:$0xf] }
  0x83   : > { %1787 = vrot.lane.b32.xlu2 %v1775_v63, %s6985_s11  ;;  %v1095_v35 = vsel %vm7149_vm5, %v1090_v41, %v1094_v15  ;;  %v1870_v1 = vunpack.c.l.b16 %v1086_v8  ;;  %v5916_v42 = vrot.slane %v1323_v4, 11  ;;  %v1331_v33 = vshll.u32 %v5890_v46, 16  ;;  %v7610_v46 = vld [vmem:[%s7078_s7 + $0x84] sm:$0xf0]  ;;  %v7616_v63 = vld [vmem:[%s7078_s7 + $0x64] sm:$0xf] }
  0x84   : > { %v1871_v59 = vunpack.c.l.b16 %v1095_v35  ;;  %v1320_v5 = vor.u32 %v1318_v44, %v1317_v39  ;;  %v1330_v25 = vrot.slane %v1328_v7, 7  ;;  %v1284_v18 = vshrl.u32 %v5883_v3, 16  ;;  %v7623_v15 = vld [vmem:[%s7078_s7 + $0x6c] sm:$0xf0]  ;;  %v5819_v4 = vld [vmem:[%s7078_s7 + $0x84] sm:$0x8] }
  0x85   : > { %v1291_v17 = vrot.slane %v1289_v22, 7  ;;  %v1297_v14 = vshrl.u32 %v5885_v45, 16  ;;  %v1304_v40 = vrot.slane %v1302_v31, 7  ;;  %v1529_v56 = vrot.slane %v1315_v60, 4  ;;  %v7627_v39 = vld [vmem:[%s7078_s7 + $0x88] sm:$0xf] }
  0x86   : > { %v1884_v12 = vpack.c.b16 %v1871_v59, %v1870_v1  ;;  %v1321_v13 = vsel %vm7112_vm4, %v5915_v34, %v1320_v5  ;;  %v1333_v48 = vor.u32 %v1331_v33, %v1330_v25  ;;  %v5913_v54 = vrot.slane %v1284_v18, 11 }
  0x87   : > { %v1915_v50 = vunpack.c.l.b16 %v1321_v13  ;;  %v1294_v62 = vor.u32 %v1292_v57, %v1291_v17  ;;  %v5914_v22 = vrot.slane %v1297_v14, 11  ;;  %v1307_v31 = vor.u32 %v1305_v27, %v1304_v40  ;;  %v7638_v17 = vld [vmem:[%s7078_s7 + $0x88] sm:$0xf]  ;;  %v7641_v14 = vld [vmem:[%s7078_s7 + $0x90] sm:$0xf0] }
  0x88   : > { %1897 = vrot.lane.b32.xlu0 %v1884_v12, %s6988_s14  ;;  %v1334_v47 = vsel %vm7112_vm4, %v5916_v42, %v1333_v48  ;;  %v1530_v32 = vrot.slane %v1318_v44, 5  ;;  %v1534_v60 = vshll.u32 %v5933_v53, 16  ;;  %v1538_v43 = vrot.slane %v1328_v7, 4  ;;  %v5821_v42 = vld [vmem:[%s7078_s7 + $0x90] sm:$0x8] }
  0x89   : > { %v1916_v57 = vunpack.c.l.b16 %v1334_v47  ;;  %v1295_v0 = vsel %vm7112_vm4, %v5913_v54, %v1294_v62  ;;  %v1308_v27 = vsel %vm7112_vm4, %v5914_v22, %v1307_v31  ;;  %v1539_v41 = vrot.slane %v1331_v33, 5  ;;  %v7633_v33 = vld [vmem:[%s7078_s7 + $0x94] sm:$0xf]  ;;  %v263_v40 = vld [vmem:[%s7078_s7 + $0xc] sm:$0x8] }
  0x8a   : > { %v1913_v3 = vunpack.c.l.b16 %v1295_v0  ;;  %v1914_v44 = vunpack.c.l.b16 %v1308_v27  ;;  %v1531_v8 = vor.u32 %v1530_v32, %v1529_v56  ;;  %v1536_v34 = vrot.slane %v1534_v60, 5  ;;  %v7648_v48 = vld [vmem:[%s7078_s7 + $0x70] sm:$0xf]  ;;  %v7655_v22 = vld [vmem:[%s7078_s7 + $0x78] sm:$0xf0] }
  0x8b   : > { %v1929_v7 = vpack.c.b16 %v1916_v57, %v1915_v50  ;;  %v1540_v45 = vor.u32 %v1539_v41, %v1538_v43  ;;  %v1543_v35 = vshll.u32 %v5934_v51, 16  ;;  %v5966_v1 = vor.u32 %v7610_v46, %v7607_v55  ;;  %v261_v60 = vld [vmem:[%s7078_s7] sm:$0x8] }
  0x8c   : > { %v1928_v59 = vpack.c.b16 %v1914_v44, %v1913_v3  ;;  %v1532_v5 = vrot.slane %v1531_v8, 4  ;;  %v5962_v25 = vor.u32 %v7623_v15, %v7616_v63  ;;  %v885_v18 = vshrl.u32 %v5819_v4, 16  ;;  %v267_v44 = vld [vmem:[%s7078_s7 + $0x24] sm:$0x8] }
  0x8d   : > { %1942 = vrot.lane.b32.xlu1 %v1929_v7, %s6989_s21  ;;  %v1541_v53 = vrot.slane %v1540_v45, 4  ;;  %v1545_v56 = vrot.slane %v1543_v35, 5  ;;  %v890_v12 = vshrl.u32 %v7627_v39, 16  ;;  %v893_v13 = vshll.u32 %v7627_v39, 16 }
  0x8e   : > { %1940 = vrot.lane.b32.xlu2 %v1928_v59, %s6989_s21  ;;  %v1537_v54 = vsel %vm7149_vm5, %v1532_v5, %v1536_v34  ;;  %v5845_v51 = vrot.slane %v885_v18, 11  ;;  %v898_v50 = vshrl.u32 %v5821_v42, 16  ;;  %v903_v62 = vshrl.u32 %v7633_v33, 16  ;;  %v7657_v31 = vpop.permute.xlu0 %1691  ;;  %v265_v5 = vld [vmem:[%s7078_s7 + $0x18] sm:$0x8] }
  0x8f   : > { %v1546_v55 = vsel %vm7149_vm5, %v1541_v53, %v1545_v56  ;;  %v2023_v46 = vunpack.c.l.b16 %v1537_v54  ;;  %v892_v47 = vrot.slane %v890_v12, 7  ;;  %v906_v32 = vshll.u32 %v7633_v33, 16  ;;  %v7669_v27 = vpop.permute.xlu1 %1844  ;;  %v2229_v56 = vld [vmem:[%s9237_s1 + $0x20] sm:$0xf]  ;;  %v6041_v33 = vld [vmem:[%s7078_s7 + $0xac] sm:$0xf] }
  0x90   : > { %v2024_v43 = vunpack.c.l.b16 %v1546_v55  ;;  %v5846_v63 = vrot.slane %v898_v50, 11  ;;  %v905_v57 = vrot.slane %v903_v62, 7  ;;  %v6002_v0 = vor.u32 %v7641_v14, %v7638_v17 }
  0x91   : > { %v895_v41 = vor.u32 %v893_v13, %v892_v47  ;;  %v5998_v15 = vor.u32 %v7655_v22, %v7648_v48  ;;  %v314_v4 = vshrl.u32 %v263_v40, 16  ;;  %v321_v3 = vrot.slane %v319_v29, 7 }
  0x92   : > { %v2037_v8 = vpack.c.b16 %v2024_v43, %v2023_v46  ;;  %v908_v34 = vor.u32 %v906_v32, %v905_v57  ;;  %v301_v7 = vshrl.u32 %v261_v60, 16  ;;  %v308_v59 = vrot.slane %v306_v24, 7  ;;  %v5891_v60 = vld [vmem:[%s7078_s7 + $0x90] sm:$0x8]  ;;  %v7714_v57 = vld [vmem:[%s7078_s7 + $0xa0] sm:$0xf] }
  0x93   : > { %v896_v45 = vsel %vm7112_vm4, %v5845_v51, %v895_v41  ;;  %v5782_v35 = vrot.slane %v314_v4, 11  ;;  %v324_v42 = vor.u32 %v322_v30, %v321_v3  ;;  %v340_v53 = vshrl.u32 %v267_v44, 16  ;;  %v7701_v51 = vld [vmem:[%s7078_s7 + $0x94] sm:$0xf]  ;;  %v5893_v44 = vld [vmem:[%s7078_s7 + $0x9c] sm:$0x8] }
  0x94   : > { %2050 = vrot.lane.b32.xlu0 %v2037_v8, %s6987_s13  ;;  %v909_v29 = vsel %vm7112_vm4, %v5846_v63, %v908_v34  ;;  %v1764_v18 = vunpack.c.l.b16 %v896_v45  ;;  %v5781_v40 = vrot.slane %v301_v7, 11  ;;  %v311_v30 = vor.u32 %v309_v28, %v308_v59  ;;  %v7720_v8 = vld [vmem:[%s7078_s7 + $0x94] sm:$0xf] }
  0x95   : > { %1701 = vrot.lane.b32.xlu1 %v5966_v1, %s6982_s8  ;;  %v1765_v20 = vunpack.c.l.b16 %v909_v29  ;;  %v325_v24 = vsel %vm7112_vm4, %v5782_v35, %v324_v42  ;;  %v347_v54 = vrot.slane %v345_v23, 7  ;;  %v5784_v55 = vrot.slane %v340_v53, 11  ;;  %v1694_v1 = vpop.permute.xlu2 %1693  ;;  %v7726_v35 = vld [vmem:[%s7078_s7 + $0x9c] sm:$0xf0]  ;;  %v7729_v42 = vld [vmem:[%s7078_s7 + $0x7c] sm:$0xf] }
  0x96   : > { %1699 = vrot.lane.b32.xlu2 %v5962_v25, %s6982_s8  ;;  %v1620_v50 = vunpack.c.l.b16 %v325_v24  ;;  %v327_v46 = vshrl.u32 %v265_v5, 16  ;;  %v334_v47 = vrot.slane %v332_v21, 7  ;;  %v7707_v19 = vpop.permute.xlu0 %1997  ;;  %v312_v23 = vsel %vm7112_vm4, %v5781_v40, %v311_v30  ;;  %v7738_v40 = vld [vmem:[%s7078_s7 + $0x84] sm:$0xf0] }
  0x97   : > { %v1777_v28 = vpack.c.b16 %v1765_v20, %v1764_v18  ;;  %v9271_v25 = vshll.u32 %v7169_v2, 16  ;;  %v2249_v63 = vunpack.c.l.b16 %v2229_v56  ;;  %v1619_v41 = vunpack.c.l.b16 %v312_v23  ;;  %v7743_v56 = vld [vmem:[%s7078_s7 + $0x94] sm:$0xf]  ;;  %v6671_v23 = vld [vmem:[%s9237_s1 + $0x18] sm:$0xff] }
  0x98   : > { %v5783_v4 = vrot.slane %v327_v46, 11  ;;  %v9272_v21 = vshll.u32 %v7160_v61, 16  ;;  %v1336_v7 = vshrl.u32 %v5891_v60, 16  ;;  %v1341_v45 = vshrl.u32 %v7701_v51, 16  ;;  %v7732_v61 = vld [vmem:[%s7078_s7 + $0x94] sm:$0xf] }
  0x99   : > { %v350_v43 = vor.u32 %v9271_v25, %v347_v54  ;;  %v2254_v2 = vpack.c.b16 %v2249_v63, %v2249_v63  ;;  %v1637_v59 = vpack.c.b16 %v1620_v50, %v1619_v41  ;;  %v1344_v18 = vshll.u32 %v7701_v51, 16  ;;  %v7749_v50 = vld [vmem:[%s7078_s7 + $0x9c] sm:$0xf0]  ;;  %v546_v41 = vld [vmem:[%s7078_s7 + $0x98] sm:$0x1] }
  0x9a   : > { %v337_v3 = vor.u32 %v9272_v21, %v334_v47  ;;  %v7740_v53 = vpop.permute.xlu1 %1781  ;;  %v5917_v30 = vrot.slane %v1336_v7, 11  ;;  %v1343_v54 = vrot.slane %v1341_v45, 7  ;;  %v1349_v46 = vshrl.u32 %v5893_v44, 16  ;;  %v7762_v25 = vld [vmem:[%s7078_s7 + $0xa0] sm:$0xf] }
  0x9b   : > { %v351_v34 = vsel %vm7112_vm4, %v5784_v55, %v350_v43  ;;  %v2280_v24 = vsel %vm2278_vm7, %v2254_v2, 0  ;;  %v7754_v55 = vsel %vm2060_vm6, %v1637_v59, %v7657_v31  ;;  %v1354_v47 = vshrl.u32 %v7714_v57, 16  ;;  %v547_v21 = vld [vmem:[%s7078_s7 + $0xa4] sm:$0x1]  ;;  %v7958_v51 = vld [vmem:[%s7078_s7 + $0xac] sm:$0xf] }
  0x9c   : > { %v1622_v5 = vunpack.c.l.b16 %v351_v34  ;;  %v338_v29 = vsel %vm7112_vm4, %v5783_v4, %v337_v3  ;;  %1791 = vrot.lane.b32.xlu0 %v1777_v28, %s6985_s11  ;;  %2285 = vmatpush.bf16.msra.mxu0 %v2280_v24  ;;  %v1357_v60 = vshll.u32 %v7714_v57, 16  ;;  %v1346_v28 = vor.u32 %v1344_v18, %v1343_v54 }
  0x9d   : > { %v1621_v20 = vunpack.c.l.b16 %v338_v29  ;;  %1854 = vrot.lane.b32.xlu1 %v6002_v0, %s6983_s9  ;;  %v6038_v43 = vor.u32 %v7726_v35, %v7720_v8  ;;  %v6034_v63 = vor.u32 %v7738_v40, %v7729_v42  ;;  %v5918_v4 = vrot.slane %v1349_v46, 11 }
  0x9e   : > { %1852 = vrot.lane.b32.xlu2 %v5998_v15, %s6983_s9  ;;  %v1356_v17 = vrot.slane %v1354_v47, 7  ;;  %v5970_v14 = vor.u32 %v7749_v50, %v7743_v56  ;;  %v9254_v0 = vshrl.u32 %v7732_v61, 16  ;;  %v1347_v44 = vsel %vm7112_vm4, %v5917_v30, %v1346_v28  ;;  %v7793_v15 = vld [vmem:[%s7078_s7 + $0x7c] sm:$0xf]  ;;  %v1737_v8 = vpop.permute.xlu0 %1736 }
  0x9f   : > { %v1638_v31 = vpack.c.b16 %v1622_v5, %v1621_v20  ;;  %v9251_v48 = vshll.u32 %v7732_v61, 16  ;;  %v9252_v22 = vshrl.u32 %v7762_v25, 16  ;;  %v1917_v2 = vunpack.c.l.b16 %v1347_v44  ;;  %v7797_v7 = vpop.permute.xlu2 %1934  ;;  %v7810_v20 = vld [vmem:[%s7078_s7 + $0x88] sm:$0xf]  ;;  %v545_v44 = vld [vmem:[%s7078_s7 + $0x8c] sm:$0x1] }
  0xa0   : > { %v1359_v34 = vor.u32 %v1357_v60, %v1356_v17  ;;  %2286 = vmatpush.bf16.msra.mxu0 %v6671_v23  ;;  %v9253_v35 = vshll.u32 %v7762_v25, 16  ;;  %v663_v42 = vrot.slane %v9254_v0, 4  ;;  %v668_v5 = vshll.u32 %v546_v41, 16  ;;  %v544_v23 = vld [vmem:[%s7078_s7 + $0x80] sm:$0x1] }
  0xa1   : > { %v7786_v3 = vsel %vm2060_vm6, %v1638_v31, %v1694_v1  ;;  %v6670_v1 = vld [vmem:[%s9237_s1 + $0x10] sm:$0xff]  ;;  %v664_v59 = vrot.slane %v9251_v48, 5  ;;  %v672_v29 = vrot.slane %v9252_v22, 4  ;;  %v677_v40 = vshll.u32 %v547_v21, 16 }
  0xa2   : > { %v1360_v24 = vsel %vm7112_vm4, %v5918_v4, %v1359_v34  ;;  %v673_v30 = vrot.slane %v9253_v35, 5  ;;  %v9262_v54 = vshrl.u32 %v7793_v15, 16  ;;  %v9261_v46 = vshll.u32 %v7793_v15, 16  ;;  %v6669_v35 = vld [vmem:[%s9237_s1 + $0x8] sm:$0xff] }
  0xa3   : > { %v1918_v31 = vunpack.c.l.b16 %v1360_v24  ;;  %v665_v28 = vor.u32 %v664_v59, %v663_v42  ;;  %v670_v41 = vrot.slane %v668_v5, 5  ;;  %v679_v17 = vrot.slane %v677_v40, 5  ;;  %v7820_v48 = vpop.permute.xlu1 %2042 }
  0xa4   : > { %2287 = vmatpush.bf16.msra.mxu0 %v6670_v1  ;;  %v674_v21 = vor.u32 %v673_v30, %v672_v29  ;;  %v9260_v22 = vshrl.u32 %v7810_v20, 16  ;;  %v9259_v4 = vshll.u32 %v7810_v20, 16  ;;  %v645_v34 = vrot.slane %v9262_v54, 4 }
  0xa5   : > { %v1930_v24 = vpack.c.b16 %v1918_v31, %v1917_v2  ;;  %2007 = vrot.lane.b32.xlu1 %v6038_v43, %s6984_s10  ;;  %v666_v42 = vrot.slane %v665_v28, 4  ;;  %v646_v59 = vrot.slane %v9261_v46, 5  ;;  %v650_v1 = vshll.u32 %v544_v23, 16 }
  0xa6   : > { %2005 = vrot.lane.b32.xlu2 %v6034_v63, %s6984_s10  ;;  %v675_v5 = vrot.slane %v674_v21, 4  ;;  %v654_v29 = vrot.slane %v9260_v22, 4  ;;  %v655_v40 = vrot.slane %v9259_v4, 5  ;;  %v659_v30 = vshll.u32 %v545_v44, 16  ;;  %v6668_v44 = vld [vmem:[%s9237_s1] sm:$0xff] }
  0xa7   : > { %1944 = vrot.lane.b32.xlu0 %v1930_v24, %s6989_s21  ;;  %v671_v43 = vsel %vm7149_vm5, %v666_v42, %v670_v41  ;;  %v647_v2 = vor.u32 %v646_v59, %v645_v34  ;;  %v652_v23 = vrot.slane %v650_v1, 5  ;;  %v7846_v24 = vld [vmem:[%s7078_s7 + $0xa0] sm:$0xf]  ;;  %v2090_v34 = vsel %vm2088_vm8, %v7754_v55, %v1737_v8  ;;  %v7854_v42 = vld [vmem:[%s7078_s7 + $0xa8] sm:$0xf0] }
  0xa8   : > { %v680_v63 = vsel %vm7149_vm5, %v675_v5, %v679_v17  ;;  %v1721_v31 = vunpack.c.l.b16 %v671_v43  ;;  %v656_v28 = vor.u32 %v655_v40, %v654_v29  ;;  %v661_v21 = vrot.slane %v659_v30, 5  ;;  %2288 = vmatpush.bf16.msra.mxu0 %v6669_v35  ;;  %v7851_v17 = vld [vmem:[%s7078_s7 + $0xa0] sm:$0xf]  ;;  %v7859_v29 = vld [vmem:[%s7078_s7 + $0xac] sm:$0xf] }
  0xa9   : > { %v1722_v0 = vunpack.c.l.b16 %v680_v63  ;;  %v648_v41 = vrot.slane %v647_v2, 4  ;;  %v1739_v59 = vpop.permute.xlu0 %1738  ;;  %v2109_v1 = vsel %vm2107_vm9, %v2090_v34, %v7740_v53  ;;  %v5865_v8 = vld [vmem:[%s7078_s7 + $0xa4] sm:$0x1]  ;;  %v5866_v43 = vld [vmem:[%s7078_s7 + $0xb0] sm:$0x1]  ;;  %v932_v34 = vshll.u32 %v7859_v29, 16 }
  0xaa   : > { %v657_v35 = vrot.slane %v656_v28, 4  ;;  %v1890_v5 = vpop.permute.xlu2 %1889  ;;  %v2128_v55 = vsel %vm2126_vm10, %v2109_v1, %v7669_v27  ;;  %v919_v28 = vshll.u32 %v7846_v24, 16  ;;  %v5863_v1 = vld [vmem:[%s7078_s7 + $0x8c] sm:$0x1]  ;;  %v9273_v46 = vshrl.u32 %v7381_v38, 16 }
  0xab   : > { %v1733_v40 = vpack.c.b16 %v1722_v0, %v1721_v31  ;;  %v653_v30 = vsel %vm7149_vm5, %v648_v41, %v652_v23  ;;  %v2147_v63 = vsel %vm2145_vm11, %v2128_v55, %v1890_v5  ;;  %v6006_v0 = vor.u32 %v7854_v42, %v7851_v17  ;;  %v5864_v5 = vld [vmem:[%s7078_s7 + $0x98] sm:$0x1] }
  0xac   : > { %v662_v2 = vsel %vm7149_vm5, %v657_v35, %v661_v21  ;;  %v1719_v53 = vunpack.c.l.b16 %v653_v30  ;;  %2289 = vmatpush.bf16.msra.mxu0 %v6668_v44  ;;  %v2166_v27 = vsel %vm2164_vm12, %v2147_v63, %v7797_v7  ;;  %v916_v31 = vshrl.u32 %v7846_v24, 16 }
  0xad   : > { %1748 = vrot.lane.b32.xlu1 %v1733_v40, %s6986_s12  ;;  %v1720_v23 = vunpack.c.l.b16 %v662_v2  ;;  %v1784_v41 = vpop.permute.xlu1 %1783  ;;  %v929_v21 = vshrl.u32 %v7859_v29, 16  ;;  %v1119_v44 = vshll.u32 %v5865_v8, 16  ;;  %v1128_v35 = vshll.u32 %v5866_v43, 16 }
  0xae   : > { %v1114_v7 = vrot.slane %v916_v31, 4  ;;  %v1115_v42 = vrot.slane %v919_v28, 5  ;;  %v1096_v40 = vrot.slane %v890_v12, 4  ;;  %v1124_v8 = vrot.slane %v932_v34, 5 }
  0xaf   : > { %1703 = vrot.lane.b32.xlu0 %v5970_v14, %s6982_s8  ;;  %v1732_v17 = vpack.c.b16 %v1720_v23, %v1719_v53  ;;  %v1121_v30 = vrot.slane %v1119_v44, 5  ;;  %v1123_v55 = vrot.slane %v929_v21, 4  ;;  %v1130_v56 = vrot.slane %v1128_v35, 5 }
  0xb0   : > { %v1116_v50 = vor.u32 %v1115_v42, %v1114_v7  ;;  %v1097_v14 = vrot.slane %v893_v13, 5  ;;  %v1101_v43 = vshll.u32 %v5863_v1, 16  ;;  %v1105_v2 = vrot.slane %v903_v62, 4 }
  0xb1   : > { %1746 = vrot.lane.b32.xlu2 %v1732_v17, %s6986_s12  ;;  %v1125_v12 = vor.u32 %v1124_v8, %v1123_v55  ;;  %v1106_v53 = vrot.slane %v906_v32, 5  ;;  %v1110_v63 = vshll.u32 %v5864_v5, 16  ;;  %v2092_v23 = vsel %vm2088_vm8, %v7786_v3, %v1739_v59  ;;  %v1892_v13 = vpop.permute.xlu0 %1891  ;;  %v6665_v32 = vld [vmem:[%s7078_s7 + $0xb4] sm:$0xf0]  ;;  %v7911_v59 = vld [vmem:[%s7078_s7 + $0xac] sm:$0xf] }
  0xb2   : > { %v1847_v44 = vpop.permute.xlu2 %1846  ;;  %v1117_v35 = vrot.slane %v1116_v50, 4  ;;  %v1098_v17 = vor.u32 %v1097_v14, %v1096_v40  ;;  %v1103_v39 = vrot.slane %v1101_v43, 5  ;;  %v2185_v42 = vsel %vm2183_vm13, %v2166_v27, %v7707_v19  ;;  %v7918_v27 = vld [vmem:[%s7078_s7 + $0xb8] sm:$0xf] }
  0xb3   : > { %v1126_v1 = vrot.slane %v1125_v12, 4  ;;  %v1107_v7 = vor.u32 %v1106_v53, %v1105_v2  ;;  %v1112_v62 = vrot.slane %v1110_v63, 5  ;;  %v2204_v19 = vsel %vm2202_vm14, %v2185_v42, %v7820_v48  ;;  %v5937_v2 = vld [vmem:[%s7078_s7 + $0xb0] sm:$0x1]  ;;  %v5938_v12 = vld [vmem:[%s7078_s7 + $0xbc] sm:$0x1] }
  0xb4   : > { %v1122_v5 = vsel %vm7149_vm5, %v1117_v35, %v1121_v30  ;;  %v1099_v3 = vrot.slane %v1098_v17, 4  ;;  %6067 = vmatmul.msk.bf16.vlgmr.msra.gmra.mxu0 %vm2259_vm15, %v2204_v19  ;;  %v2111_v43 = vsel %vm2107_vm9, %v2092_v23, %v1784_v41  ;;  %v1383_v41 = vshll.u32 %v7918_v27, 16 }
  0xb5   : > { %v1131_v40 = vsel %vm7149_vm5, %v1126_v1, %v1130_v56  ;;  %v1874_v55 = vunpack.c.l.b16 %v1122_v5  ;;  %v1108_v8 = vrot.slane %v1107_v7, 4  ;;  %v6042_v56 = vor.u32 %v6665_v32, %v6041_v33 }
  0xb6   : > { %v1937_v50 = vpop.permute.xlu1 %1936  ;;  %v1875_v30 = vunpack.c.l.b16 %v1131_v40  ;;  %v1104_v14 = vsel %vm7149_vm5, %v1099_v3, %v1103_v39  ;;  %v2130_v63 = vsel %vm2126_vm10, %v2111_v43, %v1847_v44  ;;  %v1370_v39 = vshll.u32 %v7911_v59, 16  ;;  %v5936_v3 = vld [vmem:[%s7078_s7 + $0xa4] sm:$0x1] }
  0xb7   : > { %1856 = vrot.lane.b32.xlu0 %v6006_v0, %s6983_s9  ;;  %v1113_v48 = vsel %vm7149_vm5, %v1108_v8, %v1112_v62  ;;  %v1872_v53 = vunpack.c.l.b16 %v1104_v14  ;;  %v1367_v0 = vshrl.u32 %v7911_v59, 16  ;;  %v1380_v1 = vshrl.u32 %v7918_v27, 16  ;;  %v5935_v62 = vld [vmem:[%s7078_s7 + $0x98] sm:$0x1] }
  0xb8   : > { %v1886_v35 = vpack.c.b16 %v1875_v30, %v1874_v55  ;;  %v1873_v17 = vunpack.c.l.b16 %v1113_v48  ;;  %v1570_v7 = vshll.u32 %v5937_v2, 16  ;;  %v1579_v42 = vshll.u32 %v5938_v12, 16 }
  0xb9   : > { %v1565_v23 = vrot.slane %v1367_v0, 4  ;;  %v1566_v32 = vrot.slane %v1370_v39, 5  ;;  %v1574_v5 = vrot.slane %v1380_v1, 4  ;;  %v1547_v40 = vrot.slane %v1341_v45, 4 }
  0xba   : > { %v2000_v33 = vpop.permute.xlu2 %1999  ;;  %1901 = vrot.lane.b32.xlu1 %v1886_v35, %s6988_s14  ;;  %v1885_v44 = vpack.c.b16 %v1873_v17, %v1872_v53  ;;  %v1572_v55 = vrot.slane %v1570_v7, 5  ;;  %v1575_v8 = vrot.slane %v1383_v41, 5  ;;  %v1581_v19 = vrot.slane %v1579_v42, 5 }
  0xbb   : > { %v1548_v30 = vrot.slane %v1344_v18, 5  ;;  %v1567_v14 = vor.u32 %v1566_v32, %v1565_v23  ;;  %v1552_v43 = vshll.u32 %v5935_v62, 16  ;;  %v1556_v2 = vrot.slane %v1354_v47, 4 }
  0xbc   : > { %1899 = vrot.lane.b32.xlu2 %v1885_v44, %s6988_s14  ;;  %v1557_v12 = vrot.slane %v1357_v60, 5  ;;  %v1576_v48 = vor.u32 %v1575_v8, %v1574_v5  ;;  %v1561_v35 = vshll.u32 %v5936_v3, 16  ;;  %v2149_v17 = vsel %vm2145_vm11, %v2130_v63, %v1892_v13  ;;  %v7965_v60 = vld [vmem:[%s7078_s7 + $0xb8] sm:$0xf]  ;;  %v548_v3 = vld [vmem:[%s7078_s7 + $0xb0] sm:$0x1] }
  0xbd   : > { %v7954_v45 = vpop.permute.xlu0 %2044  ;;  %v1549_v53 = vor.u32 %v1548_v30, %v1547_v40  ;;  %v1568_v23 = vrot.slane %v1567_v14, 4  ;;  %v1554_v7 = vrot.slane %v1552_v43, 5  ;;  %v2168_v57 = vsel %vm2164_vm12, %v2149_v17, %v1937_v50  ;;  %v549_v30 = vld [vmem:[%s7078_s7 + $0xbc] sm:$0x1] }
  0xbe   : > { %v7960_v18 = vpop.permute.xlu1 %1695  ;;  %v1558_v47 = vor.u32 %v1557_v12, %v1556_v2  ;;  %v1577_v42 = vrot.slane %v1576_v48, 4  ;;  %v1563_v44 = vrot.slane %v1561_v35, 5  ;;  %v7968_v13 = vsel %vm2183_vm13, %v2168_v57, %v2000_v33  ;;  %v5827_v48 = vld [vmem:[%s7078_s7 + $0xb4] sm:$0x8] }
  0xbf   : > { %2009 = vrot.lane.b32.xlu0 %v6042_v56, %s6984_s10  ;;  %v1550_v62 = vrot.slane %v1549_v53, 4  ;;  %v1573_v63 = vsel %vm7149_vm5, %v1568_v23, %v1572_v55  ;;  %v9255_v32 = vshrl.u32 %v7958_v51, 16  ;;  %v9256_v5 = vshll.u32 %v7958_v51, 16 }
  0xc0   : > { %v1559_v56 = vrot.slane %v1558_v47, 4  ;;  %v1582_v50 = vsel %vm7149_vm5, %v1577_v42, %v1581_v19  ;;  %v2027_v40 = vunpack.c.l.b16 %v1573_v63  ;;  %v9258_v8 = vshrl.u32 %v7965_v60, 16  ;;  %v7988_v19 = vld [vmem:[%s7078_s7 + $0xb8] sm:$0xf] }
  0xc1   : > { %v1555_v33 = vsel %vm7149_vm5, %v1550_v62, %v1554_v7  ;;  %v2028_v55 = vunpack.c.l.b16 %v1582_v50  ;;  %v9257_v12 = vshll.u32 %v7965_v60, 16  ;;  %v681_v35 = vrot.slane %v9255_v32, 4  ;;  %v5829_v7 = vld [vmem:[%s7078_s7 + $0xc0] sm:$0x8] }
  0xc2   : > { %v7981_v14 = vpop.permute.xlu2 %1740  ;;  %v1564_v43 = vsel %vm7149_vm5, %v1559_v56, %v1563_v44  ;;  %v2025_v2 = vunpack.c.l.b16 %v1555_v33  ;;  %v682_v17 = vrot.slane %v9256_v5, 5  ;;  %v686_v23 = vshll.u32 %v548_v3, 16  ;;  %v8000_v44 = vld [vmem:[%s7078_s7 + $0xc4] sm:$0xf] }
  0xc3   : > { %v2026_v53 = vunpack.c.l.b16 %v1564_v43  ;;  %v2039_v47 = vpack.c.b16 %v2028_v55, %v2027_v40  ;;  %v690_v57 = vrot.slane %v9258_v8, 4  ;;  %v691_v42 = vrot.slane %v9257_v12, 5  ;;  %v5823_v43 = vld [vmem:[%s7078_s7 + $0x9c] sm:$0x8]  ;;  %v5825_v8 = vld [vmem:[%s7078_s7 + $0xa8] sm:$0x8] }
  0xc4   : > { %v695_v62 = vshll.u32 %v549_v30, 16  ;;  %v683_v56 = vor.u32 %v682_v17, %v681_v35  ;;  %v688_v50 = vrot.slane %v686_v23, 5  ;;  %v937_v33 = vshrl.u32 %v5827_v48, 16 }
  0xc5   : > { %v2038_v63 = vpack.c.b16 %v2026_v53, %v2025_v2  ;;  %2054 = vrot.lane.b32.xlu1 %v2039_v47, %s6987_s13  ;;  %v692_v40 = vor.u32 %v691_v42, %v690_v57  ;;  %v942_v5 = vshrl.u32 %v7988_v19, 16  ;;  %v945_v30 = vshll.u32 %v7988_v19, 16 }
  0xc6   : > { %v8003_v32 = vpop.permute.xlu0 %1785  ;;  %v8005_v3 = vpop.permute.xlu1 %1848  ;;  %v697_v55 = vrot.slane %v695_v62, 5  ;;  %v684_v2 = vrot.slane %v683_v56, 4  ;;  %v5849_v53 = vrot.slane %v937_v33, 11  ;;  %v950_v48 = vshrl.u32 %v5829_v7, 16 }
  0xc7   : > { %2052 = vrot.lane.b32.xlu2 %v2038_v63, %s6987_s13  ;;  %v955_v35 = vshrl.u32 %v8000_v44, 16  ;;  %v693_v17 = vrot.slane %v692_v40, 4  ;;  %v944_v23 = vrot.slane %v942_v5, 7  ;;  %v958_v12 = vshll.u32 %v8000_v44, 16  ;;  %v271_v63 = vld [vmem:[%s7078_s7 + $0x3c] sm:$0x8] }
  0xc8   : > { %v911_v47 = vshrl.u32 %v5823_v43, 16  ;;  %v689_v57 = vsel %vm7149_vm5, %v684_v2, %v688_v50  ;;  %v5850_v42 = vrot.slane %v950_v48, 11  ;;  %v918_v19 = vrot.slane %v916_v31, 7 }
  0xc9   : > { %v957_v62 = vrot.slane %v955_v35, 7  ;;  %v698_v7 = vsel %vm7149_vm5, %v693_v17, %v697_v55  ;;  %v1723_v33 = vunpack.c.l.b16 %v689_v57  ;;  %v947_v40 = vor.u32 %v945_v30, %v944_v23  ;;  %v269_v55 = vld [vmem:[%s7078_s7 + $0x30] sm:$0x8] }
  0xca   : > { %v8019_v56 = vpop.permute.xlu2 %1893  ;;  %v5847_v44 = vrot.slane %v911_v47, 11  ;;  %v1724_v4 = vunpack.c.l.b16 %v698_v7  ;;  %v921_v50 = vor.u32 %v919_v28, %v918_v19  ;;  %v924_v2 = vshrl.u32 %v5825_v8, 16 }
  0xcb   : > { %v960_v43 = vor.u32 %v958_v12, %v957_v62  ;;  %v948_v48 = vsel %vm7112_vm4, %v5849_v53, %v947_v40  ;;  %v931_v31 = vrot.slane %v929_v21, 7  ;;  %v366_v22 = vshrl.u32 %v271_v63, 16 }
  0xcc   : > { %v373_v54 = vrot.slane %v9273_v46, 7  ;;  %v1734_v17 = vpack.c.b16 %v1724_v4, %v1723_v33  ;;  %v1768_v47 = vunpack.c.l.b16 %v948_v48  ;;  %v922_v24 = vsel %vm7112_vm4, %v5847_v44, %v921_v50  ;;  %v5867_v33 = vld [vmem:[%s7078_s7 + $0xbc] sm:$0x1]  ;;  %v5899_v48 = vld [vmem:[%s7078_s7 + $0xc0] sm:$0x8] }
  0xcd   : > { %v961_v23 = vsel %vm7112_vm4, %v5850_v42, %v960_v43  ;;  %v5848_v53 = vrot.slane %v924_v2, 11  ;;  %v934_v46 = vor.u32 %v932_v34, %v931_v31  ;;  %v1766_v57 = vunpack.c.l.b16 %v922_v24  ;;  %v5868_v34 = vld [vmem:[%s7078_s7 + $0xc8] sm:$0x1] }
  0xce   : > { %v8036_v28 = vpop.permute.xlu0 %1938  ;;  %v8038_v8 = vpop.permute.xlu1 %2001  ;;  %v1769_v21 = vunpack.c.l.b16 %v961_v23  ;;  %1750 = vrot.lane.b32.xlu0 %v1734_v17, %s6986_s12  ;;  %v5786_v4 = vrot.slane %v366_v22, 11  ;;  %v9274_v42 = vshll.u32 %v7381_v38, 16  ;;  %v353_v19 = vshrl.u32 %v269_v55, 16 }
  0xcf   : > { %v9275_v63 = vshrl.u32 %v7373_v16, 16  ;;  %v935_v44 = vsel %vm7112_vm4, %v5848_v53, %v934_v46  ;;  %v2206_v29 = vsel %vm2202_vm14, %v7968_v13, %v7954_v45  ;;  %v1132_v43 = vrot.slane %v942_v5, 4  ;;  %v5900_v5 = vld [vmem:[%s7078_s7 + $0xc4] sm:$0xf] }
  0xd0   : > { %v376_v62 = vor.u32 %v9274_v42, %v373_v54  ;;  %v1779_v40 = vpack.c.b16 %v1769_v21, %v1768_v47  ;;  %v1767_v22 = vunpack.c.l.b16 %v935_v44  ;;  %v5785_v54 = vrot.slane %v353_v19, 11  ;;  %6068 = vmatmul.msk.bf16.gmra.mxu0 %vm2259_vm15, %v2206_v29  ;;  %v8068_v42 = vld [vmem:[%s7078_s7 + $0xd0] sm:$0xf] }
  0xd1   : > { %v360_v7 = vrot.slane %v9275_v63, 7  ;;  %v9276_v50 = vshll.u32 %v7373_v16, 16  ;;  %v1133_v55 = vrot.slane %v945_v30, 5  ;;  %v1137_v45 = vshll.u32 %v5867_v33, 16  ;;  %v5901_v16 = vld [vmem:[%s7078_s7 + $0xcc] sm:$0x8] }
  0xd2   : > { %v377_v38 = vsel %vm7112_vm4, %v5786_v4, %v376_v62  ;;  %1795 = vrot.lane.b32.xlu1 %v1779_v40, %s6985_s11  ;;  %v1141_v13 = vrot.slane %v955_v35, 4  ;;  %v1778_v17 = vpack.c.b16 %v1767_v22, %v1766_v57  ;;  %v1142_v47 = vrot.slane %v958_v12, 5  ;;  %v8065_v21 = vpop.permute.xlu2 %2046  ;;  %v5895_v63 = vld [vmem:[%s7078_s7 + $0xa8] sm:$0x8] }
  0xd3   : > { %v363_v2 = vor.u32 %v9276_v50, %v360_v7  ;;  %v1624_v31 = vunpack.c.l.b16 %v377_v38  ;;  %v1146_v24 = vshll.u32 %v5868_v34, 16  ;;  %v1134_v46 = vor.u32 %v1133_v55, %v1132_v43 }
  0xd4   : > { %v1139_v4 = vrot.slane %v1137_v45, 5  ;;  %v1388_v62 = vshrl.u32 %v5899_v48, 16  ;;  %1793 = vrot.lane.b32.xlu2 %v1778_v17, %s6985_s11  ;;  %v1143_v30 = vor.u32 %v1142_v47, %v1141_v13  ;;  %v1393_v57 = vshrl.u32 %v5900_v5, 16  ;;  %v5897_v48 = vld [vmem:[%s7078_s7 + $0xb4] sm:$0x8] }
  0xd5   : > { %v364_v23 = vsel %vm7112_vm4, %v5785_v54, %v363_v2  ;;  %v1148_v35 = vrot.slane %v1146_v24, 5  ;;  %v1396_v19 = vshll.u32 %v5900_v5, 16  ;;  %v1135_v33 = vrot.slane %v1134_v46, 4 }
  0xd6   : > { %v1623_v53 = vunpack.c.l.b16 %v364_v23  ;;  %v8072_v7 = vpop.permute.xlu0 %1697  ;;  %v5921_v40 = vrot.slane %v1388_v62, 11  ;;  %v1401_v44 = vshrl.u32 %v5901_v16, 16  ;;  %v8074_v29 = vpop.permute.xlu1 %1742  ;;  %v1144_v34 = vrot.slane %v1143_v30, 4  ;;  %v5939_v30 = vld [vmem:[%s7078_s7 + $0xc8] sm:$0x1] }
  0xd7   : > { %v1395_v43 = vrot.slane %v1393_v57, 7  ;;  %v1406_v22 = vshrl.u32 %v8068_v42, 16  ;;  %v1409_v38 = vshll.u32 %v8068_v42, 16  ;;  %v1140_v50 = vsel %vm7149_vm5, %v1135_v33, %v1139_v4 }
  0xd8   : > { %v1639_v12 = vpack.c.b16 %v1624_v31, %v1623_v53  ;;  %v5922_v2 = vrot.slane %v1401_v44, 11  ;;  %v1362_v31 = vshrl.u32 %v5895_v63, 16  ;;  %v1149_v45 = vsel %vm7149_vm5, %v1144_v34, %v1148_v35 }
  0xd9   : > { %v1876_v13 = vunpack.c.l.b16 %v1140_v50  ;;  %v1398_v5 = vor.u32 %v1396_v19, %v1395_v43  ;;  %v1877_v17 = vunpack.c.l.b16 %v1149_v45  ;;  %v1408_v23 = vrot.slane %v1406_v22, 7  ;;  %v8126_v50 = vld [vmem:[%s7078_s7 + $0xb4] sm:$0xf0] }
  0xda   : > { %v2069_v54 = vsel %vm2060_vm6, %v1639_v12, %v7960_v18  ;;  %v5919_v47 = vrot.slane %v1362_v31, 11  ;;  %v1369_v18 = vrot.slane %v1367_v0, 7  ;;  %v1375_v16 = vshrl.u32 %v5897_v48, 16  ;;  %v5831_v31 = vld [vmem:[%s7078_s7 + $0xcc] sm:$0x8] }
  0xdb   : > { %v2094_v55 = vsel %vm2088_vm8, %v2069_v54, %v7981_v14  ;;  %v1399_v24 = vsel %vm7112_vm4, %v5921_v40, %v1398_v5  ;;  %v1382_v14 = vrot.slane %v1380_v1, 7  ;;  %v1887_v46 = vpack.c.b16 %v1877_v17, %v1876_v13  ;;  %v5940_v1 = vld [vmem:[%s7078_s7 + $0xd4] sm:$0x1]  ;;  %v8123_v54 = vld [vmem:[%s7078_s7 + $0xac] sm:$0xf] }
  0xdc   : > { %v2113_v53 = vsel %vm2107_vm9, %v2094_v55, %v8003_v32  ;;  %v1411_v4 = vor.u32 %v1409_v38, %v1408_v23  ;;  %v1921_v42 = vunpack.c.l.b16 %v1399_v24  ;;  %v1372_v62 = vor.u32 %v1370_v39, %v1369_v18  ;;  %v8130_v55 = vld [vmem:[%s7078_s7 + $0xd0] sm:$0xf] }
  0xdd   : > { %v5920_v0 = vrot.slane %v1375_v16, 11  ;;  %v1385_v35 = vor.u32 %v1383_v41, %v1382_v14  ;;  %v2132_v63 = vsel %vm2126_vm10, %v2113_v53, %v8005_v3  ;;  %v1583_v32 = vrot.slane %v1393_v57, 4  ;;  %v8103_v12 = vpop.permute.xlu2 %1787  ;;  %1903 = vrot.lane.b32.xlu0 %v1887_v46, %s6988_s14  ;;  %v8115_v3 = vld [vmem:[%s7078_s7 + $0xc4] sm:$0xf]  ;;  %v8118_v57 = vld [vmem:[%s7078_s7 + $0xcc] sm:$0xf0] }
  0xde   : > { %v8105_v33 = vpop.permute.xlu0 %1850  ;;  %v1412_v59 = vsel %vm7112_vm4, %v5922_v2, %v1411_v4  ;;  %v1373_v27 = vsel %vm7112_vm4, %v5919_v47, %v1372_v62  ;;  %v2151_v39 = vsel %vm2145_vm11, %v2132_v63, %v8019_v56  ;;  %v1584_v41 = vrot.slane %v1396_v19, 5  ;;  %v8132_v45 = vpop.permute.xlu1 %1895  ;;  %v8137_v47 = vld [vmem:[%s7078_s7 + $0xdc] sm:$0xf]  ;;  %v8143_v14 = vld [vmem:[%s7078_s7 + $0xd0] sm:$0xf] }
  0xdf   : > { %v1922_v40 = vunpack.c.l.b16 %v1412_v59  ;;  %v1386_v44 = vsel %vm7112_vm4, %v5920_v0, %v1385_v35  ;;  %v1919_v34 = vunpack.c.l.b16 %v1373_v27  ;;  %v1588_v43 = vshll.u32 %v5939_v30, 16  ;;  %v8150_v62 = vld [vmem:[%s7078_s7 + $0xd8] sm:$0xf0] }
  0xe0   : > { %v1920_v2 = vunpack.c.l.b16 %v1386_v44  ;;  %v1585_v48 = vor.u32 %v1584_v41, %v1583_v32  ;;  %v1592_v56 = vrot.slane %v1406_v22, 4  ;;  %v1593_v19 = vrot.slane %v1409_v38, 5  ;;  %v5833_v38 = vld [vmem:[%s7078_s7 + $0xd8] sm:$0x8]  ;;  %v273_v41 = vld [vmem:[%s7078_s7 + $0x48] sm:$0x8] }
  0xe1   : > { %v1932_v13 = vpack.c.b16 %v1922_v40, %v1921_v42  ;;  %v1590_v5 = vrot.slane %v1588_v43, 5  ;;  %v1597_v17 = vshll.u32 %v5940_v1, 16  ;;  %v5978_v23 = vor.u32 %v8118_v57, %v8115_v3  ;;  %v8159_v1 = vld [vmem:[%s7078_s7 + $0xb8] sm:$0xf]  ;;  %v275_v44 = vld [vmem:[%s7078_s7 + $0x54] sm:$0x8] }
  0xe2   : > { %v1931_v18 = vpack.c.b16 %v1920_v2, %v1919_v34  ;;  %v1586_v24 = vrot.slane %v1585_v48, 4  ;;  %v1594_v16 = vor.u32 %v1593_v19, %v1592_v56  ;;  %v5974_v22 = vor.u32 %v8126_v50, %v8123_v54  ;;  %v8182_v50 = vld [vmem:[%s7078_s7 + $0xdc] sm:$0xf] }
  0xe3   : > { %1948 = vrot.lane.b32.xlu1 %v1932_v13, %s6989_s21  ;;  %v1599_v53 = vrot.slane %v1597_v17, 5  ;;  %v2170_v46 = vsel %vm2164_vm12, %v2151_v39, %v8036_v28  ;;  %v963_v4 = vshrl.u32 %v5831_v31, 16  ;;  %v968_v42 = vshrl.u32 %v8130_v55, 16  ;;  %v8162_v28 = vld [vmem:[%s7078_s7 + $0xc0] sm:$0xf0] }
  0xe4   : > { %1946 = vrot.lane.b32.xlu2 %v1931_v18, %s6989_s21  ;;  %v1591_v30 = vsel %vm7149_vm5, %v1586_v24, %v1590_v5  ;;  %v1595_v0 = vrot.slane %v1594_v16, 4  ;;  %v2189_v35 = vsel %vm2183_vm13, %v2170_v46, %v8038_v8  ;;  %v971_v63 = vshll.u32 %v8130_v55, 16  ;;  %v5903_v17 = vld [vmem:[%s7078_s7 + $0xd8] sm:$0x8]  ;;  %v5905_v46 = vld [vmem:[%s7078_s7 + $0xe4] sm:$0x8] }
  0xe5   : > { %v2029_v32 = vunpack.c.l.b16 %v1591_v30  ;;  %v2208_v59 = vsel %vm2202_vm14, %v2189_v35, %v8065_v21  ;;  %v5851_v27 = vrot.slane %v963_v4, 11  ;;  %v970_v39 = vrot.slane %v968_v42, 7 }
  0xe6   : > { %v1600_v3 = vsel %vm7149_vm5, %v1595_v0, %v1599_v53  ;;  %6069 = vmatmul.msk.bf16.gmra.mxu0 %vm2259_vm15, %v2208_v59  ;;  %v976_v8 = vshrl.u32 %v5833_v38, 16  ;;  %v981_v57 = vshrl.u32 %v8137_v47, 16  ;;  %v984_v40 = vshll.u32 %v8137_v47, 16  ;;  %v8186_v48 = vpop.permute.xlu0 %2003 }
  0xe7   : > { %v2030_v34 = vunpack.c.l.b16 %v1600_v3  ;;  %v973_v21 = vor.u32 %v971_v63, %v970_v39  ;;  %v6014_v43 = vor.u32 %v8150_v62, %v8143_v14  ;;  %v6010_v54 = vor.u32 %v8162_v28, %v8159_v1  ;;  %v8203_v39 = vld [vmem:[%s7078_s7 + $0xe8] sm:$0xf] }
  0xe8   : > { %v8184_v2 = vpop.permute.xlu2 %1940  ;;  %v5852_v56 = vrot.slane %v976_v8, 11  ;;  %v983_v19 = vrot.slane %v981_v57, 7  ;;  %v379_v31 = vshrl.u32 %v273_v41, 16  ;;  %v9277_v13 = vshrl.u32 %v7327_v37, 16 }
  0xe9   : > { %v2040_v18 = vpack.c.b16 %v2030_v34, %v2029_v32  ;;  %v974_v24 = vsel %vm7112_vm4, %v5851_v27, %v973_v21  ;;  %v392_v16 = vshrl.u32 %v275_v44, 16  ;;  %v9278_v38 = vshrl.u32 %v7351_v11, 16  ;;  %v8206_v32 = vld [vmem:[%s7078_s7 + $0xdc] sm:$0xf]  ;;  %v8208_v27 = vpop.permute.xlu1 %2048  ;;  %v8216_v34 = vld [vmem:[%s7078_s7 + $0xe4] sm:$0xf0] }
  0xea   : > { %v386_v5 = vrot.slane %v9277_v13, 7  ;;  %v986_v4 = vor.u32 %v984_v40, %v983_v19  ;;  %v1770_v30 = vunpack.c.l.b16 %v974_v24  ;;  %v5787_v0 = vrot.slane %v379_v31, 11  ;;  %v8225_v31 = vld [vmem:[%s7078_s7 + $0xc4] sm:$0xf]  ;;  %v8228_v13 = vld [vmem:[%s7078_s7 + $0xcc] sm:$0xf0] }
  0xeb   : > { %v399_v53 = vrot.slane %v9278_v38, 7  ;;  %v9279_v35 = vshll.u32 %v7327_v37, 16  ;;  %2056 = vrot.lane.b32.xlu0 %v2040_v18, %s6987_s13  ;;  %1707 = vrot.lane.b32.xlu1 %v5978_v23, %s6982_s8  ;;  %v5788_v41 = vrot.slane %v392_v16, 11  ;;  %v9280_v3 = vshll.u32 %v7351_v11, 16  ;;  %v8233_v24 = vld [vmem:[%s7078_s7 + $0xc4] sm:$0xf] }
  0xec   : > { %v1414_v37 = vshrl.u32 %v5903_v17, 16  ;;  %v1419_v44 = vshrl.u32 %v8182_v50, 16  ;;  %1705 = vrot.lane.b32.xlu2 %v5974_v22, %s6982_s8  ;;  %v987_v21 = vsel %vm7112_vm4, %v5852_v56, %v986_v4  ;;  %v1422_v19 = vshll.u32 %v8182_v50, 16  ;;  %v8236_v56 = vld [vmem:[%s7078_s7 + $0xd0] sm:$0xf] }
  0xed   : > { %v389_v59 = vor.u32 %v9279_v35, %v386_v5  ;;  %v402_v8 = vor.u32 %v9280_v3, %v399_v53  ;;  %v1427_v11 = vshrl.u32 %v5905_v46, 16  ;;  %v1771_v5 = vunpack.c.l.b16 %v987_v21  ;;  %v550_v4 = vld [vmem:[%s7078_s7 + $0xc8] sm:$0x1] }
  0xee   : > { %v5923_v22 = vrot.slane %v1414_v37, 11  ;;  %v1421_v38 = vrot.slane %v1419_v44, 7  ;;  %v9263_v46 = vshrl.u32 %v8203_v39, 16  ;;  %v1435_v35 = vshll.u32 %v8203_v39, 16 }
  0xef   : > { %v390_v23 = vsel %vm7112_vm4, %v5787_v0, %v389_v59  ;;  %v403_v17 = vsel %vm7112_vm4, %v5788_v41, %v402_v8  ;;  %v5924_v53 = vrot.slane %v1427_v11, 11  ;;  %v1780_v0 = vpack.c.b16 %v1771_v5, %v1770_v30  ;;  %v8257_v5 = vpop.permute.xlu0 %1744 }
  0xf0   : > { %v1625_v18 = vunpack.c.l.b16 %v390_v23  ;;  %v1626_v16 = vunpack.c.l.b16 %v403_v17  ;;  %v6050_v59 = vor.u32 %v8216_v34, %v8206_v32  ;;  %v6046_v41 = vor.u32 %v8228_v13, %v8225_v31  ;;  %v8247_v3 = vpop.permute.xlu2 %1699 }
  0xf1   : > { %v1424_v37 = vor.u32 %v1422_v19, %v1421_v38  ;;  %v1434_v21 = vrot.slane %v9263_v46, 7  ;;  %v514_v30 = vshrl.u32 %v8233_v24, 16  ;;  %v517_v23 = vshll.u32 %v8233_v24, 16  ;;  %v551_v38 = vld [vmem:[%s7078_s7 + $0xd4] sm:$0x1] }
  0xf2   : > { %v1640_v8 = vpack.c.b16 %v1626_v16, %v1625_v18  ;;  %v527_v11 = vshrl.u32 %v8236_v56, 16  ;;  %v9264_v32 = vshll.u32 %v8236_v56, 16  ;;  %v704_v34 = vshll.u32 %v550_v4, 16 }
  0xf3   : > { %v1425_v18 = vsel %vm7112_vm4, %v5923_v22, %v1424_v37  ;;  %v1437_v16 = vor.u32 %v1435_v35, %v1434_v21  ;;  %v699_v46 = vrot.slane %v514_v30, 4  ;;  %1797 = vrot.lane.b32.xlu0 %v1780_v0, %s6985_s11  ;;  %1860 = vrot.lane.b32.xlu1 %v6014_v43, %s6983_s9  ;;  %v700_v22 = vrot.slane %v517_v23, 5  ;;  %v277_v37 = vld [vmem:[%s7078_s7 + $0x60] sm:$0x8]  ;;  %v8290_v43 = vpop.permute.xlu1 %1789 }
  0xf4   : > { %v2072_v17 = vsel %vm2060_vm6, %v1640_v8, %v8072_v7  ;;  %v1923_v4 = vunpack.c.l.b16 %v1425_v18  ;;  %v706_v8 = vrot.slane %v704_v34, 5  ;;  %1858 = vrot.lane.b32.xlu2 %v6010_v54, %s6983_s9  ;;  %v709_v62 = vrot.slane %v9264_v32, 5  ;;  %s212_s9 = sand.u32 1, %s6964_s16  }
  0xf5   : > { %v2096_v7 = vsel %vm2088_vm8, %v2072_v17, %v8074_v29  ;;  %v1438_v14 = vsel %vm7112_vm4, %v5924_v53, %v1437_v16  ;;  %v708_v29 = vrot.slane %v527_v11, 4  ;;  %v701_v1 = vor.u32 %v700_v22, %v699_v46  ;;  %v279_v53 = vld [vmem:[%s7078_s7 + $0x6c] sm:$0x8] }
  0xf6   : > { %v2115_v0 = vsel %vm2107_vm9, %v2096_v7, %v8103_v12  ;;  %v1924_v21 = vunpack.c.l.b16 %v1438_v14  ;;  %v713_v28 = vshll.u32 %v551_v38, 16  ;;  %v405_v17 = vshrl.u32 %v277_v37, 16 }
  0xf7   : > { %v2134_v34 = vsel %vm2126_vm10, %v2115_v0, %v8105_v33  ;;  %v710_v54 = vor.u32 %v709_v62, %v708_v29  ;;  %v412_v18 = vrot.slane %v410_v9, 7  ;;  %v702_v14 = vrot.slane %v701_v1, 4 }
  0xf8   : > { %v2153_v12 = vsel %vm2145_vm11, %v2134_v34, %v8132_v45  ;;  %v1933_v16 = vpack.c.b16 %v1924_v21, %v1923_v4  ;;  %v715_v32 = vrot.slane %v713_v28, 5  ;;  %v5789_v38 = vrot.slane %v405_v17, 11  ;;  %v5869_v4 = vld [vmem:[%s7078_s7 + $0xd4] sm:$0x1]  ;;  %v1853_v0 = vpop.permute.xlu2 %1852  ;;  %v281_v17 = vld [vmem:[%s7078_s7 + $0x78] sm:$0x8] }
  0xf9   : > { %v2172_v7 = vsel %vm2164_vm12, %v2153_v12, %v8184_v2  ;;  %v711_v33 = vrot.slane %v710_v54, 4  ;;  %v415_v45 = vor.u32 %v413_v49, %v412_v18  ;;  %v707_v22 = vsel %vm7149_vm5, %v702_v14, %v706_v8  ;;  %v5870_v49 = vld [vmem:[%s7078_s7 + $0xe0] sm:$0x1]  ;;  %v5942_v54 = vld [vmem:[%s7078_s7 + $0xec] sm:$0x1] }
  0xfa   : > { %v2191_v46 = vsel %vm2183_vm13, %v2172_v7, %v8186_v48  ;;  %v418_v37 = vshrl.u32 %v279_v53, 16  ;;  %v425_v9 = vrot.slane %v423_v10, 7  ;;  %v1725_v48 = vunpack.c.l.b16 %v707_v22  ;;  %v1898_v21 = vpop.permute.xlu0 %1897 }
  0xfb   : > { %v2210_v2 = vsel %vm2202_vm14, %v2191_v46, %v8208_v27  ;;  %v716_v29 = vsel %vm7149_vm5, %v711_v33, %v715_v32  ;;  %v416_v6 = vsel %vm7112_vm4, %v5789_v38, %v415_v45  ;;  %v1150_v8 = vrot.slane %v968_v42, 4  ;;  %1950 = vrot.lane.b32.xlu0 %v1933_v16, %s6989_s21  ;;  %2013 = vrot.lane.b32.xlu1 %v6050_v59, %s6984_s10 }
  0xfc   : > { %6070 = vmatmul.msk.bf16.gmra.mxu0 %vm2259_vm15, %v2210_v2  ;;  %v1726_v10 = vunpack.c.l.b16 %v716_v29  ;;  %v5790_v27 = vrot.slane %v418_v37, 11  ;;  %v428_v32 = vor.u32 %v426_v36, %v425_v9  ;;  %v1627_v62 = vunpack.c.l.b16 %v416_v6  ;;  %2011 = vrot.lane.b32.xlu2 %v6046_v41, %s6984_s10  ;;  %v5941_v36 = vld [vmem:[%s7078_s7 + $0xe0] sm:$0x1]  ;;  %s5779_s10 = sshll.u32 %s212_s9, 6 }
  0xfd   : > { %v1151_v42 = vrot.slane %v971_v63, 5  ;;  %v1155_v34 = vshll.u32 %v5869_v4, 16  ;;  %v1159_v59 = vrot.slane %v981_v57, 4  ;;  %v1160_v58 = vrot.slane %v984_v40, 5  ;;  %s9159_s11 = scalar_lea.vmem [#allocation3], %s5779_s10 }
  0xfe   : > { %v1735_v1 = vpack.c.b16 %v1726_v10, %v1725_v48  ;;  %v429_v28 = vsel %vm7112_vm4, %v5790_v27, %v428_v32  ;;  %v1164_v12 = vshll.u32 %v5870_v49, 16  ;;  %v1601_v31 = vrot.slane %v1419_v44, 4  ;;  %s5689_s30 = sshll.u32 %s9159_s11, 4  ;;  %s5690_s30 = int_to_ptr.vmem [resolvable:$true] %s5689_s30 }
  0xff   : > { %v1628_v13 = vunpack.c.l.b16 %v429_v28  ;;  %v1152_v55 = vor.u32 %v1151_v42, %v1150_v8  ;;  %v1157_v41 = vrot.slane %v1155_v34, 5  ;;  %v1161_v63 = vor.u32 %v1160_v58, %v1159_v59  ;;  %v1943_v53 = vpop.permute.xlu1 %1942 }
 0x100   : > { %v1166_v57 = vrot.slane %v1164_v12, 5  ;;  %v1602_v47 = vrot.slane %v1422_v19, 5  ;;  %v1606_v40 = vshll.u32 %v5941_v36, 16  ;;  %v9281_v18 = vshrl.u32 %v8203_v39, 16  ;;  %v2006_v39 = vpop.permute.xlu2 %2005 }
 0x101   : > { %v1641_v7 = vpack.c.b16 %v1628_v13, %v1627_v62  ;;  %v1153_v14 = vrot.slane %v1152_v55, 4  ;;  %v1162_v33 = vrot.slane %v1161_v63, 4  ;;  %v1611_v44 = vrot.slane %v1435_v35, 5  ;;  %v283_v35 = vld [vmem:[%s7078_s7 + $0x84] sm:$0x8] }
 0x102   : > { %v1610_v16 = vrot.slane %v9281_v18, 4  ;;  %v1603_v46 = vor.u32 %v1602_v47, %v1601_v31  ;;  %v1615_v38 = vshll.u32 %v5942_v54, 16  ;;  %v431_v45 = vshrl.u32 %v281_v17, 16 }
 0x103   : > { %v2075_v22 = vsel %vm2060_vm6, %v1641_v7, %v8247_v3  ;;  %v1158_v50 = vsel %vm7149_vm5, %v1153_v14, %v1157_v41  ;;  %v1167_v19 = vsel %vm7149_vm5, %v1162_v33, %v1166_v57  ;;  %v1608_v4 = vrot.slane %v1606_v40, 5 }
 0x104   : > { %v1612_v37 = vor.u32 %v1611_v44, %v1610_v16  ;;  %v1878_v9 = vunpack.c.l.b16 %v1158_v50  ;;  %v2098_v2 = vsel %vm2088_vm8, %v2075_v22, %v8257_v5  ;;  %1752 = vrot.lane.b32.xlu2 %v1735_v1, %s6986_s12  ;;  %v1879_v29 = vunpack.c.l.b16 %v1167_v19  ;;  %v285_v22 = vld [vmem:[%s7078_s7 + $0x90] sm:$0x8]  ;;  %s6768_s12 = sshll.u32 %s6972_s18, 6  ;;  %s5675_s18 = scalar_lea.sflag [#allocation4], %s212_s9 }
 0x105   : > { %v2117_v3 = vsel %vm2107_vm9, %v2098_v2, %v8290_v43  ;;  %v1604_v48 = vrot.slane %v1603_v46, 4  ;;  %v1617_v8 = vrot.slane %v1615_v38, 5  ;;  %v5791_v27 = vrot.slane %v431_v45, 11  ;;  %s5688_s29 = scalar_lea.hbm %s9240_s4, %s6768_s12 }
 0x106   : > { %v1613_v6 = vrot.slane %v1612_v37, 4  ;;  %v2136_v49 = vsel %vm2126_vm10, %v2117_v3, %v1853_v0  ;;  %v2051_v10 = vpop.permute.xlu0 %2050  ;;  %v9282_v32 = vshrl.u32 %v7793_v15, 16  ;;  %v444_v42 = vshrl.u32 %v283_v35, 16  ;;  %v287_v37 = vld [vmem:[%s7078_s7 + $0x9c] sm:$0x8]  ;;  %s5691_s5 = sshll.u32 %s5688_s29, 4  ;;  %s5692_s5 = int_to_ptr.hbm [resolvable:$true] %s5691_s5 }
 0x107   : > { %v2155_v5 = vsel %vm2145_vm11, %v2136_v49, %v1898_v21  ;;  %v9283_v59 = vshll.u32 %v7793_v15, 16  ;;  %v9284_v43 = vshrl.u32 %v7810_v20, 16  ;;  %v1888_v1 = vpack.c.b16 %v1879_v29, %v1878_v9  ;;  %v1702_v31 = vpop.permute.xlu1 %1701  ;;  %s6916_s6 = sshra.s32 %s5692_s5, 4  ;;  %s6917_s6 = int_to_ptr.hbm [resolvable:$true] %s6916_s6 }
 0x108   : > { %v438_v62 = vrot.slane %v9282_v32, 7  ;;  %v2174_v34 = vsel %vm2164_vm12, %v2155_v5, %v1943_v53  ;;  %v1609_v0 = vsel %vm7149_vm5, %v1604_v48, %v1608_v4  ;;  %v5792_v12 = vrot.slane %v444_v42, 11  ;;  %v6695_v48 = vld [vmem:[%s9238_s2 + $0x78] sm:$0xff]  ;;  %s6918_s22 = scalar_lea.hbm %s6917_s6, 64  ;;  %p6923_p1 = scmp.lt.s32.totalorder %s6917_s6, %s9240_s4 }
 0x109   : > { %v451_v36 = vrot.slane %v9284_v43, 7  ;;  %v2193_v28 = vsel %vm2183_vm13, %v2174_v34, %v2006_v39  ;;  %v1618_v21 = vsel %vm7149_vm5, %v1613_v6, %v1617_v8  ;;  %v9285_v15 = vshll.u32 %v7810_v20, 16  ;;  %2982 = vmatpush.bf16.msra.mxu1 %v6695_v48  ;;  %6816 = vmatpush.bf16.msra.mxu3 %v6695_v48  ;;  %v6688_v48 = vld [vmem:[%s9238_s2 + $0x40] sm:$0xff]  ;;  %p6919_p12 = scmp.ne.s32.totalorder %s6917_s6, %s6918_s22  ;;  %p6924_p2 = scmp.lt.s32.totalorder %s6922_s26, %s6918_s22 }
 0x10a   : > { %v441_v58 = vor.u32 %v9283_v59, %v438_v62  ;;  %v2212_v41 = vsel %vm2202_vm14, %v2193_v28, %v2051_v10  ;;  %v2031_v53 = vunpack.c.l.b16 %v1609_v0  ;;  %v2032_v17 = vunpack.c.l.b16 %v1618_v21  ;;  %v6694_v59 = vld [vmem:[%s9238_s2 + $0x70] sm:$0xff]  ;;  %v6692_v0 = vld [vmem:[%s9238_s2 + $0x60] sm:$0xff]  ;;  %v6691_v28 = vld [vmem:[%s9238_s2 + $0x58] sm:$0xff] }
 0x10b   : > { %v454_v55 = vor.u32 %v9285_v15, %v451_v36  ;;  %v1747_v47 = vpop.permute.xlu2 %1746  ;;  %v457_v9 = vshrl.u32 %v285_v22, 16  ;;  %v9286_v4 = vshrl.u32 %v7732_v61, 16  ;;  %v470_v35 = vshrl.u32 %v287_v37, 16  ;;  %p6920_p13 = pnand %p6919_p12, %p7058_p4  ;;  %p6925_p3 = por %p6924_p2, %p6923_p1 }
 0x10c   : > { %v442_v13 = vsel %vm7112_vm4, %v5791_v27, %v441_v58  ;;  %6071 = vmatmul.msk.bf16.gmra.mxu0 %vm2259_vm15, %v2212_v41  ;;  %1905 = vrot.lane.b32.xlu2 %v1888_v1, %s6988_s14  ;;  %v2041_v20 = vpack.c.b16 %v2032_v17, %v2031_v53  ;;  %v9287_v29 = vshrl.u32 %v7762_v25, 16  ;;  %v9288_v10 = vshll.u32 %v7732_v61, 16  ;;  %v6693_v61 = vld [vmem:[%s9238_s2 + $0x68] sm:$0xff]  ;;  %v8432_v17 = vld [vmem:[%s9239_s3] ss:$0 sm:$0xff] }
 0x10d   : > { %v1629_v63 = vunpack.c.l.b16 %v442_v13  ;;  %v455_v54 = vsel %vm7112_vm4, %v5792_v12, %v454_v55  ;;  %v464_v39 = vrot.slane %v9286_v4, 7  ;;  %v5793_v8 = vrot.slane %v457_v9, 11  ;;  %2983 = vmatpush.bf16.msra.mxu1 %v6694_v59  ;;  %6817 = vmatpush.bf16.msra.mxu3 %v6694_v59  ;;  %v289_v41 = vld [vmem:[%s7078_s7 + $0xa8] sm:$0x8]  ;;  %p6921_p0 = pneg %p6920_p13 }
 0x10e   : > { %v1630_v57 = vunpack.c.l.b16 %v455_v54  ;;  %v1792_v18 = vpop.permute.xlu0 %1791  ;;  %v477_v3 = vrot.slane %v9287_v29, 7  ;;  %v5794_v32 = vrot.slane %v470_v35, 11  ;;  %v9289_v62 = vshll.u32 %v7762_v25, 16  ;;  %v6690_v54 = vld [vmem:[%s9238_s2 + $0x50] sm:$0xff]  ;;  %v6685_v59 = vld [vmem:[%s9238_s2 + $0x28] sm:$0xff] }
 0x10f   : > { %v1855_v14 = vpop.permute.xlu1 %1854  ;;  %v467_v27 = vor.u32 %v9288_v10, %v464_v39  ;;  %v9293_v37 = vshll.u32 %v7965_v60, 16  ;;  %p6926_p5 = pnand %p6925_p3, %p6921_p0 }
 0x110   : > { %v1642_v40 = vpack.c.b16 %v1630_v57, %v1629_v63  ;;  %v480_v5 = vor.u32 %v9289_v62, %v477_v3  ;;  %v291_v63 = vld [vmem:[%s7078_s7 + $0xb4] sm:$0x8] }
 0x111   : > { %v468_v42 = vsel %vm7112_vm4, %v5793_v8, %v467_v27  ;;  %2984 = vmatpush.bf16.msra.mxu1 %v6693_v61  ;;  %6818 = vmatpush.bf16.msra.mxu3 %v6693_v61 }
 0x112   : > { %v2078_v16 = vsel %vm2060_vm6, %v1642_v40, %v1702_v31  ;;  %v481_v34 = vsel %vm7112_vm4, %v5794_v32, %v480_v5  ;;  %v1631_v43 = vunpack.c.l.b16 %v468_v42  ;;  %v6686_v32 = vld [vmem:[%s9238_s2 + $0x30] sm:$0xff] }
 0x113   : > { %v2100_v7 = vsel %vm2088_vm8, %v2078_v16, %v1747_v47  ;;  %v1632_v25 = vunpack.c.l.b16 %v481_v34  ;;  %v9290_v47 = vshrl.u32 %v7958_v51, 16  ;;  %v6689_v16 = vld [vmem:[%s9238_s2 + $0x48] sm:$0xff] }
 0x114   : > { %2058 = vrot.lane.b32.xlu2 %v2041_v20, %s6987_s13  ;;  %v2119_v33 = vsel %vm2107_vm9, %v2100_v7, %v1792_v18  ;;  %v9291_v18 = vshrl.u32 %v7965_v60, 16  ;;  %v483_v7 = vshrl.u32 %v289_v41, 16 }
 0x115   : > { %v2138_v46 = vsel %vm2126_vm10, %v2119_v33, %v1855_v14  ;;  %v1643_v1 = vpack.c.b16 %v1632_v25, %v1631_v43  ;;  %2985 = vmatpush.bf16.msra.mxu1 %v6692_v0  ;;  %6819 = vmatpush.bf16.msra.mxu3 %v6692_v0  ;;  %v490_v40 = vrot.slane %v9290_v47, 7  ;;  %v496_v14 = vshrl.u32 %v291_v63, 16  ;;  %v293_v43 = vld [vmem:[%s7078_s7 + $0xc0] sm:$0x8]  ;;  %v295_v25 = vld [vmem:[%s7078_s7 + $0xcc] sm:$0x8] }
 0x116   : > { %v1900_v44 = vpop.permute.xlu2 %1899  ;;  %v503_v20 = vrot.slane %v9291_v18, 7  ;;  %v6990_v33 = vmov 0.0|0.0   ;;  %v5795_v39 = vrot.slane %v483_v7, 11 }
 0x117   : > { %v2157_v45 = vsel %vm2145_vm11, %v2138_v46, %v1900_v44  ;;  %v2008_v19 = vpop.permute.xlu1 %2007  ;;  %2555 = vst [vmem:[#allocation2 + $0x4] sm:$0xf] %v6990_v33  ;;  %v5796_v35 = vrot.slane %v496_v14, 11 }
 0x118   : > { %2572 = vst [vmem:[#allocation2 + $0xd0] sm:$0xf] %v6990_v33  ;;  %v506_v9 = vor.u32 %v9293_v37, %v503_v20 }
 0x119   : > { %v1945_v38 = vpop.permute.xlu0 %1944  ;;  %2986 = vmatpush.bf16.msra.mxu1 %v6691_v28  ;;  %6820 = vmatpush.bf16.msra.mxu3 %v6691_v28  ;;  %v509_v28 = vshrl.u32 %v293_v43, 16 }
 0x11a   : > { %v2176_v50 = vsel %vm2164_vm12, %v2157_v45, %v1945_v38  ;;  %v6991_v45 = vmov 0   ;;  %v507_v27 = vsel %vm7112_vm4, %v5796_v35, %v506_v9 }
 0x11b   : > { %v2195_v2 = vsel %vm2183_vm13, %v2176_v50, %v2008_v19  ;;  %225 = vst [vmem:[#allocation2] sm:$0xf] %v6991_v45  ;;  %v9292_v50 = vshll.u32 %v7958_v51, 16  ;;  %v6687_v51 = vld [vmem:[%s9238_s2 + $0x38] sm:$0xff]  ;;  %v1634_v5 = vunpack.c.l.b16 %v507_v27 }
 0x11c   : > { %226 = vst [vmem:[#allocation2 + $0xc] sm:$0xf] %v6991_v45  ;;  %3111 = vmatpush.bf16.msrb.mxu0 %v6687_v51  ;;  %6824 = vmatpush.bf16.msra.mxu2 %v6687_v51 }
 0x11d   : > { %2987 = vmatpush.bf16.msra.mxu1 %v6690_v54  ;;  %6821 = vmatpush.bf16.msra.mxu3 %v6690_v54  ;;  %v493_v19 = vor.u32 %v9292_v50, %v490_v40  ;;  %227 = vst [vmem:[#allocation2 + $0x18] sm:$0xf] %v6991_v45  ;;  %v5797_v54 = vrot.slane %v509_v28, 11  ;;  %v9294_v40 = vshll.u32 %v8236_v56, 16 }
 0x11e   : > { %228 = vst [vmem:[#allocation2 + $0x24] sm:$0xf] %v6991_v45  ;;  %v6110_v34 = vld [vmem:[#allocation2 + $0x4] sm:$0xf] }
 0x11f   : > { %v1749_v36 = vpop.permute.xlu1 %1748  ;;  %v494_v10 = vsel %vm7112_vm4, %v5795_v39, %v493_v19  ;;  %229 = vst [vmem:[#allocation2 + $0x30] sm:$0xf] %v6991_v45  ;;  %v6680_v39 = vld [vmem:[%s9238_s2] sm:$0xff] }
 0x120   : > { %230 = vst [vmem:[#allocation2 + $0x3c] sm:$0xf] %v6991_v45  ;;  %v1633_v62 = vunpack.c.l.b16 %v494_v10  ;;  %3112 = vmatpush.bf16.msrb.mxu0 %v6686_v32  ;;  %6825 = vmatpush.bf16.msra.mxu2 %v6686_v32 }
 0x121   : > { %v2053_v6 = vpop.permute.xlu2 %2052  ;;  %v1704_v58 = vpop.permute.xlu0 %1703  ;;  %2988 = vmatpush.bf16.msra.mxu1 %v6689_v16  ;;  %6822 = vmatpush.bf16.msra.mxu3 %v6689_v16  ;;  %231 = vst [vmem:[#allocation2 + $0x48] sm:$0xf] %v6991_v45  ;;  %v6682_v16 = vld [vmem:[%s9238_s2 + $0x10] sm:$0xff] }
 0x122   : > { %v2214_v49 = vsel %vm2202_vm14, %v2195_v2, %v2053_v6  ;;  %v2081_v12 = vsel %vm2060_vm6, %v1643_v1, %v1704_v58  ;;  %232 = vst [vmem:[#allocation2 + $0x54] sm:$0xf] %v6991_v45  ;;  %v1644_v58 = vpack.c.b16 %v1634_v5, %v1633_v62 }
 0x123   : > { %6072 = vmatmul.msk.bf16.gmra.mxu0 %vm2259_vm15, %v2214_v49  ;;  %v2102_v55 = vsel %vm2088_vm8, %v2081_v12, %v1749_v36  ;;  %233 = vst [vmem:[#allocation2 + $0x60] sm:$0xf] %v6991_v45  ;;  %v516_v12 = vrot.slane %v514_v30, 7 }
 0x124   : > { %234 = vst [vmem:[#allocation2 + $0x6c] sm:$0xf] %v6991_v45  ;;  %3113 = vmatpush.bf16.msrb.mxu0 %v6685_v59  ;;  %6826 = vmatpush.bf16.msra.mxu2 %v6685_v59 }
 0x125   : > { %2989 = vmatpush.bf16.msra.mxu1 %v6688_v48  ;;  %6823 = vmatpush.bf16.msra.mxu3 %v6688_v48  ;;  %235 = vst [vmem:[#allocation2 + $0x78] sm:$0xf] %v6991_v45 }
 0x126   : > { %236 = vst [vmem:[#allocation2 + $0x84] sm:$0xf] %v6991_v45 }
 0x127   : > { %237 = vst [vmem:[#allocation2 + $0x90] sm:$0xf] %v6991_v45 }
 0x128   : > { %238 = vst [vmem:[#allocation2 + $0x9c] sm:$0xf] %v6991_v45 }
 0x129   : > { %v1857_v31 = vpop.permute.xlu0 %1856  ;;  %239 = vst [vmem:[#allocation2 + $0xa8] sm:$0xf] %v6991_v45 }
 0x12a   : > { %240 = vst [vmem:[#allocation2 + $0xb4] sm:$0xf] %v6991_v45 }
 0x12b   : > { %241 = vst [vmem:[#allocation2 + $0xc0] sm:$0xf] %v6991_v45 }
 0x12c   : > { %v1902_v15 = vpop.permute.xlu1 %1901  ;;  %242 = vst [vmem:[#allocation2 + $0xcc] sm:$0xf] %v6991_v45 }
 0x12d   : > { %243 = vst [vmem:[#allocation2 + $0x8] sm:$0xf] %v6991_v45 }
 0x12e   : > { %v1794_v13 = vpop.permute.xlu2 %1793  ;;  %244 = vst [vmem:[#allocation2 + $0x14] sm:$0xf] %v6991_v45 }
 0x12f   : > { %v2121_v53 = vsel %vm2107_vm9, %v2102_v55, %v1794_v13  ;;  %v522_v13 = vshrl.u32 %v295_v25, 16  ;;  %245 = vst [vmem:[#allocation2 + $0x20] sm:$0xf] %v6991_v45 }
 0x130   : > { %v2140_v57 = vsel %vm2126_vm10, %v2121_v53, %v1857_v31  ;;  %v6684_v31 = vld [vmem:[%s9238_s2 + $0x20] sm:$0xff]  ;;  %v519_v53 = vor.u32 %v517_v23, %v516_v12  ;;  %246 = vst [vmem:[#allocation2 + $0x2c] sm:$0xf] %v6991_v45 }
 0x131   : > { %v2291_v21 = vpop.f32.mrf.mxu0  ;;  %v2159_v46 = vsel %vm2145_vm11, %v2140_v57, %v1902_v15  ;;  %v2010_v22 = vpop.permute.xlu0 %2009  ;;  %v529_v15 = vrot.slane %v527_v11, 7  ;;  %3114 = vmatpush.bf16.msrb.mxu0 %v6684_v31  ;;  %6827 = vmatpush.bf16.msra.mxu2 %v6684_v31  ;;  %v6683_v11 = vld [vmem:[%s9238_s2 + $0x18] sm:$0xff]  ;;  %v5798_v47 = vrot.slane %v522_v13, 11  ;;  %247 = vst [vmem:[#allocation2 + $0x38] sm:$0xf] %v6991_v45 }
 0x132   : > { %v520_v14 = vsel %vm7112_vm4, %v5797_v54, %v519_v53  ;;  %248 = vst [vmem:[#allocation2 + $0x44] sm:$0xf] %v6991_v45  ;;  %v2613_v13 = vld [vmem:[#allocation2] sm:$0x8] }
 0x133   : > { %v532_v18 = vor.u32 %v9294_v40, %v529_v15  ;;  %v1635_v37 = vunpack.c.l.b16 %v520_v14  ;;  %249 = vst [vmem:[#allocation2 + $0x50] sm:$0xf] %v6991_v45  ;;  %v6750_v14 = vld [vmem:[%s9238_s2 + $0x1b0] sm:$0xff] }
 0x134   : > { %250 = vst [vmem:[#allocation2 + $0x5c] sm:$0xf] %v6991_v45 }
 0x135   : > { %3115 = vmatpush.bf16.msrb.mxu0 %v6683_v11  ;;  %6828 = vmatpush.bf16.msra.mxu2 %v6683_v11  ;;  %v533_v33 = vsel %vm7112_vm4, %v5798_v47, %v532_v18  ;;  %251 = vst [vmem:[#allocation2 + $0x68] sm:$0xf] %v6991_v45 }
 0x136   : > { %v1636_v9 = vunpack.c.l.b16 %v533_v33  ;;  %252 = vst [vmem:[#allocation2 + $0x74] sm:$0xf] %v6991_v45 }
 0x137   : > { %v2055_v4 = vpop.permute.xlu1 %2054  ;;  %253 = vst [vmem:[#allocation2 + $0x80] sm:$0xf] %v6991_v45 }
 0x138   : > { %254 = vst [vmem:[#allocation2 + $0x8c] sm:$0xf] %v6991_v45 }
 0x139   : > { %v2293_v44 = vpop.f32.mrf.mxu0  ;;  %3116 = vmatpush.bf16.msrb.mxu0 %v6682_v16  ;;  %6829 = vmatpush.bf16.msra.mxu2 %v6682_v16  ;;  %255 = vst [vmem:[#allocation2 + $0x98] sm:$0xf] %v6991_v45  ;;  %v6751_v16 = vld [vmem:[%s9238_s2 + $0x1b8] sm:$0xff] }
 0x13a   : > { %v2294_v38 = vadd.f32 %v8432_v17, %v2293_v44  ;;  %256 = vst [vmem:[#allocation2 + $0xa4] sm:$0xf] %v6991_v45 }
 0x13b   : > { %257 = vst [vmem:[#allocation2 + $0xb0] sm:$0xf] %v6991_v45 }
 0x13c   : > { %vm2337_vm0 = vcmp.ge.f32.partialorder %v2294_v38, 0.0  ;;  %v2355_v29 = vmul.f32 0.01, %v2294_v38  ;;  %258 = vst [vmem:[#allocation2 + $0xbc] sm:$0xf] %v6991_v45 }
 0x13d   : > { %259 = vst [vmem:[#allocation2 + $0xc8] sm:$0xf] %v6991_v45 }
 0x13e   : > { %v1947_v2 = vpop.permute.xlu2 %1946  ;;  %v2373_v6 = vsel %vm2337_vm0, %v2294_v38, %v2355_v29  ;;  %v1645_v29 = vpack.c.b16 %v1636_v9, %v1635_v37  ;;  %260 = vst [vmem:[#allocation2 + $0xd4] sm:$0xf] %v6991_v45 }
 0x13f   : > { %v2178_v3 = vsel %vm2164_vm12, %v2159_v46, %v1947_v2  ;;  %v2538_v8 = vpack.c.bf16 %v2373_v6, %v2373_v6 }
 0x140   : > { %v2197_v60 = vsel %vm2183_vm13, %v2178_v3, %v2010_v22  ;;  %v1751_v61 = vpop.permute.xlu0 %1750  ;;  %v6681_v22 = vld [vmem:[%s9238_s2 + $0x8] sm:$0xff] }
 0x141   : > { %v2216_v49 = vsel %vm2202_vm14, %v2197_v60, %v2055_v4  ;;  %2556 = vst [vmem:[#allocation2 + $0x10] sm:$0xf] %v2538_v8  ;;  %3117 = vmatpush.bf16.msrb.mxu0 %v6681_v22  ;;  %6830 = vmatpush.bf16.msra.mxu2 %v6681_v22  ;;  %v6749_v22 = vld [vmem:[%s9238_s2 + $0x1a8] sm:$0xff] }
 0x142   : > { %6073 = vmatmul.msk.bf16.gmra.mxu0 %vm2259_vm15, %v2216_v49 }
 0x144   : > { %v1796_v1 = vpop.permute.xlu1 %1795 }
 0x145   : > { %3118 = vmatpush.bf16.msrb.mxu0 %v6680_v39  ;;  %6831 = vmatpush.bf16.msra.mxu2 %v6680_v39 }
 0x146   : > { %v1706_v42 = vpop.permute.xlu2 %1705 }
 0x147   : > { %v2084_v21 = vsel %vm2060_vm6, %v1644_v58, %v1706_v42 }
 0x148   : > { %v6672_v36 = vld [vmem:[#allocation2 + $0xc] sm:$0xf0]  ;;  %v2104_v63 = vsel %vm2088_vm8, %v2084_v21, %v1751_v61 }
 0x149   : > { %v6111_v0 = vor.u32 %v6672_v36, %v6110_v34  ;;  %v2123_v24 = vsel %vm2107_vm9, %v2104_v63, %v1796_v1  ;;  %v2614_v1 = vld [vmem:[#allocation2 + $0x4] sm:$0xf]  ;;  %v2616_v28 = vld [vmem:[#allocation2 + $0x10] sm:$0xf]  ;;  %4915 = vmatpush.bf16.msra.mxu0 %v6751_v16 }
 0x14a   : > { %v2651_v31 = vshrl.u32 %v2614_v1, 16  ;;  %v2664_v15 = vshrl.u32 %v2616_v28, 16  ;;  %v2654_v40 = vshll.u32 %v2614_v1, 16 }
 0x14b   : > { %2990 = vmatmul.bf16.vlgmr.msra.gmra.mxu1 %v6111_v0 }
 0x14c   : > { %v2653_v47 = vrot.slane %v2651_v31, 7  ;;  %v6718_v31 = vld [vmem:[%s9238_s2 + $0xf0] sm:$0xff] }
 0x14d   : > { %v2296_v41 = vpop.f32.mrf.mxu0  ;;  %4916 = vmatpush.bf16.msra.mxu0 %v6750_v14  ;;  %v6744_v14 = vld [vmem:[%s9238_s2 + $0x180] sm:$0xff] }
 0x14e   : > { %v1859_v55 = vpop.permute.xlu2 %1858  ;;  %v2297_v30 = vadd.f32 %v8432_v17, %v2296_v41 }
 0x14f   : > { %v1904_v23 = vpop.permute.xlu0 %1903  ;;  %v2142_v44 = vsel %vm2126_vm10, %v2123_v24, %v1859_v55 }
 0x150   : > { %vm2338_vm1 = vcmp.ge.f32.partialorder %v2297_v30, 0.0  ;;  %v2356_v57 = vmul.f32 0.01, %v2297_v30  ;;  %v2161_v50 = vsel %vm2145_vm11, %v2142_v44, %v1904_v23  ;;  %v2656_v44 = vor.u32 %v2654_v40, %v2653_v47  ;;  %v6717_v40 = vld [vmem:[%s9238_s2 + $0xe8] sm:$0xff] }
 0x151   : > { %4917 = vmatpush.bf16.msra.mxu0 %v6749_v22 }
 0x152   : > { %v2374_v20 = vsel %vm2338_vm1, %v2297_v30, %v2356_v57  ;;  %v2615_v30 = vld [vmem:[#allocation2 + $0xc] sm:$0x8]  ;;  %v2646_v57 = vshrl.u32 %v2613_v13, 16 }
 0x153   : > { %v2539_v7 = vpack.c.bf16 %v2374_v20, %v2374_v20  ;;  %v2659_v23 = vshrl.u32 %v2615_v30, 16  ;;  %v2666_v20 = vrot.slane %v2664_v15, 7 }
 0x154   : > { %v6076_v33 = vrot.slane %v2646_v57, 11 }
 0x155   : > { %v1949_v56 = vpop.permute.xlu1 %1948  ;;  %2557 = vst [vmem:[#allocation2 + $0x1c] sm:$0xf] %v2539_v7  ;;  %v2298_v38 = vpop.f32.mrf.mxu0 }
 0x156   : > { %v2012_v46 = vpop.permute.xlu2 %2011  ;;  %v2299_v19 = vadd.f32 %v8432_v17, %v2298_v38  ;;  %v2180_v4 = vsel %vm2164_vm12, %v2161_v50, %v1949_v56  ;;  %v2667_v56 = vshll.u32 %v2616_v28, 16 }
 0x157   : > { %v2199_v48 = vsel %vm2183_vm13, %v2180_v4, %v2012_v46  ;;  %v6077_v46 = vrot.slane %v2659_v23, 11  ;;  %v2623_v23 = vld [vmem:[#allocation2 + $0x3c] sm:$0x8] }
 0x158   : > { %vm2339_vm2 = vcmp.ge.f32.partialorder %v2299_v19, 0.0  ;;  %v2357_v2 = vmul.f32 0.01, %v2299_v19  ;;  %v2669_v38 = vor.u32 %v2667_v56, %v2666_v20  ;;  %v2627_v56 = vld [vmem:[#allocation2 + $0x54] sm:$0x8] }
 0x15a   : > { %v2375_v35 = vsel %vm2339_vm2, %v2299_v19, %v2357_v2  ;;  %v2657_v19 = vsel %vm7112_vm4, %v6076_v33, %v2656_v44  ;;  %v2670_v37 = vsel %vm7112_vm4, %v6077_v46, %v2669_v38 }
 0x15b   : > { %v2540_v3 = vpack.c.bf16 %v2375_v35, %v2375_v35 }
 0x15c   : > { %v6114_v42 = vld [vmem:[#allocation2 + $0x1c] sm:$0xf] }
 0x15d   : > { %v2057_v51 = vpop.permute.xlu0 %2056  ;;  %v1708_v60 = vpop.permute.xlu1 %1707  ;;  %2558 = vst [vmem:[#allocation2 + $0x28] sm:$0xf] %v2540_v3  ;;  %v2618_v39 = vld [vmem:[#allocation2 + $0x1c] sm:$0xf]  ;;  %v6748_v3 = vld [vmem:[%s9238_s2 + $0x1a0] sm:$0xff] }
 0x15e   : > { %v1753_v6 = vpop.permute.xlu2 %1752  ;;  %v2218_v49 = vsel %vm2202_vm14, %v2199_v48, %v2057_v51  ;;  %v2087_v8 = vsel %vm2060_vm6, %v1645_v29, %v1708_v60  ;;  %v3031_v48 = vunpack.c.l.b16 %v2657_v19  ;;  %v3032_v51 = vunpack.c.l.b16 %v2670_v37  ;;  %4918 = vmatpush.bf16.msra.mxu0 %v6748_v3  ;;  %v2621_v37 = vld [vmem:[#allocation2 + $0x30] sm:$0x8] }
 0x15f   : > { %6074 = vmatmul.msk.bf16.gmra.mxu0 %vm2259_vm15, %v2218_v49  ;;  %v2106_v10 = vsel %vm2088_vm8, %v2087_v8, %v1753_v6  ;;  %v2619_v8 = vld [vmem:[#allocation2 + $0x24] sm:$0x8]  ;;  %v2680_v28 = vshll.u32 %v2618_v39, 16 }
 0x163   : > { %v2301_v27 = vpop.f32.mrf.mxu0 }
 0x164   : > { %v2302_v32 = vadd.f32 %v8432_v17, %v2301_v27  ;;  %v6673_v34 = vld [vmem:[#allocation2 + $0x24] sm:$0xf0]  ;;  %v2677_v27 = vshrl.u32 %v2618_v39, 16 }
 0x165   : > { %v1798_v62 = vpop.permute.xlu0 %1797  ;;  %v1861_v5 = vpop.permute.xlu1 %1860  ;;  %v6115_v43 = vor.u32 %v6673_v34, %v6114_v42  ;;  %v2620_v2 = vld [vmem:[#allocation2 + $0x28] sm:$0xf]  ;;  %v2685_v42 = vshrl.u32 %v2619_v8, 16  ;;  %v2698_v8 = vshrl.u32 %v2621_v37, 16 }
 0x166   : > { %v2125_v59 = vsel %vm2107_vm9, %v2106_v10, %v1798_v62  ;;  %v1906_v58 = vpop.permute.xlu2 %1905  ;;  %vm2340_vm3 = vcmp.ge.f32.partialorder %v2302_v32, 0.0  ;;  %v2358_v61 = vmul.f32 0.01, %v2302_v32  ;;  %v2690_v6 = vshrl.u32 %v2620_v2, 16 }
 0x167   : > { %v2144_v25 = vsel %vm2126_vm10, %v2125_v59, %v1861_v5  ;;  %2995 = vmatmul.bf16.gmra.mxu1 %v6115_v43  ;;  %v3047_v62 = vpack.c.b16 %v3032_v51, %v3031_v48  ;;  %v2679_v43 = vrot.slane %v2677_v27, 7 }
 0x168   : > { %v2376_v36 = vsel %vm2340_vm3, %v2302_v32, %v2358_v61  ;;  %v2163_v12 = vsel %vm2145_vm11, %v2144_v25, %v1906_v58  ;;  %v2617_v32 = vld [vmem:[#allocation2 + $0x18] sm:$0x8]  ;;  %v2692_v34 = vrot.slane %v2690_v6, 7  ;;  %v2693_v25 = vshll.u32 %v2620_v2, 16 }
 0x169   : > { %v2541_v0 = vpack.c.bf16 %v2376_v36, %v2376_v36  ;;  %v6747_v58 = vld [vmem:[%s9238_s2 + $0x198] sm:$0xff]  ;;  %v2672_v61 = vshrl.u32 %v2617_v32, 16 }
 0x16a   : > { %v6719_v36 = vld [vmem:[%s9238_s2 + $0xf8] sm:$0xff]  ;;  %4919 = vmatpush.bf16.msra.mxu0 %v6747_v58 }
 0x16b   : > { %2559 = vst [vmem:[#allocation2 + $0x34] sm:$0xf] %v2541_v0  ;;  %v2303_v45 = vpop.f32.mrf.mxu0  ;;  %v6746_v0 = vld [vmem:[%s9238_s2 + $0x190] sm:$0xff]  ;;  %3916 = vmatpush.bf16.msrb.mxu1 %v6719_v36  ;;  %v6078_v15 = vrot.slane %v2672_v61, 11 }
 0x16c   : > { %v2304_v21 = vadd.f32 %v8432_v17, %v2303_v45  ;;  %v2695_v45 = vor.u32 %v2693_v25, %v2692_v34  ;;  %v6716_v34 = vld [vmem:[%s9238_s2 + $0xe0] sm:$0xff] }
 0x16d   : > { %v1951_v55 = vpop.permute.xlu0 %1950  ;;  %v2014_v41 = vpop.permute.xlu1 %2013 }
 0x16e   : > { %v2182_v63 = vsel %vm2164_vm12, %v2163_v12, %v1951_v55  ;;  %v2059_v54 = vpop.permute.xlu2 %2058  ;;  %vm2341_vm6 = vcmp.ge.f32.partialorder %v2304_v21, 0.0  ;;  %v2359_v53 = vmul.f32 0.01, %v2304_v21  ;;  %v6079_v12 = vrot.slane %v2685_v42, 11  ;;  %4920 = vmatpush.bf16.msra.mxu0 %v6746_v0  ;;  %v6727_v0 = vld [vmem:[%s9238_s2 + $0x138] sm:$0xff] }
 0x16f   : > { %v2201_v11 = vsel %vm2183_vm13, %v2182_v63, %v2014_v41  ;;  %v2682_v55 = vor.u32 %v2680_v28, %v2679_v43  ;;  %v2625_v41 = vld [vmem:[#allocation2 + $0x48] sm:$0x8]  ;;  %3917 = vmatpush.bf16.msrb.mxu1 %v6718_v31  ;;  %4094 = vmatpush.bf16.msrb.mxu2 %v6727_v0 }
 0x170   : > { %v2220_v18 = vsel %vm2202_vm14, %v2201_v11, %v2059_v54  ;;  %v2377_v24 = vsel %vm2341_vm6, %v2304_v21, %v2359_v53  ;;  %v6745_v63 = vld [vmem:[%s9238_s2 + $0x188] sm:$0xff]  ;;  %v2696_v54 = vsel %vm7112_vm4, %v6079_v12, %v2695_v45  ;;  %v2724_v20 = vshrl.u32 %v2625_v41, 16  ;;  %v8611_v12 = vld [vmem:[#allocation2 + $0x10] sm:$0xf] }
 0x171   : > { %6075 = vmatmul.msk.bf16.gmra.mxu0 %vm2259_vm15, %v2220_v18  ;;  %v2542_v7 = vpack.c.bf16 %v2377_v24, %v2377_v24  ;;  %v2683_v18 = vsel %vm7112_vm4, %v6078_v15, %v2682_v55  ;;  %v3034_v16 = vunpack.c.l.b16 %v2696_v54  ;;  %v6080_v45 = vrot.slane %v2698_v8, 11  ;;  %v8615_v15 = vld [vmem:[#allocation2 + $0xc] sm:$0x8]  ;;  %v3582_v54 = vld [vmem:[#allocation2 + $0x1c] sm:$0xf] }
 0x172   : > { %v6118_v4 = vld [vmem:[#allocation2 + $0x34] sm:$0xf]  ;;  %4921 = vmatpush.bf16.msra.mxu0 %v6745_v63  ;;  %v3033_v46 = vunpack.c.l.b16 %v2683_v18  ;;  %v2629_v18 = vld [vmem:[#allocation2 + $0x60] sm:$0x8] }
 0x173   : > { %2560 = vst [vmem:[#allocation2 + $0x40] sm:$0xf] %v2542_v7  ;;  %v2622_v24 = vld [vmem:[#allocation2 + $0x34] sm:$0xf]  ;;  %3918 = vmatpush.bf16.msrb.mxu1 %v6717_v40 }
 0x174   : > { %v2703_v22 = vshrl.u32 %v2622_v24, 16  ;;  %v3048_v39 = vpack.c.b16 %v3034_v16, %v3033_v46  ;;  %v2706_v61 = vshll.u32 %v2622_v24, 16  ;;  %v3581_v24 = vld [vmem:[#allocation2 + $0x18] sm:$0x8]  ;;  %v4580_v16 = vld [vmem:[#allocation2 + $0x24] sm:$0x8] }
 0x175   : > { %v2750_v46 = vshrl.u32 %v2629_v18, 16  ;;  %v6726_v18 = vld [vmem:[%s9238_s2 + $0x130] sm:$0xff] }
 0x176   : > { %4922 = vmatpush.bf16.msra.mxu0 %v6744_v14  ;;  %4095 = vmatpush.bf16.msrb.mxu2 %v6726_v18 }
 0x177   : > { %3919 = vmatpush.bf16.msrb.mxu1 %v6716_v34 }
 0x179   : > { %v2306_v50 = vpop.f32.mrf.mxu0 }
 0x17a   : > { %v2307_v9 = vadd.f32 %v8432_v17, %v2306_v50  ;;  %v6674_v29 = vld [vmem:[#allocation2 + $0x3c] sm:$0xf0]  ;;  %v2711_v50 = vshrl.u32 %v2623_v23, 16 }
 0x17b   : > { %v6119_v60 = vor.u32 %v6674_v29, %v6118_v4  ;;  %v2624_v47 = vld [vmem:[#allocation2 + $0x40] sm:$0xf]  ;;  %v2737_v4 = vshrl.u32 %v2627_v56, 16  ;;  %v3630_v56 = vshrl.u32 %v3582_v54, 16 }
 0x17c   : > { %vm2342_vm7 = vcmp.ge.f32.partialorder %v2307_v9, 0.0  ;;  %v2360_v35 = vmul.f32 0.01, %v2307_v9  ;;  %v2716_v33 = vshrl.u32 %v2624_v47, 16  ;;  %v2719_v32 = vshll.u32 %v2624_v47, 16 }
 0x17d   : > { %3000 = vmatmul.bf16.gmra.mxu1 %v6119_v60  ;;  %v3617_v47 = vshrl.u32 %v8611_v12, 16 }
 0x17e   : > { %v2378_v49 = vsel %vm2342_vm7, %v2307_v9, %v2360_v35  ;;  %v6082_v9 = vrot.slane %v2724_v20, 11  ;;  %v2718_v51 = vrot.slane %v2716_v33, 7  ;;  %v4579_v20 = vld [vmem:[#allocation2 + $0x1c] sm:$0xf]  ;;  %v2631_v33 = vld [vmem:[#allocation2 + $0x6c] sm:$0x8] }
 0x17f   : > { %v2543_v10 = vpack.c.bf16 %v2378_v49, %v2378_v49 }
 0x180   : > { %v2721_v43 = vor.u32 %v2719_v32, %v2718_v51 }
 0x181   : > { %2561 = vst [vmem:[#allocation2 + $0x4c] sm:$0xf] %v2543_v10  ;;  %v2308_v5 = vpop.f32.mrf.mxu0  ;;  %3119 = vmatmul.bf16.vlgmr.msrb.gmra.mxu0 %v3047_v62  ;;  %v2705_v10 = vrot.slane %v2703_v22, 7  ;;  %v6083_v62 = vrot.slane %v2737_v4, 11  ;;  %v6713_v22 = vld [vmem:[%s9238_s2 + $0xc8] sm:$0xff]  ;;  %v3625_v4 = vshrl.u32 %v3581_v24, 16 }
 0x182   : > { %v2309_v59 = vadd.f32 %v8432_v17, %v2308_v5 }
 0x183   : > { %v2708_v31 = vor.u32 %v2706_v61, %v2705_v10  ;;  %v6084_v10 = vrot.slane %v2750_v46, 11  ;;  %v6253_v34 = vrot.slane %v3625_v4, 11  ;;  %v4584_v46 = vld [vmem:[#allocation2 + $0x3c] sm:$0x8] }
 0x184   : > { %vm2343_vm8 = vcmp.ge.f32.partialorder %v2309_v59, 0.0  ;;  %v2361_v1 = vmul.f32 0.01, %v2309_v59 }
 0x185   : > { %v2709_v23 = vsel %vm7112_vm4, %v6080_v45, %v2708_v31 }
 0x186   : > { %v2379_v21 = vsel %vm2343_vm8, %v2309_v59, %v2361_v1  ;;  %v6081_v59 = vrot.slane %v2711_v50, 11  ;;  %v6715_v1 = vld [vmem:[%s9238_s2 + $0xd8] sm:$0xff]  ;;  %v3619_v50 = vrot.slane %v3617_v47, 7  ;;  %v3035_v37 = vunpack.c.l.b16 %v2709_v23 }
 0x187   : > { %v2544_v13 = vpack.c.bf16 %v2379_v21, %v2379_v21  ;;  %3920 = vmatpush.bf16.msrb.mxu1 %v6715_v1 }
 0x188   : > { %v2626_v30 = vld [vmem:[#allocation2 + $0x4c] sm:$0xf] }
 0x189   : > { %2562 = vst [vmem:[#allocation2 + $0x58] sm:$0xf] %v2544_v13  ;;  %v2311_v53 = vpop.f32.mrf.mxu0  ;;  %v2729_v11 = vshrl.u32 %v2626_v30, 16  ;;  %v2732_v2 = vshll.u32 %v2626_v30, 16  ;;  %v6122_v35 = vld [vmem:[#allocation2 + $0x4c] sm:$0xf] }
 0x18a   : > { %v2312_v57 = vadd.f32 %v8432_v17, %v2311_v53  ;;  %v4581_v30 = vld [vmem:[#allocation2 + $0x28] sm:$0xf]  ;;  %v2722_v53 = vsel %vm7112_vm4, %v6081_v59, %v2721_v43  ;;  %v3633_v59 = vshll.u32 %v3582_v54, 16 }
 0x18b   : > { %v2731_v44 = vrot.slane %v2729_v11, 7  ;;  %v6714_v11 = vld [vmem:[%s9238_s2 + $0xd0] sm:$0xff]  ;;  %v3036_v14 = vunpack.c.l.b16 %v2722_v53 }
 0x18c   : > { %vm2344_vm9 = vcmp.ge.f32.partialorder %v2312_v57, 0.0  ;;  %v2362_v7 = vmul.f32 0.01, %v2312_v57  ;;  %3921 = vmatpush.bf16.msrb.mxu1 %v6714_v11 }
 0x18d   : > { %v2734_v6 = vor.u32 %v2732_v2, %v2731_v44  ;;  %v3612_v44 = vshrl.u32 %v8615_v15, 16  ;;  %v4624_v2 = vshrl.u32 %v4580_v16, 16  ;;  %v3049_v51 = vpack.c.b16 %v3036_v14, %v3035_v37  ;;  %v3586_v16 = vld [vmem:[#allocation2 + $0x34] sm:$0xf] }
 0x18e   : > { %v2380_v38 = vsel %vm2344_vm9, %v2312_v57, %v2362_v7  ;;  %v4629_v7 = vshrl.u32 %v4581_v30, 16 }
 0x18f   : > { %v2545_v19 = vpack.c.bf16 %v2380_v38, %v2380_v38  ;;  %v2735_v25 = vsel %vm7112_vm4, %v6082_v9, %v2734_v6  ;;  %v4616_v9 = vshrl.u32 %v4579_v20, 16  ;;  %v6445_v0 = vrot.slane %v4624_v2, 11 }
 0x190   : > { %v6675_v29 = vld [vmem:[#allocation2 + $0x54] sm:$0xf0]  ;;  %v3037_v55 = vunpack.c.l.b16 %v2735_v25  ;;  %3922 = vmatpush.bf16.msrb.mxu1 %v6713_v22  ;;  %v6252_v15 = vrot.slane %v3612_v44, 11  ;;  %v4583_v44 = vld [vmem:[#allocation2 + $0x34] sm:$0xf] }
 0x191   : > { %v2628_v3 = vld [vmem:[#allocation2 + $0x58] sm:$0xf]  ;;  %2563 = vst [vmem:[#allocation2 + $0x64] sm:$0xf] %v2545_v19  ;;  %v6123_v48 = vor.u32 %v6675_v29, %v6122_v35  ;;  %v2313_v60 = vpop.f32.mrf.mxu0  ;;  %3124 = vmatmul.bf16.gmra.mxu0 %v3048_v39  ;;  %v3620_v19 = vshll.u32 %v8611_v12, 16  ;;  %v4631_v35 = vrot.slane %v4629_v7, 7 }
 0x192   : > { %v2742_v49 = vshrl.u32 %v2628_v3, 16  ;;  %v2314_v27 = vadd.f32 %v8432_v17, %v2313_v60  ;;  %v2745_v42 = vshll.u32 %v2628_v3, 16  ;;  %v4578_v39 = vld [vmem:[#allocation2 + $0x18] sm:$0x8]  ;;  %v2763_v3 = vshrl.u32 %v2631_v33, 16 }
 0x193   : > { %3005 = vmatmul.bf16.gmra.mxu1 %v6123_v48  ;;  %v3632_v48 = vrot.slane %v3630_v56, 7  ;;  %v4618_v1 = vrot.slane %v4616_v9, 7  ;;  %v3584_v56 = vld [vmem:[#allocation2 + $0x28] sm:$0xf]  ;;  %v3656_v9 = vshrl.u32 %v3586_v16, 16 }
 0x194   : > { %v2744_v5 = vrot.slane %v2742_v49, 7  ;;  %vm2345_vm10 = vcmp.ge.f32.partialorder %v2314_v27, 0.0  ;;  %v2363_v58 = vmul.f32 0.01, %v2314_v27  ;;  %v6085_v61 = vrot.slane %v2763_v3, 11 }
 0x195   : > { %v3635_v12 = vor.u32 %v3633_v59, %v3632_v48  ;;  %v3643_v2 = vshrl.u32 %v3584_v56, 16  ;;  %v4642_v3 = vshrl.u32 %v4583_v44, 16  ;;  %v4650_v48 = vshrl.u32 %v4584_v46, 16  ;;  %v6725_v59 = vld [vmem:[%s9238_s2 + $0x128] sm:$0xff] }
 0x196   : > { %v2747_v36 = vor.u32 %v2745_v42, %v2744_v5  ;;  %v2381_v28 = vsel %vm2345_vm10, %v2314_v27, %v2363_v58  ;;  %v4611_v5 = vshrl.u32 %v4578_v39, 16  ;;  %v4632_v42 = vshll.u32 %v4581_v30, 16  ;;  %4096 = vmatpush.bf16.msrb.mxu2 %v6725_v59 }
 0x197   : > { %v2546_v21 = vpack.c.bf16 %v2381_v28, %v2381_v28 }
 0x198   : > { %v2748_v13 = vsel %vm7112_vm4, %v6083_v62, %v2747_v36  ;;  %v2630_v63 = vld [vmem:[#allocation2 + $0x64] sm:$0xf]  ;;  %v4634_v28 = vor.u32 %v4632_v42, %v4631_v35 }
 0x199   : > { %v3038_v41 = vunpack.c.l.b16 %v2748_v13  ;;  %2564 = vst [vmem:[#allocation2 + $0x70] sm:$0xf] %v2546_v21  ;;  %v2755_v57 = vshrl.u32 %v2630_v63, 16  ;;  %v2758_v29 = vshll.u32 %v2630_v63, 16  ;;  %v6126_v60 = vld [vmem:[#allocation2 + $0x64] sm:$0xf]  ;;  %v3622_v63 = vor.u32 %v3620_v19, %v3619_v50 }
 0x19a   : > { %v6712_v36 = vld [vmem:[%s9238_s2 + $0xc0] sm:$0xff]  ;;  %v4619_v13 = vshll.u32 %v4579_v20, 16  ;;  %v4635_v47 = vsel %vm7112_vm4, %v6445_v0, %v4634_v28  ;;  %v3585_v50 = vld [vmem:[#allocation2 + $0x30] sm:$0x8] }
 0x19b   : > { %v3050_v40 = vpack.c.b16 %v3038_v41, %v3037_v55  ;;  %v2757_v38 = vrot.slane %v2755_v57, 7  ;;  %3923 = vmatpush.bf16.msrb.mxu1 %v6712_v36  ;;  %v6444_v41 = vrot.slane %v4611_v5, 11  ;;  %v4585_v20 = vld [vmem:[#allocation2 + $0x40] sm:$0xf]  ;;  %v4836_v33 = vunpack.c.l.b16 %v4635_v47  ;;  %v3583_v35 = vld [vmem:[#allocation2 + $0x24] sm:$0x8] }
 0x19c   : > { %v4621_v53 = vor.u32 %v4619_v13, %v4618_v1  ;;  %v4655_v37 = vshrl.u32 %v4585_v20, 16  ;;  %v3645_v5 = vrot.slane %v3643_v2, 7  ;;  %v4658_v42 = vshll.u32 %v4585_v20, 16  ;;  %v2635_v28 = vld [vmem:[#allocation2 + $0x84] sm:$0x8] }
 0x19d   : > { %3134 = vmatmul.bf16.vlgmr.msra.gmra.mxu2 %v3050_v40  ;;  %v2760_v27 = vor.u32 %v2758_v29, %v2757_v38  ;;  %v3636_v40 = vsel %vm7112_vm4, %v6253_v34, %v3635_v12  ;;  %v3623_v38 = vsel %vm7112_vm4, %v6252_v15, %v3622_v63  ;;  %v2633_v34 = vld [vmem:[#allocation2 + $0x78] sm:$0x8]  ;;  %v3646_v36 = vshll.u32 %v3584_v56, 16  ;;  %v3588_v56 = vld [vmem:[#allocation2 + $0x40] sm:$0xf] }
 0x19e   : > { %v4622_v14 = vsel %vm7112_vm4, %v6444_v41, %v4621_v53  ;;  %v3837_v22 = vunpack.c.l.b16 %v3636_v40  ;;  %v3836_v39 = vunpack.c.l.b16 %v3623_v38  ;;  %v6447_v1 = vrot.slane %v4650_v48, 11  ;;  %v3589_v48 = vld [vmem:[#allocation2 + $0x48] sm:$0x8] }
 0x19f   : > { %v2761_v31 = vsel %vm7112_vm4, %v6084_v10, %v2760_v27  ;;  %v3658_v27 = vrot.slane %v3656_v9, 7  ;;  %v3587_v9 = vld [vmem:[#allocation2 + $0x3c] sm:$0x8] }
 0x1a0   : > { %v6676_v6 = vld [vmem:[#allocation2 + $0x6c] sm:$0xf0]  ;;  %v2316_v62 = vpop.f32.mrf.mxu0  ;;  %v3039_v11 = vunpack.c.l.b16 %v2761_v31  ;;  %v4645_v31 = vshll.u32 %v4583_v44, 16 }
 0x1a1   : > { %v2632_v49 = vld [vmem:[#allocation2 + $0x70] sm:$0xf]  ;;  %v6127_v8 = vor.u32 %v6676_v6, %v6126_v60  ;;  %3129 = vmatmul.bf16.gmra.mxu0 %v3049_v51  ;;  %v2317_v58 = vadd.f32 %v8432_v17, %v2316_v62  ;;  %v3651_v51 = vshrl.u32 %v3585_v50, 16  ;;  %v3638_v62 = vshrl.u32 %v3583_v35, 16 }
 0x1a2   : > { %v2768_v32 = vshrl.u32 %v2632_v49, 16  ;;  %v2771_v25 = vshll.u32 %v2632_v49, 16  ;;  %v4582_v6 = vld [vmem:[#allocation2 + $0x30] sm:$0x8]  ;;  %v4657_v49 = vrot.slane %v4655_v37, 7 }
 0x1a3   : > { %3010 = vmatmul.bf16.gmra.mxu1 %v6127_v8  ;;  %vm2346_vm11 = vcmp.ge.f32.partialorder %v2317_v58, 0.0  ;;  %v2364_v45 = vmul.f32 0.01, %v2317_v58  ;;  %v3852_v8 = vpack.c.b16 %v3837_v22, %v3836_v39  ;;  %v6255_v12 = vrot.slane %v3651_v51, 11  ;;  %v4587_v22 = vld [vmem:[#allocation2 + $0x4c] sm:$0xf] }
 0x1a4   : > { %v2770_v43 = vrot.slane %v2768_v32, 7  ;;  %v4660_v0 = vor.u32 %v4658_v42, %v4657_v49  ;;  %v6254_v15 = vrot.slane %v3638_v62, 11  ;;  %v3669_v51 = vshrl.u32 %v3588_v56, 16  ;;  %v8671_v42 = vld [vmem:[%s9239_s3] ss:$0 sm:$0xff] }
 0x1a5   : > { %v2382_v55 = vsel %vm2346_vm11, %v2317_v58, %v2364_v45  ;;  %v3659_v58 = vshll.u32 %v3586_v16, 16  ;;  %v4589_v16 = vld [vmem:[#allocation2 + $0x58] sm:$0xf] }
 0x1a6   : > { %v2773_v21 = vor.u32 %v2771_v25, %v2770_v43  ;;  %v2547_v54 = vpack.c.bf16 %v2382_v55, %v2382_v55  ;;  %v4637_v43 = vshrl.u32 %v4582_v6, 16  ;;  %v4644_v25 = vrot.slane %v4642_v3, 7  ;;  %v4586_v6 = vld [vmem:[#allocation2 + $0x48] sm:$0x8] }
 0x1a7   : > { %v3661_v45 = vor.u32 %v3659_v58, %v3658_v27  ;;  %v3648_v55 = vor.u32 %v3646_v36, %v3645_v5  ;;  %v4661_v53 = vsel %vm7112_vm4, %v6447_v1, %v4660_v0  ;;  %v3677_v58 = vshrl.u32 %v3589_v48, 16 }
 0x1a8   : > { %v2774_v30 = vsel %vm7112_vm4, %v6085_v61, %v2773_v21  ;;  %2565 = vst [vmem:[#allocation2 + $0x7c] sm:$0xf] %v2547_v54  ;;  %v2318_v24 = vpop.f32.mrf.mxu0  ;;  %v6703_v61 = vld [vmem:[%s9238_s2 + $0xb8] sm:$0xff]  ;;  %v2776_v21 = vshrl.u32 %v2633_v34, 16  ;;  %v6446_v41 = vrot.slane %v4637_v43, 11  ;;  %v2789_v54 = vshrl.u32 %v2635_v28, 16 }
 0x1a9   : > { %v3040_v57 = vunpack.c.l.b16 %v2774_v30  ;;  %v2319_v7 = vadd.f32 %v8432_v17, %v2318_v24  ;;  %v4835_v17 = vunpack.c.l.b16 %v4622_v14  ;;  %3513 = vmatpush.bf16.msrb.mxu3 %v6703_v61  ;;  %v4647_v30 = vor.u32 %v4645_v31, %v4644_v25  ;;  %v3590_v14 = vld [vmem:[#allocation2 + $0x4c] sm:$0xf] }
 0x1aa   : > { %v3662_v40 = vsel %vm7112_vm4, %v6255_v12, %v3661_v45  ;;  %v6086_v24 = vrot.slane %v2776_v21, 11  ;;  %v6087_v44 = vrot.slane %v2789_v54, 11  ;;  %v4838_v50 = vunpack.c.l.b16 %v4661_v53 }
 0x1ab   : > { %v3051_v23 = vpack.c.b16 %v3040_v57, %v3039_v11  ;;  %vm2347_vm12 = vcmp.ge.f32.partialorder %v2319_v7, 0.0  ;;  %v2365_v19 = vmul.f32 0.01, %v2319_v7  ;;  %v4851_v60 = vpack.c.b16 %v4836_v33, %v4835_v17 }
 0x1ac   : > { %v4648_v33 = vsel %vm7112_vm4, %v6446_v41, %v4647_v30  ;;  %v3839_v37 = vunpack.c.l.b16 %v3662_v40  ;;  %v3682_v39 = vshrl.u32 %v3590_v14, 16  ;;  %v4663_v25 = vshrl.u32 %v4586_v6, 16  ;;  %v6724_v41 = vld [vmem:[%s9238_s2 + $0x120] sm:$0xff]  ;;  %v6702_v30 = vld [vmem:[%s9238_s2 + $0xb0] sm:$0xff] }
 0x1ad   : > { %3139 = vmatmul.bf16.gmra.mxu2 %v3051_v23  ;;  %v2383_v4 = vsel %vm2347_vm12, %v2319_v7, %v2365_v19  ;;  %v3649_v7 = vsel %vm7112_vm4, %v6254_v15, %v3648_v55  ;;  %v4588_v19 = vld [vmem:[#allocation2 + $0x54] sm:$0x8]  ;;  %v4837_v35 = vunpack.c.l.b16 %v4648_v33  ;;  %v3671_v1 = vrot.slane %v3669_v51, 7  ;;  %3514 = vmatpush.bf16.msrb.mxu3 %v6702_v30  ;;  %v3594_v40 = vld [vmem:[#allocation2 + $0x64] sm:$0xf] }
 0x1ae   : > { %v2548_v29 = vpack.c.bf16 %v2383_v4, %v2383_v4  ;;  %v4681_v4 = vshrl.u32 %v4589_v16, 16  ;;  %v3838_v3 = vunpack.c.l.b16 %v3649_v7  ;;  %v4676_v49 = vshrl.u32 %v4588_v19, 16  ;;  %4097 = vmatpush.bf16.msrb.mxu2 %v6724_v41  ;;  %v4591_v33 = vld [vmem:[#allocation2 + $0x64] sm:$0xf] }
 0x1af   : > { %v2634_v10 = vld [vmem:[#allocation2 + $0x7c] sm:$0xf]  ;;  %v3684_v61 = vrot.slane %v3682_v39, 7  ;;  %v4684_v28 = vshll.u32 %v4589_v16, 16  ;;  %v3685_v12 = vshll.u32 %v3590_v14, 16  ;;  %v4671_v45 = vshll.u32 %v4587_v22, 16 }
 0x1b0   : > { %2566 = vst [vmem:[#allocation2 + $0x88] sm:$0xf] %v2548_v29  ;;  %v2781_v32 = vshrl.u32 %v2634_v10, 16  ;;  %v2784_v63 = vshll.u32 %v2634_v10, 16  ;;  %v6130_v11 = vld [vmem:[#allocation2 + $0x7c] sm:$0xf]  ;;  %v4852_v10 = vpack.c.b16 %v4838_v50, %v4837_v35  ;;  %v3853_v5 = vpack.c.b16 %v3839_v37, %v3838_v3 }
 0x1b1   : > { %4923 = vmatmul.bf16.vlgmr.msra.gmra.mxu0 %v4851_v60  ;;  %v4668_v29 = vshrl.u32 %v4587_v22, 16  ;;  %v4683_v59 = vrot.slane %v4681_v4, 7  ;;  %v6449_v31 = vrot.slane %v4676_v49, 11  ;;  %v3687_v54 = vor.u32 %v3685_v12, %v3684_v61  ;;  %v6701_v39 = vld [vmem:[%s9238_s2 + $0xa8] sm:$0xff] }
 0x1b2   : > { %v2783_v13 = vrot.slane %v2781_v32, 7  ;;  %v4694_v4 = vshrl.u32 %v4591_v33, 16  ;;  %3515 = vmatpush.bf16.msrb.mxu3 %v6701_v39 }
 0x1b3   : > { %3924 = vmatmul.bf16.vlgmr.msrb.gmra.mxu1 %v3852_v8  ;;  %v3664_v8 = vshrl.u32 %v3587_v9, 16  ;;  %v4670_v36 = vrot.slane %v4668_v29, 7  ;;  %v4686_v55 = vor.u32 %v4684_v28, %v4683_v59  ;;  %v4592_v9 = vld [vmem:[#allocation2 + $0x6c] sm:$0x8]  ;;  %v6723_v29 = vld [vmem:[%s9238_s2 + $0x118] sm:$0xff] }
 0x1b4   : > { %v2786_v23 = vor.u32 %v2784_v63, %v2783_v13  ;;  %v3672_v13 = vshll.u32 %v3588_v56, 16  ;;  %v6257_v63 = vrot.slane %v3677_v58, 11  ;;  %v3591_v56 = vld [vmem:[#allocation2 + $0x54] sm:$0x8]  ;;  %4098 = vmatpush.bf16.msrb.mxu2 %v6723_v29  ;;  %v3711_v58 = vshll.u32 %v3594_v40, 16 }
 0x1b5   : > { %v6256_v21 = vrot.slane %v3664_v8, 11  ;;  %v4687_v16 = vsel %vm7112_vm4, %v6449_v31, %v4686_v55  ;;  %v3690_v3 = vshrl.u32 %v3591_v56, 16  ;;  %v4702_v8 = vshrl.u32 %v4592_v9, 16  ;;  %v3160_v55 = vld [vmem:[#allocation2 + $0x4] sm:$0xf]  ;;  %v6721_v9 = vld [vmem:[%s9238_s2 + $0x108] sm:$0xff] }
 0x1b6   : > { %v2787_v2 = vsel %vm7112_vm4, %v6086_v24, %v2786_v23  ;;  %v4593_v24 = vld [vmem:[#allocation2 + $0x70] sm:$0xf]  ;;  %v3592_v23 = vld [vmem:[#allocation2 + $0x58] sm:$0xf]  ;;  %v3688_v7 = vsel %vm7112_vm4, %v6257_v63, %v3687_v54  ;;  %v4840_v37 = vunpack.c.l.b16 %v4687_v16  ;;  %v3196_v56 = vshll.u32 %v3160_v55, 16 }
 0x1b7   : > { %v6677_v57 = vld [vmem:[#allocation2 + $0x84] sm:$0xf0]  ;;  %v3041_v32 = vunpack.c.l.b16 %v2787_v2  ;;  %v4707_v50 = vshrl.u32 %v4593_v24, 16  ;;  %v3695_v19 = vshrl.u32 %v3592_v23, 16  ;;  %v3841_v2 = vunpack.c.l.b16 %v3688_v7  ;;  %v6722_v16 = vld [vmem:[%s9238_s2 + $0x110] sm:$0xff] }
 0x1b8   : > { %v2636_v47 = vld [vmem:[#allocation2 + $0x88] sm:$0xf]  ;;  %v6131_v18 = vor.u32 %v6677_v57, %v6130_v11  ;;  %v6448_v11 = vrot.slane %v4663_v25, 11  ;;  %v4673_v57 = vor.u32 %v4671_v45, %v4670_v36  ;;  %v4710_v25 = vshll.u32 %v4593_v24, 16  ;;  %v2637_v36 = vld [vmem:[#allocation2 + $0x90] sm:$0x8]  ;;  %4099 = vmatpush.bf16.msrb.mxu2 %v6722_v16 }
 0x1b9   : > { %v2794_v20 = vshrl.u32 %v2636_v47, 16  ;;  %v2797_v38 = vshll.u32 %v2636_v47, 16  ;;  %v3674_v47 = vor.u32 %v3672_v13, %v3671_v1  ;;  %v3698_v1 = vshll.u32 %v3592_v23, 16  ;;  %v2639_v13 = vld [vmem:[#allocation2 + $0x9c] sm:$0x8] }
 0x1ba   : > { %3015 = vmatmul.bf16.vlgmr.msra.gmra.mxu3 %v6131_v18  ;;  %v4674_v14 = vsel %vm7112_vm4, %v6448_v11, %v4673_v57  ;;  %v4697_v45 = vshll.u32 %v4591_v33, 16  ;;  %v6451_v31 = vrot.slane %v4702_v8, 11  ;;  %v2802_v41 = vshrl.u32 %v2637_v36, 16  ;;  %v8724_v29 = vld [vmem:[#allocation2 + $0x70] sm:$0xf] }
 0x1bb   : > { %v2796_v46 = vrot.slane %v2794_v20, 7  ;;  %v4839_v51 = vunpack.c.l.b16 %v4674_v14  ;;  %v2815_v57 = vshrl.u32 %v2639_v13, 16 }
 0x1bc   : > { %v6088_v33 = vrot.slane %v2802_v41, 11  ;;  %4100 = vmatpush.bf16.msrb.mxu2 %v6721_v9 }
 0x1bd   : > { %v2799_v17 = vor.u32 %v2797_v38, %v2796_v46  ;;  %v3593_v46 = vld [vmem:[#allocation2 + $0x60] sm:$0x8]  ;;  %v3708_v38 = vshrl.u32 %v3594_v40, 16 }
 0x1be   : > { %v3703_v6 = vshrl.u32 %v3593_v46, 16 }
 0x1bf   : > { %v2800_v60 = vsel %vm7112_vm4, %v6087_v44, %v2799_v17  ;;  %v2321_v27 = vpop.f32.mrf.mxu0  ;;  %v3675_v44 = vsel %vm7112_vm4, %v6256_v21, %v3674_v47  ;;  %v3710_v49 = vrot.slane %v3708_v38, 7  ;;  %v6699_v47 = vld [vmem:[%s9238_s2 + $0x98] sm:$0xff]  ;;  %v6698_v38 = vld [vmem:[%s9238_s2 + $0x90] sm:$0xff] }
 0x1c0   : > { %v3042_v62 = vunpack.c.l.b16 %v2800_v60  ;;  %v2322_v34 = vadd.f32 %v8671_v42, %v2321_v27  ;;  %v3840_v35 = vunpack.c.l.b16 %v3675_v44  ;;  %v4590_v60 = vld [vmem:[#allocation2 + $0x60] sm:$0x8]  ;;  %v6259_v28 = vrot.slane %v3703_v6, 11 }
 0x1c1   : > { %4928 = vmatmul.bf16.gmra.mxu0 %v4852_v10  ;;  %v4709_v10 = vrot.slane %v4707_v50, 7  ;;  %v4689_v61 = vshrl.u32 %v4590_v60, 16  ;;  %v3713_v12 = vor.u32 %v3711_v58, %v3710_v49  ;;  %v8730_v60 = vrot.slane %v3196_v56, 5 }
 0x1c2   : > { %v3052_v43 = vpack.c.b16 %v3042_v62, %v3041_v32  ;;  %vm2348_vm13 = vcmp.ge.f32.partialorder %v2322_v34, 0.0  ;;  %v2366_v0 = vmul.f32 0.01, %v2322_v34  ;;  %v6700_v32 = vld [vmem:[%s9238_s2 + $0xa0] sm:$0xff]  ;;  %v3697_v62 = vrot.slane %v3695_v19, 7 }
 0x1c3   : > { %3929 = vmatmul.bf16.gmra.mxu1 %v3853_v5  ;;  %v4853_v5 = vpack.c.b16 %v4840_v37, %v4839_v51  ;;  %v4712_v21 = vor.u32 %v4710_v25, %v4709_v10  ;;  %3516 = vmatpush.bf16.msrb.mxu3 %v6700_v32  ;;  %v6450_v63 = vrot.slane %v4689_v61, 11  ;;  %v3714_v40 = vsel %vm7112_vm4, %v6259_v28, %v3713_v12  ;;  %v8717_v19 = vld [vmem:[#allocation2 + $0x88] sm:$0xf]  ;;  %v3595_v28 = vld [vmem:[#allocation2 + $0x6c] sm:$0x8] }
 0x1c4   : > { %3144 = vmatmul.bf16.gmra.mxu2 %v3052_v43  ;;  %v2384_v15 = vsel %vm2348_vm13, %v2322_v34, %v2366_v0  ;;  %v3854_v34 = vpack.c.b16 %v3841_v2, %v3840_v35  ;;  %v4696_v43 = vrot.slane %v4694_v4, 7  ;;  %v6258_v0 = vrot.slane %v3690_v3, 11  ;;  %v8722_v2 = vld [vmem:[#allocation2 + $0x10] sm:$0xf]  ;;  %v8726_v3 = vld [vmem:[#allocation2 + $0x7c] sm:$0xf] }
 0x1c5   : > { %v2549_v53 = vpack.c.bf16 %v2384_v15, %v2384_v15  ;;  %v3700_v15 = vor.u32 %v3698_v1, %v3697_v62  ;;  %v4713_v23 = vsel %vm7112_vm4, %v6451_v31, %v4712_v21  ;;  %v3843_v37 = vunpack.c.l.b16 %v3714_v40  ;;  %v6697_v32 = vld [vmem:[%s9238_s2 + $0x88] sm:$0xff]  ;;  %v3597_v62 = vld [vmem:[#allocation2 + $0x78] sm:$0x8] }
 0x1c6   : > { %v4699_v54 = vor.u32 %v4697_v45, %v4696_v43  ;;  %v6089_v4 = vrot.slane %v2815_v57, 11  ;;  %v3207_v58 = vshrl.u32 %v8722_v2, 16  ;;  %v3210_v61 = vshll.u32 %v8722_v2, 16  ;;  %v4594_v31 = vld [vmem:[#allocation2 + $0x78] sm:$0x8] }
 0x1c7   : > { %2567 = vst [vmem:[#allocation2 + $0x94] sm:$0xf] %v2549_v53  ;;  %v2323_v18 = vpop.f32.mrf.mxu0  ;;  %v3701_v7 = vsel %vm7112_vm4, %v6258_v0, %v3700_v15  ;;  %3517 = vmatpush.bf16.msrb.mxu3 %v6699_v47  ;;  %v3721_v43 = vshrl.u32 %v8724_v29, 16  ;;  %v4720_v0 = vshrl.u32 %v8726_v3, 16  ;;  %v3729_v21 = vshrl.u32 %v3597_v62, 16 }
 0x1c8   : > { %v2324_v20 = vadd.f32 %v8671_v42, %v2323_v18  ;;  %v3193_v18 = vshrl.u32 %v3160_v55, 16  ;;  %v4700_v50 = vsel %vm7112_vm4, %v6450_v63, %v4699_v54  ;;  %v3716_v63 = vshrl.u32 %v3595_v28, 16 }
 0x1c9   : > { %v4841_v49 = vunpack.c.l.b16 %v4700_v50  ;;  %v3723_v54 = vrot.slane %v3721_v43, 7  ;;  %v4715_v57 = vshrl.u32 %v4594_v31, 16  ;;  %v4722_v47 = vrot.slane %v4720_v0, 7  ;;  %v8783_v0 = vld [vmem:[#allocation2 + $0x88] sm:$0xf] }
 0x1ca   : > { %vm2349_vm14 = vcmp.ge.f32.partialorder %v2324_v20, 0.0  ;;  %v2367_v22 = vmul.f32 0.01, %v2324_v20  ;;  %v8728_v51 = vrot.slane %v3193_v18, 4  ;;  %v4736_v40 = vshll.u32 %v8717_v19, 16  ;;  %v6696_v18 = vld [vmem:[%s9238_s2 + $0x80] sm:$0xff] }
 0x1cb   : > { %3518 = vmatpush.bf16.msrb.mxu3 %v6698_v38  ;;  %v6261_v16 = vrot.slane %v3729_v21, 11  ;;  %v4723_v56 = vshll.u32 %v8726_v3, 16  ;;  %v3209_v38 = vrot.slane %v3207_v58, 4  ;;  %v6260_v50 = vrot.slane %v3716_v63, 11  ;;  %v3601_v31 = vld [vmem:[#allocation2 + $0x90] sm:$0x8] }
 0x1cc   : > { %v2385_v17 = vsel %vm2349_vm14, %v2324_v20, %v2367_v22  ;;  %v8713_v22 = vld [vmem:[#allocation2 + $0x7c] sm:$0xf]  ;;  %v6452_v2 = vrot.slane %v4715_v57, 11 }
 0x1cd   : > { %v2550_v48 = vpack.c.bf16 %v2385_v17, %v2385_v17  ;;  %v4842_v17 = vunpack.c.l.b16 %v4713_v23  ;;  %v3734_v6 = vshrl.u32 %v8713_v22, 16 }
 0x1ce   : > { %v2638_v27 = vld [vmem:[#allocation2 + $0x94] sm:$0xf] }
 0x1cf   : > { %2568 = vst [vmem:[#allocation2 + $0xa0] sm:$0xf] %v2550_v48  ;;  %v2807_v59 = vshrl.u32 %v2638_v27, 16  ;;  %v6134_v53 = vld [vmem:[#allocation2 + $0x94] sm:$0xf]  ;;  %v2810_v11 = vshll.u32 %v2638_v27, 16  ;;  %v3842_v48 = vunpack.c.l.b16 %v3701_v7  ;;  %v4854_v36 = vpack.c.b16 %v4842_v17, %v4841_v49  ;;  %3519 = vmatpush.bf16.msrb.mxu3 %v6697_v32 }
 0x1d0   : > { %v4733_v27 = vshrl.u32 %v8717_v19, 16  ;;  %v3736_v13 = vrot.slane %v3734_v6, 7  ;;  %v4725_v17 = vor.u32 %v4723_v56, %v4722_v47  ;;  %v8776_v32 = vld [vmem:[#allocation2 + $0x94] sm:$0xf]  ;;  %v6767_v56 = vld [vmem:[%s9238_s2 + $0x238] sm:$0xff] }
 0x1d1   : > { %4933 = vmatmul.bf16.gmra.mxu0 %v4853_v5  ;;  %v2809_v30 = vrot.slane %v2807_v59, 7  ;;  %v3855_v59 = vpack.c.b16 %v3843_v37, %v3842_v48  ;;  %v8758_v37 = vpop.f32.mrf.mxu1  ;;  %v3760_v21 = vshrl.u32 %v8776_v32, 16 }
 0x1d2   : > { %v4735_v41 = vrot.slane %v4733_v27, 7 }
 0x1d3   : > { %3934 = vmatmul.bf16.gmra.mxu1 %v3854_v34  ;;  %v2812_v44 = vor.u32 %v2810_v11, %v2809_v30  ;;  %v4596_v34 = vld [vmem:[#allocation2 + $0x84] sm:$0x8]  ;;  %3520 = vmatpush.bf16.msrb.mxu3 %v6696_v18  ;;  %v3747_v18 = vshrl.u32 %v8783_v0, 16 }
 0x1d4   : > { %v4728_v55 = vshrl.u32 %v4596_v34, 16  ;;  %v8780_v34 = vld [vmem:[#allocation2 + $0x94] sm:$0xf] }
 0x1d5   : > { %v2813_v8 = vsel %vm7112_vm4, %v6088_v33, %v2812_v44  ;;  %v4738_v33 = vor.u32 %v4736_v40, %v4735_v41  ;;  %v3199_v44 = vor.u32 %v8730_v60, %v8728_v51  ;;  %v2641_v51 = vld [vmem:[#allocation2 + $0xa8] sm:$0x8]  ;;  %v6735_v60 = vld [vmem:[%s9238_s2 + $0x178] sm:$0xff] }
 0x1d6   : > { %v6678_v24 = vld [vmem:[#allocation2 + $0x9c] sm:$0xf0]  ;;  %v3043_v12 = vunpack.c.l.b16 %v2813_v8 }
 0x1d7   : > { %v2640_v20 = vld [vmem:[#allocation2 + $0xa0] sm:$0xf]  ;;  %v6135_v14 = vor.u32 %v6678_v24, %v6134_v53  ;;  %v3737_v53 = vshll.u32 %v8713_v22, 16  ;;  %v3212_v22 = vrot.slane %v3210_v61, 5  ;;  %v8772_v49 = vrot.slane %v3199_v44, 4  ;;  %4512 = vmatpush.bf16.msra.mxu3 %v6735_v60 }
 0x1d8   : > { %v2820_v46 = vshrl.u32 %v2640_v20, 16  ;;  %v2823_v35 = vshll.u32 %v2640_v20, 16  ;;  %v6720_v24 = vld [vmem:[%s9238_s2 + $0x100] sm:$0xff]  ;;  %v3724_v20 = vshll.u32 %v8724_v29, 16 }
 0x1d9   : > { %3020 = vmatmul.bf16.gmra.mxu3 %v6135_v14  ;;  %v3739_v7 = vor.u32 %v3737_v53, %v3736_v13  ;;  %v6453_v14 = vrot.slane %v4728_v55, 11  ;;  %4101 = vmatpush.bf16.msrb.mxu2 %v6720_v24  ;;  %v8770_v6 = vld [vmem:[#allocation2 + $0xa0] sm:$0xf]  ;;  %v4746_v55 = vshrl.u32 %v8780_v34, 16  ;;  %v3755_v24 = vshrl.u32 %v3601_v31, 16 }
 0x1da   : > { %v2822_v39 = vrot.slane %v2820_v46, 7  ;;  %v3726_v19 = vor.u32 %v3724_v20, %v3723_v54 }
 0x1db   : > { %v3740_v29 = vsel %vm7112_vm4, %v6261_v16, %v3739_v7  ;;  %v4739_v48 = vsel %vm7112_vm4, %v6453_v14, %v4738_v33  ;;  %v4749_v16 = vshll.u32 %v8780_v34, 16  ;;  %v3599_v14 = vld [vmem:[#allocation2 + $0x84] sm:$0x8]  ;;  %v3762_v33 = vrot.slane %v3760_v21, 7 }
 0x1dc   : > { %v2825_v10 = vor.u32 %v2823_v35, %v2822_v39  ;;  %v2326_v5 = vpop.f32.mrf.mxu0  ;;  %v4600_v39 = vld [vmem:[#allocation2 + $0x9c] sm:$0x8]  ;;  %v8761_v35 = vld [vmem:[#allocation2 + $0x14] sm:$0x1]  ;;  %v3727_v27 = vsel %vm7112_vm4, %v6260_v50, %v3726_v19  ;;  %v3845_v58 = vunpack.c.l.b16 %v3740_v29  ;;  %v4844_v43 = vunpack.c.l.b16 %v4739_v48 }
 0x1dd   : > { %v2327_v25 = vadd.f32 %v8671_v42, %v2326_v5  ;;  %v4726_v5 = vsel %vm7112_vm4, %v6452_v2, %v4725_v17  ;;  %v4762_v19 = vshll.u32 %v8770_v6, 16  ;;  %5511 = vmatpush.bf16.msra.mxu2 %v6767_v56  ;;  %v3742_v17 = vshrl.u32 %v3599_v14, 16  ;;  %v4604_v56 = vld [vmem:[#allocation2 + $0xb4] sm:$0x8] }
 0x1de   : > { %v2826_v1 = vsel %vm7112_vm4, %v6089_v4, %v2825_v10  ;;  %v3161_v4 = vld [vmem:[#allocation2 + $0x8] sm:$0x1]  ;;  %v3213_v10 = vor.u32 %v3212_v22, %v3209_v38  ;;  %v4843_v13 = vunpack.c.l.b16 %v4726_v5  ;;  %v4748_v38 = vrot.slane %v4746_v55, 7 }
 0x1df   : > { %v3044_v45 = vunpack.c.l.b16 %v2826_v1  ;;  %vm2350_vm15 = vcmp.ge.f32.partialorder %v2327_v25, 0.0  ;;  %v2368_v15 = vmul.f32 0.01, %v2327_v25  ;;  %v3202_v8 = vshll.u32 %v3161_v4, 16 }
 0x1e0   : > { %v3216_v1 = vshll.u32 %v8761_v35, 16  ;;  %v8792_v53 = vrot.slane %v3213_v10, 4  ;;  %v4855_v47 = vpack.c.b16 %v4844_v43, %v4843_v13  ;;  %v3750_v22 = vshll.u32 %v8783_v0, 16 }
 0x1e1   : > { %v3053_v30 = vpack.c.b16 %v3044_v45, %v3043_v12  ;;  %v2386_v11 = vsel %vm2350_vm15, %v2327_v25, %v2368_v15  ;;  %4938 = vmatmul.bf16.gmra.mxu0 %v4854_v36  ;;  %v2828_v25 = vshrl.u32 %v2641_v51, 16  ;;  %v4598_v36 = vld [vmem:[#allocation2 + $0x90] sm:$0x8]  ;;  %v4759_v12 = vshrl.u32 %v8770_v6, 16 }
 0x1e2   : > { %v2551_v23 = vpack.c.bf16 %v2386_v11, %v2386_v11  ;;  %v3844_v45 = vunpack.c.l.b16 %v3727_v27  ;;  %v8788_v41 = vrot.slane %v3202_v8, 5  ;;  %v4741_v63 = vshrl.u32 %v4598_v36, 16 }
 0x1e3   : > { %3939 = vmatmul.bf16.gmra.mxu1 %v3855_v59  ;;  %3149 = vmatmul.bf16.gmra.mxu2 %v3053_v30  ;;  %v4754_v59 = vshrl.u32 %v4600_v39, 16  ;;  %v2643_v30 = vld [vmem:[#allocation2 + $0xb4] sm:$0x8]  ;;  %v8794_v40 = vrot.slane %v2828_v25, 11  ;;  %v4761_v7 = vrot.slane %v4759_v12, 7  ;;  %v3749_v4 = vrot.slane %v3747_v18, 7 }
 0x1e4   : > { %2569 = vst [vmem:[#allocation2 + $0xac] sm:$0xf] %v2551_v23  ;;  %v2328_v46 = vpop.f32.mrf.mxu0  ;;  %v3856_v11 = vpack.c.b16 %v3845_v58, %v3844_v45  ;;  %v8797_v23 = vpop.f32.mrf.mxu1  ;;  %v6263_v39 = vrot.slane %v3755_v24, 11  ;;  %v3205_v60 = vsel %vm7149_vm5, %v8772_v49, %v8788_v41  ;;  %v6454_v34 = vrot.slane %v4741_v63, 11  ;;  %v6734_v12 = vld [vmem:[%s9238_s2 + $0x170] sm:$0xff] }
 0x1e5   : > { %v2329_v9 = vadd.f32 %v8671_v42, %v2328_v46  ;;  %v8790_v54 = vrot.slane %v4754_v59, 11  ;;  %v2841_v46 = vshrl.u32 %v2643_v30, 16  ;;  %v4764_v51 = vor.u32 %v4762_v19, %v4761_v7  ;;  %4513 = vmatpush.bf16.msra.mxu3 %v6734_v12 }
 0x1e6   : > { %v4751_v59 = vor.u32 %v4749_v16, %v4748_v38  ;;  %v3218_v58 = vrot.slane %v3216_v1, 5  ;;  %v6262_v0 = vrot.slane %v3742_v17, 11  ;;  %v3752_v49 = vor.u32 %v3750_v22, %v3749_v4 }
 0x1e7   : > { %vm2351_vm0 = vcmp.ge.f32.partialorder %v2329_v9, 0.0  ;;  %v2369_v3 = vmul.f32 0.01, %v2329_v9  ;;  %v6091_v5 = vrot.slane %v2841_v46, 11  ;;  %v4765_v1 = vsel %vm7112_vm4, %v8790_v54, %v4764_v51 }
 0x1e8   : > { %v3219_v13 = vsel %vm7149_vm5, %v8792_v53, %v3218_v58  ;;  %v4752_v54 = vsel %vm7112_vm4, %v6454_v34, %v4751_v59  ;;  %v4846_v24 = vunpack.c.l.b16 %v4765_v1  ;;  %v4780_v4 = vshrl.u32 %v4604_v56, 16 }
 0x1e9   : > { %v2387_v62 = vsel %vm2351_vm0, %v2329_v9, %v2369_v3  ;;  %v3763_v9 = vshll.u32 %v8776_v32, 16  ;;  %v3434_v7 = vunpack.c.l.b16 %v3219_v13  ;;  %v4845_v38 = vunpack.c.l.b16 %v4752_v54  ;;  %v6733_v54 = vld [vmem:[%s9238_s2 + $0x168] sm:$0xff] }
 0x1ea   : > { %v2552_v61 = vpack.c.bf16 %v2387_v62, %v2387_v62  ;;  %v8814_v62 = vld [vmem:[#allocation2 + $0x1c] sm:$0xf]  ;;  %4514 = vmatpush.bf16.msra.mxu3 %v6733_v54 }
 0x1eb   : > { %v2642_v28 = vld [vmem:[#allocation2 + $0xac] sm:$0xf]  ;;  %v3765_v6 = vor.u32 %v3763_v9, %v3762_v33  ;;  %v3221_v41 = vshrl.u32 %v8814_v62, 16  ;;  %v3224_v33 = vshll.u32 %v8814_v62, 16  ;;  %v4856_v17 = vpack.c.b16 %v4846_v24, %v4845_v38  ;;  %v6755_v54 = vld [vmem:[%s9238_s2 + $0x1d8] sm:$0xff] }
 0x1ec   : > { %2570 = vst [vmem:[#allocation2 + $0xb8] sm:$0xf] %v2552_v61  ;;  %v2833_v15 = vshrl.u32 %v2642_v28, 16  ;;  %v2836_v2 = vshll.u32 %v2642_v28, 16  ;;  %v6138_v29 = vld [vmem:[#allocation2 + $0xac] sm:$0xf]  ;;  %v8816_v28 = vpop.f32.mrf.mxu1 }
 0x1ed   : > { %v3166_v61 = vld [vmem:[#allocation2 + $0x28] sm:$0xf]  ;;  %v3766_v21 = vsel %vm7112_vm4, %v6263_v39, %v3765_v6  ;;  %v3606_v63 = vld [vmem:[#allocation2 + $0xac] sm:$0xf]  ;;  %v3223_v62 = vrot.slane %v3221_v41, 4 }
 0x1ee   : > { %v2331_v57 = vpop.f32.mrf.mxu0  ;;  %v2835_v44 = vrot.slane %v2833_v15, 7  ;;  %v8832_v15 = vunpack.c.l.b16 %v3205_v60  ;;  %v3235_v30 = vshrl.u32 %v3166_v61, 16  ;;  %v3847_v16 = vunpack.c.l.b16 %v3766_v21  ;;  %v3167_v6 = vld [vmem:[#allocation2 + $0x2c] sm:$0x1] }
 0x1ef   : > { %v2332_v20 = vadd.f32 %v8671_v42, %v2331_v57  ;;  %v6759_v42 = vld [vmem:[%s9238_s2 + $0x1f8] sm:$0xff]  ;;  %v3238_v57 = vshll.u32 %v3166_v61, 16  ;;  %v3165_v61 = vld [vmem:[#allocation2 + $0x20] sm:$0x1] }
 0x1f0   : > { %5093 = vmatpush.bf16.msra.mxu1 %v6759_v42  ;;  %v2838_v27 = vor.u32 %v2836_v2, %v2835_v44  ;;  %v3786_v44 = vshrl.u32 %v3606_v63, 16  ;;  %v4602_v42 = vld [vmem:[#allocation2 + $0xa8] sm:$0x8]  ;;  %v3237_v2 = vrot.slane %v3235_v30, 4  ;;  %v3449_v51 = vpack.c.b16 %v3434_v7, %v8832_v15  ;;  %v3170_v7 = vld [vmem:[#allocation2 + $0x40] sm:$0xf] }
 0x1f1   : > { %vm2352_vm1 = vcmp.ge.f32.partialorder %v2332_v20, 0.0  ;;  %v2370_v50 = vmul.f32 0.01, %v2332_v20  ;;  %4943 = vmatmul.bf16.gmra.mxu0 %v4855_v47  ;;  %v3753_v47 = vsel %vm7112_vm4, %v6262_v0, %v3752_v49  ;;  %v3240_v39 = vrot.slane %v3238_v57, 5 }
 0x1f2   : > { %v2839_v45 = vsel %vm7112_vm4, %v8794_v40, %v2838_v27  ;;  %v3604_v40 = vld [vmem:[#allocation2 + $0xa0] sm:$0xf]  ;;  %v3846_v22 = vunpack.c.l.b16 %v3753_v47  ;;  %v3244_v49 = vshll.u32 %v3167_v6, 16  ;;  %v3230_v15 = vshll.u32 %v3165_v61, 16  ;;  %v6757_v6 = vld [vmem:[%s9238_s2 + $0x1e8] sm:$0xff] }
 0x1f3   : > { %3944 = vmatmul.bf16.gmra.mxu1 %v3856_v11  ;;  %v2388_v35 = vsel %vm2352_vm1, %v2332_v20, %v2370_v50  ;;  %v6679_v3 = vld [vmem:[#allocation2 + $0xb4] sm:$0xf0]  ;;  %v3045_v53 = vunpack.c.l.b16 %v2839_v45  ;;  %v4603_v20 = vld [vmem:[#allocation2 + $0xac] sm:$0xf]  ;;  %v3605_v50 = vld [vmem:[#allocation2 + $0xa8] sm:$0x8]  ;;  %v3241_v0 = vor.u32 %v3240_v39, %v3237_v2 }
 0x1f4   : > { %v2644_v48 = vld [vmem:[#allocation2 + $0xb8] sm:$0xf]  ;;  %v2553_v8 = vpack.c.bf16 %v2388_v35, %v2388_v35  ;;  %v6139_v10 = vor.u32 %v6679_v3, %v6138_v29  ;;  %v3773_v19 = vshrl.u32 %v3604_v40, 16  ;;  %v4772_v9 = vshrl.u32 %v4603_v20, 16  ;;  %v6766_v29 = vld [vmem:[%s9238_s2 + $0x230] sm:$0xff]  ;;  %v8849_v27 = vpop.f32.mrf.mxu1 }
 0x1f5   : > { %v2846_v32 = vshrl.u32 %v2644_v48, 16  ;;  %v2849_v36 = vshll.u32 %v2644_v48, 16  ;;  %v4605_v55 = vld [vmem:[#allocation2 + $0xb8] sm:$0xf]  ;;  %v3857_v35 = vpack.c.b16 %v3847_v16, %v3846_v22  ;;  %v6758_v3 = vld [vmem:[%s9238_s2 + $0x1f0] sm:$0xff]  ;;  %5512 = vmatpush.bf16.msra.mxu2 %v6766_v29  ;;  %v3776_v12 = vshll.u32 %v3604_v40, 16 }
 0x1f6   : > { %2571 = vst [vmem:[#allocation2 + $0xc4] sm:$0xf] %v2553_v8  ;;  %v2333_v43 = vpop.f32.mrf.mxu0  ;;  %3025 = vmatmul.bf16.gmra.mxu3 %v6139_v10  ;;  %v4785_v14 = vshrl.u32 %v4605_v55, 16  ;;  %v3603_v48 = vld [vmem:[#allocation2 + $0x9c] sm:$0x8]  ;;  %v3781_v8 = vshrl.u32 %v3605_v50, 16  ;;  %5094 = vmatpush.bf16.msra.mxu1 %v6758_v3 }
 0x1f7   : > { %v2848_v25 = vrot.slane %v2846_v32, 7  ;;  %v3788_v10 = vrot.slane %v3786_v44, 7  ;;  %v4767_v32 = vshrl.u32 %v4602_v42, 16  ;;  %v3775_v34 = vrot.slane %v3773_v19, 7  ;;  %v3608_v38 = vld [vmem:[#allocation2 + $0xb8] sm:$0xf] }
 0x1f8   : > { %v4787_v60 = vrot.slane %v4785_v14, 7  ;;  %v4774_v59 = vrot.slane %v4772_v9, 7  ;;  %v4788_v58 = vshll.u32 %v4605_v55, 16  ;;  %v3768_v43 = vshrl.u32 %v3603_v48, 16  ;;  %v3168_v19 = vld [vmem:[#allocation2 + $0x34] sm:$0xf] }
 0x1f9   : > { %v2851_v31 = vor.u32 %v2849_v36, %v2848_v25  ;;  %v3789_v25 = vshll.u32 %v3606_v63, 16  ;;  %v6457_v36 = vrot.slane %v4780_v4, 11  ;;  %v4775_v45 = vshll.u32 %v4603_v20, 16  ;;  %v3609_v39 = vld [vmem:[#allocation2 + $0xc0] sm:$0x8] }
 0x1fa   : > { %v6265_v1 = vrot.slane %v3781_v8, 11  ;;  %v6456_v41 = vrot.slane %v4767_v32, 11  ;;  %v3778_v55 = vor.u32 %v3776_v12, %v3775_v34  ;;  %v3242_v57 = vrot.slane %v3241_v0, 4  ;;  %v6765_v8 = vld [vmem:[%s9238_s2 + $0x228] sm:$0xff]  ;;  %5095 = vmatpush.bf16.msra.mxu1 %v6757_v6 }
 0x1fb   : > { %v2852_v11 = vsel %vm7112_vm4, %v6091_v5, %v2851_v31  ;;  %v3226_v5 = vrot.slane %v3224_v33, 5  ;;  %v4790_v31 = vor.u32 %v4788_v58, %v4787_v60  ;;  %v3791_v21 = vor.u32 %v3789_v25, %v3788_v10  ;;  %v6334_v33 = vld [vmem:[#allocation2 + $0x10] sm:$0xf]  ;;  %v3607_v10 = vld [vmem:[#allocation2 + $0xb4] sm:$0x8]  ;;  %5513 = vmatpush.bf16.msra.mxu2 %v6765_v8  ;;  %v6756_v25 = vld [vmem:[%s9238_s2 + $0x1e0] sm:$0xff] }
 0x1fc   : > { %v3046_v18 = vunpack.c.l.b16 %v2852_v11  ;;  %v4777_v30 = vor.u32 %v4775_v45, %v4774_v59  ;;  %v6264_v11 = vrot.slane %v3768_v43, 11  ;;  %v3246_v47 = vrot.slane %v3244_v49, 5  ;;  %v3171_v43 = vld [vmem:[#allocation2 + $0x44] sm:$0x1] }
 0x1fd   : > { %v3227_v13 = vor.u32 %v3226_v5, %v3223_v62  ;;  %v4791_v63 = vsel %vm7112_vm4, %v6457_v36, %v4790_v31  ;;  %v3792_v40 = vsel %vm7112_vm4, %v6265_v1, %v3791_v21  ;;  %v3232_v16 = vrot.slane %v3230_v15, 5  ;;  %v3610_v14 = vld [vmem:[#allocation2 + $0xc4] sm:$0xf]  ;;  %v3169_v1 = vld [vmem:[#allocation2 + $0x38] sm:$0x1] }
 0x1fe   : > { %v3054_v46 = vpack.c.b16 %v3046_v18, %v3045_v53  ;;  %v8858_v53 = vpop.f32.mrf.mxu1  ;;  %v6704_v18 = vld [vmem:[#allocation2 + $0x18] sm:$0xf0]  ;;  %v4778_v24 = vsel %vm7112_vm4, %v6456_v41, %v4777_v30  ;;  %v3779_v56 = vsel %vm7112_vm4, %v6264_v11, %v3778_v55  ;;  %v4848_v44 = vunpack.c.l.b16 %v4791_v63  ;;  %5096 = vmatpush.bf16.msra.mxu1 %v6756_v25  ;;  %v6732_v63 = vld [vmem:[%s9238_s2 + $0x160] sm:$0xff] }
 0x1ff   : > { %v3228_v20 = vrot.slane %v3227_v13, 4  ;;  %v6335_v22 = vor.u32 %v6704_v18, %v6334_v33  ;;  %v3247_v50 = vsel %vm7149_vm5, %v3242_v57, %v3246_v47  ;;  %v3812_v42 = vshrl.u32 %v3610_v14, 16  ;;  %4515 = vmatpush.bf16.msra.mxu3 %v6732_v63  ;;  %v6705_v18 = vld [vmem:[#allocation2 + $0x30] sm:$0xf0]  ;;  %v6338_v33 = vld [vmem:[#allocation2 + $0x28] sm:$0xf] }
 0x200   : > { %3154 = vmatmul.bf16.gmra.mxu2 %v3054_v46  ;;  %v3849_v46 = vunpack.c.l.b16 %v3792_v40  ;;  %v4847_v9 = vunpack.c.l.b16 %v4778_v24  ;;  %v3263_v2 = vshrl.u32 %v3170_v7, 16  ;;  %v3848_v4 = vunpack.c.l.b16 %v3779_v56  ;;  %v6754_v56 = vld [vmem:[%s9238_s2 + $0x1d0] sm:$0xff] }
 0x201   : > { %4948 = vmatmul.bf16.gmra.mxu0 %v4856_v17  ;;  %v3266_v17 = vshll.u32 %v3170_v7, 16  ;;  %v3799_v29 = vshrl.u32 %v3608_v38, 16  ;;  %v3249_v48 = vshrl.u32 %v3168_v19, 16  ;;  %v3436_v32 = vunpack.c.l.b16 %v3247_v50  ;;  %v3172_v50 = vld [vmem:[#allocation2 + $0x4c] sm:$0xf] }
 0x202   : > { %v4857_v3 = vpack.c.b16 %v4848_v44, %v4847_v9  ;;  %v3858_v60 = vpack.c.b16 %v3849_v46, %v3848_v4  ;;  %v3807_v62 = vshrl.u32 %v3609_v39, 16  ;;  %v3814_v5 = vrot.slane %v3812_v42, 7  ;;  %5097 = vmatpush.bf16.msra.mxu1 %v6755_v54 }
 0x203   : > { %3949 = vmatmul.bf16.gmra.mxu1 %v3857_v35  ;;  %v3233_v35 = vsel %vm7149_vm5, %v3228_v20, %v3232_v16  ;;  %v3815_v34 = vshll.u32 %v3610_v14, 16  ;;  %v3265_v59 = vrot.slane %v3263_v2, 4  ;;  %v3268_v58 = vrot.slane %v3266_v17, 5  ;;  %v3174_v16 = vld [vmem:[#allocation2 + $0x58] sm:$0xf] }
 0x204   : > { %v3435_v61 = vunpack.c.l.b16 %v3233_v35  ;;  %v3794_v36 = vshrl.u32 %v3607_v10, 16  ;;  %v3801_v0 = vrot.slane %v3799_v29, 7  ;;  %v3251_v12 = vrot.slane %v3249_v48, 4  ;;  %v6753_v48 = vld [vmem:[%s9238_s2 + $0x1c8] sm:$0xff] }
 0x205   : > { %v3802_v21 = vshll.u32 %v3608_v38, 16  ;;  %v6267_v13 = vrot.slane %v3807_v62, 11  ;;  %v3817_v15 = vor.u32 %v3815_v34, %v3814_v5  ;;  %v3269_v41 = vor.u32 %v3268_v58, %v3265_v59  ;;  %v6752_v62 = vld [vmem:[%s9238_s2 + $0x1c0] sm:$0xff]  ;;  %v3173_v58 = vld [vmem:[#allocation2 + $0x50] sm:$0x1] }
 0x206   : > { %3521 = vmatmul.bf16.vlgmr.msrb.gmra.mxu3 %v3449_v51  ;;  %v3252_v51 = vshll.u32 %v3168_v19, 16  ;;  %v8877_v49 = vpop.f32.mrf.mxu1  ;;  %v3450_v31 = vpack.c.b16 %v3436_v32, %v3435_v61  ;;  %v3272_v30 = vshll.u32 %v3171_v43, 16  ;;  %v6266_v11 = vrot.slane %v3794_v36, 11  ;;  %5098 = vmatpush.bf16.msra.mxu1 %v6754_v56  ;;  %v3175_v32 = vld [vmem:[#allocation2 + $0x5c] sm:$0x1] }
 0x207   : > { %v3804_v55 = vor.u32 %v3802_v21, %v3801_v0  ;;  %v3258_v47 = vshll.u32 %v3169_v1, 16  ;;  %v3818_v40 = vsel %vm7112_vm4, %v6267_v13, %v3817_v15  ;;  %v3270_v24 = vrot.slane %v3269_v41, 4  ;;  %v6731_v0 = vld [vmem:[%s9238_s2 + $0x158] sm:$0xff]  ;;  %v6706_v21 = vld [vmem:[#allocation2 + $0x48] sm:$0xf0] }
 0x208   : > { %v3254_v45 = vrot.slane %v3252_v51, 5  ;;  %v3274_v20 = vrot.slane %v3272_v30, 5  ;;  %v3851_v38 = vunpack.c.l.b16 %v3818_v40  ;;  %v3291_v9 = vshrl.u32 %v3174_v16, 16  ;;  %v6764_v51 = vld [vmem:[%s9238_s2 + $0x220] sm:$0xff]  ;;  %4516 = vmatpush.bf16.msra.mxu3 %v6731_v0  ;;  %v3178_v13 = vld [vmem:[#allocation2 + $0x70] sm:$0xf] }
 0x209   : > { %v3805_v7 = vsel %vm7112_vm4, %v6266_v11, %v3804_v55  ;;  %v3260_v46 = vrot.slane %v3258_v47, 5  ;;  %v3294_v2 = vshll.u32 %v3174_v16, 16  ;;  %v3277_v35 = vshrl.u32 %v3172_v50, 16  ;;  %5514 = vmatpush.bf16.msra.mxu2 %v6764_v51  ;;  %v6342_v30 = vld [vmem:[#allocation2 + $0x40] sm:$0xf] }
 0x20a   : > { %v3255_v57 = vor.u32 %v3254_v45, %v3251_v12  ;;  %v3275_v19 = vsel %vm7149_vm5, %v3270_v24, %v3274_v20  ;;  %v3850_v17 = vunpack.c.l.b16 %v3805_v7  ;;  %v3280_v29 = vshll.u32 %v3172_v50, 16  ;;  %5099 = vmatpush.bf16.msra.mxu1 %v6753_v48  ;;  %v3176_v11 = vld [vmem:[#allocation2 + $0x64] sm:$0xf]  ;;  %v6736_v55 = vld [vmem:[#allocation2 + $0x24] sm:$0xf0] }
 0x20b   : > { %v3293_v6 = vrot.slane %v3291_v9, 4  ;;  %v3296_v8 = vrot.slane %v3294_v2, 5  ;;  %v3279_v5 = vrot.slane %v3277_v35, 4  ;;  %v3300_v36 = vshll.u32 %v3175_v32, 16  ;;  %v6526_v20 = vld [vmem:[#allocation2 + $0x1c] sm:$0xf] }
 0x20c   : > { %v3256_v44 = vrot.slane %v3255_v57, 4  ;;  %v3282_v34 = vrot.slane %v3280_v29, 5  ;;  %v3286_v45 = vshll.u32 %v3173_v58, 16  ;;  %v6343_v54 = vor.u32 %v6706_v21, %v6342_v30  ;;  %v3179_v50 = vld [vmem:[#allocation2 + $0x74] sm:$0x1] }
 0x20d   : > { %v3297_v25 = vor.u32 %v3296_v8, %v3293_v6  ;;  %v3302_v1 = vrot.slane %v3300_v36, 5  ;;  %v3319_v40 = vshrl.u32 %v3178_v13, 16  ;;  %v3305_v7 = vshrl.u32 %v3176_v11, 16  ;;  %v3177_v2 = vld [vmem:[#allocation2 + $0x68] sm:$0x1]  ;;  %v6730_v35 = vld [vmem:[%s9238_s2 + $0x150] sm:$0xff] }
 0x20e   : > { %v3261_v39 = vsel %vm7149_vm5, %v3256_v44, %v3260_v46  ;;  %5100 = vmatpush.bf16.msra.mxu1 %v6752_v62  ;;  %v3283_v12 = vor.u32 %v3282_v34, %v3279_v5  ;;  %v3288_v41 = vrot.slane %v3286_v45, 5  ;;  %v3308_v56 = vshll.u32 %v3176_v11, 16  ;;  %4517 = vmatpush.bf16.msra.mxu3 %v6730_v35  ;;  %v3182_v6 = vld [vmem:[#allocation2 + $0x88] sm:$0xf]  ;;  %v6346_v32 = vld [vmem:[#allocation2 + $0x58] sm:$0xf] }
 0x20f   : > { %v3437_v10 = vunpack.c.l.b16 %v3261_v39  ;;  %v3321_v46 = vrot.slane %v3319_v40, 4  ;;  %v3328_v39 = vshll.u32 %v3179_v50, 16  ;;  %v3180_v62 = vld [vmem:[#allocation2 + $0x7c] sm:$0xf]  ;;  %v6737_v5 = vld [vmem:[#allocation2 + $0x3c] sm:$0xf0] }
 0x210   : > { %4102 = vmatmul.bf16.vlgmr.msrb.gmra.mxu2 %v6335_v22  ;;  %v3006_v14 = vpop.f32.mrf.mxu1  ;;  %v6339_v22 = vor.u32 %v6705_v18, %v6338_v33  ;;  %v3284_v15 = vrot.slane %v3283_v12, 4  ;;  %v3322_v18 = vshll.u32 %v3178_v13, 16  ;;  %v6763_v33 = vld [vmem:[%s9238_s2 + $0x218] sm:$0xff]  ;;  %v3347_v58 = vshrl.u32 %v3182_v6, 16  ;;  %v6530_v0 = vld [vmem:[#allocation2 + $0x34] sm:$0xf] }
 0x211   : > { %4953 = vmatmul.bf16.gmra.mxu0 %v4857_v3  ;;  %v3859_v3 = vpack.c.b16 %v3851_v38, %v3850_v17  ;;  %5515 = vmatpush.bf16.msra.mxu2 %v6763_v33  ;;  %v3330_v51 = vrot.slane %v3328_v39, 5  ;;  %v3333_v45 = vshrl.u32 %v3180_v62, 16  ;;  %v6762_v21 = vld [vmem:[%s9238_s2 + $0x210] sm:$0xff]  ;;  %v3183_v11 = vld [vmem:[#allocation2 + $0x8c] sm:$0x1] }
 0x212   : > { %v3289_v16 = vsel %vm7149_vm5, %v3284_v15, %v3288_v41  ;;  %v3324_v38 = vrot.slane %v3322_v18, 5  ;;  %v3349_v15 = vrot.slane %v3347_v58, 4  ;;  %v3356_v40 = vshll.u32 %v3183_v11, 16  ;;  %v6708_v39 = vld [vmem:[#allocation2 + $0x78] sm:$0xf0] }
 0x213   : > { %3954 = vmatmul.bf16.gmra.mxu1 %v3858_v60  ;;  %v3438_v60 = vunpack.c.l.b16 %v3275_v19  ;;  %v3307_v19 = vrot.slane %v3305_v7, 4  ;;  %v6729_v7 = vld [vmem:[%s9238_s2 + $0x148] sm:$0xff] }
 0x214   : > { %v3325_v17 = vor.u32 %v3324_v38, %v3321_v46  ;;  %v4608_v46 = vld [vmem:[#allocation2 + $0xcc] sm:$0x8]  ;;  %v4609_v38 = vld [vmem:[#allocation2 + $0xd0] sm:$0xf]  ;;  %4518 = vmatpush.bf16.msra.mxu3 %v6729_v7 }
 0x215   : > { %v3451_v59 = vpack.c.b16 %v3438_v60, %v3437_v10  ;;  %v6707_v60 = vld [vmem:[#allocation2 + $0x60] sm:$0xf0]  ;;  %5516 = vmatpush.bf16.msra.mxu2 %v6762_v21 }
 0x216   : > { %3526 = vmatmul.bf16.gmra.mxu3 %v3450_v31  ;;  %v3298_v31 = vrot.slane %v3297_v25, 4  ;;  %v3326_v48 = vrot.slane %v3325_v17, 4  ;;  %v6347_v34 = vor.u32 %v6707_v60, %v6346_v32  ;;  %v3350_v25 = vshll.u32 %v3182_v6, 16 }
 0x217   : > { %v4814_v17 = vshll.u32 %v4609_v38, 16 }
 0x218   : > { %v8907_v61 = vpop.f32.mrf.mxu1  ;;  %v3303_v57 = vsel %vm7149_vm5, %v3298_v31, %v3302_v1  ;;  %v3336_v31 = vshll.u32 %v3180_v62, 16  ;;  %v6531_v1 = vor.u32 %v6737_v5, %v6530_v0  ;;  %v3352_v41 = vrot.slane %v3350_v25, 5  ;;  %v6738_v62 = vld [vmem:[#allocation2 + $0x54] sm:$0xf0] }
 0x219   : > { %v3440_v44 = vunpack.c.l.b16 %v3303_v57 }
 0x220   : > { %v3135_v42 = vpop.f32.mrf.mxu2  ;;  %4107 = vmatmul.bf16.gmra.mxu2 %v6339_v22  ;;  %v3011_v63 = vpop.f32.mrf.mxu1  ;;  %v3439_v22 = vunpack.c.l.b16 %v3289_v16 }
 0x221   : > { %v8894_v4 = vadd.f32 %v3135_v42, %v3006_v14  ;;  %v6527_v14 = vor.u32 %v6736_v55, %v6526_v20  ;;  %v3310_v42 = vrot.slane %v3308_v56, 5  ;;  %v3181_v55 = vld [vmem:[#allocation2 + $0x80] sm:$0x1]  ;;  %v4606_v56 = vld [vmem:[#allocation2 + $0xc0] sm:$0x8] }
 0x222   : > { %v3452_v9 = vpack.c.b16 %v3440_v44, %v3439_v22  ;;  %v3342_v16 = vshll.u32 %v3181_v55, 16  ;;  %v4793_v22 = vshrl.u32 %v4606_v56, 16  ;;  %v6761_v55 = vld [vmem:[%s9238_s2 + $0x208] sm:$0xff]  ;;  %v3185_v56 = vld [vmem:[#allocation2 + $0x98] sm:$0x1] }
 0x223   : > { %3959 = vmatmul.bf16.gmra.mxu1 %v3859_v3  ;;  %v3311_v29 = vor.u32 %v3310_v42, %v3307_v19  ;;  %v3314_v3 = vshll.u32 %v3177_v2, 16  ;;  %v4811_v2 = vshrl.u32 %v4609_v38, 16  ;;  %5517 = vmatpush.bf16.msra.mxu2 %v6761_v55  ;;  %v3370_v38 = vshll.u32 %v3185_v56, 16 }
 0x224   : > { %v3344_v32 = vrot.slane %v3342_v16, 5 }
 0x225   : > { %v3312_v8 = vrot.slane %v3311_v29, 4  ;;  %v3316_v10 = vrot.slane %v3314_v3, 5  ;;  %v3358_v29 = vrot.slane %v3356_v40, 5  ;;  %v6458_v3 = vrot.slane %v4793_v22, 11 }
 0x226   : > { %3531 = vmatmul.bf16.gmra.mxu3 %v3451_v59  ;;  %v3331_v59 = vsel %vm7149_vm5, %v3326_v48, %v3330_v51  ;;  %v3186_v51 = vld [vmem:[#allocation2 + $0xa0] sm:$0xf]  ;;  %v4813_v6 = vrot.slane %v4811_v2, 7  ;;  %v3190_v2 = vld [vmem:[#allocation2 + $0xb8] sm:$0xf] }
 0x227   : > { %v3317_v12 = vsel %vm7149_vm5, %v3312_v8, %v3316_v10  ;;  %v3442_v13 = vunpack.c.l.b16 %v3331_v59  ;;  %v6350_v8 = vld [vmem:[#allocation2 + $0x70] sm:$0xf]  ;;  %v3184_v59 = vld [vmem:[#allocation2 + $0x94] sm:$0xf]  ;;  %v3375_v0 = vshrl.u32 %v3186_v51, 16 }
 0x228   : > { %v8909_v43 = vpop.f32.mrf.mxu2  ;;  %v3441_v30 = vunpack.c.l.b16 %v3317_v12  ;;  %v8940_v19 = vpop.f32.mrf.mxu1  ;;  %v4816_v58 = vor.u32 %v4814_v17, %v4813_v6  ;;  %v3378_v12 = vshll.u32 %v3186_v51, 16 }
 0x22a   : > { %v3453_v57 = vpack.c.b16 %v3442_v13, %v3441_v30  ;;  %v3364_v30 = vshll.u32 %v3184_v59, 16 }
 0x22c   : > { %v3366_v16 = vrot.slane %v3364_v30, 5 }
 0x230   : > { %v3140_v47 = vpop.f32.mrf.mxu2  ;;  %4112 = vmatmul.bf16.gmra.mxu2 %v6343_v54  ;;  %v3335_v54 = vrot.slane %v3333_v45, 4  ;;  %v6534_v45 = vld [vmem:[#allocation2 + $0x4c] sm:$0xf]  ;;  %v8953_v26 = vpop.f32.mrf.mxu1 }
 0x231   : > { %v8916_v24 = vadd.f32 %v3140_v47, %v3011_v63  ;;  %v3338_v63 = vrot.slane %v3336_v31, 5  ;;  %v3353_v47 = vor.u32 %v3352_v41, %v3349_v15  ;;  %v3361_v41 = vshrl.u32 %v3184_v59, 16 }
 0x233   : > { %5101 = vmatmul.bf16.vlgmr.msra.gmra.mxu1 %v6527_v14  ;;  %v4607_v14 = vld [vmem:[#allocation2 + $0xc4] sm:$0xf]  ;;  %v3339_v44 = vor.u32 %v3338_v63, %v3335_v54  ;;  %v3354_v35 = vrot.slane %v3353_v47, 4  ;;  %v3377_v63 = vrot.slane %v3375_v0, 4 }
 0x234   : > { %v4798_v50 = vshrl.u32 %v4607_v14, 16  ;;  %v4801_v42 = vshll.u32 %v4607_v14, 16 }
 0x235   : > { %v3340_v10 = vrot.slane %v3339_v44, 4  ;;  %v3359_v25 = vsel %vm7149_vm5, %v3354_v35, %v3358_v29  ;;  %v6354_v29 = vld [vmem:[#allocation2 + $0x88] sm:$0xf] }
 0x236   : > { %3536 = vmatmul.bf16.gmra.mxu3 %v3452_v9  ;;  %v4806_v9 = vshrl.u32 %v4608_v46, 16  ;;  %v4800_v48 = vrot.slane %v4798_v50, 7  ;;  %v3444_v54 = vunpack.c.l.b16 %v3359_v25  ;;  %v6760_v25 = vld [vmem:[%s9238_s2 + $0x200] sm:$0xff] }
 0x237   : > { %v3345_v15 = vsel %vm7149_vm5, %v3340_v10, %v3344_v32  ;;  %v3403_v10 = vshrl.u32 %v3190_v2, 16  ;;  %v3406_v32 = vshll.u32 %v3190_v2, 16  ;;  %5518 = vmatpush.bf16.msra.mxu2 %v6760_v25  ;;  %v4160_v25 = vld [vmem:[#allocation2 + $0x14] sm:$0x1] }
 0x238   : > { %v8928_v36 = vpop.f32.mrf.mxu2  ;;  %v6459_v60 = vrot.slane %v4806_v9, 11  ;;  %v4803_v5 = vor.u32 %v4801_v42, %v4800_v48  ;;  %v3443_v40 = vunpack.c.l.b16 %v3345_v15  ;;  %v6728_v42 = vld [vmem:[%s9238_s2 + $0x140] sm:$0xff]  ;;  %v6709_v9 = vld [vmem:[#allocation2 + $0x90] sm:$0xf0]  ;;  %v8958_v35 = vpop.f32.mrf.mxu1  ;;  %v6739_v48 = vld [vmem:[#allocation2 + $0x6c] sm:$0xf0] }
 0x239   : > { %4519 = vmatpush.bf16.msra.mxu3 %v6728_v42  ;;  %v6355_v6 = vor.u32 %v6709_v9, %v6354_v29 }
 0x23a   : > { %v4804_v31 = vsel %vm7112_vm4, %v6458_v3, %v4803_v5  ;;  %v4817_v21 = vsel %vm7112_vm4, %v6459_v60, %v4816_v58  ;;  %v3454_v7 = vpack.c.b16 %v3444_v54, %v3443_v40  ;;  %v3188_v3 = vld [vmem:[#allocation2 + $0xac] sm:$0xf] }
 0x23b   : > { %v4849_v13 = vunpack.c.l.b16 %v4804_v31  ;;  %v4850_v11 = vunpack.c.l.b16 %v4817_v21  ;;  %v3392_v59 = vshll.u32 %v3188_v3, 16 }
 0x23d   : > { %v3016_v18 = vpop.f32.mrf.mxu3  ;;  %v4858_v47 = vpack.c.b16 %v4850_v11, %v4849_v13  ;;  %v3394_v13 = vrot.slane %v3392_v59, 5 }
 0x23f   : > { %4958 = vmatmul.bf16.gmra.mxu0 %v4858_v47 }
 0x240   : > { %4117 = vmatmul.bf16.gmra.mxu2 %v6347_v34  ;;  %v6351_v34 = vor.u32 %v6708_v39, %v6350_v8  ;;  %v3372_v39 = vrot.slane %v3370_v38, 5  ;;  %v6740_v38 = vld [vmem:[#allocation2 + $0x84] sm:$0xf0] }
 0x243   : > { %5106 = vmatmul.bf16.gmra.mxu1 %v6531_v1  ;;  %v6535_v1 = vor.u32 %v6738_v62, %v6534_v45  ;;  %v6538_v62 = vld [vmem:[#allocation2 + $0x64] sm:$0xf]  ;;  %v3408_v45 = vrot.slane %v3406_v32, 5 }
 0x244   : > { %v6539_v58 = vor.u32 %v6739_v48, %v6538_v62  ;;  %v5160_v62 = vld [vmem:[#allocation2 + $0x28] sm:$0xf] }
 0x245   : > { %v8960_v51 = vpop.f32.mrf.mxu3 }
 0x246   : > { %3541 = vmatmul.bf16.gmra.mxu3 %v3453_v57  ;;  %v3380_v57 = vrot.slane %v3378_v12, 5  ;;  %v3405_v12 = vrot.slane %v3403_v10, 4 }
 0x247   : > { %v3145_v20 = vpop.f32.mrf.mxu2 }
 0x248   : > { %v8938_v33 = vadd.f32 %v3145_v20, %v3016_v18  ;;  %v3187_v18 = vld [vmem:[#allocation2 + $0xa4] sm:$0x1]  ;;  %v3363_v20 = vrot.slane %v3361_v41, 4  ;;  %v3381_v14 = vor.u32 %v3380_v57, %v3377_v63  ;;  %v3189_v41 = vld [vmem:[#allocation2 + $0xb0] sm:$0x1]  ;;  %v3409_v55 = vor.u32 %v3408_v45, %v3405_v12  ;;  %v8971_v63 = vpop.f32.mrf.mxu1 }
 0x249   : > { %v3384_v44 = vshll.u32 %v3187_v18, 16  ;;  %v3398_v40 = vshll.u32 %v3189_v41, 16  ;;  %v5158_v12 = vld [vmem:[#allocation2 + $0x1c] sm:$0xf]  ;;  %v5205_v45 = vshrl.u32 %v5160_v62, 16 }
 0x24a   : > { %v3367_v46 = vor.u32 %v3366_v16, %v3363_v20  ;;  %v3382_v22 = vrot.slane %v3381_v14, 4  ;;  %v3410_v18 = vrot.slane %v3409_v55, 4  ;;  %v6710_v16 = vld [vmem:[#allocation2 + $0xa8] sm:$0xf0]  ;;  %v5191_v41 = vshrl.u32 %v5158_v12, 16 }
 0x24b   : > { %v3386_v50 = vrot.slane %v3384_v44, 5  ;;  %v3400_v14 = vrot.slane %v3398_v40, 5  ;;  %v4159_v44 = vld [vmem:[#allocation2 + $0x10] sm:$0xf] }
 0x24c   : > { %v3368_v17 = vrot.slane %v3367_v46, 4  ;;  %v6358_v46 = vld [vmem:[#allocation2 + $0xa0] sm:$0xf]  ;;  %v4192_v2 = vshrl.u32 %v4159_v44, 16 }
 0x24d   : > { %v3387_v8 = vsel %vm7149_vm5, %v3382_v22, %v3386_v50  ;;  %v6359_v22 = vor.u32 %v6710_v16, %v6358_v46  ;;  %v3120_v46 = vpop.f32.mrf.mxu0 }
 0x24e   : > { %v3373_v5 = vsel %vm7149_vm5, %v3368_v17, %v3372_v39  ;;  %v3446_v0 = vunpack.c.l.b16 %v3387_v8  ;;  %v4195_v17 = vshll.u32 %v4159_v44, 16  ;;  %v6542_v39 = vld [vmem:[#allocation2 + $0x7c] sm:$0xf]  ;;  %v4194_v59 = vrot.slane %v4192_v2, 4  ;;  %v4165_v44 = vld [vmem:[#allocation2 + $0x34] sm:$0xf] }
 0x24f   : > { %v8962_v60 = vpop.f32.mrf.mxu2  ;;  %v3445_v31 = vunpack.c.l.b16 %v3373_v5 }
 0x250   : > { %4122 = vmatmul.bf16.gmra.mxu2 %v6351_v34  ;;  %v3389_v34 = vshrl.u32 %v3188_v3, 16  ;;  %v6543_v3 = vor.u32 %v6740_v38, %v6542_v39  ;;  %v8979_v48 = vpop.f32.mrf.mxu1  ;;  %v5159_v38 = vld [vmem:[#allocation2 + $0x20] sm:$0x1] }
 0x251   : > { %v3455_v15 = vpack.c.b16 %v3446_v0, %v3445_v31  ;;  %v5208_v31 = vshll.u32 %v5160_v62, 16  ;;  %v6741_v39 = vld [vmem:[#allocation2 + $0x9c] sm:$0xf0]  ;;  %v5200_v62 = vshll.u32 %v5159_v38, 16  ;;  %v5162_v38 = vld [vmem:[#allocation2 + $0x34] sm:$0xf] }
 0x252   : > { %v3391_v21 = vrot.slane %v3389_v34, 4  ;;  %v4162_v34 = vld [vmem:[#allocation2 + $0x20] sm:$0x1] }
 0x253   : > { %5111 = vmatmul.bf16.gmra.mxu1 %v6535_v1  ;;  %v3191_v1 = vld [vmem:[#allocation2 + $0xbc] sm:$0x1]  ;;  %v5210_v55 = vrot.slane %v5208_v31, 5 }
 0x254   : > { %v3412_v54 = vshll.u32 %v3191_v1, 16  ;;  %v3395_v47 = vor.u32 %v3394_v13, %v3391_v21  ;;  %v4215_v21 = vshll.u32 %v4162_v34, 16 }
 0x256   : > { %3546 = vmatmul.bf16.gmra.mxu3 %v3454_v7  ;;  %v3414_v20 = vrot.slane %v3412_v54, 5  ;;  %v4161_v7 = vld [vmem:[#allocation2 + $0x1c] sm:$0xf]  ;;  %v3396_v56 = vrot.slane %v3395_v47, 4  ;;  %v4217_v40 = vrot.slane %v4215_v21, 5 }
 0x257   : > { %v4206_v42 = vshrl.u32 %v4161_v7, 16  ;;  %v4209_v9 = vshll.u32 %v4161_v7, 16  ;;  %v6711_v7 = vld [vmem:[#allocation2 + $0xc0] sm:$0xf0] }
 0x258   : > { %v3415_v50 = vsel %vm7149_vm5, %v3410_v18, %v3414_v20  ;;  %v3401_v29 = vsel %vm7149_vm5, %v3396_v56, %v3400_v14  ;;  %v5161_v18 = vld [vmem:[#allocation2 + $0x2c] sm:$0x1]  ;;  %v8983_v20 = vpop.f32.mrf.mxu1 }
 0x259   : > { %v4208_v10 = vrot.slane %v4206_v42, 4  ;;  %v4211_v32 = vrot.slane %v4209_v9, 5  ;;  %v3447_v5 = vunpack.c.l.b16 %v3401_v29  ;;  %v4163_v42 = vld [vmem:[#allocation2 + $0x28] sm:$0xf]  ;;  %v6362_v9 = vld [vmem:[#allocation2 + $0xb8] sm:$0xf] }
 0x25a   : > { %v6363_v29 = vor.u32 %v6711_v7, %v6362_v9 }
 0x25b   : > { %v4212_v1 = vor.u32 %v4211_v32, %v4208_v10  ;;  %v4237_v10 = vshll.u32 %v4165_v44, 16 }
 0x25c   : > { %v3021_v30 = vpop.f32.mrf.mxu3 }
 0x25d   : > { %v4213_v47 = vrot.slane %v4212_v1, 4  ;;  %v4239_v21 = vrot.slane %v4237_v10, 5 }
 0x260   : > { %4127 = vmatmul.bf16.gmra.mxu2 %v6355_v6  ;;  %v3448_v6 = vunpack.c.l.b16 %v3415_v50 }
 0x262   : > { %v3456_v0 = vpack.c.b16 %v3448_v6, %v3447_v5  ;;  %v4234_v6 = vshrl.u32 %v4165_v44, 16  ;;  %v6546_v5 = vld [vmem:[#allocation2 + $0x94] sm:$0xf] }
 0x263   : > { %5116 = vmatmul.bf16.gmra.mxu1 %v6539_v58  ;;  %v4197_v58 = vrot.slane %v4195_v17, 5  ;;  %v5214_v17 = vshll.u32 %v5161_v18, 16 }
 0x264   : > { %v8981_v8 = vpop.f32.mrf.mxu3  ;;  %v4236_v1 = vrot.slane %v4234_v6, 4  ;;  %v3121_v6 = vadd.f32 %v3120_v46, %v8758_v37  ;;  %v5163_v37 = vld [vmem:[#allocation2 + $0x38] sm:$0x1] }
 0x265   : > { %v4198_v13 = vor.u32 %v4197_v58, %v4194_v59  ;;  %v4220_v59 = vshrl.u32 %v4163_v42, 16  ;;  %v4223_v58 = vshll.u32 %v4163_v42, 16 }
 0x266   : > { %v3150_v11 = vpop.f32.mrf.mxu2  ;;  %3551 = vmatmul.bf16.gmra.mxu3 %v3455_v15  ;;  %v4201_v15 = vshll.u32 %v4160_v25, 16  ;;  %v6547_v25 = vor.u32 %v6741_v39, %v6546_v5 }
 0x267   : > { %v8973_v57 = vadd.f32 %v3150_v11, %v3021_v30  ;;  %v5194_v30 = vshll.u32 %v5158_v12, 16  ;;  %v5207_v11 = vrot.slane %v5205_v45, 4  ;;  %v4199_v56 = vrot.slane %v4198_v13, 4 }
 0x268   : > { %v4203_v14 = vrot.slane %v4201_v15, 5  ;;  %v5216_v45 = vrot.slane %v5214_v17, 5  ;;  %v4222_v18 = vrot.slane %v4220_v59, 4  ;;  %v4225_v7 = vrot.slane %v4223_v58, 5 }
 0x269   : > { %v5196_v50 = vrot.slane %v5194_v30, 5  ;;  %v5211_v2 = vor.u32 %v5210_v55, %v5207_v11  ;;  %v4166_v30 = vld [vmem:[#allocation2 + $0x38] sm:$0x1]  ;;  %v5164_v11 = vld [vmem:[#allocation2 + $0x40] sm:$0xf] }
 0x26a   : > { %v4204_v32 = vsel %vm7149_vm5, %v4199_v56, %v4203_v14  ;;  %v8993_v56 = vpop.f32.mrf.mxu1  ;;  %v4243_v42 = vshll.u32 %v4166_v30, 16  ;;  %v5233_v9 = vshrl.u32 %v5164_v11, 16  ;;  %v4226_v39 = vor.u32 %v4225_v7, %v4222_v18  ;;  %v4167_v30 = vld [vmem:[#allocation2 + $0x40] sm:$0xf] }
 0x26b   : > { %v5212_v12 = vrot.slane %v5211_v2, 4  ;;  %v4432_v15 = vunpack.c.l.b16 %v4204_v32  ;;  %v5236_v2 = vshll.u32 %v5164_v11, 16 }
 0x26c   : > { %v4245_v5 = vrot.slane %v4243_v42, 5  ;;  %v5235_v59 = vrot.slane %v5233_v9, 4 }
 0x26d   : > { %v5217_v44 = vsel %vm7149_vm5, %v5212_v12, %v5216_v45  ;;  %v5238_v58 = vrot.slane %v5236_v2, 5 }
 0x26e   : > { %v8985_v16 = vpop.f32.mrf.mxu2  ;;  %v5432_v10 = vunpack.c.l.b16 %v5217_v44 }
 0x26f   : > { %v5239_v18 = vor.u32 %v5238_v58, %v5235_v59 }
 0x270   : > { %4132 = vmatmul.bf16.gmra.mxu2 %v6359_v22  ;;  %v5193_v22 = vrot.slane %v5191_v41, 4  ;;  %v5202_v41 = vrot.slane %v5200_v62, 5 }
 0x272   : > { %v5197_v34 = vor.u32 %v5196_v50, %v5193_v22  ;;  %v3122_v22 = vpop.f32.mrf.mxu0  ;;  %v4240_v50 = vor.u32 %v4239_v21, %v4236_v1  ;;  %v4169_v1 = vld [vmem:[#allocation2 + $0x4c] sm:$0xf]  ;;  %v9004_v44 = vpop.f32.mrf.mxu1 }
 0x273   : > { %5121 = vmatmul.bf16.gmra.mxu1 %v6543_v3  ;;  %v4218_v3 = vsel %vm7149_vm5, %v4213_v47, %v4217_v40  ;;  %v4164_v40 = vld [vmem:[#allocation2 + $0x2c] sm:$0x1]  ;;  %v4262_v7 = vshrl.u32 %v4169_v1, 16 }
 0x274   : > { %v5198_v47 = vrot.slane %v5197_v34, 4  ;;  %v4229_v17 = vshll.u32 %v4164_v40, 16  ;;  %v4241_v62 = vrot.slane %v4240_v50, 4  ;;  %v5165_v34 = vld [vmem:[#allocation2 + $0x44] sm:$0x1]  ;;  %v4251_v50 = vshll.u32 %v4167_v30, 16 }
 0x275   : > { %v5242_v46 = vshll.u32 %v5165_v34, 16 }
 0x276   : > { %3556 = vmatmul.bf16.gmra.mxu3 %v3456_v0  ;;  %v4433_v0 = vunpack.c.l.b16 %v4218_v3  ;;  %v5222_v3 = vshll.u32 %v5162_v38, 16  ;;  %v4231_v45 = vrot.slane %v4229_v17, 5  ;;  %v4246_v40 = vsel %vm7149_vm5, %v4241_v62, %v4245_v5  ;;  %v4170_v62 = vld [vmem:[#allocation2 + $0x50] sm:$0x1] }
 0x277   : > { %v5228_v17 = vshll.u32 %v5163_v37, 16  ;;  %v4264_v5 = vrot.slane %v4262_v7, 4 }
 0x278   : > { %v4448_v14 = vpack.c.b16 %v4433_v0, %v4432_v15 }
 0x279   : > { %v3026_v54 = vpop.f32.mrf.mxu3 }
 0x27a   : > { %v3125_v42 = vpop.f32.mrf.mxu0 }
 0x280   : > { %4137 = vmatmul.bf16.gmra.mxu2 %v6363_v29  ;;  %v5219_v29 = vshrl.u32 %v5162_v38, 16  ;;  %v4248_v38 = vshrl.u32 %v4167_v30, 16  ;;  %v4271_v30 = vshll.u32 %v4170_v62, 16 }
 0x281   : > { %v3028_v31 = vpop.f32.mrf.mxu3 }
 0x282   : > { %v5221_v15 = vrot.slane %v5219_v29, 4  ;;  %v4435_v29 = vunpack.c.l.b16 %v4246_v40 }
 0x283   : > { %5126 = vmatmul.bf16.gmra.mxu1 %v6547_v25  ;;  %v3155_v13 = vpop.f32.mrf.mxu2 }
 0x284   : > { %v8991_v55 = vadd.f32 %v3155_v13, %v3026_v54  ;;  %v5203_v54 = vsel %vm7149_vm5, %v5198_v47, %v5202_v41  ;;  %v4227_v13 = vrot.slane %v4226_v39, 4  ;;  %v5224_v41 = vrot.slane %v5222_v3, 5  ;;  %v6742_v47 = vld [vmem:[#allocation2 + $0xb4] sm:$0xf0] }
 0x285   : > { %v5431_v12 = vunpack.c.l.b16 %v5203_v54  ;;  %v3123_v39 = vadd.f32 %v3122_v22, %v8797_v23  ;;  %v5244_v3 = vrot.slane %v5242_v46, 5  ;;  %v5230_v23 = vrot.slane %v5228_v17, 5  ;;  %v4168_v22 = vld [vmem:[#allocation2 + $0x44] sm:$0x1] }
 0x286   : > { %4520 = vmatmul.bf16.vlgmr.msra.gmra.mxu3 %v4448_v14  ;;  %v4265_v14 = vshll.u32 %v4169_v1, 16  ;;  %v4232_v9 = vsel %vm7149_vm5, %v4227_v13, %v4231_v45  ;;  %v5225_v2 = vor.u32 %v5224_v41, %v5221_v15  ;;  %v4253_v45 = vrot.slane %v4251_v50, 5  ;;  %v5168_v1 = vld [vmem:[#allocation2 + $0x58] sm:$0xf]  ;;  %v9017_v50 = vpop.f32.mrf.mxu1 }
 0x287   : > { %v5447_v11 = vpack.c.b16 %v5432_v10, %v5431_v12  ;;  %v4250_v12 = vrot.slane %v4248_v38, 4  ;;  %v5261_v37 = vshrl.u32 %v5168_v1, 16  ;;  %v5264_v46 = vshll.u32 %v5168_v1, 16 }
 0x288   : > { %v4267_v34 = vrot.slane %v4265_v14, 5  ;;  %v5226_v15 = vrot.slane %v5225_v2, 4  ;;  %v4257_v40 = vshll.u32 %v4168_v22, 16  ;;  %v3126_v38 = vadd.f32 %v3125_v42, %v8816_v28  ;;  %v3127_v2 = vpop.f32.mrf.mxu0  ;;  %v5167_v28 = vld [vmem:[#allocation2 + $0x50] sm:$0x1] }
 0x289   : > { %v3522_v32 = vpop.f32.mrf.mxu3 }
 0x28a   : > { %v3562_v25 = vadd.f32 %v3522_v32, %v3121_v6  ;;  %v5240_v32 = vrot.slane %v5239_v18, 4  ;;  %v5231_v18 = vsel %vm7149_vm5, %v5226_v15, %v5230_v23  ;;  %v6554_v23 = vld [vmem:[#allocation2 + $0xc4] sm:$0xf] }
 0x28b   : > { %v3157_v0 = vpop.f32.mrf.mxu2  ;;  %v5433_v62 = vunpack.c.l.b16 %v5231_v18 }
 0x28c   : > { %v9000_v21 = vadd.f32 %v3157_v0, %v3028_v31  ;;  %v6550_v31 = vld [vmem:[#allocation2 + $0xac] sm:$0xf]  ;;  %v3965_v10 = vadd.f32 %v8953_v26, %v3562_v25  ;;  %v4434_v0 = vunpack.c.l.b16 %v4232_v9  ;;  %v5245_v26 = vsel %vm7149_vm5, %v5240_v32, %v5244_v3 }
 0x28d   : > { %v6551_v54 = vor.u32 %v6742_v47, %v6550_v31  ;;  %v4268_v25 = vor.u32 %v4267_v34, %v4264_v5  ;;  %v4254_v47 = vor.u32 %v4253_v45, %v4250_v12  ;;  %v5434_v31 = vunpack.c.l.b16 %v5245_v26  ;;  %v4171_v45 = vld [vmem:[#allocation2 + $0x58] sm:$0xf] }
 0x28e   : > { %v4449_v41 = vpack.c.b16 %v4435_v29, %v4434_v0  ;;  %v4273_v9 = vrot.slane %v4271_v30, 5  ;;  %v5169_v29 = vld [vmem:[#allocation2 + $0x5c] sm:$0x1]  ;;  %v5263_v3 = vrot.slane %v5261_v37, 4  ;;  %v4259_v34 = vrot.slane %v4257_v40, 5 }
 0x28f   : > { %v4255_v5 = vrot.slane %v4254_v47, 4  ;;  %v5448_v1 = vpack.c.b16 %v5434_v31, %v5433_v62  ;;  %v5270_v15 = vshll.u32 %v5169_v29, 16  ;;  %v5256_v26 = vshll.u32 %v5167_v28, 16  ;;  %v5172_v62 = vld [vmem:[#allocation2 + $0x70] sm:$0xf] }
 0x290   : > { %5519 = vmatmul.bf16.vlgmr.msra.gmra.mxu2 %v5447_v11  ;;  %v5166_v11 = vld [vmem:[#allocation2 + $0x4c] sm:$0xf]  ;;  %v4276_v37 = vshrl.u32 %v4171_v45, 16  ;;  %v3128_v40 = vadd.f32 %v3127_v2, %v8849_v27  ;;  %v4172_v2 = vld [vmem:[#allocation2 + $0x5c] sm:$0x1] }
 0x291   : > { %v3524_v6 = vpop.f32.mrf.mxu3  ;;  %v5247_v7 = vshrl.u32 %v5166_v11, 16  ;;  %v5250_v14 = vshll.u32 %v5166_v11, 16  ;;  %v4260_v11 = vsel %vm7149_vm5, %v4255_v5, %v4259_v34  ;;  %v3130_v5 = vpop.f32.mrf.mxu0 }
 0x292   : > { %v3563_v59 = vadd.f32 %v3524_v6, %v3123_v39  ;;  %v4269_v39 = vrot.slane %v4268_v25, 4  ;;  %v5266_v6 = vrot.slane %v5264_v46, 5  ;;  %v4279_v46 = vshll.u32 %v4171_v45, 16 }
 0x293   : > { %5131 = vmatmul.bf16.gmra.mxu1 %v6551_v54  ;;  %v4103_v58 = vpop.f32.mrf.mxu2  ;;  %v5249_v42 = vrot.slane %v5247_v7, 4  ;;  %v5252_v12 = vrot.slane %v5250_v14, 5  ;;  %v5272_v7 = vrot.slane %v5270_v15, 5  ;;  %v5292_v15 = vshll.u32 %v5172_v62, 16 }
 0x294   : > { %v9010_v13 = vadd.f32 %v4103_v58, %v3965_v10  ;;  %v3966_v54 = vadd.f32 %v8958_v35, %v3563_v59  ;;  %v4173_v58 = vld [vmem:[#allocation2 + $0x64] sm:$0xf]  ;;  %v6743_v35 = vld [vmem:[#allocation2 + $0xcc] sm:$0xf0]  ;;  %v4274_v59 = vsel %vm7149_vm5, %v4269_v39, %v4273_v9  ;;  %v5267_v22 = vor.u32 %v5266_v6, %v5263_v3  ;;  %v4174_v9 = vld [vmem:[#allocation2 + $0x68] sm:$0x1]  ;;  %v9028_v39 = vpop.f32.mrf.mxu1 }
 0x295   : > { %v4293_v30 = vshll.u32 %v4173_v58, 16  ;;  %v5253_v25 = vor.u32 %v5252_v12, %v5249_v42  ;;  %v6555_v47 = vor.u32 %v6743_v35, %v6554_v23  ;;  %v4437_v18 = vunpack.c.l.b16 %v4274_v59  ;;  %v5170_v42 = vld [vmem:[#allocation2 + $0x64] sm:$0xf] }
 0x296   : > { %4525 = vmatmul.bf16.gmra.mxu3 %v4449_v41  ;;  %v4290_v41 = vshrl.u32 %v4173_v58, 16  ;;  %v5268_v31 = vrot.slane %v5267_v22, 4  ;;  %v4436_v6 = vunpack.c.l.b16 %v4260_v11  ;;  %v4278_v58 = vrot.slane %v4276_v37, 4 }
 0x297   : > { %v5254_v27 = vrot.slane %v5253_v25, 4  ;;  %v4281_v28 = vrot.slane %v4279_v46, 5  ;;  %v4285_v23 = vshll.u32 %v4172_v2, 16  ;;  %v5275_v22 = vshrl.u32 %v5170_v42, 16 }
 0x298   : > { %v5273_v12 = vsel %vm7149_vm5, %v5268_v31, %v5272_v7 }
 0x299   : > { %v3527_v17 = vpop.f32.mrf.mxu3  ;;  %v4282_v59 = vor.u32 %v4281_v28, %v4278_v58  ;;  %v5436_v11 = vunpack.c.l.b16 %v5273_v12  ;;  %v4287_v31 = vrot.slane %v4285_v23, 5 }
 0x29a   : > { %v3564_v10 = vadd.f32 %v3527_v17, %v3126_v38  ;;  %v4292_v17 = vrot.slane %v4290_v41, 4  ;;  %v5278_v41 = vshll.u32 %v5170_v42, 16 }
 0x29b   : > { %v4105_v32 = vpop.f32.mrf.mxu2 }
 0x29c   : > { %v9020_v0 = vadd.f32 %v4105_v32, %v3966_v54  ;;  %v3967_v38 = vadd.f32 %v8971_v63, %v3564_v10  ;;  %v4295_v54 = vrot.slane %v4293_v30, 5  ;;  %v5258_v32 = vrot.slane %v5256_v26, 5 }
 0x29d   : > { %v4450_v63 = vpack.c.b16 %v4437_v18, %v4436_v6  ;;  %v4299_v10 = vshll.u32 %v4174_v9, 16  ;;  %v3131_v30 = vadd.f32 %v3130_v5, %v8858_v53  ;;  %v5294_v18 = vrot.slane %v5292_v15, 5  ;;  %v4177_v9 = vld [vmem:[#allocation2 + $0x7c] sm:$0xf] }
 0x29e   : > { %v4296_v45 = vor.u32 %v4295_v54, %v4292_v17  ;;  %v5259_v35 = vsel %vm7149_vm5, %v5254_v27, %v5258_v32  ;;  %v4283_v54 = vrot.slane %v4282_v59, 4  ;;  %v5277_v6 = vrot.slane %v5275_v22, 4  ;;  %v9040_v32 = vpop.f32.mrf.mxu1 }
 0x29f   : > { %v4301_v26 = vrot.slane %v4299_v10, 5  ;;  %v5280_v53 = vrot.slane %v5278_v41, 5  ;;  %v4318_v58 = vshrl.u32 %v4177_v9, 16  ;;  %v4321_v28 = vshll.u32 %v4177_v9, 16  ;;  %v5174_v9 = vld [vmem:[#allocation2 + $0x7c] sm:$0xf] }
 0x2a0   : > { %5524 = vmatmul.bf16.gmra.mxu2 %v5448_v1  ;;  %v5289_v1 = vshrl.u32 %v5172_v62, 16  ;;  %v4297_v46 = vrot.slane %v4296_v45, 4  ;;  %v4288_v10 = vsel %vm7149_vm5, %v4283_v54, %v4287_v31 }
 0x2a1   : > { %v3529_v14 = vpop.f32.mrf.mxu3  ;;  %v5281_v42 = vor.u32 %v5280_v53, %v5277_v6  ;;  %v4320_v41 = vrot.slane %v4318_v58, 4 }
 0x2a2   : > { %v3565_v29 = vadd.f32 %v3529_v14, %v3128_v40  ;;  %v5291_v40 = vrot.slane %v5289_v1, 4  ;;  %v4302_v27 = vsel %vm7149_vm5, %v4297_v46, %v4301_v26 }
 0x2a3   : > { %5136 = vmatmul.bf16.gmra.mxu1 %v6555_v47  ;;  %v4108_v3 = vpop.f32.mrf.mxu2  ;;  %v5173_v47 = vld [vmem:[#allocation2 + $0x74] sm:$0x1]  ;;  %v4439_v15 = vunpack.c.l.b16 %v4302_v27  ;;  %v5306_v27 = vshll.u32 %v5174_v9, 16 }
 0x2a4   : > { %v9030_v34 = vadd.f32 %v4108_v3, %v3967_v38  ;;  %v3968_v37 = vadd.f32 %v8979_v48, %v3565_v29  ;;  %v5435_v38 = vunpack.c.l.b16 %v5259_v35  ;;  %v5171_v3 = vld [vmem:[#allocation2 + $0x68] sm:$0x1]  ;;  %v5298_v5 = vshll.u32 %v5173_v47, 16  ;;  %v4175_v48 = vld [vmem:[#allocation2 + $0x70] sm:$0xf]  ;;  %v3132_v29 = vpop.f32.mrf.mxu0 }
 0x2a5   : > { %v5295_v2 = vor.u32 %v5294_v18, %v5291_v40  ;;  %v4304_v12 = vshrl.u32 %v4175_v48, 16  ;;  %v4307_v45 = vshll.u32 %v4175_v48, 16  ;;  %v3133_v1 = vadd.f32 %v3132_v29, %v8877_v49  ;;  %v4178_v47 = vld [vmem:[#allocation2 + $0x80] sm:$0x1] }
 0x2a6   : > { %4530 = vmatmul.bf16.gmra.mxu3 %v4450_v63  ;;  %v5449_v62 = vpack.c.b16 %v5436_v11, %v5435_v38  ;;  %v5284_v63 = vshll.u32 %v5171_v3, 16  ;;  %v5300_v23 = vrot.slane %v5298_v5, 5  ;;  %v5176_v11 = vld [vmem:[#allocation2 + $0x88] sm:$0xf]  ;;  %v5282_v18 = vrot.slane %v5281_v42, 4  ;;  %v9052_v53 = vpop.f32.mrf.mxu1 }
 0x2a7   : > { %v5296_v22 = vrot.slane %v5295_v2, 4  ;;  %v4306_v38 = vrot.slane %v4304_v12, 4  ;;  %v4309_v49 = vrot.slane %v4307_v45, 5  ;;  %v5317_v54 = vshrl.u32 %v5176_v11, 16  ;;  %v4179_v45 = vld [vmem:[#allocation2 + $0x88] sm:$0xf] }
 0x2a8   : > { %v5286_v46 = vrot.slane %v5284_v63, 5  ;;  %v5320_v3 = vshll.u32 %v5176_v11, 16  ;;  %v4327_v6 = vshll.u32 %v4178_v47, 16  ;;  %v5303_v29 = vshrl.u32 %v5174_v9, 16 }
 0x2a9   : > { %v3532_v25 = vpop.f32.mrf.mxu3  ;;  %v4310_v48 = vor.u32 %v4309_v49, %v4306_v38  ;;  %v5319_v58 = vrot.slane %v5317_v54, 4  ;;  %v3138_v49 = vadd.f32 %v8909_v43, %v8907_v61  ;;  %v5178_v61 = vld [vmem:[#allocation2 + $0x94] sm:$0xf] }
 0x2aa   : > { %v3566_v7 = vadd.f32 %v3532_v25, %v3131_v30  ;;  %v4323_v30 = vrot.slane %v4321_v28, 5  ;;  %v5287_v5 = vsel %vm7149_vm5, %v5282_v18, %v5286_v46  ;;  %v5322_v28 = vrot.slane %v5320_v3, 5  ;;  %v5175_v46 = vld [vmem:[#allocation2 + $0x80] sm:$0x1] }
 0x2ab   : > { %v4110_v14 = vpop.f32.mrf.mxu2  ;;  %v4329_v12 = vrot.slane %v4327_v6, 5  ;;  %v5305_v11 = vrot.slane %v5303_v29, 4  ;;  %v4332_v18 = vshrl.u32 %v4179_v45, 16  ;;  %v5312_v54 = vshll.u32 %v5175_v46, 16  ;;  %v4180_v6 = vld [vmem:[#allocation2 + $0x8c] sm:$0x1] }
 0x2ac   : > { %v9038_v17 = vadd.f32 %v4110_v14, %v3968_v37  ;;  %v3969_v59 = vadd.f32 %v8983_v20, %v3566_v7  ;;  %v4438_v37 = vunpack.c.l.b16 %v4288_v10  ;;  %v4176_v14 = vld [vmem:[#allocation2 + $0x74] sm:$0x1]  ;;  %v5301_v20 = vsel %vm7149_vm5, %v5296_v22, %v5300_v23 }
 0x2ad   : > { %v4324_v7 = vor.u32 %v4323_v30, %v4320_v41  ;;  %v5438_v2 = vunpack.c.l.b16 %v5301_v20  ;;  %v5437_v23 = vunpack.c.l.b16 %v5287_v5  ;;  %v4181_v22 = vld [vmem:[#allocation2 + $0x94] sm:$0xf]  ;;  %v4311_v30 = vrot.slane %v4310_v48, 4 }
 0x2ae   : > { %v4451_v31 = vpack.c.b16 %v4439_v15, %v4438_v37  ;;  %v5323_v47 = vor.u32 %v5322_v28, %v5319_v58  ;;  %v4349_v38 = vshll.u32 %v4181_v22, 16  ;;  %v9066_v3 = vpop.f32.mrf.mxu1 }
 0x2af   : > { %v4325_v42 = vrot.slane %v4324_v7, 4  ;;  %v5450_v37 = vpack.c.b16 %v5438_v2, %v5437_v23 }
 0x2b0   : > { %5529 = vmatmul.bf16.gmra.mxu2 %v5449_v62  ;;  %v4313_v62 = vshll.u32 %v4176_v14, 16  ;;  %v5324_v7 = vrot.slane %v5323_v47, 4  ;;  %v4351_v58 = vrot.slane %v4349_v38, 5 }
 0x2b1   : > { %v3534_v35 = vpop.f32.mrf.mxu3 }
 0x2b2   : > { %v3567_v26 = vadd.f32 %v3534_v35, %v3133_v1  ;;  %v4315_v35 = vrot.slane %v4313_v62, 5  ;;  %v4334_v62 = vrot.slane %v4332_v18, 4 }
 0x2b3   : > { %v4113_v25 = vpop.f32.mrf.mxu2 }
 0x2b4   : > { %v9048_v40 = vadd.f32 %v4113_v25, %v3969_v59  ;;  %v3970_v10 = vadd.f32 %v8993_v56, %v3567_v26  ;;  %v5177_v59 = vld [vmem:[#allocation2 + $0x8c] sm:$0x1]  ;;  %v5308_v25 = vrot.slane %v5306_v27, 5  ;;  %v4335_v56 = vshll.u32 %v4179_v45, 16 }
 0x2b5   : > { %v4330_v26 = vsel %vm7149_vm5, %v4325_v42, %v4329_v12  ;;  %v5326_v14 = vshll.u32 %v5177_v59, 16  ;;  %v5314_v45 = vrot.slane %v5312_v54, 5  ;;  %v4341_v59 = vshll.u32 %v4180_v6, 16 }
 0x2b6   : > { %4535 = vmatmul.bf16.gmra.mxu3 %v4451_v31  ;;  %v4316_v31 = vsel %vm7149_vm5, %v4311_v30, %v4315_v35  ;;  %v5309_v9 = vor.u32 %v5308_v25, %v5305_v11  ;;  %v4441_v20 = vunpack.c.l.b16 %v4330_v26  ;;  %v4337_v5 = vrot.slane %v4335_v56, 5  ;;  %v9076_v54 = vpop.f32.mrf.mxu1 }
 0x2b7   : > { %v5328_v27 = vrot.slane %v5326_v14, 5  ;;  %v5334_v11 = vshll.u32 %v5178_v61, 16  ;;  %v4343_v56 = vrot.slane %v4341_v59, 5  ;;  %v4185_v14 = vld [vmem:[#allocation2 + $0xac] sm:$0xf]  ;;  %v3143_v59 = vadd.f32 %v8928_v36, %v8940_v19 }
 0x2b8   : > { %v5310_v12 = vrot.slane %v5309_v9, 4  ;;  %v4338_v35 = vor.u32 %v4337_v5, %v4334_v62  ;;  %v5179_v62 = vld [vmem:[#allocation2 + $0x98] sm:$0x1]  ;;  %v5181_v5 = vld [vmem:[#allocation2 + $0xa4] sm:$0x1] }
 0x2b9   : > { %v3537_v63 = vpop.f32.mrf.mxu3  ;;  %v5336_v9 = vrot.slane %v5334_v11, 5 }
 0x2ba   : > { %v3568_v1 = vadd.f32 %v3537_v63, %v8894_v4  ;;  %v4346_v4 = vshrl.u32 %v4181_v22, 16  ;;  %v4440_v63 = vunpack.c.l.b16 %v4316_v31  ;;  %v5331_v22 = vshrl.u32 %v5178_v61, 16 }
 0x2bb   : > { %v4115_v15 = vpop.f32.mrf.mxu2  ;;  %v5315_v46 = vsel %vm7149_vm5, %v5310_v12, %v5314_v45  ;;  %v4339_v18 = vrot.slane %v4338_v35, 4  ;;  %v4377_v61 = vshll.u32 %v4185_v14, 16 }
 0x2bc   : > { %v9058_v41 = vadd.f32 %v4115_v15, %v3970_v10  ;;  %v3971_v29 = vadd.f32 %v9004_v44, %v3568_v1  ;;  %v4348_v2 = vrot.slane %v4346_v4, 4  ;;  %v4182_v10 = vld [vmem:[#allocation2 + $0x98] sm:$0x1]  ;;  %v5180_v15 = vld [vmem:[#allocation2 + $0xa0] sm:$0xf]  ;;  %v4452_v23 = vpack.c.b16 %v4441_v20, %v4440_v63 }
 0x2bd   : > { %v5329_v44 = vsel %vm7149_vm5, %v5324_v7, %v5328_v27  ;;  %v4355_v30 = vshll.u32 %v4182_v10, 16  ;;  %v5345_v25 = vshrl.u32 %v5180_v15, 16  ;;  %v5333_v26 = vrot.slane %v5331_v22, 4 }
 0x2be   : > { %v4352_v1 = vor.u32 %v4351_v58, %v4348_v2  ;;  %v5440_v47 = vunpack.c.l.b16 %v5329_v44  ;;  %v5439_v6 = vunpack.c.l.b16 %v5315_v46  ;;  %v4183_v2 = vld [vmem:[#allocation2 + $0xa0] sm:$0xf]  ;;  %v4374_v58 = vshrl.u32 %v4185_v14, 16  ;;  %v9090_v19 = vpop.f32.mrf.mxu1 }
 0x2bf   : > { %v4357_v31 = vrot.slane %v4355_v30, 5  ;;  %v5337_v63 = vor.u32 %v5336_v9, %v5333_v26  ;;  %v5354_v10 = vshll.u32 %v5181_v5, 16  ;;  %v4360_v45 = vshrl.u32 %v4183_v2, 16 }
 0x2c0   : > { %5534 = vmatmul.bf16.gmra.mxu2 %v5450_v37  ;;  %v5348_v37 = vshll.u32 %v5180_v15, 16  ;;  %v4363_v15 = vshll.u32 %v4183_v2, 16  ;;  %v4379_v35 = vrot.slane %v4377_v61, 5 }
 0x2c1   : > { %v3539_v48 = vpop.f32.mrf.mxu3  ;;  %v5356_v46 = vrot.slane %v5354_v10, 5  ;;  %v4362_v14 = vrot.slane %v4360_v45, 4  ;;  %v5185_v10 = vld [vmem:[#allocation2 + $0xbc] sm:$0x1] }
 0x2c2   : > { %v3569_v43 = vadd.f32 %v3539_v48, %v3138_v49  ;;  %v4353_v49 = vrot.slane %v4352_v1, 4  ;;  %v5347_v48 = vrot.slane %v5345_v25, 4  ;;  %v4186_v1 = vld [vmem:[#allocation2 + $0xb0] sm:$0x1]  ;;  %v5338_v25 = vrot.slane %v5337_v63, 4 }
 0x2c3   : > { %v4118_v28 = vpop.f32.mrf.mxu2  ;;  %v4383_v36 = vshll.u32 %v4186_v1, 16 }
 0x2c4   : > { %v9069_v42 = vadd.f32 %v4118_v28, %v3971_v29  ;;  %v3972_v38 = vadd.f32 %v9017_v50, %v3569_v43  ;;  %v5350_v29 = vrot.slane %v5348_v37, 5  ;;  %v5451_v28 = vpack.c.b16 %v5440_v47, %v5439_v6  ;;  %v5184_v47 = vld [vmem:[#allocation2 + $0xb8] sm:$0xf] }
 0x2c5   : > { %v4344_v50 = vsel %vm7149_vm5, %v4339_v18, %v4343_v56  ;;  %v4358_v43 = vsel %vm7149_vm5, %v4353_v49, %v4357_v31  ;;  %v4184_v49 = vld [vmem:[#allocation2 + $0xa4] sm:$0x1]  ;;  %v5373_v6 = vshrl.u32 %v5184_v47, 16  ;;  %v4385_v2 = vrot.slane %v4383_v36, 5 }
 0x2c6   : > { %4540 = vmatmul.bf16.gmra.mxu3 %v4452_v23  ;;  %v5351_v12 = vor.u32 %v5350_v29, %v5347_v48  ;;  %v4376_v23 = vrot.slane %v4374_v58, 4  ;;  %v4442_v22 = vunpack.c.l.b16 %v4344_v50  ;;  %v4443_v44 = vunpack.c.l.b16 %v4358_v43 }
 0x2c7   : > { %v4369_v48 = vshll.u32 %v4184_v49, 16 }
 0x2c8   : > { %v5352_v26 = vrot.slane %v5351_v12, 4  ;;  %v4380_v31 = vor.u32 %v4379_v35, %v4376_v23  ;;  %v4453_v9 = vpack.c.b16 %v4443_v44, %v4442_v22  ;;  %v4189_v12 = vld [vmem:[#allocation2 + $0xc4] sm:$0xf] }
 0x2c9   : > { %v3542_v4 = vpop.f32.mrf.mxu3 }
 0x2ca   : > { %v3570_v20 = vadd.f32 %v3542_v4, %v8916_v24  ;;  %v5340_v24 = vshll.u32 %v5179_v62, 16  ;;  %v4365_v4 = vrot.slane %v4363_v15, 5  ;;  %v5357_v62 = vsel %vm7149_vm5, %v5352_v26, %v5356_v46 }
 0x2cb   : > { %v4120_v7 = vpop.f32.mrf.mxu2  ;;  %v4381_v29 = vrot.slane %v4380_v31, 4  ;;  %v4402_v46 = vshrl.u32 %v4189_v12, 16 }
 0x2cc   : > { %v9079_v27 = vadd.f32 %v4120_v7, %v3972_v38  ;;  %v3973_v11 = vadd.f32 %v9028_v39, %v3570_v20  ;;  %v5342_v37 = vrot.slane %v5340_v24, 5  ;;  %v5182_v7 = vld [vmem:[#allocation2 + $0xac] sm:$0xf]  ;;  %v5376_v39 = vshll.u32 %v5184_v47, 16 }
 0x2cd   : > { %v4366_v5 = vor.u32 %v4365_v4, %v4362_v14  ;;  %v5359_v58 = vshrl.u32 %v5182_v7, 16  ;;  %v5362_v61 = vshll.u32 %v5182_v7, 16  ;;  %v5442_v24 = vunpack.c.l.b16 %v5357_v62  ;;  %v4188_v62 = vld [vmem:[#allocation2 + $0xbc] sm:$0x1] }
 0x2ce   : > { %v5343_v20 = vsel %vm7149_vm5, %v5338_v25, %v5342_v37  ;;  %v5378_v50 = vrot.slane %v5376_v39, 5  ;;  %v4386_v44 = vsel %vm7149_vm5, %v4381_v29, %v4385_v2  ;;  %v5183_v25 = vld [vmem:[#allocation2 + $0xb0] sm:$0x1]  ;;  %v4405_v47 = vshll.u32 %v4189_v12, 16  ;;  %v4190_v29 = vld [vmem:[#allocation2 + $0xc8] sm:$0x1] }
 0x2cf   : > { %v5441_v23 = vunpack.c.l.b16 %v5343_v20  ;;  %v4367_v35 = vrot.slane %v4366_v5, 4  ;;  %v5361_v1 = vrot.slane %v5359_v58, 4  ;;  %v4445_v4 = vunpack.c.l.b16 %v4386_v44 }
 0x2d0   : > { %5539 = vmatmul.bf16.gmra.mxu2 %v5451_v28  ;;  %v5375_v28 = vrot.slane %v5373_v6, 4  ;;  %v5368_v31 = vshll.u32 %v5183_v25, 16  ;;  %v4404_v7 = vrot.slane %v4402_v46, 4  ;;  %v4407_v6 = vrot.slane %v4405_v47, 5 }
 0x2d1   : > { %v3544_v30 = vpop.f32.mrf.mxu3 }
 0x2d2   : > { %v3571_v18 = vadd.f32 %v3544_v30, %v3143_v59  ;;  %v4371_v59 = vrot.slane %v4369_v48, 5  ;;  %v5364_v30 = vrot.slane %v5362_v61, 5  ;;  %v5379_v37 = vor.u32 %v5378_v50, %v5375_v28  ;;  %v5186_v61 = vld [vmem:[#allocation2 + $0xc4] sm:$0xf] }
 0x2d3   : > { %v4123_v56 = vpop.f32.mrf.mxu2  ;;  %v3148_v28 = vadd.f32 %v8962_v60, %v8960_v51 }
 0x2d4   : > { %v9088_v38 = vadd.f32 %v4123_v56, %v3973_v11  ;;  %v3974_v63 = vadd.f32 %v9040_v32, %v3571_v18  ;;  %v4187_v11 = vld [vmem:[#allocation2 + $0xb8] sm:$0xf]  ;;  %v5382_v32 = vshll.u32 %v5185_v10, 16  ;;  %v5452_v18 = vpack.c.b16 %v5442_v24, %v5441_v23  ;;  %v9102_v56 = vpop.f32.mrf.mxu1  ;;  %v5188_v24 = vld [vmem:[#allocation2 + $0xd0] sm:$0xf] }
 0x2d5   : > { %v4391_v26 = vshll.u32 %v4187_v11, 16  ;;  %v4372_v14 = vsel %vm7149_vm5, %v4367_v35, %v4371_v59  ;;  %v5365_v49 = vor.u32 %v5364_v30, %v5361_v1  ;;  %v5380_v36 = vrot.slane %v5379_v37, 4 }
 0x2d6   : > { %4545 = vmatmul.bf16.gmra.mxu3 %v4453_v9  ;;  %v5384_v9 = vrot.slane %v5382_v32, 5  ;;  %v4444_v48 = vunpack.c.l.b16 %v4372_v14  ;;  %v4411_v23 = vshll.u32 %v4190_v29, 16  ;;  %v5387_v35 = vshrl.u32 %v5186_v61, 16  ;;  %v4924_v29 = vpop.f32.mrf.mxu0 }
 0x2d7   : > { %v4393_v58 = vrot.slane %v4391_v26, 5  ;;  %v5390_v59 = vshll.u32 %v5186_v61, 16  ;;  %v5401_v1 = vshrl.u32 %v5188_v24, 16  ;;  %v5404_v30 = vshll.u32 %v5188_v24, 16 }
 0x2d8   : > { %v4454_v10 = vpack.c.b16 %v4445_v4, %v4444_v48  ;;  %v5385_v12 = vsel %vm7149_vm5, %v5380_v36, %v5384_v9  ;;  %v4413_v47 = vrot.slane %v4411_v23, 5 }
 0x2d9   : > { %v3547_v43 = vpop.f32.mrf.mxu3 }
 0x2da   : > { %v3572_v45 = vadd.f32 %v3547_v43, %v8938_v33  ;;  %v4388_v33 = vshrl.u32 %v4187_v11, 16  ;;  %v5366_v43 = vrot.slane %v5365_v49, 4  ;;  %v5444_v11 = vunpack.c.l.b16 %v5385_v12 }
 0x2db   : > { %v4125_v15 = vpop.f32.mrf.mxu2  ;;  %v5403_v49 = vrot.slane %v5401_v1, 4 }
 0x2dc   : > { %v9098_v22 = vadd.f32 %v4125_v15, %v3974_v63  ;;  %v3975_v20 = vadd.f32 %v9052_v53, %v3572_v45  ;;  %v4390_v2 = vrot.slane %v4388_v33, 4  ;;  %v5370_v63 = vrot.slane %v5368_v31, 5  ;;  %v9113_v51 = vpop.f32.mrf.mxu1 }
 0x2dd   : > { %v4397_v53 = vshll.u32 %v4188_v62, 16  ;;  %v4408_v45 = vor.u32 %v4407_v6, %v4404_v7  ;;  %v5392_v33 = vrot.slane %v5390_v59, 5  ;;  %v5406_v31 = vrot.slane %v5404_v30, 5  ;;  %v5187_v7 = vld [vmem:[#allocation2 + $0xc8] sm:$0x1] }
 0x2de   : > { %v4394_v44 = vor.u32 %v4393_v58, %v4390_v2  ;;  %v5371_v60 = vsel %vm7149_vm5, %v5366_v43, %v5370_v63  ;;  %v5189_v6 = vld [vmem:[#allocation2 + $0xd4] sm:$0x1]  ;;  %v3153_v2 = vadd.f32 %v8985_v16, %v8981_v8  ;;  %v4926_v30 = vpop.f32.mrf.mxu0 }
 0x2df   : > { %v4399_v25 = vrot.slane %v4397_v53, 5  ;;  %v4409_v37 = vrot.slane %v4408_v45, 4  ;;  %v5443_v9 = vunpack.c.l.b16 %v5371_v60  ;;  %v5407_v48 = vor.u32 %v5406_v31, %v5403_v49 }
 0x2e0   : > { %5544 = vmatmul.bf16.gmra.mxu2 %v5452_v18  ;;  %v5389_v18 = vrot.slane %v5387_v35, 4  ;;  %v4395_v4 = vrot.slane %v4394_v44, 4 }
 0x2e1   : > { %v3549_v39 = vpop.f32.mrf.mxu3  ;;  %v5408_v45 = vrot.slane %v5407_v48, 4 }
 0x2e2   : > { %v3573_v15 = vadd.f32 %v3549_v39, %v3148_v28  ;;  %v5453_v39 = vpack.c.b16 %v5444_v11, %v5443_v9  ;;  %v5393_v62 = vor.u32 %v5392_v33, %v5389_v18 }
 0x2e3   : > { %v4128_v5 = vpop.f32.mrf.mxu2 }
 0x2e4   : > { %v9109_v50 = vadd.f32 %v4128_v5, %v3975_v20  ;;  %v3976_v46 = vadd.f32 %v9066_v3, %v3573_v15  ;;  %v4414_v20 = vsel %vm7149_vm5, %v4409_v37, %v4413_v47  ;;  %v4400_v3 = vsel %vm7149_vm5, %v4395_v4, %v4399_v25  ;;  %v5102_v24 = vpop.f32.mrf.mxu1 }
 0x2e5   : > { %v5396_v5 = vshll.u32 %v5187_v7, 16  ;;  %v4447_v58 = vunpack.c.l.b16 %v4414_v20  ;;  %v4446_v43 = vunpack.c.l.b16 %v4400_v3  ;;  %v5394_v63 = vrot.slane %v5393_v62, 4 }
 0x2e6   : > { %4550 = vmatmul.bf16.gmra.mxu3 %v4454_v10 }
 0x2e7   : > { %v5398_v53 = vrot.slane %v5396_v5, 5  ;;  %v4455_v35 = vpack.c.b16 %v4447_v58, %v4446_v43 }
 0x2e9   : > { %v3552_v32 = vpop.f32.mrf.mxu3  ;;  %v5399_v59 = vsel %vm7149_vm5, %v5394_v63, %v5398_v53 }
 0x2ea   : > { %v3574_v26 = vadd.f32 %v3552_v32, %v8973_v57  ;;  %v5410_v57 = vshll.u32 %v5189_v6, 16  ;;  %v5445_v44 = vunpack.c.l.b16 %v5399_v59 }
 0x2eb   : > { %v4130_v14 = vpop.f32.mrf.mxu2 }
 0x2ec   : > { %v9119_v36 = vadd.f32 %v4130_v14, %v3976_v46  ;;  %v3977_v28 = vadd.f32 %v9076_v54, %v3574_v26  ;;  %v5412_v15 = vrot.slane %v5410_v57, 5  ;;  %v5104_v37 = vpop.f32.mrf.mxu1 }
 0x2ee   : > { %v5413_v8 = vsel %vm7149_vm5, %v5408_v45, %v5412_v15 }
 0x2ef   : > { %v5446_v1 = vunpack.c.l.b16 %v5413_v8 }
 0x2f0   : > { %5549 = vmatmul.bf16.gmra.mxu2 %v5453_v39 }
 0x2f1   : > { %v3554_v61 = vpop.f32.mrf.mxu3  ;;  %v5454_v32 = vpack.c.b16 %v5446_v1, %v5445_v44 }
 0x2f2   : > { %v3575_v10 = vadd.f32 %v3554_v61, %v3153_v2 }
 0x2f3   : > { %v4133_v12 = vpop.f32.mrf.mxu2 }
 0x2f4   : > { %v9128_v23 = vadd.f32 %v4133_v12, %v3977_v28  ;;  %v3978_v54 = vadd.f32 %v9090_v19, %v3575_v10  ;;  %v4929_v19 = vpop.f32.mrf.mxu0  ;;  %v5107_v26 = vpop.f32.mrf.mxu1 }
 0x2f6   : > { %4555 = vmatmul.bf16.gmra.mxu3 %v4455_v35 }
 0x2f9   : > { %v3557_v16 = vpop.f32.mrf.mxu3 }
 0x2fa   : > { %v3576_v60 = vadd.f32 %v3557_v16, %v8991_v55 }
 0x2fb   : > { %v4135_v11 = vpop.f32.mrf.mxu2 }
 0x2fc   : > { %v9136_v25 = vadd.f32 %v4135_v11, %v3978_v54  ;;  %v3979_v47 = vadd.f32 %v9102_v56, %v3576_v60  ;;  %v4931_v9 = vpop.f32.mrf.mxu0  ;;  %v5109_v6 = vpop.f32.mrf.mxu1 }
 0x300   : > { %5554 = vmatmul.bf16.gmra.mxu2 %v5454_v32 }
 0x301   : > { %v3559_v46 = vpop.f32.mrf.mxu3 }
 0x302   : > { %v3577_v52 = vadd.f32 %v3559_v46, %v9000_v21 }
 0x303   : > { %v4138_v18 = vpop.f32.mrf.mxu2 }
 0x304   : > { %v9140_v33 = vadd.f32 %v4138_v18, %v3979_v47  ;;  %v3980_v4 = vadd.f32 %v9113_v51, %v3577_v52  ;;  %v9150_v51 = vld [vmem:[%s9239_s3 + $0x1] ss:$0 sm:$0xff] }
 0x309   : > { %v4521_v14 = vpop.f32.mrf.mxu3 }
 0x30a   : > { %v4561_v49 = vadd.f32 %v4521_v14, %v9010_v13  ;;  %v4934_v13 = vpop.f32.mrf.mxu0 }
 0x30b   : > { %v4140_v55 = vpop.f32.mrf.mxu2 }
 0x30c   : > { %v9144_v31 = vadd.f32 %v4140_v55, %v3980_v4  ;;  %v4964_v7 = vadd.f32 %v4924_v29, %v4561_v49  ;;  %v5112_v29 = vpop.f32.mrf.mxu1 }
 0x30e   : > { %v5142_v20 = vadd.f32 %v5102_v24, %v4964_v7 }
 0x311   : > { %v4523_v56 = vpop.f32.mrf.mxu3 }
 0x312   : > { %v4562_v21 = vadd.f32 %v4523_v56, %v9020_v0  ;;  %v4936_v53 = vpop.f32.mrf.mxu0 }
 0x313   : > { %v5520_v39 = vpop.f32.mrf.mxu2 }
 0x314   : > { %v4965_v62 = vadd.f32 %v4926_v30, %v4562_v21  ;;  %v5560_v3 = vadd.f32 %v5520_v39, %v5142_v20  ;;  %v5114_v59 = vpop.f32.mrf.mxu1 }
 0x316   : > { %v5578_v5 = vadd.f32 %v9150_v51, %v5560_v3  ;;  %v5143_v57 = vadd.f32 %v5104_v37, %v4965_v62 }
 0x318   : > { %v5610_v61 = vmul.f32 0.01, %v5578_v5  ;;  %vm5594_vm4 = vcmp.ge.f32.partialorder %v5578_v5, 0.0 }
 0x319   : > { %v4526_v48 = vpop.f32.mrf.mxu3 }
 0x31a   : > { %v4563_v58 = vadd.f32 %v4526_v48, %v9030_v34  ;;  %v5626_v24 = vsel %vm5594_vm4, %v5578_v5, %v5610_v61  ;;  %v4939_v37 = vpop.f32.mrf.mxu0 }
 0x31b   : > { %v5522_v2 = vpop.f32.mrf.mxu2 }
 0x31c   : > { %v5561_v0 = vadd.f32 %v5522_v2, %v5143_v57  ;;  %v4966_v43 = vadd.f32 %v4929_v19, %v4563_v58  ;;  %v5117_v46 = vpop.f32.mrf.mxu1 }
 0x31e   : > { %v5579_v28 = vadd.f32 %v9150_v51, %v5561_v0  ;;  %v5144_v34 = vadd.f32 %v5107_v26, %v4966_v43 }
 0x320   : > { %vm5595_vm5 = vcmp.ge.f32.partialorder %v5579_v28, 0.0  ;;  %v5611_v63 = vmul.f32 0.01, %v5579_v28 }
 0x321   : > { %v4528_v12 = vpop.f32.mrf.mxu3 }
 0x322   : > { %v5627_v10 = vsel %vm5595_vm5, %v5579_v28, %v5611_v63  ;;  %v4564_v15 = vadd.f32 %v4528_v12, %v9038_v17  ;;  %v4941_v7 = vpop.f32.mrf.mxu0 }
 0x323   : > { %v6772_v45 = vpack.c.bf16 %v5627_v10, %v5626_v24  ;;  %v5525_v35 = vpop.f32.mrf.mxu2 }
 0x324   : > { %v4967_v8 = vadd.f32 %v4931_v9, %v4564_v15  ;;  %v5562_v16 = vadd.f32 %v5525_v35, %v5144_v34 }
 0x325   : > { %6773 = vst [vmem:[%s9159_s11] sm:$0xff] %v6772_v45  }
 0x326   : > { %v5580_v54 = vadd.f32 %v9150_v51, %v5562_v16  ;;  %v5145_v1 = vadd.f32 %v5109_v6, %v4967_v8  ;;  %v5119_v6 = vpop.f32.mrf.mxu1 }
 0x328   : > { %v5612_v17 = vmul.f32 0.01, %v5580_v54  ;;  %vm5596_vm2 = vcmp.ge.f32.partialorder %v5580_v54, 0.0 }
 0x329   : > { %v4531_v44 = vpop.f32.mrf.mxu3 }
 0x32a   : > { %v4565_v60 = vadd.f32 %v4531_v44, %v9048_v40  ;;  %v5628_v18 = vsel %vm5596_vm2, %v5580_v54, %v5612_v17  ;;  %v4944_v57 = vpop.f32.mrf.mxu0 }
 0x32b   : > { %v5527_v30 = vpop.f32.mrf.mxu2 }
 0x32c   : > { %v5563_v11 = vadd.f32 %v5527_v30, %v5145_v1  ;;  %v4968_v47 = vadd.f32 %v4934_v13, %v4565_v60 }
 0x32e   : > { %v5581_v32 = vadd.f32 %v9150_v51, %v5563_v11  ;;  %v5146_v49 = vadd.f32 %v5112_v29, %v4968_v47  ;;  %v5122_v0 = vpop.f32.mrf.mxu1 }
 0x330   : > { %vm5597_vm3 = vcmp.ge.f32.partialorder %v5581_v32, 0.0  ;;  %v5613_v52 = vmul.f32 0.01, %v5581_v32 }
 0x331   : > { %v4533_v26 = vpop.f32.mrf.mxu3 }
 0x332   : > { %v5629_v19 = vsel %vm5597_vm3, %v5581_v32, %v5613_v52  ;;  %v4566_v4 = vadd.f32 %v4533_v26, %v9058_v41  ;;  %v4946_v45 = vpop.f32.mrf.mxu0 }
 0x333   : > { %v6777_v14 = vpack.c.bf16 %v5629_v19, %v5628_v18  ;;  %v5530_v55 = vpop.f32.mrf.mxu2 }
 0x334   : > { %v4969_v40 = vadd.f32 %v4936_v53, %v4566_v4  ;;  %v5564_v9 = vadd.f32 %v5530_v55, %v5146_v49 }
 0x335   : > { %6809 = vst [vmem:[%s9159_s11 + $0x8] sm:$0xff] %v6777_v14  }
 0x336   : > { %v5582_v56 = vadd.f32 %v9150_v51, %v5564_v9  ;;  %v5147_v39 = vadd.f32 %v5114_v59, %v4969_v40  ;;  %v5124_v59 = vpop.f32.mrf.mxu1 }
 0x338   : > { %v5614_v13 = vmul.f32 0.01, %v5582_v56  ;;  %vm5598_vm6 = vcmp.ge.f32.partialorder %v5582_v56, 0.0 }
 0x339   : > { %v4536_v21 = vpop.f32.mrf.mxu3 }
 0x33a   : > { %v4567_v62 = vadd.f32 %v4536_v21, %v9069_v42  ;;  %v5630_v29 = vsel %vm5598_vm6, %v5582_v56, %v5614_v13  ;;  %v4949_v32 = vpop.f32.mrf.mxu0 }
 0x33b   : > { %v5532_v20 = vpop.f32.mrf.mxu2 }
 0x33c   : > { %v5565_v3 = vadd.f32 %v5532_v20, %v5147_v39  ;;  %v4970_v41 = vadd.f32 %v4939_v37, %v4567_v62 }
 0x33e   : > { %v5583_v5 = vadd.f32 %v9150_v51, %v5565_v3  ;;  %v5148_v63 = vadd.f32 %v5117_v46, %v4970_v41  ;;  %v5127_v47 = vpop.f32.mrf.mxu1 }
 0x340   : > { %vm5599_vm7 = vcmp.ge.f32.partialorder %v5583_v5, 0.0  ;;  %v5615_v48 = vmul.f32 0.01, %v5583_v5 }
 0x341   : > { %v4538_v58 = vpop.f32.mrf.mxu3 }
 0x342   : > { %v5631_v2 = vsel %vm5599_vm7, %v5583_v5, %v5615_v48  ;;  %v4568_v28 = vadd.f32 %v4538_v58, %v9079_v27 }
 0x343   : > { %v6782_v61 = vpack.c.bf16 %v5631_v2, %v5630_v29  ;;  %v5535_v43 = vpop.f32.mrf.mxu2 }
 0x344   : > { %v4971_v42 = vadd.f32 %v4941_v7, %v4568_v28  ;;  %v5566_v24 = vadd.f32 %v5535_v43, %v5148_v63 }
 0x345   : > { %6810 = vst [vmem:[%s9159_s11 + $0x10] sm:$0xff] %v6782_v61  }
 0x346   : > { %v5584_v10 = vadd.f32 %v9150_v51, %v5566_v24  ;;  %v5149_v53 = vadd.f32 %v5119_v6, %v4971_v42  ;;  %v5129_v7 = vpop.f32.mrf.mxu1 }
 0x348   : > { %v5616_v8 = vmul.f32 0.01, %v5584_v10  ;;  %vm5600_vm8 = vcmp.ge.f32.partialorder %v5584_v10, 0.0 }
 0x349   : > { %v4541_v12 = vpop.f32.mrf.mxu3 }
 0x34a   : > { %v4569_v35 = vadd.f32 %v4541_v12, %v9088_v38  ;;  %v5632_v44 = vsel %vm5600_vm8, %v5584_v10, %v5616_v8 }
 0x34b   : > { %v5537_v15 = vpop.f32.mrf.mxu2 }
 0x34c   : > { %v5567_v34 = vadd.f32 %v5537_v15, %v5149_v53  ;;  %v4972_v27 = vadd.f32 %v4944_v57, %v4569_v35 }
 0x34e   : > { %v5585_v16 = vadd.f32 %v9150_v51, %v5567_v34  ;;  %v5150_v17 = vadd.f32 %v5122_v0, %v4972_v27  ;;  %v5132_v29 = vpop.f32.mrf.mxu1 }
 0x350   : > { %vm5601_vm9 = vcmp.ge.f32.partialorder %v5585_v16, 0.0  ;;  %v5617_v54 = vmul.f32 0.01, %v5585_v16 }
 0x351   : > { %v4543_v30 = vpop.f32.mrf.mxu3 }
 0x352   : > { %v5633_v1 = vsel %vm5601_vm9, %v5585_v16, %v5617_v54  ;;  %v4570_v11 = vadd.f32 %v4543_v30, %v9098_v22  ;;  %v4951_v22 = vpop.f32.mrf.mxu0 }
 0x353   : > { %v6787_v60 = vpack.c.bf16 %v5633_v1, %v5632_v44  ;;  %v5540_v37 = vpop.f32.mrf.mxu2 }
 0x354   : > { %v4973_v38 = vadd.f32 %v4946_v45, %v4570_v11  ;;  %v5568_v46 = vadd.f32 %v5540_v37, %v5150_v17 }
 0x355   : > { %6811 = vst [vmem:[%s9159_s11 + $0x18] sm:$0xff] %v6787_v60  }
 0x356   : > { %v5586_v52 = vadd.f32 %v9150_v51, %v5568_v46  ;;  %v5151_v19 = vadd.f32 %v5124_v59, %v4973_v38  ;;  %v5134_v35 = vpop.f32.mrf.mxu1 }
 0x358   : > { %v5618_v55 = vmul.f32 0.01, %v5586_v52  ;;  %vm5602_vm10 = vcmp.ge.f32.partialorder %v5586_v52, 0.0 }
 0x359   : > { %v4546_v18 = vpop.f32.mrf.mxu3 }
 0x35a   : > { %v4571_v14 = vadd.f32 %v4546_v18, %v9109_v50  ;;  %v5634_v6 = vsel %vm5602_vm10, %v5586_v52, %v5618_v55  ;;  %v4954_v5 = vpop.f32.mrf.mxu0 }
 0x35b   : > { %v5542_v26 = vpop.f32.mrf.mxu2 }
 0x35c   : > { %v5569_v4 = vadd.f32 %v5542_v26, %v5151_v19  ;;  %v4974_v40 = vadd.f32 %v4949_v32, %v4571_v14 }
 0x35e   : > { %v5587_v49 = vadd.f32 %v9150_v51, %v5569_v4  ;;  %v5152_v3 = vadd.f32 %v5127_v47, %v4974_v40 }
 0x360   : > { %vm5603_vm11 = vcmp.ge.f32.partialorder %v5587_v49, 0.0  ;;  %v5619_v9 = vmul.f32 0.01, %v5587_v49 }
 0x361   : > { %v4548_v21 = vpop.f32.mrf.mxu3 }
 0x362   : > { %v5635_v56 = vsel %vm5603_vm11, %v5587_v49, %v5619_v9  ;;  %v4572_v20 = vadd.f32 %v4548_v21, %v9119_v36  ;;  %v4956_v10 = vpop.f32.mrf.mxu0 }
 0x363   : > { %v6792_v39 = vpack.c.bf16 %v5635_v56, %v5634_v6  ;;  %v5545_v62 = vpop.f32.mrf.mxu2 }
 0x364   : > { %v4975_v50 = vadd.f32 %v4951_v22, %v4572_v20  ;;  %v5570_v13 = vadd.f32 %v5545_v62, %v5152_v3 }
 0x365   : > { %6812 = vst [vmem:[%s9159_s11 + $0x20] sm:$0xff] %v6792_v39  }
 0x366   : > { %v5588_v41 = vadd.f32 %v9150_v51, %v5570_v13  ;;  %v5153_v57 = vadd.f32 %v5129_v7, %v4975_v50 }
 0x368   : > { %v5620_v61 = vmul.f32 0.01, %v5588_v41  ;;  %vm5604_vm12 = vcmp.ge.f32.partialorder %v5588_v41, 0.0 }
 0x369   : > { %v4551_v48 = vpop.f32.mrf.mxu3 }
 0x36a   : > { %v4573_v58 = vadd.f32 %v4551_v48, %v9128_v23  ;;  %v5636_v63 = vsel %vm5604_vm12, %v5588_v41, %v5620_v61  ;;  %v4959_v27 = vpop.f32.mrf.mxu0 }
 0x36b   : > { %v5547_v2 = vpop.f32.mrf.mxu2 }
 0x36c   : > { %v5571_v0 = vadd.f32 %v5547_v2, %v5153_v57  ;;  %v4976_v36 = vadd.f32 %v4954_v5, %v4573_v58 }
 0x36e   : > { %v5589_v28 = vadd.f32 %v9150_v51, %v5571_v0  ;;  %v5154_v15 = vadd.f32 %v5132_v29, %v4976_v36 }
 0x370   : > { %vm5605_vm13 = vcmp.ge.f32.partialorder %v5589_v28, 0.0  ;;  %v5621_v43 = vmul.f32 0.01, %v5589_v28 }
 0x371   : > { %v4553_v24 = vpop.f32.mrf.mxu3 }
 0x372   : > { %v5637_v42 = vsel %vm5605_vm13, %v5589_v28, %v5621_v43  ;;  %v4574_v53 = vadd.f32 %v4553_v24, %v9136_v25  ;;  %v5137_v25 = vpop.f32.mrf.mxu1  ;;  %v4961_v18 = vpop.f32.mrf.mxu0 }
 0x373   : > { %v6797_v12 = vpack.c.bf16 %v5637_v42, %v5636_v63  ;;  %v5550_v45 = vpop.f32.mrf.mxu2 }
 0x374   : > { %v4977_v23 = vadd.f32 %v4956_v10, %v4574_v53  ;;  %v5572_v34 = vadd.f32 %v5550_v45, %v5154_v15 }
 0x375   : > { %6813 = vst [vmem:[%s9159_s11 + $0x28] sm:$0xff] %v6797_v12  }
 0x376   : > { %v5590_v59 = vadd.f32 %v9150_v51, %v5572_v34  ;;  %v5155_v16 = vadd.f32 %v5134_v35, %v4977_v23 }
 0x378   : > { %v5622_v30 = vmul.f32 0.01, %v5590_v59  ;;  %vm5606_vm14 = vcmp.ge.f32.partialorder %v5590_v59, 0.0 }
 0x379   : > { %v4556_v8 = vpop.f32.mrf.mxu3 }
 0x37a   : > { %v4575_v44 = vadd.f32 %v4556_v8, %v9140_v33  ;;  %v5638_v17 = vsel %vm5606_vm14, %v5590_v59, %v5622_v30  ;;  %v5139_v14 = vpop.f32.mrf.mxu1 }
 0x37b   : > { %v5552_v54 = vpop.f32.mrf.mxu2 }
 0x37c   : > { %v5573_v1 = vadd.f32 %v5552_v54, %v5155_v16  ;;  %v4978_v11 = vadd.f32 %v4959_v27, %v4575_v44 }
 0x37e   : > { %v5591_v60 = vadd.f32 %v9150_v51, %v5573_v1  ;;  %v5156_v33 = vadd.f32 %v5137_v25, %v4978_v11 }
 0x380   : > { %vm5607_vm15 = vcmp.ge.f32.partialorder %v5591_v60, 0.0  ;;  %v5623_v37 = vmul.f32 0.01, %v5591_v60 }
 0x381   : > { %v4558_v38 = vpop.f32.mrf.mxu3 }
 0x382   : > { %v5639_v32 = vsel %vm5607_vm15, %v5591_v60, %v5623_v37  ;;  %v4576_v47 = vadd.f32 %v4558_v38, %v9144_v31 }
 0x383   : > { %v6802_v46 = vpack.c.bf16 %v5639_v32, %v5638_v17  ;;  %v5555_v52 = vpop.f32.mrf.mxu2 }
 0x384   : > { %v4979_v19 = vadd.f32 %v4961_v18, %v4576_v47  ;;  %v5574_v26 = vadd.f32 %v5555_v52, %v5156_v33 }
 0x385   : > { %6814 = vst [vmem:[%s9159_s11 + $0x30] sm:$0xff] %v6802_v46  }
 0x386   : > { %v5592_v4 = vadd.f32 %v9150_v51, %v5574_v26  ;;  %v5157_v55 = vadd.f32 %v5139_v14, %v4979_v19 }
 0x388   : > { %v5624_v31 = vmul.f32 0.01, %v5592_v4  ;;  %vm5608_vm0 = vcmp.ge.f32.partialorder %v5592_v4, 0.0 }
 0x38a   : > { %v5640_v7 = vsel %vm5608_vm0, %v5592_v4, %v5624_v31 }
 0x38b   : > { %v5557_v49 = vpop.f32.mrf.mxu2 }
 0x38c   : > { %v5575_v22 = vadd.f32 %v5557_v49, %v5157_v55 }
 0x38e   : > { %v5593_v40 = vadd.f32 %v9150_v51, %v5575_v22 }
 0x390   : > { %vm5609_vm1 = vcmp.ge.f32.partialorder %v5593_v40, 0.0  ;;  %v5625_v9 = vmul.f32 0.01, %v5593_v40 }
 0x392   : > { %v5641_v6 = vsel %vm5609_vm1, %v5593_v40, %v5625_v9 }
 0x393   : > { %v6807_v56 = vpack.c.bf16 %v5641_v6, %v5640_v7 }
 0x395   : > { %6815 = vst [vmem:[%s9159_s11 + $0x38] sm:$0xff] %v6807_v56  }
 0x396   : > { %6929 = shalt.err (!%p6926_p5)
}
 0x397   : > { %s6992_s9 = smov 4  }
 0x398   : > { %6833 = dma.vmem_to_hbm [thread:$0]  (%p7058_p4), %s5690_s30, 1024, %s5692_s5, %s5675_s18, %s6987_s13, %s6987_s13, %s6992_s9  }
 0x399 PF: > { %p6839_p6 = scmp.ge.s32.totalorder %s6980_s20, 2  ;;  %s5706_s11 = sand.u32 1, %s6960_s15  }
 0x39a   : > { %s5707_s12 = scalar_lea.sflag [#allocation4], %s5706_s11 }
 0x39b   : > { %p6836_p7 = pnand %p6839_p6, %p7065_p8 }
 0x39d   : > { %p6837_p9 = pneg %p6836_p7 }
 0x39f   : > { %6955 = dma.done.wait (%p6837_p9), %s5707_s12, 1024  }
 0x3a0   : > { %6957 = vsyncadd (%p6837_p9), %s5707_s12, 4294966272  ;;  %s17_s20 = sadd.s32 1, %s6980_s20   ;;  %s9295_s15 = smov %s6964_s16 }
 0x3a1   : > { %p14_p10 = scmp.ge.s32.totalorder %s17_s20, 4   ;;  %s9296_s16 = smov %s6968_s17 }
 0x3a2   : > { %s9297_s17 = smov %s7071_s28  ;;  %s9298_s18 = smov %s6976_s19 }
 0x3a3   : > { %s9299_s19 = smov %s9301_s23  ;;  %16 = sbr.rel (!%p14_p10) target bundleno = 4 (0x4), region = 91 }
 0x3a8   :  { %5713 = vsyncpa [#allocation4], 1 }
 0x3a9   :  { %5715 = vsyncpa [#allocation4 + $0x1], 1 }

</bundles_post_ra>
